<compile_context>
chip_gen: v7x
topology: tpu7x:2x2x1
jax: 0.10.0
libtpu: 0.0.40
codegen_flags: <defaults>
</compile_context>

<pallas_src>
import functools

import jax
import jax.numpy as jnp
from jax import lax
from jax.experimental import pallas as pl
from jax.experimental.pallas import tpu as pltpu


def _mha_flash_kernel(q_ref, k_ref, v_ref,
                      wq_ref, bq_ref, wk_ref, bk_ref, wv_ref, bv_ref,
                      wo_ref, bo_ref,
                      out_ref,
                      qh_scratch, m_scratch, l_scratch, acc_scratch,
                      *, num_heads, d_k, d_v):
    # grid = (batch, q_tile, kv_tile); kv_tile is the (innermost) reduction axis.
    ki = pl.program_id(2)
    nk = pl.num_programs(2)
    scale = 1.0 / (float(d_k) ** 0.5)

    @pl.when(ki == 0)
    def _init():
        # Project the q tile for ALL heads with one big MXU matmul (bf16 in, f32 acc),
        # folding the 1/sqrt(d_k) score scale into q (done once per q tile).
        q = q_ref[0]                                                   # (tq, d_model) bf16
        qh = jnp.dot(q, wq_ref[...], preferred_element_type=jnp.float32) + bq_ref[...]
        qh_scratch[...] = (qh * scale).astype(qh_scratch.dtype)        # (tq, H*d_k) bf16
        m_scratch[...] = jnp.full(m_scratch.shape, -jnp.inf, m_scratch.dtype)
        l_scratch[...] = jnp.zeros(l_scratch.shape, l_scratch.dtype)
        acc_scratch[...] = jnp.zeros(acc_scratch.shape, acc_scratch.dtype)

    # Project the current K/V tile for ALL heads at once (big MXU matmuls).
    k = k_ref[0]                                                       # (tk, d_model) bf16
    v = v_ref[0]
    kh_all = (jnp.dot(k, wk_ref[...], preferred_element_type=jnp.float32)
              + bk_ref[...]).astype(jnp.bfloat16)                      # (tk, H*d_k)
    vh_all = (jnp.dot(v, wv_ref[...], preferred_element_type=jnp.float32)
              + bv_ref[...]).astype(jnp.bfloat16)                      # (tk, H*d_v)

    # Static (small) head loop; online-softmax state lives in VMEM scratch, so each
    # head's intermediates die at the end of its iteration.
    for h in range(num_heads):
        qh = qh_scratch[:, h * d_k:(h + 1) * d_k]                      # (tq, d_k) bf16
        kh = kh_all[:, h * d_k:(h + 1) * d_k]                          # (tk, d_k) bf16
        vh = vh_all[:, h * d_v:(h + 1) * d_v]                          # (tk, d_v) bf16

        # NT matmul: contract last dims of both -> no materialized transpose of kh.
        s = lax.dot_general(qh, kh, (((1,), (1,)), ((), ())),
                            preferred_element_type=jnp.float32)        # (tq, tk) f32

        # Online softmax update (f32).
        m_prev = m_scratch[h]                                          # (tq, 1)
        m_new = jnp.maximum(m_prev, jnp.max(s, axis=-1, keepdims=True))
        alpha = jnp.exp(m_prev - m_new)
        p = jnp.exp(s - m_new)
        l_scratch[h] = alpha * l_scratch[h] + jnp.sum(p, axis=-1, keepdims=True)
        pv = jnp.dot(p.astype(jnp.bfloat16), vh,
                     preferred_element_type=jnp.float32)               # (tq, d_v)
        acc_scratch[h] = alpha * acc_scratch[h] + pv
        m_scratch[h] = m_new

    @pl.when(ki == nk - 1)
    def _finish():
        tq, d_model = out_ref.shape[1], out_ref.shape[2]
        out = jnp.zeros((tq, d_model), jnp.float32)
        for h in range(num_heads):
            # approx reciprocal goes to the EUP slot instead of a VALU divide.
            inv_l = pl.reciprocal(l_scratch[h], approx=True)           # (tq, 1)
            o_h = (acc_scratch[h] * inv_l).astype(jnp.bfloat16)        # (tq, d_v)
            # Per-head slice of the output projection -> accumulate (no concatenate).
            out = out + jnp.dot(o_h, wo_ref[h * d_v:(h + 1) * d_v, :],
                                preferred_element_type=jnp.float32)
        out_ref[0] = (out + bo_ref[...]).astype(out_ref.dtype)


def multi_head_attention(q, k, v, params, *, num_heads, d_k, d_v,
                         block_q=128, block_k=128):
    """q, k, v: (B, S, d_model) float32.  Returns (B, S, d_model) float32."""
    # TODO(synk): optional `mask` argument of the PyTorch forward is not wired in
    # (reference call uses mask=None); unmasked softmax only.
    B, S, d_model = q.shape
    wq, bq, wk, bk, wv, bv, wo, bo = params

    tq = min(block_q, S)
    tk = min(block_k, S)
    assert S % tq == 0 and S % tk == 0, (S, tq, tk)

    bf = jnp.bfloat16
    # Fuse heads along the feature axis so the QKV projections become single matmuls.
    wq_all = jnp.transpose(wq, (1, 0, 2)).reshape(d_model, num_heads * d_k).astype(bf)
    wk_all = jnp.transpose(wk, (1, 0, 2)).reshape(d_model, num_heads * d_k).astype(bf)
    wv_all = jnp.transpose(wv, (1, 0, 2)).reshape(d_model, num_heads * d_v).astype(bf)
    bq_all = bq.reshape(1, num_heads * d_k).astype(jnp.float32)
    bk_all = bk.reshape(1, num_heads * d_k).astype(jnp.float32)
    bv_all = bv.reshape(1, num_heads * d_v).astype(jnp.float32)
    wo_b = wo.astype(bf)                                   # (H*d_v, d_model)
    bo_b = bo.reshape(1, d_model).astype(jnp.float32)

    qb, kb, vb = q.astype(bf), k.astype(bf), v.astype(bf)

    kernel = functools.partial(_mha_flash_kernel,
                               num_heads=num_heads, d_k=d_k, d_v=d_v)

    def const_spec(shape):
        # Full-array block, constant across the grid (fetched once).
        return pl.BlockSpec(shape, lambda b, qi, ki: (0,) * len(shape))

    grid = (B, S // tq, S // tk)

    return pl.pallas_call(
        kernel,
        out_shape=jax.ShapeDtypeStruct((B, S, d_model), q.dtype),
        grid_spec=pltpu.PrefetchScalarGridSpec(
            num_scalar_prefetch=0,
            grid=grid,
            in_specs=[
                pl.BlockSpec((1, tq, d_model), lambda b, qi, ki: (b, qi, 0)),  # q
                pl.BlockSpec((1, tk, d_model), lambda b, qi, ki: (b, ki, 0)),  # k
                pl.BlockSpec((1, tk, d_model), lambda b, qi, ki: (b, ki, 0)),  # v
                const_spec(wq_all.shape), const_spec(bq_all.shape),
                const_spec(wk_all.shape), const_spec(bk_all.shape),
                const_spec(wv_all.shape), const_spec(bv_all.shape),
                const_spec(wo_b.shape), const_spec(bo_b.shape),
            ],
            out_specs=pl.BlockSpec((1, tq, d_model), lambda b, qi, ki: (b, qi, 0)),
            scratch_shapes=[
                pltpu.VMEM((tq, num_heads * d_k), jnp.bfloat16),   # projected Q (scaled)
                pltpu.VMEM((num_heads, tq, 1), jnp.float32),       # running max m
                pltpu.VMEM((num_heads, tq, 1), jnp.float32),       # running sum l
                pltpu.VMEM((num_heads, tq, d_v), jnp.float32),     # output accumulator
            ],
        ),
        compiler_params=pltpu.CompilerParams(
            dimension_semantics=("parallel", "parallel", "arbitrary"),
        ),
    )(qb, kb, vb, wq_all, bq_all, wk_all, bk_all, wv_all, bv_all, wo_b, bo_b)


def _reference(q, k, v, params, *, num_heads, d_k):
    """Pure-JAX f32 reference mirroring the PyTorch module semantics."""
    wq, bq, wk, bk, wv, bv, wo, bo = params
    outs = []
    for h in range(num_heads):
        qh = q @ wq[h] + bq[h]
        kh = k @ wk[h] + bk[h]
        vh = v @ wv[h] + bv[h]
        scores = jnp.einsum("bsd,btd->bst", qh, kh) / (d_k ** 0.5)
        p = jax.nn.softmax(scores, axis=-1)
        outs.append(jnp.einsum("bst,btd->bsd", p, vh))
    x = jnp.concatenate(outs, axis=-1)
    return x @ wo + bo[0]


def _init_params(key, d_model, num_heads, d_k, d_v):
    """Deterministic init, nn.Linear-style uniform(-1/sqrt(fan_in), 1/sqrt(fan_in))."""
    keys = jax.random.split(key, 8)
    lim_in = 1.0 / (d_model ** 0.5)
    lim_out = 1.0 / ((num_heads * d_v) ** 0.5)
    wq = jax.random.uniform(keys[0], (num_heads, d_model, d_k), jnp.float32, -lim_in, lim_in)
    bq = jax.random.uniform(keys[1], (num_heads, d_k), jnp.float32, -lim_in, lim_in)
    wk = jax.random.uniform(keys[2], (num_heads, d_model, d_k), jnp.float32, -lim_in, lim_in)
    bk = jax.random.uniform(keys[3], (num_heads, d_k), jnp.float32, -lim_in, lim_in)
    wv = jax.random.uniform(keys[4], (num_heads, d_model, d_v), jnp.float32, -lim_in, lim_in)
    bv = jax.random.uniform(keys[5], (num_heads, d_v), jnp.float32, -lim_in, lim_in)
    wo = jax.random.uniform(keys[6], (num_heads * d_v, d_model), jnp.float32, -lim_out, lim_out)
    bo = jax.random.uniform(keys[7], (1, d_model), jnp.float32, -lim_out, lim_out)
    return (wq, bq, wk, bk, wv, bv, wo, bo)


if __name__ == "__main__":
    # Scaled-down, lane-dense shapes consistent with the module
    # (d_model / H*d_k / H*d_v are multiples of 128; S a multiple of the 128 tiles).
    B, S, d_model = 2, 256, 128
    num_heads, d_k, d_v = 4, 32, 32

    key = jax.random.PRNGKey(0)
    kq, kk, kv, kp = jax.random.split(key, 4)
    q = jax.random.normal(kq, (B, S, d_model), jnp.float32)
    k = jax.random.normal(kk, (B, S, d_model), jnp.float32)
    v = jax.random.normal(kv, (B, S, d_model), jnp.float32)
    params = _init_params(kp, d_model, num_heads, d_k, d_v)

    out = multi_head_attention(q, k, v, params, num_heads=num_heads, d_k=d_k, d_v=d_v)
    out = jax.block_until_ready(out)

    ref = _reference(q, k, v, params, num_heads=num_heads, d_k=d_k)
    assert out.shape == (B, S, d_model), out.shape
    max_err = float(jnp.max(jnp.abs(out - ref)))
    # bf16 matmul inputs with f32 accumulation -> small numeric drift vs f32 reference.
    assert jnp.allclose(out, ref, atol=5e-2, rtol=5e-2), max_err

    print("KERNEL_OK")
</pallas_src>

<mosaic_0001>
module attributes {stable_mosaic.version = 11 : i64} {
  func.func @_mha_flash_kernel(%arg0: i32, %arg1: i32, %arg2: i32, %arg3: memref<1x128x128xbf16, #tpu.memory_space<vmem>>, %arg4: memref<1x128x128xbf16, #tpu.memory_space<vmem>>, %arg5: memref<1x128x128xbf16, #tpu.memory_space<vmem>>, %arg6: memref<128x128xbf16, #tpu.memory_space<vmem>>, %arg7: memref<1x128xf32, #tpu.memory_space<vmem>>, %arg8: memref<128x128xbf16, #tpu.memory_space<vmem>>, %arg9: memref<1x128xf32, #tpu.memory_space<vmem>>, %arg10: memref<128x128xbf16, #tpu.memory_space<vmem>>, %arg11: memref<1x128xf32, #tpu.memory_space<vmem>>, %arg12: memref<128x128xbf16, #tpu.memory_space<vmem>>, %arg13: memref<1x128xf32, #tpu.memory_space<vmem>>, %arg14: memref<1x128x128xf32, #tpu.memory_space<vmem>>, %arg15: memref<128x128xbf16, #tpu.memory_space<vmem>>, %arg16: memref<4x128x1xf32, #tpu.memory_space<vmem>>, %arg17: memref<4x128x1xf32, #tpu.memory_space<vmem>>, %arg18: memref<4x128x32xf32, #tpu.memory_space<vmem>>) attributes {dimension_semantics = [#tpu.dimension_semantics<parallel>, #tpu.dimension_semantics<parallel>, #tpu.dimension_semantics<arbitrary>], iteration_bounds = array<i64: 2, 2, 2>, scalar_prefetch = 0 : i64, scratch_operands = 4 : i64, tpu.core_type = #tpu.core_type<tc>, window_params = [{transform_indices = @transform_0, window_bounds = array<i64: 1, 128, 128>}, {transform_indices = @transform_1, window_bounds = array<i64: 1, 128, 128>}, {transform_indices = @transform_2, window_bounds = array<i64: 1, 128, 128>}, {pipeline_mode = #tpu.pipeline_mode<synchronous>, transform_indices = @transform_3, window_bounds = array<i64: 128, 128>}, {pipeline_mode = #tpu.pipeline_mode<synchronous>, transform_indices = @transform_4, window_bounds = array<i64: 1, 128>}, {pipeline_mode = #tpu.pipeline_mode<synchronous>, transform_indices = @transform_5, window_bounds = array<i64: 128, 128>}, {pipeline_mode = #tpu.pipeline_mode<synchronous>, transform_indices = @transform_6, window_bounds = array<i64: 1, 128>}, {pipeline_mode = #tpu.pipeline_mode<synchronous>, transform_indices = @transform_7, window_bounds = array<i64: 128, 128>}, {pipeline_mode = #tpu.pipeline_mode<synchronous>, transform_indices = @transform_8, window_bounds = array<i64: 1, 128>}, {pipeline_mode = #tpu.pipeline_mode<synchronous>, transform_indices = @transform_9, window_bounds = array<i64: 128, 128>}, {pipeline_mode = #tpu.pipeline_mode<synchronous>, transform_indices = @transform_10, window_bounds = array<i64: 1, 128>}, {transform_indices = @transform_11, window_bounds = array<i64: 1, 128, 128>}]} {
    %c0_i32 = arith.constant 0 : i32
    %0 = arith.cmpi eq, %arg2, %c0_i32 : i32
    %1 = arith.extui %0 : i1 to i32
    %c0_i32_0 = arith.constant 0 : i32
    %2 = arith.cmpi ne, %1, %c0_i32_0 : i32
    scf.if %2 {
      %c0_106 = arith.constant 0 : index
      %c0_107 = arith.constant 0 : index
      %c0_108 = arith.constant 0 : index
      %166 = vector.load %arg3[%c0_106, %c0_107, %c0_108] : memref<1x128x128xbf16, #tpu.memory_space<vmem>>, vector<1x128x128xbf16>
      %167 = vector.shape_cast %166 : vector<1x128x128xbf16> to vector<128x128xbf16>
      %c0_109 = arith.constant 0 : index
      %c0_110 = arith.constant 0 : index
      %168 = vector.load %arg6[%c0_109, %c0_110] : memref<128x128xbf16, #tpu.memory_space<vmem>>, vector<128x128xbf16>
      %cst_111 = arith.constant dense<0.000000e+00> : vector<128x128xf32>
      %169 = tpu.matmul %167, %168, %cst_111 {dimension_numbers = #tpu.dot_dimension_numbers<[1], [0], [0], [1], [0, 0, 1, 1], [], []>} : vector<128x128xbf16>, vector<128x128xbf16>, vector<128x128xf32> -> vector<128x128xf32>
      %c0_112 = arith.constant 0 : index
      %c0_113 = arith.constant 0 : index
      %170 = vector.load %arg7[%c0_112, %c0_113] : memref<1x128xf32, #tpu.memory_space<vmem>>, vector<1x128xf32>
      %171 = vector.broadcast %170 : vector<1x128xf32> to vector<128x128xf32>
      %172 = arith.addf %169, %171 : vector<128x128xf32>
      %cst_114 = arith.constant 0.176776692 : f32
      %173 = vector.broadcast %cst_114 : f32 to vector<128x128xf32>
      %174 = arith.mulf %172, %173 : vector<128x128xf32>
      %175 = arith.truncf %174 : vector<128x128xf32> to vector<128x128xbf16>
      %c0_115 = arith.constant 0 : index
      %c0_116 = arith.constant 0 : index
      %176 = vector.load %arg15[%c0_115, %c0_116] : memref<128x128xbf16, #tpu.memory_space<vmem>>, vector<128x128xbf16>
      tpu.vector_store %arg15[%c0_115, %c0_116], %175 {strides = array<i32>} : memref<128x128xbf16, #tpu.memory_space<vmem>>, vector<128x128xbf16>,
      %cst_117 = arith.constant 0xFF800000 : f32
      %177 = vector.broadcast %cst_117 : f32 to vector<4x128x1xf32>
      %c0_118 = arith.constant 0 : index
      %c0_119 = arith.constant 0 : index
      %c0_120 = arith.constant 0 : index
      %178 = vector.load %arg16[%c0_118, %c0_119, %c0_120] : memref<4x128x1xf32, #tpu.memory_space<vmem>>, vector<4x128x1xf32>
      tpu.vector_store %arg16[%c0_118, %c0_119, %c0_120], %177 {strides = array<i32>} : memref<4x128x1xf32, #tpu.memory_space<vmem>>, vector<4x128x1xf32>,
      %cst_121 = arith.constant 0.000000e+00 : f32
      %179 = vector.broadcast %cst_121 : f32 to vector<4x128x1xf32>
      %c0_122 = arith.constant 0 : index
      %c0_123 = arith.constant 0 : index
      %c0_124 = arith.constant 0 : index
      %180 = vector.load %arg17[%c0_122, %c0_123, %c0_124] : memref<4x128x1xf32, #tpu.memory_space<vmem>>, vector<4x128x1xf32>
      tpu.vector_store %arg17[%c0_122, %c0_123, %c0_124], %179 {strides = array<i32>} : memref<4x128x1xf32, #tpu.memory_space<vmem>>, vector<4x128x1xf32>,
      %cst_125 = arith.constant 0.000000e+00 : f32
      %181 = vector.broadcast %cst_125 : f32 to vector<4x128x32xf32>
      %c0_126 = arith.constant 0 : index
      %c0_127 = arith.constant 0 : index
      %c0_128 = arith.constant 0 : index
      %182 = vector.load %arg18[%c0_126, %c0_127, %c0_128] : memref<4x128x32xf32, #tpu.memory_space<vmem>>, vector<4x128x32xf32>
      tpu.vector_store %arg18[%c0_126, %c0_127, %c0_128], %181 {strides = array<i32>} : memref<4x128x32xf32, #tpu.memory_space<vmem>>, vector<4x128x32xf32>,
    } else {
    }
    %c0 = arith.constant 0 : index
    %c0_1 = arith.constant 0 : index
    %c0_2 = arith.constant 0 : index
    %3 = vector.load %arg4[%c0, %c0_1, %c0_2] : memref<1x128x128xbf16, #tpu.memory_space<vmem>>, vector<1x128x128xbf16>
    %4 = vector.shape_cast %3 : vector<1x128x128xbf16> to vector<128x128xbf16>
    %c0_3 = arith.constant 0 : index
    %c0_4 = arith.constant 0 : index
    %c0_5 = arith.constant 0 : index
    %5 = vector.load %arg5[%c0_3, %c0_4, %c0_5] : memref<1x128x128xbf16, #tpu.memory_space<vmem>>, vector<1x128x128xbf16>
    %6 = vector.shape_cast %5 : vector<1x128x128xbf16> to vector<128x128xbf16>
    %c0_6 = arith.constant 0 : index
    %c0_7 = arith.constant 0 : index
    %7 = vector.load %arg8[%c0_6, %c0_7] : memref<128x128xbf16, #tpu.memory_space<vmem>>, vector<128x128xbf16>
    %cst = arith.constant dense<0.000000e+00> : vector<128x128xf32>
    %8 = tpu.matmul %4, %7, %cst {dimension_numbers = #tpu.dot_dimension_numbers<[1], [0], [0], [1], [0, 0, 1, 1], [], []>} : vector<128x128xbf16>, vector<128x128xbf16>, vector<128x128xf32> -> vector<128x128xf32>
    %c0_8 = arith.constant 0 : index
    %c0_9 = arith.constant 0 : index
    %9 = vector.load %arg9[%c0_8, %c0_9] : memref<1x128xf32, #tpu.memory_space<vmem>>, vector<1x128xf32>
    %10 = vector.broadcast %9 : vector<1x128xf32> to vector<128x128xf32>
    %11 = arith.addf %8, %10 : vector<128x128xf32>
    %12 = arith.truncf %11 : vector<128x128xf32> to vector<128x128xbf16>
    %c0_10 = arith.constant 0 : index
    %c0_11 = arith.constant 0 : index
    %13 = vector.load %arg10[%c0_10, %c0_11] : memref<128x128xbf16, #tpu.memory_space<vmem>>, vector<128x128xbf16>
    %cst_12 = arith.constant dense<0.000000e+00> : vector<128x128xf32>
    %14 = tpu.matmul %6, %13, %cst_12 {dimension_numbers = #tpu.dot_dimension_numbers<[1], [0], [0], [1], [0, 0, 1, 1], [], []>} : vector<128x128xbf16>, vector<128x128xbf16>, vector<128x128xf32> -> vector<128x128xf32>
    %c0_13 = arith.constant 0 : index
    %c0_14 = arith.constant 0 : index
    %15 = vector.load %arg11[%c0_13, %c0_14] : memref<1x128xf32, #tpu.memory_space<vmem>>, vector<1x128xf32>
    %16 = vector.broadcast %15 : vector<1x128xf32> to vector<128x128xf32>
    %17 = arith.addf %14, %16 : vector<128x128xf32>
    %18 = arith.truncf %17 : vector<128x128xf32> to vector<128x128xbf16>
    %c0_15 = arith.constant 0 : index
    %c0_16 = arith.constant 0 : index
    %19 = vector.load %arg15[%c0_15, %c0_16] : memref<128x128xbf16, #tpu.memory_space<vmem>>, vector<128x32xbf16>
    %20 = vector.extract_strided_slice %12 {offsets = [0, 0], sizes = [128, 32], strides = [1, 1]} : vector<128x128xbf16> to vector<128x32xbf16>
    %21 = vector.extract_strided_slice %18 {offsets = [0, 0], sizes = [128, 32], strides = [1, 1]} : vector<128x128xbf16> to vector<128x32xbf16>
    %cst_17 = arith.constant dense<0.000000e+00> : vector<128x128xf32>
    %22 = tpu.matmul %19, %20, %cst_17 {dimension_numbers = #tpu.dot_dimension_numbers<[1], [1], [0], [0], [0, 0, 1, 0], [], []>} : vector<128x32xbf16>, vector<128x32xbf16>, vector<128x128xf32> -> vector<128x128xf32>
    %c0_18 = arith.constant 0 : index
    %c0_19 = arith.constant 0 : index
    %c0_20 = arith.constant 0 : index
    %23 = vector.load %arg16[%c0_18, %c0_19, %c0_20] : memref<4x128x1xf32, #tpu.memory_space<vmem>>, vector<1x128x1xf32>
    %24 = vector.shape_cast %23 : vector<1x128x1xf32> to vector<128x1xf32>
    %cst_21 = arith.constant dense<0xFF800000> : vector<128xf32>
    %25 = vector.multi_reduction <maximumf>, %22, %cst_21 [1] : vector<128x128xf32> to vector<128xf32>
    %26 = vector.shape_cast %25 : vector<128xf32> to vector<128x1xf32>
    %27 = arith.maximumf %24, %26 : vector<128x1xf32>
    %28 = arith.subf %24, %27 : vector<128x1xf32>
    %29 = math.exp %28 : vector<128x1xf32>
    %30 = vector.broadcast %27 : vector<128x1xf32> to vector<128x128xf32>
    %31 = arith.subf %22, %30 : vector<128x128xf32>
    %32 = math.exp %31 : vector<128x128xf32>
    %c0_22 = arith.constant 0 : index
    %c0_23 = arith.constant 0 : index
    %c0_24 = arith.constant 0 : index
    %33 = vector.load %arg17[%c0_22, %c0_23, %c0_24] : memref<4x128x1xf32, #tpu.memory_space<vmem>>, vector<1x128x1xf32>
    %34 = vector.shape_cast %33 : vector<1x128x1xf32> to vector<128x1xf32>
    %35 = arith.mulf %29, %34 : vector<128x1xf32>
    %cst_25 = arith.constant dense<0.000000e+00> : vector<128xf32>
    %36 = vector.multi_reduction <add>, %32, %cst_25 [1] : vector<128x128xf32> to vector<128xf32>
    %37 = vector.shape_cast %36 : vector<128xf32> to vector<128x1xf32>
    %38 = arith.addf %35, %37 : vector<128x1xf32>
    %c0_26 = arith.constant 0 : index
    %c0_27 = arith.constant 0 : index
    %c0_28 = arith.constant 0 : index
    %39 = vector.load %arg17[%c0_26, %c0_27, %c0_28] : memref<4x128x1xf32, #tpu.memory_space<vmem>>, vector<1x128x1xf32>
    %40 = vector.shape_cast %39 : vector<1x128x1xf32> to vector<128x1xf32>
    %41 = vector.shape_cast %38 : vector<128x1xf32> to vector<1x128x1xf32>
    tpu.vector_store %arg17[%c0_26, %c0_27, %c0_28], %41 {strides = array<i32>} : memref<4x128x1xf32, #tpu.memory_space<vmem>>, vector<1x128x1xf32>,
    %42 = arith.truncf %32 : vector<128x128xf32> to vector<128x128xbf16>
    %cst_29 = arith.constant dense<0.000000e+00> : vector<128x32xf32>
    %43 = tpu.matmul %42, %21, %cst_29 {dimension_numbers = #tpu.dot_dimension_numbers<[1], [0], [0], [1], [0, 0, 1, 1], [], []>} : vector<128x128xbf16>, vector<128x32xbf16>, vector<128x32xf32> -> vector<128x32xf32>
    %c0_30 = arith.constant 0 : index
    %c0_31 = arith.constant 0 : index
    %c0_32 = arith.constant 0 : index
    %44 = vector.load %arg18[%c0_30, %c0_31, %c0_32] : memref<4x128x32xf32, #tpu.memory_space<vmem>>, vector<1x128x32xf32>
    %45 = vector.shape_cast %44 : vector<1x128x32xf32> to vector<128x32xf32>
    %46 = vector.broadcast %29 : vector<128x1xf32> to vector<128x32xf32>
    %47 = arith.mulf %46, %45 : vector<128x32xf32>
    %48 = arith.addf %47, %43 : vector<128x32xf32>
    %c0_33 = arith.constant 0 : index
    %c0_34 = arith.constant 0 : index
    %c0_35 = arith.constant 0 : index
    %49 = vector.load %arg18[%c0_33, %c0_34, %c0_35] : memref<4x128x32xf32, #tpu.memory_space<vmem>>, vector<1x128x32xf32>
    %50 = vector.shape_cast %49 : vector<1x128x32xf32> to vector<128x32xf32>
    %51 = vector.shape_cast %48 : vector<128x32xf32> to vector<1x128x32xf32>
    tpu.vector_store %arg18[%c0_33, %c0_34, %c0_35], %51 {strides = array<i32>} : memref<4x128x32xf32, #tpu.memory_space<vmem>>, vector<1x128x32xf32>,
    %c0_36 = arith.constant 0 : index
    %c0_37 = arith.constant 0 : index
    %c0_38 = arith.constant 0 : index
    %52 = vector.load %arg16[%c0_36, %c0_37, %c0_38] : memref<4x128x1xf32, #tpu.memory_space<vmem>>, vector<1x128x1xf32>
    %53 = vector.shape_cast %52 : vector<1x128x1xf32> to vector<128x1xf32>
    %54 = vector.shape_cast %27 : vector<128x1xf32> to vector<1x128x1xf32>
    tpu.vector_store %arg16[%c0_36, %c0_37, %c0_38], %54 {strides = array<i32>} : memref<4x128x1xf32, #tpu.memory_space<vmem>>, vector<1x128x1xf32>,
    %c0_39 = arith.constant 0 : index
    %c32 = arith.constant 32 : index
    %55 = vector.load %arg15[%c0_39, %c32] : memref<128x128xbf16, #tpu.memory_space<vmem>>, vector<128x32xbf16>
    %56 = vector.extract_strided_slice %12 {offsets = [0, 32], sizes = [128, 32], strides = [1, 1]} : vector<128x128xbf16> to vector<128x32xbf16>
    %57 = vector.extract_strided_slice %18 {offsets = [0, 32], sizes = [128, 32], strides = [1, 1]} : vector<128x128xbf16> to vector<128x32xbf16>
    %cst_40 = arith.constant dense<0.000000e+00> : vector<128x128xf32>
    %58 = tpu.matmul %55, %56, %cst_40 {dimension_numbers = #tpu.dot_dimension_numbers<[1], [1], [0], [0], [0, 0, 1, 0], [], []>} : vector<128x32xbf16>, vector<128x32xbf16>, vector<128x128xf32> -> vector<128x128xf32>
    %c1 = arith.constant 1 : index
    %c0_41 = arith.constant 0 : index
    %c0_42 = arith.constant 0 : index
    %59 = vector.load %arg16[%c1, %c0_41, %c0_42] : memref<4x128x1xf32, #tpu.memory_space<vmem>>, vector<1x128x1xf32>
    %60 = vector.shape_cast %59 : vector<1x128x1xf32> to vector<128x1xf32>
    %cst_43 = arith.constant dense<0xFF800000> : vector<128xf32>
    %61 = vector.multi_reduction <maximumf>, %58, %cst_43 [1] : vector<128x128xf32> to vector<128xf32>
    %62 = vector.shape_cast %61 : vector<128xf32> to vector<128x1xf32>
    %63 = arith.maximumf %60, %62 : vector<128x1xf32>
    %64 = arith.subf %60, %63 : vector<128x1xf32>
    %65 = math.exp %64 : vector<128x1xf32>
    %66 = vector.broadcast %63 : vector<128x1xf32> to vector<128x128xf32>
    %67 = arith.subf %58, %66 : vector<128x128xf32>
    %68 = math.exp %67 : vector<128x128xf32>
    %c1_44 = arith.constant 1 : index
    %c0_45 = arith.constant 0 : index
    %c0_46 = arith.constant 0 : index
    %69 = vector.load %arg17[%c1_44, %c0_45, %c0_46] : memref<4x128x1xf32, #tpu.memory_space<vmem>>, vector<1x128x1xf32>
    %70 = vector.shape_cast %69 : vector<1x128x1xf32> to vector<128x1xf32>
    %71 = arith.mulf %65, %70 : vector<128x1xf32>
    %cst_47 = arith.constant dense<0.000000e+00> : vector<128xf32>
    %72 = vector.multi_reduction <add>, %68, %cst_47 [1] : vector<128x128xf32> to vector<128xf32>
    %73 = vector.shape_cast %72 : vector<128xf32> to vector<128x1xf32>
    %74 = arith.addf %71, %73 : vector<128x1xf32>
    %c1_48 = arith.constant 1 : index
    %c0_49 = arith.constant 0 : index
    %c0_50 = arith.constant 0 : index
    %75 = vector.load %arg17[%c1_48, %c0_49, %c0_50] : memref<4x128x1xf32, #tpu.memory_space<vmem>>, vector<1x128x1xf32>
    %76 = vector.shape_cast %75 : vector<1x128x1xf32> to vector<128x1xf32>
    %77 = vector.shape_cast %74 : vector<128x1xf32> to vector<1x128x1xf32>
    tpu.vector_store %arg17[%c1_48, %c0_49, %c0_50], %77 {strides = array<i32>} : memref<4x128x1xf32, #tpu.memory_space<vmem>>, vector<1x128x1xf32>,
    %78 = arith.truncf %68 : vector<128x128xf32> to vector<128x128xbf16>
    %cst_51 = arith.constant dense<0.000000e+00> : vector<128x32xf32>
    %79 = tpu.matmul %78, %57, %cst_51 {dimension_numbers = #tpu.dot_dimension_numbers<[1], [0], [0], [1], [0, 0, 1, 1], [], []>} : vector<128x128xbf16>, vector<128x32xbf16>, vector<128x32xf32> -> vector<128x32xf32>
    %c1_52 = arith.constant 1 : index
    %c0_53 = arith.constant 0 : index
    %c0_54 = arith.constant 0 : index
    %80 = vector.load %arg18[%c1_52, %c0_53, %c0_54] : memref<4x128x32xf32, #tpu.memory_space<vmem>>, vector<1x128x32xf32>
    %81 = vector.shape_cast %80 : vector<1x128x32xf32> to vector<128x32xf32>
    %82 = vector.broadcast %65 : vector<128x1xf32> to vector<128x32xf32>
    %83 = arith.mulf %82, %81 : vector<128x32xf32>
    %84 = arith.addf %83, %79 : vector<128x32xf32>
    %c1_55 = arith.constant 1 : index
    %c0_56 = arith.constant 0 : index
    %c0_57 = arith.constant 0 : index
    %85 = vector.load %arg18[%c1_55, %c0_56, %c0_57] : memref<4x128x32xf32, #tpu.memory_space<vmem>>, vector<1x128x32xf32>
    %86 = vector.shape_cast %85 : vector<1x128x32xf32> to vector<128x32xf32>
    %87 = vector.shape_cast %84 : vector<128x32xf32> to vector<1x128x32xf32>
    tpu.vector_store %arg18[%c1_55, %c0_56, %c0_57], %87 {strides = array<i32>} : memref<4x128x32xf32, #tpu.memory_space<vmem>>, vector<1x128x32xf32>,
    %c1_58 = arith.constant 1 : index
    %c0_59 = arith.constant 0 : index
    %c0_60 = arith.constant 0 : index
    %88 = vector.load %arg16[%c1_58, %c0_59, %c0_60] : memref<4x128x1xf32, #tpu.memory_space<vmem>>, vector<1x128x1xf32>
    %89 = vector.shape_cast %88 : vector<1x128x1xf32> to vector<128x1xf32>
    %90 = vector.shape_cast %63 : vector<128x1xf32> to vector<1x128x1xf32>
    tpu.vector_store %arg16[%c1_58, %c0_59, %c0_60], %90 {strides = array<i32>} : memref<4x128x1xf32, #tpu.memory_space<vmem>>, vector<1x128x1xf32>,
    %c0_61 = arith.constant 0 : index
    %c64 = arith.constant 64 : index
    %91 = vector.load %arg15[%c0_61, %c64] : memref<128x128xbf16, #tpu.memory_space<vmem>>, vector<128x32xbf16>
    %92 = vector.extract_strided_slice %12 {offsets = [0, 64], sizes = [128, 32], strides = [1, 1]} : vector<128x128xbf16> to vector<128x32xbf16>
    %93 = vector.extract_strided_slice %18 {offsets = [0, 64], sizes = [128, 32], strides = [1, 1]} : vector<128x128xbf16> to vector<128x32xbf16>
    %cst_62 = arith.constant dense<0.000000e+00> : vector<128x128xf32>
    %94 = tpu.matmul %91, %92, %cst_62 {dimension_numbers = #tpu.dot_dimension_numbers<[1], [1], [0], [0], [0, 0, 1, 0], [], []>} : vector<128x32xbf16>, vector<128x32xbf16>, vector<128x128xf32> -> vector<128x128xf32>
    %c2 = arith.constant 2 : index
    %c0_63 = arith.constant 0 : index
    %c0_64 = arith.constant 0 : index
    %95 = vector.load %arg16[%c2, %c0_63, %c0_64] : memref<4x128x1xf32, #tpu.memory_space<vmem>>, vector<1x128x1xf32>
    %96 = vector.shape_cast %95 : vector<1x128x1xf32> to vector<128x1xf32>
    %cst_65 = arith.constant dense<0xFF800000> : vector<128xf32>
    %97 = vector.multi_reduction <maximumf>, %94, %cst_65 [1] : vector<128x128xf32> to vector<128xf32>
    %98 = vector.shape_cast %97 : vector<128xf32> to vector<128x1xf32>
    %99 = arith.maximumf %96, %98 : vector<128x1xf32>
    %100 = arith.subf %96, %99 : vector<128x1xf32>
    %101 = math.exp %100 : vector<128x1xf32>
    %102 = vector.broadcast %99 : vector<128x1xf32> to vector<128x128xf32>
    %103 = arith.subf %94, %102 : vector<128x128xf32>
    %104 = math.exp %103 : vector<128x128xf32>
    %c2_66 = arith.constant 2 : index
    %c0_67 = arith.constant 0 : index
    %c0_68 = arith.constant 0 : index
    %105 = vector.load %arg17[%c2_66, %c0_67, %c0_68] : memref<4x128x1xf32, #tpu.memory_space<vmem>>, vector<1x128x1xf32>
    %106 = vector.shape_cast %105 : vector<1x128x1xf32> to vector<128x1xf32>
    %107 = arith.mulf %101, %106 : vector<128x1xf32>
    %cst_69 = arith.constant dense<0.000000e+00> : vector<128xf32>
    %108 = vector.multi_reduction <add>, %104, %cst_69 [1] : vector<128x128xf32> to vector<128xf32>
    %109 = vector.shape_cast %108 : vector<128xf32> to vector<128x1xf32>
    %110 = arith.addf %107, %109 : vector<128x1xf32>
    %c2_70 = arith.constant 2 : index
    %c0_71 = arith.constant 0 : index
    %c0_72 = arith.constant 0 : index
    %111 = vector.load %arg17[%c2_70, %c0_71, %c0_72] : memref<4x128x1xf32, #tpu.memory_space<vmem>>, vector<1x128x1xf32>
    %112 = vector.shape_cast %111 : vector<1x128x1xf32> to vector<128x1xf32>
    %113 = vector.shape_cast %110 : vector<128x1xf32> to vector<1x128x1xf32>
    tpu.vector_store %arg17[%c2_70, %c0_71, %c0_72], %113 {strides = array<i32>} : memref<4x128x1xf32, #tpu.memory_space<vmem>>, vector<1x128x1xf32>,
    %114 = arith.truncf %104 : vector<128x128xf32> to vector<128x128xbf16>
    %cst_73 = arith.constant dense<0.000000e+00> : vector<128x32xf32>
    %115 = tpu.matmul %114, %93, %cst_73 {dimension_numbers = #tpu.dot_dimension_numbers<[1], [0], [0], [1], [0, 0, 1, 1], [], []>} : vector<128x128xbf16>, vector<128x32xbf16>, vector<128x32xf32> -> vector<128x32xf32>
    %c2_74 = arith.constant 2 : index
    %c0_75 = arith.constant 0 : index
    %c0_76 = arith.constant 0 : index
    %116 = vector.load %arg18[%c2_74, %c0_75, %c0_76] : memref<4x128x32xf32, #tpu.memory_space<vmem>>, vector<1x128x32xf32>
    %117 = vector.shape_cast %116 : vector<1x128x32xf32> to vector<128x32xf32>
    %118 = vector.broadcast %101 : vector<128x1xf32> to vector<128x32xf32>
    %119 = arith.mulf %118, %117 : vector<128x32xf32>
    %120 = arith.addf %119, %115 : vector<128x32xf32>
    %c2_77 = arith.constant 2 : index
    %c0_78 = arith.constant 0 : index
    %c0_79 = arith.constant 0 : index
    %121 = vector.load %arg18[%c2_77, %c0_78, %c0_79] : memref<4x128x32xf32, #tpu.memory_space<vmem>>, vector<1x128x32xf32>
    %122 = vector.shape_cast %121 : vector<1x128x32xf32> to vector<128x32xf32>
    %123 = vector.shape_cast %120 : vector<128x32xf32> to vector<1x128x32xf32>
    tpu.vector_store %arg18[%c2_77, %c0_78, %c0_79], %123 {strides = array<i32>} : memref<4x128x32xf32, #tpu.memory_space<vmem>>, vector<1x128x32xf32>,
    %c2_80 = arith.constant 2 : index
    %c0_81 = arith.constant 0 : index
    %c0_82 = arith.constant 0 : index
    %124 = vector.load %arg16[%c2_80, %c0_81, %c0_82] : memref<4x128x1xf32, #tpu.memory_space<vmem>>, vector<1x128x1xf32>
    %125 = vector.shape_cast %124 : vector<1x128x1xf32> to vector<128x1xf32>
    %126 = vector.shape_cast %99 : vector<128x1xf32> to vector<1x128x1xf32>
    tpu.vector_store %arg16[%c2_80, %c0_81, %c0_82], %126 {strides = array<i32>} : memref<4x128x1xf32, #tpu.memory_space<vmem>>, vector<1x128x1xf32>,
    %c0_83 = arith.constant 0 : index
    %c96 = arith.constant 96 : index
    %127 = vector.load %arg15[%c0_83, %c96] : memref<128x128xbf16, #tpu.memory_space<vmem>>, vector<128x32xbf16>
    %128 = vector.extract_strided_slice %12 {offsets = [0, 96], sizes = [128, 32], strides = [1, 1]} : vector<128x128xbf16> to vector<128x32xbf16>
    %129 = vector.extract_strided_slice %18 {offsets = [0, 96], sizes = [128, 32], strides = [1, 1]} : vector<128x128xbf16> to vector<128x32xbf16>
    %cst_84 = arith.constant dense<0.000000e+00> : vector<128x128xf32>
    %130 = tpu.matmul %127, %128, %cst_84 {dimension_numbers = #tpu.dot_dimension_numbers<[1], [1], [0], [0], [0, 0, 1, 0], [], []>} : vector<128x32xbf16>, vector<128x32xbf16>, vector<128x128xf32> -> vector<128x128xf32>
    %c3 = arith.constant 3 : index
    %c0_85 = arith.constant 0 : index
    %c0_86 = arith.constant 0 : index
    %131 = vector.load %arg16[%c3, %c0_85, %c0_86] : memref<4x128x1xf32, #tpu.memory_space<vmem>>, vector<1x128x1xf32>
    %132 = vector.shape_cast %131 : vector<1x128x1xf32> to vector<128x1xf32>
    %cst_87 = arith.constant dense<0xFF800000> : vector<128xf32>
    %133 = vector.multi_reduction <maximumf>, %130, %cst_87 [1] : vector<128x128xf32> to vector<128xf32>
    %134 = vector.shape_cast %133 : vector<128xf32> to vector<128x1xf32>
    %135 = arith.maximumf %132, %134 : vector<128x1xf32>
    %136 = arith.subf %132, %135 : vector<128x1xf32>
    %137 = math.exp %136 : vector<128x1xf32>
    %138 = vector.broadcast %135 : vector<128x1xf32> to vector<128x128xf32>
    %139 = arith.subf %130, %138 : vector<128x128xf32>
    %140 = math.exp %139 : vector<128x128xf32>
    %c3_88 = arith.constant 3 : index
    %c0_89 = arith.constant 0 : index
    %c0_90 = arith.constant 0 : index
    %141 = vector.load %arg17[%c3_88, %c0_89, %c0_90] : memref<4x128x1xf32, #tpu.memory_space<vmem>>, vector<1x128x1xf32>
    %142 = vector.shape_cast %141 : vector<1x128x1xf32> to vector<128x1xf32>
    %143 = arith.mulf %137, %142 : vector<128x1xf32>
    %cst_91 = arith.constant dense<0.000000e+00> : vector<128xf32>
    %144 = vector.multi_reduction <add>, %140, %cst_91 [1] : vector<128x128xf32> to vector<128xf32>
    %145 = vector.shape_cast %144 : vector<128xf32> to vector<128x1xf32>
    %146 = arith.addf %143, %145 : vector<128x1xf32>
    %c3_92 = arith.constant 3 : index
    %c0_93 = arith.constant 0 : index
    %c0_94 = arith.constant 0 : index
    %147 = vector.load %arg17[%c3_92, %c0_93, %c0_94] : memref<4x128x1xf32, #tpu.memory_space<vmem>>, vector<1x128x1xf32>
    %148 = vector.shape_cast %147 : vector<1x128x1xf32> to vector<128x1xf32>
    %149 = vector.shape_cast %146 : vector<128x1xf32> to vector<1x128x1xf32>
    tpu.vector_store %arg17[%c3_92, %c0_93, %c0_94], %149 {strides = array<i32>} : memref<4x128x1xf32, #tpu.memory_space<vmem>>, vector<1x128x1xf32>,
    %150 = arith.truncf %140 : vector<128x128xf32> to vector<128x128xbf16>
    %cst_95 = arith.constant dense<0.000000e+00> : vector<128x32xf32>
    %151 = tpu.matmul %150, %129, %cst_95 {dimension_numbers = #tpu.dot_dimension_numbers<[1], [0], [0], [1], [0, 0, 1, 1], [], []>} : vector<128x128xbf16>, vector<128x32xbf16>, vector<128x32xf32> -> vector<128x32xf32>
    %c3_96 = arith.constant 3 : index
    %c0_97 = arith.constant 0 : index
    %c0_98 = arith.constant 0 : index
    %152 = vector.load %arg18[%c3_96, %c0_97, %c0_98] : memref<4x128x32xf32, #tpu.memory_space<vmem>>, vector<1x128x32xf32>
    %153 = vector.shape_cast %152 : vector<1x128x32xf32> to vector<128x32xf32>
    %154 = vector.broadcast %137 : vector<128x1xf32> to vector<128x32xf32>
    %155 = arith.mulf %154, %153 : vector<128x32xf32>
    %156 = arith.addf %155, %151 : vector<128x32xf32>
    %c3_99 = arith.constant 3 : index
    %c0_100 = arith.constant 0 : index
    %c0_101 = arith.constant 0 : index
    %157 = vector.load %arg18[%c3_99, %c0_100, %c0_101] : memref<4x128x32xf32, #tpu.memory_space<vmem>>, vector<1x128x32xf32>
    %158 = vector.shape_cast %157 : vector<1x128x32xf32> to vector<128x32xf32>
    %159 = vector.shape_cast %156 : vector<128x32xf32> to vector<1x128x32xf32>
    tpu.vector_store %arg18[%c3_99, %c0_100, %c0_101], %159 {strides = array<i32>} : memref<4x128x32xf32, #tpu.memory_space<vmem>>, vector<1x128x32xf32>,
    %c3_102 = arith.constant 3 : index
    %c0_103 = arith.constant 0 : index
    %c0_104 = arith.constant 0 : index
    %160 = vector.load %arg16[%c3_102, %c0_103, %c0_104] : memref<4x128x1xf32, #tpu.memory_space<vmem>>, vector<1x128x1xf32>
    %161 = vector.shape_cast %160 : vector<1x128x1xf32> to vector<128x1xf32>
    %162 = vector.shape_cast %135 : vector<128x1xf32> to vector<1x128x1xf32>
    tpu.vector_store %arg16[%c3_102, %c0_103, %c0_104], %162 {strides = array<i32>} : memref<4x128x1xf32, #tpu.memory_space<vmem>>, vector<1x128x1xf32>,
    %c1_i32 = arith.constant 1 : i32
    %163 = arith.cmpi eq, %arg2, %c1_i32 : i32
    %164 = arith.extui %163 : i1 to i32
    %c0_i32_105 = arith.constant 0 : i32
    %165 = arith.cmpi ne, %164, %c0_i32_105 : i32
    scf.if %165 {
      %cst_106 = arith.constant 0.000000e+00 : f32
      %166 = vector.broadcast %cst_106 : f32 to vector<128x128xf32>
      %c0_107 = arith.constant 0 : index
      %c0_108 = arith.constant 0 : index
      %c0_109 = arith.constant 0 : index
      %167 = vector.load %arg17[%c0_107, %c0_108, %c0_109] : memref<4x128x1xf32, #tpu.memory_space<vmem>>, vector<1x128x1xf32>
      %168 = vector.shape_cast %167 : vector<1x128x1xf32> to vector<128x1xf32>
      %169 = tpu.reciprocal %168 {approx = true} : vector<128x1xf32> -> vector<128x1xf32>
      %c0_110 = arith.constant 0 : index
      %c0_111 = arith.constant 0 : index
      %c0_112 = arith.constant 0 : index
      %170 = vector.load %arg18[%c0_110, %c0_111, %c0_112] : memref<4x128x32xf32, #tpu.memory_space<vmem>>, vector<1x128x32xf32>
      %171 = vector.shape_cast %170 : vector<1x128x32xf32> to vector<128x32xf32>
      %172 = vector.broadcast %169 : vector<128x1xf32> to vector<128x32xf32>
      %173 = arith.mulf %171, %172 : vector<128x32xf32>
      %174 = arith.truncf %173 : vector<128x32xf32> to vector<128x32xbf16>
      %c0_113 = arith.constant 0 : index
      %c0_114 = arith.constant 0 : index
      %175 = vector.load %arg12[%c0_113, %c0_114] : memref<128x128xbf16, #tpu.memory_space<vmem>>, vector<32x128xbf16>
      %cst_115 = arith.constant dense<0.000000e+00> : vector<128x128xf32>
      %176 = tpu.matmul %174, %175, %cst_115 {dimension_numbers = #tpu.dot_dimension_numbers<[1], [0], [0], [1], [0, 0, 1, 1], [], []>} : vector<128x32xbf16>, vector<32x128xbf16>, vector<128x128xf32> -> vector<128x128xf32>
      %177 = arith.addf %166, %176 : vector<128x128xf32>
      %c1_116 = arith.constant 1 : index
      %c0_117 = arith.constant 0 : index
      %c0_118 = arith.constant 0 : index
      %178 = vector.load %arg17[%c1_116, %c0_117, %c0_118] : memref<4x128x1xf32, #tpu.memory_space<vmem>>, vector<1x128x1xf32>
      %179 = vector.shape_cast %178 : vector<1x128x1xf32> to vector<128x1xf32>
      %180 = tpu.reciprocal %179 {approx = true} : vector<128x1xf32> -> vector<128x1xf32>
      %c1_119 = arith.constant 1 : index
      %c0_120 = arith.constant 0 : index
      %c0_121 = arith.constant 0 : index
      %181 = vector.load %arg18[%c1_119, %c0_120, %c0_121] : memref<4x128x32xf32, #tpu.memory_space<vmem>>, vector<1x128x32xf32>
      %182 = vector.shape_cast %181 : vector<1x128x32xf32> to vector<128x32xf32>
      %183 = vector.broadcast %180 : vector<128x1xf32> to vector<128x32xf32>
      %184 = arith.mulf %182, %183 : vector<128x32xf32>
      %185 = arith.truncf %184 : vector<128x32xf32> to vector<128x32xbf16>
      %c32_122 = arith.constant 32 : index
      %c0_123 = arith.constant 0 : index
      %186 = vector.load %arg12[%c32_122, %c0_123] : memref<128x128xbf16, #tpu.memory_space<vmem>>, vector<32x128xbf16>
      %cst_124 = arith.constant dense<0.000000e+00> : vector<128x128xf32>
      %187 = tpu.matmul %185, %186, %cst_124 {dimension_numbers = #tpu.dot_dimension_numbers<[1], [0], [0], [1], [0, 0, 1, 1], [], []>} : vector<128x32xbf16>, vector<32x128xbf16>, vector<128x128xf32> -> vector<128x128xf32>
      %188 = arith.addf %177, %187 : vector<128x128xf32>
      %c2_125 = arith.constant 2 : index
      %c0_126 = arith.constant 0 : index
      %c0_127 = arith.constant 0 : index
      %189 = vector.load %arg17[%c2_125, %c0_126, %c0_127] : memref<4x128x1xf32, #tpu.memory_space<vmem>>, vector<1x128x1xf32>
      %190 = vector.shape_cast %189 : vector<1x128x1xf32> to vector<128x1xf32>
      %191 = tpu.reciprocal %190 {approx = true} : vector<128x1xf32> -> vector<128x1xf32>
      %c2_128 = arith.constant 2 : index
      %c0_129 = arith.constant 0 : index
      %c0_130 = arith.constant 0 : index
      %192 = vector.load %arg18[%c2_128, %c0_129, %c0_130] : memref<4x128x32xf32, #tpu.memory_space<vmem>>, vector<1x128x32xf32>
      %193 = vector.shape_cast %192 : vector<1x128x32xf32> to vector<128x32xf32>
      %194 = vector.broadcast %191 : vector<128x1xf32> to vector<128x32xf32>
      %195 = arith.mulf %193, %194 : vector<128x32xf32>
      %196 = arith.truncf %195 : vector<128x32xf32> to vector<128x32xbf16>
      %c64_131 = arith.constant 64 : index
      %c0_132 = arith.constant 0 : index
      %197 = vector.load %arg12[%c64_131, %c0_132] : memref<128x128xbf16, #tpu.memory_space<vmem>>, vector<32x128xbf16>
      %cst_133 = arith.constant dense<0.000000e+00> : vector<128x128xf32>
      %198 = tpu.matmul %196, %197, %cst_133 {dimension_numbers = #tpu.dot_dimension_numbers<[1], [0], [0], [1], [0, 0, 1, 1], [], []>} : vector<128x32xbf16>, vector<32x128xbf16>, vector<128x128xf32> -> vector<128x128xf32>
      %199 = arith.addf %188, %198 : vector<128x128xf32>
      %c3_134 = arith.constant 3 : index
      %c0_135 = arith.constant 0 : index
      %c0_136 = arith.constant 0 : index
      %200 = vector.load %arg17[%c3_134, %c0_135, %c0_136] : memref<4x128x1xf32, #tpu.memory_space<vmem>>, vector<1x128x1xf32>
      %201 = vector.shape_cast %200 : vector<1x128x1xf32> to vector<128x1xf32>
      %202 = tpu.reciprocal %201 {approx = true} : vector<128x1xf32> -> vector<128x1xf32>
      %c3_137 = arith.constant 3 : index
      %c0_138 = arith.constant 0 : index
      %c0_139 = arith.constant 0 : index
      %203 = vector.load %arg18[%c3_137, %c0_138, %c0_139] : memref<4x128x32xf32, #tpu.memory_space<vmem>>, vector<1x128x32xf32>
      %204 = vector.shape_cast %203 : vector<1x128x32xf32> to vector<128x32xf32>
      %205 = vector.broadcast %202 : vector<128x1xf32> to vector<128x32xf32>
      %206 = arith.mulf %204, %205 : vector<128x32xf32>
      %207 = arith.truncf %206 : vector<128x32xf32> to vector<128x32xbf16>
      %c96_140 = arith.constant 96 : index
      %c0_141 = arith.constant 0 : index
      %208 = vector.load %arg12[%c96_140, %c0_141] : memref<128x128xbf16, #tpu.memory_space<vmem>>, vector<32x128xbf16>
      %cst_142 = arith.constant dense<0.000000e+00> : vector<128x128xf32>
      %209 = tpu.matmul %207, %208, %cst_142 {dimension_numbers = #tpu.dot_dimension_numbers<[1], [0], [0], [1], [0, 0, 1, 1], [], []>} : vector<128x32xbf16>, vector<32x128xbf16>, vector<128x128xf32> -> vector<128x128xf32>
      %210 = arith.addf %199, %209 : vector<128x128xf32>
      %c0_143 = arith.constant 0 : index
      %c0_144 = arith.constant 0 : index
      %211 = vector.load %arg13[%c0_143, %c0_144] : memref<1x128xf32, #tpu.memory_space<vmem>>, vector<1x128xf32>
      %212 = vector.broadcast %211 : vector<1x128xf32> to vector<128x128xf32>
      %213 = arith.addf %210, %212 : vector<128x128xf32>
      %c0_145 = arith.constant 0 : index
      %c0_146 = arith.constant 0 : index
      %c0_147 = arith.constant 0 : index
      %214 = vector.load %arg14[%c0_145, %c0_146, %c0_147] : memref<1x128x128xf32, #tpu.memory_space<vmem>>, vector<1x128x128xf32>
      %215 = vector.shape_cast %214 : vector<1x128x128xf32> to vector<128x128xf32>
      %216 = vector.shape_cast %213 : vector<128x128xf32> to vector<1x128x128xf32>
      tpu.vector_store %arg14[%c0_145, %c0_146, %c0_147], %216 {strides = array<i32>} : memref<1x128x128xf32, #tpu.memory_space<vmem>>, vector<1x128x128xf32>,
    } else {
    }
    return
  }
  func.func @transform_0(%arg0: i32, %arg1: i32, %arg2: i32) -> (i32, i32, i32) {
    %c0_i32 = arith.constant 0 : i32
    %c0_i32_0 = arith.constant 0 : i32
    return %arg0, %arg1, %c0_i32 : i32, i32, i32
  }
  func.func @transform_1(%arg0: i32, %arg1: i32, %arg2: i32) -> (i32, i32, i32) {
    %c0_i32 = arith.constant 0 : i32
    %c0_i32_0 = arith.constant 0 : i32
    return %arg0, %arg2, %c0_i32 : i32, i32, i32
  }
  func.func @transform_2(%arg0: i32, %arg1: i32, %arg2: i32) -> (i32, i32, i32) {
    %c0_i32 = arith.constant 0 : i32
    %c0_i32_0 = arith.constant 0 : i32
    return %arg0, %arg2, %c0_i32 : i32, i32, i32
  }
  func.func @transform_3(%arg0: i32, %arg1: i32, %arg2: i32) -> (i32, i32) {
    %c0_i32 = arith.constant 0 : i32
    %c0_i32_0 = arith.constant 0 : i32
    %c0_i32_1 = arith.constant 0 : i32
    return %c0_i32, %c0_i32_0 : i32, i32
  }
  func.func @transform_4(%arg0: i32, %arg1: i32, %arg2: i32) -> (i32, i32) {
    %c0_i32 = arith.constant 0 : i32
    %c0_i32_0 = arith.constant 0 : i32
    %c0_i32_1 = arith.constant 0 : i32
    return %c0_i32, %c0_i32_0 : i32, i32
  }
  func.func @transform_5(%arg0: i32, %arg1: i32, %arg2: i32) -> (i32, i32) {
    %c0_i32 = arith.constant 0 : i32
    %c0_i32_0 = arith.constant 0 : i32
    %c0_i32_1 = arith.constant 0 : i32
    return %c0_i32, %c0_i32_0 : i32, i32
  }
  func.func @transform_6(%arg0: i32, %arg1: i32, %arg2: i32) -> (i32, i32) {
    %c0_i32 = arith.constant 0 : i32
    %c0_i32_0 = arith.constant 0 : i32
    %c0_i32_1 = arith.constant 0 : i32
    return %c0_i32, %c0_i32_0 : i32, i32
  }
  func.func @transform_7(%arg0: i32, %arg1: i32, %arg2: i32) -> (i32, i32) {
    %c0_i32 = arith.constant 0 : i32
    %c0_i32_0 = arith.constant 0 : i32
    %c0_i32_1 = arith.constant 0 : i32
    return %c0_i32, %c0_i32_0 : i32, i32
  }
  func.func @transform_8(%arg0: i32, %arg1: i32, %arg2: i32) -> (i32, i32) {
    %c0_i32 = arith.constant 0 : i32
    %c0_i32_0 = arith.constant 0 : i32
    %c0_i32_1 = arith.constant 0 : i32
    return %c0_i32, %c0_i32_0 : i32, i32
  }
  func.func @transform_9(%arg0: i32, %arg1: i32, %arg2: i32) -> (i32, i32) {
    %c0_i32 = arith.constant 0 : i32
    %c0_i32_0 = arith.constant 0 : i32
    %c0_i32_1 = arith.constant 0 : i32
    return %c0_i32, %c0_i32_0 : i32, i32
  }
  func.func @transform_10(%arg0: i32, %arg1: i32, %arg2: i32) -> (i32, i32) {
    %c0_i32 = arith.constant 0 : i32
    %c0_i32_0 = arith.constant 0 : i32
    %c0_i32_1 = arith.constant 0 : i32
    return %c0_i32, %c0_i32_0 : i32, i32
  }
  func.func @transform_11(%arg0: i32, %arg1: i32, %arg2: i32) -> (i32, i32, i32) {
    %c0_i32 = arith.constant 0 : i32
    %c0_i32_0 = arith.constant 0 : i32
    return %arg0, %arg1, %c0_i32 : i32, i32, i32
  }
}

</mosaic_0001>

<bundles_post_ra>
// kernel: tpu_custom_call.1
= control target key start
LH: loop header
LB: loop body
LE: loop exit
PB: predicated region body
PF: predicated region fallthrough
CT: control target
= control target key end

     0   :  { %s11357_s0 = inlined_call_operand.hbm [shape: bf16[2,256,128], index: 0, kind: input, shape index: {}]   ;;  %s11358_s1 = inlined_call_operand.hbm [shape: bf16[2,256,128], index: 1, kind: input, shape index: {}]   ;;  %s11359_s2 = inlined_call_operand.hbm [shape: bf16[2,256,128], index: 2, kind: input, shape index: {}]   ;;  %s11360_s3 = inlined_call_operand.hbm [shape: bf16[128,128], index: 3, kind: input, shape index: {}]   ;;  %s11361_s4 = inlined_call_operand.vmem [shape: f32[1,128], index: 4, kind: input, shape index: {}]   ;;  %s11362_s5 = inlined_call_operand.hbm [shape: bf16[128,128], index: 5, kind: input, shape index: {}]   ;;  %s11363_s6 = inlined_call_operand.vmem [shape: f32[1,128], index: 6, kind: input, shape index: {}]   ;;  %s11364_s7 = inlined_call_operand.hbm [shape: bf16[128,128], index: 7, kind: input, shape index: {}]   ;;  %s11365_s8 = inlined_call_operand.vmem [shape: f32[1,128], index: 8, kind: input, shape index: {}]   ;;  %s11366_s9 = inlined_call_operand.hbm [shape: bf16[128,128], index: 9, kind: input, shape index: {}]   ;;  %s11367_s10 = inlined_call_operand.vmem [shape: f32[1,128], index: 10, kind: input, shape index: {}]   ;;  %s11368_s11 = inlined_call_operand.hbm [shape: f32[2,256,128], index: 11, kind: output, shape index: {}]  }
   0x1   :  { %11531 = sst [smem:[#allocation178_spill]] %s11357_s0 }
   0x2   :  { %11532 = sst [smem:[#allocation179_spill]] %s11358_s1 }
   0x3   :  { %11533 = sst [smem:[#allocation180_spill]] %s11359_s2 }
   0x4   :  { %11534 = sst [smem:[#allocation181_spill]] %s11360_s3 }
   0x5   :  { %11535 = sst [smem:[#allocation182_spill]] %s11361_s4 }
   0x6   :  { %11536 = sst [smem:[#allocation183_spill]] %s11362_s5 }
   0x7   :  { %11537 = sst [smem:[#allocation184_spill]] %s11363_s6 }
   0x8   :  { %11538 = sst [smem:[#allocation185_spill]] %s11364_s7 }
   0x9   :  { %11539 = sst [smem:[#allocation186_spill]] %s11365_s8 }
   0xa   :  { %11540 = sst [smem:[#allocation187_spill]] %s11366_s9 }
   0xb   :  { %11541 = sst [smem:[#allocation188_spill]] %s11367_s10 }
   0xc   :  { %11542 = sst [smem:[#allocation189_spill]] %s11368_s11 }
   0xd   :  { %16 = vsyncpa [#allocation7], 0 }
   0xe   :  { %18 = vsyncpa [#allocation7 + $0x1], 0 }
   0xf   :  { %19 = vsyncpa [#allocation10], 0 }
  0x10   :  { %21 = vsyncpa [#allocation10 + $0x1], 0 }
  0x11   :  { %22 = vsyncpa [#allocation13], 0 }
  0x12   :  { %23 = vsyncpa [#allocation16], 0 }
  0x13   :  { %24 = vsyncpa [#allocation8], 0 }
  0x14   :  { %26 = vsyncpa [#allocation8 + $0x1], 0  ;;  %s8147_s17 = smov 0   ;;  %s8149_s18 = smov 0  }
  0x15   :  { %s8151_s19 = smov 0   ;;  %s8153_s20 = smov 0  }
  0x16   :  { %s8155_s21 = smov 0   ;;  %s8157_s22 = smov 0  }
  0x17   :  { %s8159_s23 = smov 0   ;;  %s8161_s24 = smov 0  }
  0x18   :  { %s8163_s25 = smov 0   ;;  %s8165_s26 = smov 0  }
  0x19   :  { %s8167_s27 = smov 0   ;;  %s8169_s28 = smov 0  }
  0x1a   :  { %s8171_s29 = smov 0  }
  0x1b LB: > { %11543 = sst [smem:[#allocation24_spill]] %s8022_s18  ;;  %s8213_s30 = sadd.s32 4294967295, %s8066_s29   ;;  %s8066_s29 = sphi %s8171_s29, %s32_s29   ;;  %s8062_s28 = sphi %s8169_s28, %s12050_s28   ;;  %s8058_s27 = sphi %s8167_s27, %s12049_s27   ;;  %s8054_s26 = sphi %s8165_s26, %s12048_s26   ;;  %s8050_s25 = sphi %s8163_s25, %s12047_s25   ;;  %s8046_s24 = sphi %s8161_s24, %s12037_s24   ;;  %s8042_s23 = sphi %s8159_s23, %s12046_s23   ;;  %s8038_s22 = sphi %s8157_s22, %s12045_s22   ;;  %s8034_s21 = sphi %s8155_s21, %s12044_s21   ;;  %s8030_s20 = sphi %s8153_s20, %s12036_s20   ;;  %s8026_s19 = sphi %s8151_s19, %s12043_s19   ;;  %s8022_s18 = sphi %s8149_s18, %s12042_s18   ;;  %s8018_s17 = sphi %s8147_s17, %s12033_s17  }
  0x1c   : > { %11544 = sst [smem:[#allocation25_spill]] %s8026_s19  ;;  %p6187_p0 = scmp.ge.s32.totalorder %s8066_s29, 1 }
  0x1d   : > { %11545 = sst [smem:[#allocation26_spill]] %s8030_s20  ;;  %p11370_p1 = scmp.eq.s32.totalorder %s8213_s30, 0 }
  0x1e   : > { %11546 = sst [smem:[#allocation27_spill]] %s8034_s21  ;;  %p336_p2 = scmp.lt.s32.totalorder %s8066_s29, 9 }
  0x1f   : > { %11547 = sst [smem:[#allocation28_spill]] %s8042_s23  ;;  %s8068_s13 = smov [#allocation12]  }
  0x20   : > { %11548 = sst [smem:[#allocation29_spill]] %s8046_s24  ;;  %p8219_p4 = pnand %p6187_p0, %p336_p2 }
  0x21   : > { %11549 = sst [smem:[#allocation30_spill]] %s8050_s25  ;;  %s348_s14 = sshll.u32 %s8068_s13, 4  ;;  %s349_s14 = int_to_ptr.vmem [resolvable:$true] %s348_s14 }
  0x22   : > { %11550 = sst [smem:[#allocation31_spill]] %s8058_s27  ;;  %p7114_p5 = pneg %p8219_p4 }
  0x23   : > { %11551 = sst [smem:[#allocation32_spill]] %s8213_s30  ;;  %s8069_s16 = smov [#allocation15]  }
  0x24   : > { %s11552_s12 = scalar_select %p8219_p4, 1, 0 }
  0x25   : > { %p8227_p6 = pnand %p7114_p5, %p11370_p1  ;;  %s380_s11 = sshll.u32 %s8069_s16, 4  ;;  %s8231_s11 = int_to_ptr.vmem [resolvable:$true] %s380_s11 }
  0x26   : > { %11553 = sst [smem:[#allocation33_spill]] %s11552_s12  ;;  %s11555_s3 = sld [smem:[#allocation181_spill]] }
  0x27   : > { %s11554_s15 = scalar_select %p8227_p6, 1, 0 }
  0x28   : > { %p8241_p8 = pneg %p8227_p6 }
  0x2c   : > { %s7714_s10 = scalar_lea.hbm %s11555_s3, 1024 }
  0x2d   : > { %p7715_p7 = scmp.ne.s32.totalorder %s11555_s3, %s7714_s10  ;;  %p7721_p11 = scmp.lt.u32.totalorder %s7714_s10, %s11555_s3 }
  0x2f   : > { %p7717_p9 = pnand %p8241_p8, %p7715_p7 }
  0x31   : > { %p7718_p10 = pneg %p7717_p9 }
  0x33   : > { %p7723_p12 = pnand %p7721_p11, %p7718_p10 }
  0x35   : > { %7726 = shalt.err (!%p7723_p12)
}
  0x36   : > { %s7727_s24 = scalar_lea.vmem %s349_s14, 1024  ;;  %p7735_p5 = scmp.lt.s32.totalorder %s349_s14, %s349_s14 }
  0x37   : > { %p7728_p13 = scmp.ne.s32.totalorder %s349_s14, %s7727_s24  ;;  %p7736_p3 = scmp.lt.s32.totalorder %s7727_s24, %s7727_s24 }
  0x39   : > { %p7730_p0 = pnand %p7728_p13, %p8241_p8  ;;  %p7737_p1 = por %p7736_p3, %p7735_p5 }
  0x3b   : > { %p7731_p2 = pneg %p7730_p0 }
  0x3d   : > { %p7738_p4 = pnand %p7737_p1, %p7731_p2 }
  0x3f   : > { %7741 = shalt.err (!%p7738_p4)
}
  0x40   : > { %s11374_s6 = smov 64   ;;  %s11376_s8 = smov 4  }
  0x41   : > { %7117 = dma.hbm_to_vmem [thread:$0]  (!%p8227_p6), %s11555_s3, 1024, %s349_s14, [#allocation13], %s11374_s6, %s11374_s6, %s11376_s8  }
  0x42   : > { %s11557_s7 = sld [smem:[#allocation185_spill]] }
  0x48   : > { %s7742_s23 = scalar_lea.hbm %s11557_s7, 1024 }
  0x49   : > { %p7743_p1 = scmp.ne.s32.totalorder %s11557_s7, %s7742_s23  ;;  %p7749_p7 = scmp.lt.u32.totalorder %s7742_s23, %s11557_s7 }
  0x4b   : > { %p7745_p3 = pnand %p7743_p1, %p8241_p8 }
  0x4d   : > { %p7746_p4 = pneg %p7745_p3 }
  0x4f   : > { %p7751_p9 = pnand %p7749_p7, %p7746_p4 }
  0x51   : > { %7754 = shalt.err (!%p7751_p9)
}
  0x52   : > { %s7755_s14 = scalar_lea.vmem %s8231_s11, 1024  ;;  %p7763_p13 = scmp.lt.s32.totalorder %s8231_s11, %s8231_s11 }
  0x53   : > { %p7756_p10 = scmp.ne.s32.totalorder %s8231_s11, %s7755_s14  ;;  %p7764_p0 = scmp.lt.s32.totalorder %s7755_s14, %s7755_s14 }
  0x55   : > { %p7758_p11 = pnand %p7756_p10, %p8241_p8  ;;  %p7765_p2 = por %p7764_p0, %p7763_p13 }
  0x57   : > { %p7759_p12 = pneg %p7758_p11 }
  0x59   : > { %p7766_p5 = pnand %p7765_p2, %p7759_p12 }
  0x5b   : > { %7769 = shalt.err (!%p7766_p5)
}
  0x5c   : > { %7123 = dma.hbm_to_vmem [thread:$0]  (!%p8227_p6), %s11557_s7, 1024, %s8231_s11, [#allocation16], %s11374_s6, %s11374_s6, %s11376_s8  }
  0x5d   : > { %s44_s23 = sadd.s32 1, %s8054_s26  ;;  %p11385_p3 = scmp.eq.s32.totalorder %s8066_s29, 0 }
  0x5e   : > { %p8287_p1 = scmp.ge.s32.totalorder %s44_s23, 2  ;;  %p95_p4 = scmp.ne.s32.totalorder %s8026_s19, %s8022_s18 }
  0x5f   : > { %p101_p7 = scmp.ne.s32.totalorder %s8022_s18, %s8018_s17  ;;  %p11384_p9 = scmp.lt.s32.totalorder %s8066_s29, 8 }
  0x60   : > { %s11558_s12 = scalar_select %p8287_p1, 1, 0 }
  0x61   : > { %s12052_s23 = smov (%p8287_p1, %s44_s23), 0  ;;  %p8305_p10 = por %p95_p4, %p11385_p3 }
  0x62   : > { %p11560_p11 = scmp.eq.s32.totalorder %s8213_s30, 0  ;;  %s11378_s16 = sshll.u32 %s8062_s28, 5 }
  0x63   : > { %s436_s24 = sand.u32 1, %s8066_s29   ;;  %s438_s14 = sand.u32 1, %s8026_s19  }
  0x64   : > { %p8311_p12 = por %p101_p7, %p11560_p11  ;;  %s6197_s17 = sshll.u32 %s438_s14, 6 }
  0x65   : > { %s6198_s0 = sshll.u32 %s8054_s26, 4  ;;  %s440_s4 = scalar_lea.vmem [#allocation9], %s6197_s17 }
  0x66   : > { %s11561_s25 = scalar_select %p8311_p12, 1, 0 }
  0x67   : > { %s446_s20 = sadd.s32 %s6198_s0, %s11378_s16  ;;  %s449_s6 = sshll.u32 %s440_s4, 4  ;;  %s8326_s6 = int_to_ptr.vmem [resolvable:$true] %s449_s6 }
  0x68   : > { %11562 = sst [smem:[#allocation34_spill]] %s11561_s25  ;;  %s6200_s10 = sshll.u32 %s446_s20, 6 }
  0x69   : > { %s11563_s1 = sld [smem:[#allocation179_spill]]  ;;  %p8332_p13 = pnand %p11384_p9, %p8305_p10 }
  0x6a   : > { %s11565_s2 = sld [smem:[#allocation180_spill]]  ;;  %s463_s8 = scalar_lea.vmem [#allocation11], %s6197_s17 }
  0x6b   : > { %s8343_s16 = sshll.u32 %s463_s8, 4  ;;  %s8345_s25 = scalar_lea.sflag [#allocation10], %s436_s24  ;;  %s8426_s16 = int_to_ptr.vmem [resolvable:$true] %s8343_s16 }
  0x6c   : > { %p11391_p2 = pneg %p8332_p13 }
  0x6f   : > { %s8324_s7 = scalar_lea.hbm %s11563_s1, %s6200_s10  ;;  %s7775_s19 = scalar_lea.hbm %s11563_s1, 4096 }
  0x70   : > { %s8341_s3 = scalar_lea.hbm %s11565_s2, %s6200_s10  ;;  %s7770_s11 = scalar_lea.hbm %s8324_s7, 1024 }
  0x71   : > { %p7771_p0 = scmp.ne.s32.totalorder %s8324_s7, %s7770_s11  ;;  %p7776_p7 = scmp.lt.u32.totalorder %s8324_s7, %s11563_s1 }
  0x72   : > { %p7777_p10 = scmp.lt.u32.totalorder %s7775_s19, %s7770_s11  ;;  %p7779_p9 = scmp.lt.u32.totalorder %s7770_s11, %s8324_s7 }
  0x73   : > { %p7773_p5 = pnand %p11391_p2, %p7771_p0 }
  0x74   : > { %p7778_p11 = por %p7777_p10, %p7776_p7 }
  0x75   : > { %p7774_p4 = pneg %p7773_p5 }
  0x76   : > { %p7780_p3 = por %p7779_p9, %p7778_p11 }
  0x78   : > { %p7781_p12 = pnand %p7780_p3, %p7774_p4 }
  0x7a   : > { %7784 = shalt.err (!%p7781_p12)
}
  0x7b   : > { %s7785_s24 = scalar_lea.vmem %s8326_s6, 1024  ;;  %s8072_s18 = smov [#allocation9]  }
  0x7c   : > { %p7786_p0 = scmp.ne.s32.totalorder %s8326_s6, %s7785_s24  ;;  %s7790_s17 = sshll.u32 %s8072_s18, 4  ;;  %s7791_s17 = int_to_ptr.vmem [resolvable:$false] %s7790_s17 }
  0x7d   : > { %s7792_s4 = scalar_lea.vmem %s7791_s17, 2048  ;;  %p7793_p6 = scmp.lt.s32.totalorder %s8326_s6, %s7791_s17 }
  0x7e   : > { %p7788_p5 = pnand %p7786_p0, %p11391_p2  ;;  %p7794_p7 = scmp.lt.s32.totalorder %s7792_s4, %s7785_s24 }
  0x80   : > { %p7789_p1 = pneg %p7788_p5  ;;  %p7795_p10 = por %p7794_p7, %p7793_p6 }
  0x82   : > { %p7796_p9 = pnand %p7795_p10, %p7789_p1 }
  0x84   : > { %7799 = shalt.err (!%p7796_p9)
}
  0x85   : > { %s11566_s19 = smov 4   ;;  %s11567_s20 = smov 64  }
  0x86   : > { %7133 = dma.hbm_to_vmem [thread:$0]  (!%p8332_p13), %s8324_s7, 1024, %s8326_s6, %s8345_s25, %s11567_s20, %s11567_s20, %s11566_s19  }
  0x87   : > { %s8073_s8 = smov [#allocation14]   ;;  %s8074_s0 = smov [#allocation17]  }
  0x88   : > { %s364_s11 = sshll.u32 %s8073_s8, 4  ;;  %s396_s10 = sshll.u32 %s8074_s0, 4  ;;  %s365_s11 = int_to_ptr.vmem [resolvable:$true] %s364_s11  ;;  %s8376_s10 = int_to_ptr.vmem [resolvable:$true] %s396_s10 }
  0x89   : > { %s11568_s5 = sld [smem:[#allocation183_spill]] }
  0x8f   : > { %s7800_s17 = scalar_lea.hbm %s11568_s5, 1024 }
  0x90   : > { %p7801_p6 = scmp.ne.s32.totalorder %s11568_s5, %s7800_s17  ;;  %p7807_p12 = scmp.lt.u32.totalorder %s7800_s17, %s11568_s5 }
  0x92   : > { %p7803_p1 = pnand %p7801_p6, %p8241_p8 }
  0x94   : > { %p7804_p3 = pneg %p7803_p1 }
  0x96   : > { %p7809_p4 = pnand %p7807_p12, %p7804_p3 }
  0x98   : > { %7812 = shalt.err (!%p7809_p4)
}
  0x99   : > { %s7813_s6 = scalar_lea.vmem %s365_s11, 1024  ;;  %p7821_p7 = scmp.lt.s32.totalorder %s365_s11, %s365_s11 }
  0x9a   : > { %p7814_p11 = scmp.ne.s32.totalorder %s365_s11, %s7813_s6  ;;  %p7822_p10 = scmp.lt.s32.totalorder %s7813_s6, %s7813_s6 }
  0x9c   : > { %p7816_p0 = pnand %p7814_p11, %p8241_p8  ;;  %p7823_p9 = por %p7822_p10, %p7821_p7 }
  0x9e   : > { %p7817_p5 = pneg %p7816_p0 }
  0xa0   : > { %p7824_p2 = pnand %p7823_p9, %p7817_p5 }
  0xa2   : > { %7827 = shalt.err (!%p7824_p2)
}
  0xa3   : > { %p11569_p6 = scmp.ne.s32.totalorder %s11554_s15, 0  ;;  %s11570_s9 = sld [smem:[#allocation187_spill]] }
  0xa5   : > { %7120 = dma.hbm_to_vmem [thread:$0]  (!%p11569_p6), %s11568_s5, 1024, %s365_s11, [#allocation13], %s11567_s20, %s11567_s20, %s11566_s19  }
  0xa9   : > { %s7828_s24 = scalar_lea.hbm %s11570_s9, 1024 }
  0xaa   : > { %p7829_p1 = scmp.ne.s32.totalorder %s11570_s9, %s7828_s24  ;;  %p7835_p12 = scmp.lt.u32.totalorder %s7828_s24, %s11570_s9 }
  0xac   : > { %p7831_p2 = pnand %p7829_p1, %p8241_p8 }
  0xae   : > { %p7832_p3 = pneg %p7831_p2 }
  0xb0   : > { %p7837_p4 = pnand %p7835_p12, %p7832_p3 }
  0xb2   : > { %7840 = shalt.err (!%p7837_p4)
}
  0xb3   : > { %s7841_s11 = scalar_lea.vmem %s8376_s10, 1024  ;;  %p7849_p7 = scmp.lt.s32.totalorder %s8376_s10, %s8376_s10 }
  0xb4   : > { %p7842_p11 = scmp.ne.s32.totalorder %s8376_s10, %s7841_s11  ;;  %p7850_p10 = scmp.lt.s32.totalorder %s7841_s11, %s7841_s11 }
  0xb6   : > { %p7844_p0 = pnand %p7842_p11, %p8241_p8  ;;  %p7851_p9 = por %p7850_p10, %p7849_p7 }
  0xb8   : > { %p7845_p5 = pneg %p7844_p0 }
  0xba   : > { %p7852_p1 = pnand %p7851_p9, %p7845_p5 }
  0xbc   : > { %7855 = shalt.err (!%p7852_p1)
}
  0xbd   : > { %s11571_s13 = sld [smem:[#allocation26_spill]]  ;;  %11572 = sst [smem:[#allocation35_spill]] %s8426_s16 }
  0xbe   : > { %7126 = dma.hbm_to_vmem [thread:$0]  (!%p11569_p6), %s11570_s9, 1024, %s8376_s10, [#allocation16], %s11567_s20, %s11567_s20, %s11566_s19  }
  0xbf   : > { %s47_s15 = sadd.s32 1, %s8058_s27  ;;  %p11573_p8 = scmp.ne.s32.totalorder %s11558_s12, 0 }
  0xc0   : > { %s6186_s2 = sadd.s32 4294967294, %s8066_s29   ;;  %p67_p2 = scmp.ne.s32.totalorder %s8038_s22, %s8034_s21 }
  0xc1   : > { %s12054_s15 = smov (!%p11573_p8, %s47_s15), %s8058_s27  ;;  %s60_s8 = sadd.s32 1, %s8038_s22 }
  0xc2   : > { %p49_p3 = scmp.ge.s32.totalorder %s12054_s15, 2  ;;  %p11574_p4 = scmp.eq.s32.totalorder %s8213_s30, 7 }
  0xc3   : > { %p73_p12 = scmp.ne.s32.totalorder %s8034_s21, %s11571_s13  ;;  %s11578_s0 = sadd.s32 1, %s8062_s28 }
  0xc4   : > { %p8440_p11 = por %p11574_p4, %p67_p2  ;;  %s12056_s15 = smov (%p49_p3, %s12054_s15), 0 }
  0xc5   : > { %11577 = sst [smem:[#allocation37_spill]] %s12056_s15  ;;  %s12058_s0 = smov (!%p49_p3, %s11578_s0), %s8062_s28 }
  0xc6   : > { %s11575_s10 = scalar_select %p8440_p11, 1, 0 }
  0xc7   : > { %p11579_p6 = scmp.eq.s32.totalorder %s8066_s29, 0  ;;  %p11581_p5 = scmp.eq.s32.totalorder %s8213_s30, 0 }
  0xc8   : > { %11576 = sst [smem:[#allocation36_spill]] %s11575_s10  ;;  %s11584_s18 = sld [smem:[#allocation25_spill]] }
  0xc9   : > { %p8451_p0 = por %p11579_p6, %p67_p2  ;;  %p8457_p7 = por %p11581_p5, %p73_p12 }
  0xca   : > { %p53_p10 = scmp.ge.s32.totalorder %s12058_s0, 2  ;;  %p329_p9 = scmp.eq.s32.totalorder %s6186_s2, 7 }
  0xcb   : > { %s11582_s24 = scalar_select %p8457_p7, 1, 0 }
  0xcc   : > { %s56_s17 = ssub.s32 %s8058_s27, %s12056_s15  ;;  %s11402_s4 = sand.u32 1, %s8038_s22  }
  0xcd   : > { %11583 = sst [smem:[#allocation38_spill]] %s11582_s24  ;;  %s12060_s0 = smov (%p53_p10, %s12058_s0), 0 }
  0xce   : > { %11585 = sst [smem:[#allocation39_spill]] %s12060_s0  ;;  %p8466_p1 = por %p329_p9, %p73_p12 }
  0xcf   : > { %s6194_s11 = sshll.u32 %s8058_s27, 4  ;;  %s55_s6 = ssub.s32 %s8062_s28, %s12060_s0 }
  0xd0   : > { %s11586_s7 = scalar_select %p8466_p1, 1, 0 }
  0xd1   : > { %s6193_s1 = sshll.u32 %s11402_s4, 6  ;;  %s57_s13 = sor.u32 %s56_s17, %s55_s6 }
  0xd2   : > { %11587 = sst [smem:[#allocation40_spill]] %s11586_s7  ;;  %s11588_s2 = ssub.s32 %s8054_s26, %s12052_s23 }
  0xd3   : > { %s85_s5 = sor.u32 %s11588_s2, %s55_s6  ;;  %p58_p8 = scmp.eq.s32.totalorder %s57_s13, 0 }
  0xd4   : > { %p86_p2 = scmp.eq.s32.totalorder %s85_s5, 0  ;;  %s11589_s9 = sshll.u32 %s8062_s28, 5 }
  0xd5   : > { %s423_s15 = sadd.s32 %s11589_s9, %s6194_s11  ;;  %s11590_s7 = sadd.s32 1, %s11584_s18 }
  0xd6   : > { %s8481_s10 = scalar_select %p58_p8, %s8038_s22, %s60_s8  }
  0xd7   : > { %s12062_s18 = smov (!%p86_p2, %s11584_s18), %s11590_s7  ;;  %s6196_s27 = sshll.u32 %s423_s15, 6 }
  0xd8   : > { %s417_s0 = scalar_lea.vmem [#allocation6], %s6193_s1  ;;  %s11591_s21 = sld [smem:[#allocation178_spill]] }
  0xd9   : > { %s426_s30 = sshll.u32 %s417_s0, 4  ;;  %p11593_p3 = scmp.lt.s32.totalorder %s8066_s29, 8  ;;  %s8493_s30 = int_to_ptr.vmem [resolvable:$true] %s426_s30 }
  0xda   : > { %s7856_s9 = scalar_lea.hbm %s8341_s3, 1024  ;;  %p11595_p6 = pneg %p8332_p13 }
  0xdb   : > { %p8499_p12 = pnand %p11593_p3, %p8451_p0  ;;  %p7857_p4 = scmp.ne.s32.totalorder %s8341_s3, %s7856_s9 }
  0xdc   : > { %s11596_s0 = sld [smem:[#allocation180_spill]]  ;;  %p7865_p0 = scmp.lt.u32.totalorder %s7856_s9, %s8341_s3 }
  0xdd   : > { %p7859_p5 = pnand %p7857_p4, %p11595_p6 }
  0xde   : > { %s11592_s16 = smov %s11591_s21  ;;  %s8491_s17 = scalar_lea.hbm %s11591_s21, %s6196_s27 }
  0xdf   : > { %p7860_p10 = pneg %p7859_p5 }
  0xe2   : > { %s7861_s24 = scalar_lea.hbm %s11596_s0, 4096  ;;  %p7862_p9 = scmp.lt.u32.totalorder %s8341_s3, %s11596_s0 }
  0xe3   : > { %p7863_p8 = scmp.lt.u32.totalorder %s7861_s24, %s7856_s9 }
  0xe5   : > { %p7864_p2 = por %p7863_p8, %p7862_p9 }
  0xe7   : > { %p7866_p3 = por %p7865_p0, %p7864_p2 }
  0xe9   : > { %p7867_p1 = pnand %p7866_p3, %p7860_p10 }
  0xeb   : > { %7870 = shalt.err (!%p7867_p1)
}
  0xec   : > { %s11597_s12 = sld [smem:[#allocation35_spill]]  ;;  %s8075_s7 = smov [#allocation11]  }
  0xed   : > { %s7876_s11 = sshll.u32 %s8075_s7, 4  ;;  %s7877_s11 = int_to_ptr.vmem [resolvable:$false] %s7876_s11 }
  0xee   : > { %s7878_s6 = scalar_lea.vmem %s7877_s11, 2048 }
  0xf2   : > { %s7871_s4 = scalar_lea.vmem %s11597_s12, 1024  ;;  %p7879_p7 = scmp.lt.s32.totalorder %s11597_s12, %s7877_s11 }
  0xf3   : > { %p7872_p4 = scmp.ne.s32.totalorder %s11597_s12, %s7871_s4  ;;  %p7880_p9 = scmp.lt.s32.totalorder %s7878_s6, %s7871_s4 }
  0xf5   : > { %p7874_p5 = pnand %p7872_p4, %p11595_p6  ;;  %p7881_p8 = por %p7880_p9, %p7879_p7 }
  0xf7   : > { %p7875_p11 = pneg %p7874_p5 }
  0xf9   : > { %p7882_p2 = pnand %p7881_p8, %p7875_p11 }
  0xfb   : > { %7885 = shalt.err (!%p7882_p2)
}
  0xfc   : > { %7136 = dma.hbm_to_vmem [thread:$0]  (!%p8332_p13), %s8341_s3, 1024, %s11597_s12, %s8345_s25, %s11567_s20, %s11567_s20, %s11566_s19  }
  0xfd   : > { %s11598_s1 = sand.u32 1, %s8038_s22   ;;  %s7886_s2 = scalar_lea.hbm %s8491_s17, 1024 }
  0xfe   : > { %s8532_s13 = scalar_lea.sflag [#allocation7], %s11598_s1  ;;  %p7887_p11 = scmp.ne.s32.totalorder %s8491_s17, %s7886_s2 }
  0xff   : > { %p7888_p7 = pneg %p8499_p12  ;;  %s7891_s15 = scalar_lea.hbm %s11592_s16, 4096 }
 0x100   : > { %p7892_p0 = scmp.lt.u32.totalorder %s8491_s17, %s11592_s16  ;;  %p7893_p13 = scmp.lt.u32.totalorder %s7891_s15, %s7886_s2 }
 0x101   : > { %p7889_p1 = pnand %p7888_p7, %p7887_p11  ;;  %p7895_p4 = scmp.lt.u32.totalorder %s7886_s2, %s8491_s17 }
 0x102   : > { %p7894_p3 = por %p7893_p13, %p7892_p0 }
 0x103   : > { %p7890_p10 = pneg %p7889_p1 }
 0x104   : > { %p7896_p6 = por %p7895_p4, %p7894_p3 }
 0x106   : > { %p7897_p5 = pnand %p7896_p6, %p7890_p10 }
 0x108   : > { %7900 = shalt.err (!%p7897_p5)
}
 0x109   : > { %s7901_s25 = scalar_lea.vmem %s8493_s30, 1024  ;;  %s8076_s3 = smov [#allocation6]  }
 0x10a   : > { %p7902_p9 = scmp.ne.s32.totalorder %s8493_s30, %s7901_s25  ;;  %s7906_s24 = sshll.u32 %s8076_s3, 4  ;;  %s7907_s24 = int_to_ptr.vmem [resolvable:$false] %s7906_s24 }
 0x10b   : > { %s7908_s21 = scalar_lea.vmem %s7907_s24, 2048  ;;  %p7909_p11 = scmp.lt.s32.totalorder %s8493_s30, %s7907_s24 }
 0x10c   : > { %p7904_p8 = pnand %p7902_p9, %p7888_p7  ;;  %p7910_p1 = scmp.lt.s32.totalorder %s7908_s21, %s7901_s25 }
 0x10e   : > { %p7905_p2 = pneg %p7904_p8  ;;  %p7911_p0 = por %p7910_p1, %p7909_p11 }
 0x110   : > { %p7912_p13 = pnand %p7911_p0, %p7905_p2 }
 0x112   : > { %7915 = shalt.err (!%p7912_p13)
}
 0x113   : > { %7130 = dma.hbm_to_vmem [thread:$0]  (!%p8499_p12), %s8491_s17, 1024, %s8493_s30, %s8532_s13, %s11567_s20, %s11567_s20, %s11566_s19  }
 0x114   : > { %s11599_s27 = sld [smem:[#allocation33_spill]] }
 0x11a   : > { %p11600_p7 = scmp.ne.s32.totalorder %s11599_s27, 0 }
 0x11c   : > { %484 = sbr.rel (%p11600_p7) target bundleno = 3961 (0xf79), region = 64 }
 0x123   : > { %s11601_s12 = sld [smem:[#allocation27_spill]]  ;;  %s11602_s4 = sld [smem:[#allocation38_spill]] }
 0x129   : > { %s8566_s7 = sand.u32 1, %s11601_s12   ;;  %p11603_p10 = scmp.ne.s32.totalorder %s11602_s4, 0 }
 0x12a   : > { %s6206_s11 = sshll.u32 %s8566_s7, 6  ;;  %s487_s6 = scalar_lea.sflag [#allocation7], %s8566_s7 }
 0x12b   : > { %s8570_s1 = scalar_lea.vmem [#allocation6], %s6206_s11 }
 0x12c   : > { %7997 = dma.done.wait (%p11603_p10), %s487_s6, 1024  }
 0x12d   : > { %7999 = vsyncadd (%p11603_p10), %s487_s6, 4294966272  ;;  %s11604_s5 = sld [smem:[#allocation32_spill]]  ;;  %s11605_s30 = sld [smem:[#allocation24_spill]] }
 0x12e   : > { %s11606_s19 = sld [smem:[#allocation34_spill]] }
 0x133   : > { %s495_s20 = sand.u32 1, %s11604_s5   ;;  %s497_s17 = sand.u32 1, %s11605_s30  }
 0x134   : > { %s6207_s13 = sshll.u32 %s497_s17, 6  ;;  %s496_s2 = scalar_lea.sflag [#allocation10], %s495_s20 }
 0x135   : > { %s8578_s14 = scalar_lea.vmem [#allocation9], %s6207_s13  ;;  %p11607_p12 = scmp.ne.s32.totalorder %s11606_s19, 0 }
 0x137   : > { %8001 = dma.done.wait (%p11607_p12), %s496_s2, 2048  }
 0x138   : > { %8003 = vsyncadd (%p11607_p12), %s496_s2, 4294965248  ;;  %s8584_s9 = scalar_lea.vmem [#allocation11], %s6207_s13  ;;  %p11608_p3 = scmp.eq.s32.totalorder %s11604_s5, 0 }
 0x13a   : > { %8005 = dma.done.wait (%p11608_p3), [#allocation13], 2048   ;;  %p11609_p4 = pmov %p11608_p3 }
 0x13b   : > { %p11610_p6 = pmov %p11608_p3 }
 0x13c   : > { %8007 = vsyncadd (%p11609_p4), [#allocation13], 4294965248 }
 0x13d   : > { %8009 = dma.done.wait (%p11610_p6), [#allocation16], 2048   ;;  %p11611_p5 = pmov %p11608_p3 }
 0x13e   : > { %s6213_s15 = sshll.u32 %s8566_s7, 7  ;;  %s11612_s0 = sld [smem:[#allocation28_spill]] }
 0x13f   : > { %8011 = vsyncadd (%p11611_p5), [#allocation16], 4294965248  ;;  %s8595_s8 = scalar_lea.vmem [#allocation18], %s6213_s15 }
 0x144   : > { %p6214_p9 = scmp.ne.s32.totalorder %s11612_s0, 0 }
 0x145   : > { %v7270_v0 = vld [vmem:[#allocation12] sm:$0xff] (!%p6214_p9)   ;;  %v7271_v1 = vld [vmem:[#allocation12 + $0x8] sm:$0xff] (!%p6214_p9)   ;;  %v7272_v2 = vld [vmem:[#allocation12 + $0x10] sm:$0xff] (!%p6214_p9)   ;;  %vm846_vm0 = vcmask (!%p6214_p9), 7168   ;;  %vm975_vm1 = vcmask (!%p6214_p9), 261120   ;;  %v8077_v16 = vmov (!%p6214_p9), -inf  }
 0x146   : > { %581 = sbr.rel (%p6214_p9) target bundleno = 588 (0x24c), region = 96  ;;  %6562 = vmatprep.subr.bf16.mxu0 (!%p6214_p9), %v7270_v0  ;;  %6994 = vmatprep.subr.bf16.mxu1 (!%p6214_p9), %v7270_v0  ;;  %v7273_v3 = vld [vmem:[#allocation12 + $0x18] sm:$0xff] (!%p6214_p9)   ;;  %v7278_v4 = vld [vmem:[%s8570_s1] sm:$0xff] (!%p6214_p9)   ;;  %v7275_v7 = vld [vmem:[#allocation12 + $0x28] sm:$0xff] (!%p6214_p9)   ;;  %847 = vst.msk [vmem:[#allocation3] sm:$0xff] (!%p6214_p9), %vm846_vm0, %v8077_v16  ;;  %v8078_v17 = vmov (!%p6214_p9), 0.0  }
 0x147   : > { %6563 = vmatpush3.bf16.msra.mxu0 (!%p6214_p9), %v7270_v0  ;;  %7002 = vmatpush3.bf16.msra.mxu1 (!%p6214_p9), %v7270_v0  ;;  %v7279_v5 = vld [vmem:[%s8570_s1 + $0x20] sm:$0xff] (!%p6214_p9)   ;;  %v7276_v8 = vld [vmem:[#allocation12 + $0x30] sm:$0xff] (!%p6214_p9)   ;;  %v7277_v9 = vld [vmem:[#allocation12 + $0x38] sm:$0xff] (!%p6214_p9)   ;;  %848 = vst.msk [vmem:[#allocation3 + $0x8] sm:$0xff] (!%p6214_p9), %vm846_vm0, %v8077_v16  ;;  %s11613_s24 = sld [smem:[#allocation182_spill]] (!%p6214_p9) }
 0x148   : > { %6564 = vmatprep.subr.bf16.mxu0 (!%p6214_p9), %v7271_v1  ;;  %6995 = vmatprep.subr.bf16.mxu1 (!%p6214_p9), %v7271_v1  ;;  %v7274_v6 = vld [vmem:[#allocation12 + $0x20] sm:$0xff] (!%p6214_p9)   ;;  %v7280_v10 = vld [vmem:[%s8570_s1 + $0x8] sm:$0xff] (!%p6214_p9)   ;;  %v7282_v12 = vld [vmem:[%s8570_s1 + $0x10] sm:$0xff] (!%p6214_p9)   ;;  %849 = vst.msk [vmem:[#allocation3 + $0x10] sm:$0xff] (!%p6214_p9), %vm846_vm0, %v8077_v16 }
 0x149   : > { %6578 = vmatprep.mubr.bf16.mxu0 (!%p6214_p9), %v7278_v4  ;;  %6586 = vmatprep.mubr.bf16.mxu1 (!%p6214_p9), %v7279_v5  ;;  %v7281_v11 = vld [vmem:[%s8570_s1 + $0x28] sm:$0xff] (!%p6214_p9)   ;;  %v7283_v13 = vld [vmem:[%s8570_s1 + $0x30] sm:$0xff] (!%p6214_p9)   ;;  %v7284_v14 = vld [vmem:[%s8570_s1 + $0x18] sm:$0xff] (!%p6214_p9)   ;;  %850 = vst.msk [vmem:[#allocation3 + $0x18] sm:$0xff] (!%p6214_p9), %vm846_vm0, %v8077_v16 }
 0x14a   : > { %v7285_v15 = vld [vmem:[%s8570_s1 + $0x38] sm:$0xff] (!%p6214_p9)   ;;  %851 = vst.msk [vmem:[#allocation3 + $0x20] sm:$0xff] (!%p6214_p9), %vm846_vm0, %v8077_v16  ;;  %852 = vst.msk [vmem:[#allocation3 + $0x28] sm:$0xff] (!%p6214_p9), %vm846_vm0, %v8077_v16 }
 0x14b   : > { %6565 = vmatpush3.bf16.msra.mxu0 (!%p6214_p9), %v7271_v1  ;;  %7003 = vmatpush3.bf16.msra.mxu1 (!%p6214_p9), %v7271_v1  ;;  %853 = vst.msk [vmem:[#allocation3 + $0x30] sm:$0xff] (!%p6214_p9), %vm846_vm0, %v8077_v16  ;;  %854 = vst.msk [vmem:[#allocation3 + $0x38] sm:$0xff] (!%p6214_p9), %vm846_vm0, %v8077_v16 }
 0x14c   : > { %6566 = vmatprep.subr.bf16.mxu0 (!%p6214_p9), %v7272_v2  ;;  %6996 = vmatprep.subr.bf16.mxu1 (!%p6214_p9), %v7272_v2  ;;  %855 = vst.msk [vmem:[#allocation3 + $0x40] sm:$0xff] (!%p6214_p9), %vm846_vm0, %v8077_v16  ;;  %856 = vst.msk [vmem:[#allocation3 + $0x48] sm:$0xff] (!%p6214_p9), %vm846_vm0, %v8077_v16 }
 0x14d   : > { %857 = vst.msk [vmem:[#allocation3 + $0x50] sm:$0xff] %vm846_vm0, %v8077_v16  ;;  %858 = vst.msk [vmem:[#allocation3 + $0x58] sm:$0xff] %vm846_vm0, %v8077_v16  ;;  %v6215_v18 = vld [vmem:[%s11613_s24] ss:$0 sm:$0xff] }
 0x14e   : > { %859 = vst.msk [vmem:[#allocation3 + $0x60] sm:$0xff] %vm846_vm0, %v8077_v16  ;;  %860 = vst.msk [vmem:[#allocation3 + $0x68] sm:$0xff] %vm846_vm0, %v8077_v16 }
 0x14f   : > { %6567 = vmatpush3.bf16.msra.mxu0 %v7272_v2  ;;  %7004 = vmatpush3.bf16.msra.mxu1 %v7272_v2  ;;  %861 = vst.msk [vmem:[#allocation3 + $0x70] sm:$0xff] %vm846_vm0, %v8077_v16  ;;  %862 = vst.msk [vmem:[#allocation3 + $0x78] sm:$0xff] %vm846_vm0, %v8077_v16 }
 0x150   : > { %6568 = vmatprep.subr.bf16.mxu0 %v7273_v3  ;;  %6997 = vmatprep.subr.bf16.mxu1 %v7273_v3  ;;  %863 = vst.msk [vmem:[#allocation3 + $0x80] sm:$0xff] %vm846_vm0, %v8077_v16  ;;  %864 = vst.msk [vmem:[#allocation3 + $0x88] sm:$0xff] %vm846_vm0, %v8077_v16 }
 0x151   : > { %865 = vst.msk [vmem:[#allocation3 + $0x90] sm:$0xff] %vm846_vm0, %v8077_v16  ;;  %866 = vst.msk [vmem:[#allocation3 + $0x98] sm:$0xff] %vm846_vm0, %v8077_v16 }
 0x152   : > { %867 = vst.msk [vmem:[#allocation3 + $0xa0] sm:$0xff] %vm846_vm0, %v8077_v16  ;;  %868 = vst.msk [vmem:[#allocation3 + $0xa8] sm:$0xff] %vm846_vm0, %v8077_v16 }
 0x153   : > { %6569 = vmatpush3.bf16.msra.mxu0 %v7273_v3  ;;  %7005 = vmatpush3.bf16.msra.mxu1 %v7273_v3  ;;  %869 = vst.msk [vmem:[#allocation3 + $0xb0] sm:$0xff] %vm846_vm0, %v8077_v16  ;;  %870 = vst.msk [vmem:[#allocation3 + $0xb8] sm:$0xff] %vm846_vm0, %v8077_v16 }
 0x154   : > { %6570 = vmatprep.subr.bf16.mxu0 %v7274_v6  ;;  %6998 = vmatprep.subr.bf16.mxu1 %v7274_v6  ;;  %871 = vst.msk [vmem:[#allocation3 + $0xc0] sm:$0xff] %vm846_vm0, %v8077_v16  ;;  %872 = vst.msk [vmem:[#allocation3 + $0xc8] sm:$0xff] %vm846_vm0, %v8077_v16 }
 0x155   : > { %873 = vst.msk [vmem:[#allocation3 + $0xd0] sm:$0xff] %vm846_vm0, %v8077_v16  ;;  %874 = vst.msk [vmem:[#allocation3 + $0xd8] sm:$0xff] %vm846_vm0, %v8077_v16 }
 0x156   : > { %875 = vst.msk [vmem:[#allocation3 + $0xe0] sm:$0xff] %vm846_vm0, %v8077_v16  ;;  %876 = vst.msk [vmem:[#allocation3 + $0xe8] sm:$0xff] %vm846_vm0, %v8077_v16 }
 0x157   : > { %6571 = vmatpush3.bf16.msra.mxu0 %v7274_v6  ;;  %7006 = vmatpush3.bf16.msra.mxu1 %v7274_v6  ;;  %877 = vst.msk [vmem:[#allocation3 + $0xf0] sm:$0xff] %vm846_vm0, %v8077_v16  ;;  %878 = vst.msk [vmem:[#allocation3 + $0xf8] sm:$0xff] %vm846_vm0, %v8077_v16 }
 0x158   : > { %6572 = vmatprep.subr.bf16.mxu0 %v7275_v7  ;;  %6999 = vmatprep.subr.bf16.mxu1 %v7275_v7  ;;  %879 = vst.msk [vmem:[#allocation3 + $0x100] sm:$0xff] %vm846_vm0, %v8077_v16  ;;  %880 = vst.msk [vmem:[#allocation3 + $0x108] sm:$0xff] %vm846_vm0, %v8077_v16 }
 0x159   : > { %881 = vst.msk [vmem:[#allocation3 + $0x110] sm:$0xff] %vm846_vm0, %v8077_v16  ;;  %882 = vst.msk [vmem:[#allocation3 + $0x118] sm:$0xff] %vm846_vm0, %v8077_v16 }
 0x15a   : > { %883 = vst.msk [vmem:[#allocation3 + $0x120] sm:$0xff] %vm846_vm0, %v8077_v16  ;;  %884 = vst.msk [vmem:[#allocation3 + $0x128] sm:$0xff] %vm846_vm0, %v8077_v16 }
 0x15b   : > { %6573 = vmatpush3.bf16.msra.mxu0 %v7275_v7  ;;  %7007 = vmatpush3.bf16.msra.mxu1 %v7275_v7  ;;  %885 = vst.msk [vmem:[#allocation3 + $0x130] sm:$0xff] %vm846_vm0, %v8077_v16  ;;  %886 = vst.msk [vmem:[#allocation3 + $0x138] sm:$0xff] %vm846_vm0, %v8077_v16 }
 0x15c   : > { %6574 = vmatprep.subr.bf16.mxu0 %v7276_v8  ;;  %7000 = vmatprep.subr.bf16.mxu1 %v7276_v8  ;;  %887 = vst.msk [vmem:[#allocation3 + $0x140] sm:$0xff] %vm846_vm0, %v8077_v16  ;;  %888 = vst.msk [vmem:[#allocation3 + $0x148] sm:$0xff] %vm846_vm0, %v8077_v16 }
 0x15d   : > { %889 = vst.msk [vmem:[#allocation3 + $0x150] sm:$0xff] %vm846_vm0, %v8077_v16  ;;  %890 = vst.msk [vmem:[#allocation3 + $0x158] sm:$0xff] %vm846_vm0, %v8077_v16 }
 0x15e   : > { %891 = vst.msk [vmem:[#allocation3 + $0x160] sm:$0xff] %vm846_vm0, %v8077_v16  ;;  %892 = vst.msk [vmem:[#allocation3 + $0x168] sm:$0xff] %vm846_vm0, %v8077_v16 }
 0x15f   : > { %6575 = vmatpush3.bf16.msra.mxu0 %v7276_v8  ;;  %7008 = vmatpush3.bf16.msra.mxu1 %v7276_v8  ;;  %893 = vst.msk [vmem:[#allocation3 + $0x170] sm:$0xff] %vm846_vm0, %v8077_v16  ;;  %894 = vst.msk [vmem:[#allocation3 + $0x178] sm:$0xff] %vm846_vm0, %v8077_v16 }
 0x160   : > { %6576 = vmatprep.subr.bf16.mxu0 %v7277_v9  ;;  %7001 = vmatprep.subr.bf16.mxu1 %v7277_v9  ;;  %895 = vst.msk [vmem:[#allocation3 + $0x180] sm:$0xff] %vm846_vm0, %v8077_v16  ;;  %896 = vst.msk [vmem:[#allocation3 + $0x188] sm:$0xff] %vm846_vm0, %v8077_v16 }
 0x161   : > { %897 = vst.msk [vmem:[#allocation3 + $0x190] sm:$0xff] %vm846_vm0, %v8077_v16  ;;  %898 = vst.msk [vmem:[#allocation3 + $0x198] sm:$0xff] %vm846_vm0, %v8077_v16 }
 0x162   : > { %899 = vst.msk [vmem:[#allocation3 + $0x1a0] sm:$0xff] %vm846_vm0, %v8077_v16  ;;  %900 = vst.msk [vmem:[#allocation3 + $0x1a8] sm:$0xff] %vm846_vm0, %v8077_v16 }
 0x163   : > { %6577 = vmatpush3.bf16.msra.mxu0 %v7277_v9  ;;  %7009 = vmatpush3.bf16.msra.mxu1 %v7277_v9  ;;  %901 = vst.msk [vmem:[#allocation3 + $0x1b0] sm:$0xff] %vm846_vm0, %v8077_v16  ;;  %902 = vst.msk [vmem:[#allocation3 + $0x1b8] sm:$0xff] %vm846_vm0, %v8077_v16 }
 0x164   : > { %903 = vst.msk [vmem:[#allocation3 + $0x1c0] sm:$0xff] %vm846_vm0, %v8077_v16  ;;  %904 = vst.msk [vmem:[#allocation3 + $0x1c8] sm:$0xff] %vm846_vm0, %v8077_v16 }
 0x165   : > { %905 = vst.msk [vmem:[#allocation3 + $0x1d0] sm:$0xff] %vm846_vm0, %v8077_v16  ;;  %906 = vst.msk [vmem:[#allocation3 + $0x1d8] sm:$0xff] %vm846_vm0, %v8077_v16 }
 0x166   : > { %6579 = vmatmul.mubr.bf16.vlgmr.msra.gmra.mrb[0].mxu0 %v7280_v10  ;;  %6587 = vmatmul.mubr.bf16.vlgmr.msra.gmra.mrb[0].mxu1 %v7281_v11  ;;  %907 = vst.msk [vmem:[#allocation3 + $0x1e0] sm:$0xff] %vm846_vm0, %v8077_v16  ;;  %908 = vst.msk [vmem:[#allocation3 + $0x1e8] sm:$0xff] %vm846_vm0, %v8077_v16 }
 0x167   : > { %6582 = vmatprep.mubr.bf16.mxu0 %v7282_v12  ;;  %6590 = vmatprep.mubr.bf16.mxu1 %v7283_v13  ;;  %909 = vst.msk [vmem:[#allocation3 + $0x1f0] sm:$0xff] %vm846_vm0, %v8077_v16  ;;  %910 = vst.msk [vmem:[#allocation3 + $0x1f8] sm:$0xff] %vm846_vm0, %v8077_v16 }
 0x168   : > { %911 = vst.msk [vmem:[#allocation4] sm:$0xff] %vm846_vm0, %v8078_v17  ;;  %912 = vst.msk [vmem:[#allocation4 + $0x8] sm:$0xff] %vm846_vm0, %v8078_v17 }
 0x169   : > { %913 = vst.msk [vmem:[#allocation4 + $0x10] sm:$0xff] %vm846_vm0, %v8078_v17  ;;  %914 = vst.msk [vmem:[#allocation4 + $0x18] sm:$0xff] %vm846_vm0, %v8078_v17 }
 0x16a   : > { %915 = vst.msk [vmem:[#allocation4 + $0x20] sm:$0xff] %vm846_vm0, %v8078_v17  ;;  %916 = vst.msk [vmem:[#allocation4 + $0x28] sm:$0xff] %vm846_vm0, %v8078_v17 }
 0x16b   : > { %917 = vst.msk [vmem:[#allocation4 + $0x30] sm:$0xff] %vm846_vm0, %v8078_v17  ;;  %918 = vst.msk [vmem:[#allocation4 + $0x38] sm:$0xff] %vm846_vm0, %v8078_v17 }
 0x16c   : > { %919 = vst.msk [vmem:[#allocation4 + $0x40] sm:$0xff] %vm846_vm0, %v8078_v17  ;;  %920 = vst.msk [vmem:[#allocation4 + $0x48] sm:$0xff] %vm846_vm0, %v8078_v17 }
 0x16d   : > { %921 = vst.msk [vmem:[#allocation4 + $0x50] sm:$0xff] %vm846_vm0, %v8078_v17  ;;  %922 = vst.msk [vmem:[#allocation4 + $0x58] sm:$0xff] %vm846_vm0, %v8078_v17 }
 0x16e   : > { %6583 = vmatmul.mubr.bf16.gmra.mrb[4].mxu0 %v7284_v14  ;;  %6591 = vmatmul.mubr.bf16.gmra.mrb[4].mxu1 %v7285_v15  ;;  %923 = vst.msk [vmem:[#allocation4 + $0x60] sm:$0xff] %vm846_vm0, %v8078_v17  ;;  %924 = vst.msk [vmem:[#allocation4 + $0x68] sm:$0xff] %vm846_vm0, %v8078_v17 }
 0x16f   : > { %925 = vst.msk [vmem:[#allocation4 + $0x70] sm:$0xff] %vm846_vm0, %v8078_v17  ;;  %926 = vst.msk [vmem:[#allocation4 + $0x78] sm:$0xff] %vm846_vm0, %v8078_v17 }
 0x170   : > { %927 = vst.msk [vmem:[#allocation4 + $0x80] sm:$0xff] %vm846_vm0, %v8078_v17  ;;  %928 = vst.msk [vmem:[#allocation4 + $0x88] sm:$0xff] %vm846_vm0, %v8078_v17 }
 0x171   : > { %929 = vst.msk [vmem:[#allocation4 + $0x90] sm:$0xff] %vm846_vm0, %v8078_v17  ;;  %930 = vst.msk [vmem:[#allocation4 + $0x98] sm:$0xff] %vm846_vm0, %v8078_v17 }
 0x172   : > { %931 = vst.msk [vmem:[#allocation4 + $0xa0] sm:$0xff] %vm846_vm0, %v8078_v17  ;;  %932 = vst.msk [vmem:[#allocation4 + $0xa8] sm:$0xff] %vm846_vm0, %v8078_v17 }
 0x173   : > { %933 = vst.msk [vmem:[#allocation4 + $0xb0] sm:$0xff] %vm846_vm0, %v8078_v17  ;;  %934 = vst.msk [vmem:[#allocation4 + $0xb8] sm:$0xff] %vm846_vm0, %v8078_v17 }
 0x174   : > { %935 = vst.msk [vmem:[#allocation4 + $0xc0] sm:$0xff] %vm846_vm0, %v8078_v17  ;;  %936 = vst.msk [vmem:[#allocation4 + $0xc8] sm:$0xff] %vm846_vm0, %v8078_v17 }
 0x175   : > { %937 = vst.msk [vmem:[#allocation4 + $0xd0] sm:$0xff] %vm846_vm0, %v8078_v17  ;;  %938 = vst.msk [vmem:[#allocation4 + $0xd8] sm:$0xff] %vm846_vm0, %v8078_v17 }
 0x176   : > { %939 = vst.msk [vmem:[#allocation4 + $0xe0] sm:$0xff] %vm846_vm0, %v8078_v17  ;;  %940 = vst.msk [vmem:[#allocation4 + $0xe8] sm:$0xff] %vm846_vm0, %v8078_v17 }
 0x177   : > { %941 = vst.msk [vmem:[#allocation4 + $0xf0] sm:$0xff] %vm846_vm0, %v8078_v17  ;;  %942 = vst.msk [vmem:[#allocation4 + $0xf8] sm:$0xff] %vm846_vm0, %v8078_v17 }
 0x178   : > { %943 = vst.msk [vmem:[#allocation4 + $0x100] sm:$0xff] %vm846_vm0, %v8078_v17  ;;  %944 = vst.msk [vmem:[#allocation4 + $0x108] sm:$0xff] %vm846_vm0, %v8078_v17 }
 0x179   : > { %945 = vst.msk [vmem:[#allocation4 + $0x110] sm:$0xff] %vm846_vm0, %v8078_v17  ;;  %946 = vst.msk [vmem:[#allocation4 + $0x118] sm:$0xff] %vm846_vm0, %v8078_v17 }
 0x17a   : > { %947 = vst.msk [vmem:[#allocation4 + $0x120] sm:$0xff] %vm846_vm0, %v8078_v17  ;;  %948 = vst.msk [vmem:[#allocation4 + $0x128] sm:$0xff] %vm846_vm0, %v8078_v17 }
 0x17b   : > { %949 = vst.msk [vmem:[#allocation4 + $0x130] sm:$0xff] %vm846_vm0, %v8078_v17  ;;  %950 = vst.msk [vmem:[#allocation4 + $0x138] sm:$0xff] %vm846_vm0, %v8078_v17 }
 0x17c   : > { %951 = vst.msk [vmem:[#allocation4 + $0x140] sm:$0xff] %vm846_vm0, %v8078_v17  ;;  %952 = vst.msk [vmem:[#allocation4 + $0x148] sm:$0xff] %vm846_vm0, %v8078_v17 }
 0x17d   : > { %953 = vst.msk [vmem:[#allocation4 + $0x150] sm:$0xff] %vm846_vm0, %v8078_v17  ;;  %954 = vst.msk [vmem:[#allocation4 + $0x158] sm:$0xff] %vm846_vm0, %v8078_v17 }
 0x17e   : > { %955 = vst.msk [vmem:[#allocation4 + $0x160] sm:$0xff] %vm846_vm0, %v8078_v17  ;;  %956 = vst.msk [vmem:[#allocation4 + $0x168] sm:$0xff] %vm846_vm0, %v8078_v17 }
 0x17f   : > { %957 = vst.msk [vmem:[#allocation4 + $0x170] sm:$0xff] %vm846_vm0, %v8078_v17  ;;  %958 = vst.msk [vmem:[#allocation4 + $0x178] sm:$0xff] %vm846_vm0, %v8078_v17 }
 0x180   : > { %959 = vst.msk [vmem:[#allocation4 + $0x180] sm:$0xff] %vm846_vm0, %v8078_v17  ;;  %960 = vst.msk [vmem:[#allocation4 + $0x188] sm:$0xff] %vm846_vm0, %v8078_v17 }
 0x181   : > { %961 = vst.msk [vmem:[#allocation4 + $0x190] sm:$0xff] %vm846_vm0, %v8078_v17  ;;  %962 = vst.msk [vmem:[#allocation4 + $0x198] sm:$0xff] %vm846_vm0, %v8078_v17 }
 0x182   : > { %963 = vst.msk [vmem:[#allocation4 + $0x1a0] sm:$0xff] %vm846_vm0, %v8078_v17  ;;  %964 = vst.msk [vmem:[#allocation4 + $0x1a8] sm:$0xff] %vm846_vm0, %v8078_v17 }
 0x183   : > { %965 = vst.msk [vmem:[#allocation4 + $0x1b0] sm:$0xff] %vm846_vm0, %v8078_v17  ;;  %966 = vst.msk [vmem:[#allocation4 + $0x1b8] sm:$0xff] %vm846_vm0, %v8078_v17 }
 0x184   : > { %967 = vst.msk [vmem:[#allocation4 + $0x1c0] sm:$0xff] %vm846_vm0, %v8078_v17  ;;  %968 = vst.msk [vmem:[#allocation4 + $0x1c8] sm:$0xff] %vm846_vm0, %v8078_v17 }
 0x185   : > { %969 = vst.msk [vmem:[#allocation4 + $0x1d0] sm:$0xff] %vm846_vm0, %v8078_v17  ;;  %970 = vst.msk [vmem:[#allocation4 + $0x1d8] sm:$0xff] %vm846_vm0, %v8078_v17 }
 0x186   : > { %971 = vst.msk [vmem:[#allocation4 + $0x1e0] sm:$0xff] %vm846_vm0, %v8078_v17  ;;  %972 = vst.msk [vmem:[#allocation4 + $0x1e8] sm:$0xff] %vm846_vm0, %v8078_v17 }
 0x187   : > { %973 = vst.msk [vmem:[#allocation4 + $0x1f0] sm:$0xff] %vm846_vm0, %v8078_v17  ;;  %974 = vst.msk [vmem:[#allocation4 + $0x1f8] sm:$0xff] %vm846_vm0, %v8078_v17 }
 0x188   : > { %976 = vst.msk [vmem:[#allocation5] sm:$0xff] %vm975_vm1, %v8078_v17  ;;  %977 = vst.msk [vmem:[#allocation5 + $0x8] sm:$0xff] %vm975_vm1, %v8078_v17 }
 0x189   : > { %978 = vst.msk [vmem:[#allocation5 + $0x10] sm:$0xff] %vm975_vm1, %v8078_v17  ;;  %979 = vst.msk [vmem:[#allocation5 + $0x18] sm:$0xff] %vm975_vm1, %v8078_v17 }
 0x18a   : > { %980 = vst.msk [vmem:[#allocation5 + $0x20] sm:$0xff] %vm975_vm1, %v8078_v17  ;;  %981 = vst.msk [vmem:[#allocation5 + $0x28] sm:$0xff] %vm975_vm1, %v8078_v17 }
 0x18b   : > { %982 = vst.msk [vmem:[#allocation5 + $0x30] sm:$0xff] %vm975_vm1, %v8078_v17  ;;  %983 = vst.msk [vmem:[#allocation5 + $0x38] sm:$0xff] %vm975_vm1, %v8078_v17 }
 0x18c   : > { %984 = vst.msk [vmem:[#allocation5 + $0x40] sm:$0xff] %vm975_vm1, %v8078_v17  ;;  %985 = vst.msk [vmem:[#allocation5 + $0x48] sm:$0xff] %vm975_vm1, %v8078_v17 }
 0x18d   : > { %986 = vst.msk [vmem:[#allocation5 + $0x50] sm:$0xff] %vm975_vm1, %v8078_v17  ;;  %987 = vst.msk [vmem:[#allocation5 + $0x58] sm:$0xff] %vm975_vm1, %v8078_v17 }
 0x18e   : > { %988 = vst.msk [vmem:[#allocation5 + $0x60] sm:$0xff] %vm975_vm1, %v8078_v17  ;;  %989 = vst.msk [vmem:[#allocation5 + $0x68] sm:$0xff] %vm975_vm1, %v8078_v17 }
 0x18f   : > { %990 = vst.msk [vmem:[#allocation5 + $0x70] sm:$0xff] %vm975_vm1, %v8078_v17  ;;  %991 = vst.msk [vmem:[#allocation5 + $0x78] sm:$0xff] %vm975_vm1, %v8078_v17 }
 0x190   : > { %992 = vst.msk [vmem:[#allocation5 + $0x80] sm:$0xff] %vm975_vm1, %v8078_v17  ;;  %993 = vst.msk [vmem:[#allocation5 + $0x88] sm:$0xff] %vm975_vm1, %v8078_v17 }
 0x191   : > { %994 = vst.msk [vmem:[#allocation5 + $0x90] sm:$0xff] %vm975_vm1, %v8078_v17  ;;  %995 = vst.msk [vmem:[#allocation5 + $0x98] sm:$0xff] %vm975_vm1, %v8078_v17 }
 0x192   : > { %996 = vst.msk [vmem:[#allocation5 + $0xa0] sm:$0xff] %vm975_vm1, %v8078_v17  ;;  %997 = vst.msk [vmem:[#allocation5 + $0xa8] sm:$0xff] %vm975_vm1, %v8078_v17 }
 0x193   : > { %998 = vst.msk [vmem:[#allocation5 + $0xb0] sm:$0xff] %vm975_vm1, %v8078_v17  ;;  %999 = vst.msk [vmem:[#allocation5 + $0xb8] sm:$0xff] %vm975_vm1, %v8078_v17 }
 0x194   : > { %1000 = vst.msk [vmem:[#allocation5 + $0xc0] sm:$0xff] %vm975_vm1, %v8078_v17  ;;  %1001 = vst.msk [vmem:[#allocation5 + $0xc8] sm:$0xff] %vm975_vm1, %v8078_v17 }
 0x195   : > { %1002 = vst.msk [vmem:[#allocation5 + $0xd0] sm:$0xff] %vm975_vm1, %v8078_v17  ;;  %1003 = vst.msk [vmem:[#allocation5 + $0xd8] sm:$0xff] %vm975_vm1, %v8078_v17 }
 0x196   : > { %1004 = vst.msk [vmem:[#allocation5 + $0xe0] sm:$0xff] %vm975_vm1, %v8078_v17  ;;  %1005 = vst.msk [vmem:[#allocation5 + $0xe8] sm:$0xff] %vm975_vm1, %v8078_v17 }
 0x197   : > { %1006 = vst.msk [vmem:[#allocation5 + $0xf0] sm:$0xff] %vm975_vm1, %v8078_v17  ;;  %1007 = vst.msk [vmem:[#allocation5 + $0xf8] sm:$0xff] %vm975_vm1, %v8078_v17 }
 0x198   : > { %1008 = vst.msk [vmem:[#allocation5 + $0x100] sm:$0xff] %vm975_vm1, %v8078_v17  ;;  %1009 = vst.msk [vmem:[#allocation5 + $0x108] sm:$0xff] %vm975_vm1, %v8078_v17 }
 0x199   : > { %1010 = vst.msk [vmem:[#allocation5 + $0x110] sm:$0xff] %vm975_vm1, %v8078_v17  ;;  %1011 = vst.msk [vmem:[#allocation5 + $0x118] sm:$0xff] %vm975_vm1, %v8078_v17 }
 0x19a   : > { %1012 = vst.msk [vmem:[#allocation5 + $0x120] sm:$0xff] %vm975_vm1, %v8078_v17  ;;  %1013 = vst.msk [vmem:[#allocation5 + $0x128] sm:$0xff] %vm975_vm1, %v8078_v17 }
 0x19b   : > { %1014 = vst.msk [vmem:[#allocation5 + $0x130] sm:$0xff] %vm975_vm1, %v8078_v17  ;;  %1015 = vst.msk [vmem:[#allocation5 + $0x138] sm:$0xff] %vm975_vm1, %v8078_v17 }
 0x19c   : > { %1016 = vst.msk [vmem:[#allocation5 + $0x140] sm:$0xff] %vm975_vm1, %v8078_v17  ;;  %1017 = vst.msk [vmem:[#allocation5 + $0x148] sm:$0xff] %vm975_vm1, %v8078_v17 }
 0x19d   : > { %1018 = vst.msk [vmem:[#allocation5 + $0x150] sm:$0xff] %vm975_vm1, %v8078_v17  ;;  %1019 = vst.msk [vmem:[#allocation5 + $0x158] sm:$0xff] %vm975_vm1, %v8078_v17 }
 0x19e   : > { %1020 = vst.msk [vmem:[#allocation5 + $0x160] sm:$0xff] %vm975_vm1, %v8078_v17  ;;  %1021 = vst.msk [vmem:[#allocation5 + $0x168] sm:$0xff] %vm975_vm1, %v8078_v17 }
 0x19f   : > { %1022 = vst.msk [vmem:[#allocation5 + $0x170] sm:$0xff] %vm975_vm1, %v8078_v17  ;;  %1023 = vst.msk [vmem:[#allocation5 + $0x178] sm:$0xff] %vm975_vm1, %v8078_v17 }
 0x1a0   : > { %1024 = vst.msk [vmem:[#allocation5 + $0x180] sm:$0xff] %vm975_vm1, %v8078_v17  ;;  %1025 = vst.msk [vmem:[#allocation5 + $0x188] sm:$0xff] %vm975_vm1, %v8078_v17 }
 0x1a1   : > { %1026 = vst.msk [vmem:[#allocation5 + $0x190] sm:$0xff] %vm975_vm1, %v8078_v17  ;;  %1027 = vst.msk [vmem:[#allocation5 + $0x198] sm:$0xff] %vm975_vm1, %v8078_v17 }
 0x1a2   : > { %1028 = vst.msk [vmem:[#allocation5 + $0x1a0] sm:$0xff] %vm975_vm1, %v8078_v17  ;;  %1029 = vst.msk [vmem:[#allocation5 + $0x1a8] sm:$0xff] %vm975_vm1, %v8078_v17 }
 0x1a3   : > { %1030 = vst.msk [vmem:[#allocation5 + $0x1b0] sm:$0xff] %vm975_vm1, %v8078_v17  ;;  %1031 = vst.msk [vmem:[#allocation5 + $0x1b8] sm:$0xff] %vm975_vm1, %v8078_v17 }
 0x1a4   : > { %1032 = vst.msk [vmem:[#allocation5 + $0x1c0] sm:$0xff] %vm975_vm1, %v8078_v17  ;;  %1033 = vst.msk [vmem:[#allocation5 + $0x1c8] sm:$0xff] %vm975_vm1, %v8078_v17 }
 0x1a5   : > { %1034 = vst.msk [vmem:[#allocation5 + $0x1d0] sm:$0xff] %vm975_vm1, %v8078_v17  ;;  %1035 = vst.msk [vmem:[#allocation5 + $0x1d8] sm:$0xff] %vm975_vm1, %v8078_v17 }
 0x1a6   : > { %1036 = vst.msk [vmem:[#allocation5 + $0x1e0] sm:$0xff] %vm975_vm1, %v8078_v17  ;;  %1037 = vst.msk [vmem:[#allocation5 + $0x1e8] sm:$0xff] %vm975_vm1, %v8078_v17 }
 0x1a7   : > { %1038 = vst.msk [vmem:[#allocation5 + $0x1f0] sm:$0xff] %vm975_vm1, %v8078_v17  ;;  %1039 = vst.msk [vmem:[#allocation5 + $0x1f8] sm:$0xff] %vm975_vm1, %v8078_v17 }
 0x239   : > { %v6580_v19 = vpop.f32.mrb[0].mxu0  ;;  %v6588_v20 = vpop.f32.mrb[0].mxu1 }
 0x23a   : > { %v760_v21 = vadd.f32 %v6580_v19, %v6215_v18  ;;  %v792_v22 = vadd.f32 %v6588_v20, %v6215_v18  ;;  %v751_v23 = vpop.f32.mrb[1].mxu0  ;;  %v783_v24 = vpop.f32.mrb[1].mxu1 }
 0x23b   : > { %v752_v25 = vadd.f32 %v6215_v18, %v751_v23  ;;  %v784_v26 = vadd.f32 %v6215_v18, %v783_v24  ;;  %v6581_v27 = vpop.f32.mrb[2].mxu0  ;;  %v6589_v28 = vpop.f32.mrb[2].mxu1 }
 0x23c   : > { %v763_v29 = vadd.f32 %v6581_v27, %v6215_v18  ;;  %v795_v30 = vadd.f32 %v6589_v28, %v6215_v18  ;;  %v754_v31 = vpop.f32.mrb[3].mxu0  ;;  %v786_v32 = vpop.f32.mrb[3].mxu1  ;;  %v816_v33 = vmul.f32 0.17677669, %v760_v21  ;;  %v824_v34 = vmul.f32 0.17677669, %v792_v22 }
 0x23d   : > { %v755_v35 = vadd.f32 %v6215_v18, %v754_v31  ;;  %v787_v36 = vadd.f32 %v6215_v18, %v786_v32  ;;  %v814_v37 = vmul.f32 0.17677669, %v752_v25  ;;  %v822_v40 = vmul.f32 0.17677669, %v784_v26 }
 0x23e   : > { %v817_v38 = vmul.f32 0.17677669, %v763_v29  ;;  %v825_v39 = vmul.f32 0.17677669, %v795_v30 }
 0x23f   : > { %v815_v41 = vmul.f32 0.17677669, %v755_v35  ;;  %v823_v42 = vmul.f32 0.17677669, %v787_v36 }
 0x240   : > { %v831_v43 = vpack.c.bf16 %v817_v38, %v816_v33  ;;  %v835_v44 = vpack.c.bf16 %v825_v39, %v824_v34 }
 0x241   : > { %v830_v45 = vpack.c.bf16 %v815_v41, %v814_v37  ;;  %v834_v46 = vpack.c.bf16 %v823_v42, %v822_v40  ;;  %v6584_v47 = vpop.f32.mrb[4].mxu0  ;;  %v6592_v48 = vpop.f32.mrb[4].mxu1 }
 0x242   : > { %839 = vst [vmem:[#allocation2 + $0x8] sm:$0xff] %v831_v43  ;;  %843 = vst [vmem:[#allocation2 + $0x28] sm:$0xff] %v835_v44  ;;  %v776_v49 = vadd.f32 %v6584_v47, %v6215_v18  ;;  %v808_v50 = vadd.f32 %v6592_v48, %v6215_v18  ;;  %v767_v51 = vpop.f32.mrb[5].mxu0  ;;  %v799_v52 = vpop.f32.mrb[5].mxu1 }
 0x243   : > { %838 = vst [vmem:[#allocation2] sm:$0xff] %v830_v45  ;;  %842 = vst [vmem:[#allocation2 + $0x20] sm:$0xff] %v834_v46  ;;  %v768_v53 = vadd.f32 %v6215_v18, %v767_v51  ;;  %v800_v54 = vadd.f32 %v6215_v18, %v799_v52  ;;  %v6585_v55 = vpop.f32.mrb[6].mxu0  ;;  %v6593_v56 = vpop.f32.mrb[6].mxu1 }
 0x244   : > { %v779_v57 = vadd.f32 %v6585_v55, %v6215_v18  ;;  %v811_v58 = vadd.f32 %v6593_v56, %v6215_v18  ;;  %v770_v59 = vpop.f32.mrb[7].mxu0  ;;  %v802_v60 = vpop.f32.mrb[7].mxu1  ;;  %v820_v61 = vmul.f32 0.17677669, %v776_v49  ;;  %v828_v62 = vmul.f32 0.17677669, %v808_v50 }
 0x245   : > { %v771_v63 = vadd.f32 %v6215_v18, %v770_v59  ;;  %v803_v0 = vadd.f32 %v6215_v18, %v802_v60  ;;  %v818_v1 = vmul.f32 0.17677669, %v768_v53  ;;  %v826_v4 = vmul.f32 0.17677669, %v800_v54 }
 0x246   : > { %v821_v2 = vmul.f32 0.17677669, %v779_v57  ;;  %v829_v3 = vmul.f32 0.17677669, %v811_v58 }
 0x247   : > { %v819_v5 = vmul.f32 0.17677669, %v771_v63  ;;  %v827_v6 = vmul.f32 0.17677669, %v803_v0 }
 0x248   : > { %v833_v7 = vpack.c.bf16 %v821_v2, %v820_v61  ;;  %v837_v8 = vpack.c.bf16 %v829_v3, %v828_v62 }
 0x249   : > { %v832_v9 = vpack.c.bf16 %v819_v5, %v818_v1  ;;  %v836_v10 = vpack.c.bf16 %v827_v6, %v826_v4 }
 0x24a   : > { %841 = vst [vmem:[#allocation2 + $0x18] sm:$0xff] %v833_v7  ;;  %845 = vst [vmem:[#allocation2 + $0x38] sm:$0xff] %v837_v8 }
 0x24b   : > { %840 = vst [vmem:[#allocation2 + $0x10] sm:$0xff] %v832_v9  ;;  %844 = vst [vmem:[#allocation2 + $0x30] sm:$0xff] %v836_v10 }
 0x24c PF: > { %v7288_v11 = vld [vmem:[#allocation14] sm:$0xff]   ;;  %v7289_v12 = vld [vmem:[#allocation14 + $0x8] sm:$0xff]   ;;  %v7290_v13 = vld [vmem:[#allocation14 + $0x10] sm:$0xff]   ;;  %vm1528_vm2 = vcmask 261120   ;;  %s11614_s12 = sld [smem:[#allocation184_spill]]  ;;  %s11615_s6 = sld [smem:[#allocation186_spill]] }
 0x24d   : > { %6594 = vmatprep.subr.bf16.mxu0 %v7288_v11  ;;  %v7291_v14 = vld [vmem:[#allocation14 + $0x18] sm:$0xff]   ;;  %v7296_v15 = vld [vmem:[%s8578_s14] sm:$0xff]   ;;  %v7293_v17 = vld [vmem:[#allocation14 + $0x28] sm:$0xff]   ;;  %vm1994_vm3 = vcmask 7168   ;;  %s8080_s1 = smov 96   ;;  %s8081_s5 = smov 64  }
 0x24e   : > { %6595 = vmatpush3.bf16.msra.mxu0 %v7288_v11  ;;  %6610 = vmatprep.mubr.bf16.mxu0 %v7296_v15  ;;  %v7292_v16 = vld [vmem:[#allocation14 + $0x20] sm:$0xff]   ;;  %v7294_v18 = vld [vmem:[#allocation14 + $0x30] sm:$0xff]   ;;  %v7295_v19 = vld [vmem:[#allocation14 + $0x38] sm:$0xff]   ;;  %s8082_s30 = smov 32   ;;  %s12022_s19 = sld [smem:[#allocation28_spill]] }
 0x24f   : > { %6596 = vmatprep.subr.bf16.mxu0 %v7289_v12  ;;  %v7297_v20 = vld [vmem:[%s8578_s14 + $0x8] sm:$0xff]   ;;  %v7298_v21 = vld [vmem:[%s8578_s14 + $0x10] sm:$0xff]   ;;  %v7299_v22 = vld [vmem:[%s8578_s14 + $0x18] sm:$0xff]  }
 0x250   : > { %v7300_v23 = vld [vmem:[%s8578_s14 + $0x20] sm:$0xff]   ;;  %v7301_v24 = vld [vmem:[%s8578_s14 + $0x28] sm:$0xff]   ;;  %v7302_v25 = vld [vmem:[%s8578_s14 + $0x30] sm:$0xff]  }
 0x251   : > { %v7303_v26 = vld [vmem:[%s8578_s14 + $0x38] sm:$0xff]   ;;  %v9001_v27 = vld [vmem:[#allocation2] sm:$0xff] }
 0x252   : > { %6597 = vmatpush3.bf16.msra.mxu0 %v7289_v12  ;;  %v6232_v29 = vld [vmem:[%s11614_s12] ss:$0 sm:$0xff]  ;;  %v9064_v15 = vld [vmem:[#allocation2 + $0x18] sm:$0xff] }
 0x253   : > { %6598 = vmatprep.subr.bf16.mxu0 %v7290_v13 }
 0x254   : > { %p6298_p8 = scmp.ne.s32.totalorder %s12022_s19, 1 }
 0x255   : > { %s12023_s13 = sld [smem:[#allocation188_spill]] (!%p6298_p8) }
 0x256   : > { %6599 = vmatpush3.bf16.msra.mxu0 %v7290_v13  ;;  %v9056_v13 = vld [vmem:[#allocation2 + $0x8] sm:$0xff] }
 0x257   : > { %6600 = vmatprep.subr.bf16.mxu0 %v7291_v14 }
 0x25a   : > { %6601 = vmatpush3.bf16.msra.mxu0 %v7291_v14  ;;  %v9058_v14 = vld [vmem:[#allocation2 + $0x10] sm:$0xff] }
 0x25b   : > { %6602 = vmatprep.subr.bf16.mxu0 %v7292_v16 }
 0x25e   : > { %6603 = vmatpush3.bf16.msra.mxu0 %v7292_v16  ;;  %v9066_v16 = vld [vmem:[#allocation2 + $0x20] sm:$0xff] }
 0x25f   : > { %6604 = vmatprep.subr.bf16.mxu0 %v7293_v17 }
 0x262   : > { %6605 = vmatpush3.bf16.msra.mxu0 %v7293_v17  ;;  %v9072_v17 = vld [vmem:[#allocation2 + $0x28] sm:$0xff] }
 0x263   : > { %6606 = vmatprep.subr.bf16.mxu0 %v7294_v18 }
 0x266   : > { %6607 = vmatpush3.bf16.msra.mxu0 %v7294_v18  ;;  %v9074_v18 = vld [vmem:[#allocation2 + $0x30] sm:$0xff] }
 0x267   : > { %6608 = vmatprep.subr.bf16.mxu0 %v7295_v19 }
 0x26a   : > { %6609 = vmatpush3.bf16.msra.mxu0 %v7295_v19  ;;  %v9080_v19 = vld [vmem:[#allocation2 + $0x38] sm:$0xff] }
 0x26d   : > { %6611 = vmatmul.mubr.bf16.vlgmr.msra.gmra.mrb[0].mxu0 %v7297_v20  ;;  %v7304_v20 = vld [vmem:[#allocation15] sm:$0xff]  }
 0x26e   : > { %6614 = vmatprep.mubr.bf16.mxu0 %v7298_v21  ;;  %6626 = vmatprep.subr.bf16.mxu1 %v7304_v20  ;;  %v7305_v21 = vld [vmem:[#allocation15 + $0x8] sm:$0xff]  }
 0x26f   : > { %6627 = vmatpush3.bf16.msra.mxu1 %v7304_v20 }
 0x270   : > { %6628 = vmatprep.subr.bf16.mxu1 %v7305_v21 }
 0x273   : > { %6629 = vmatpush3.bf16.msra.mxu1 %v7305_v21 }
 0x275   : > { %6615 = vmatmul.mubr.bf16.gmra.mrb[4].mxu0 %v7299_v22  ;;  %v7306_v22 = vld [vmem:[#allocation15 + $0x10] sm:$0xff]  }
 0x276   : > { %6618 = vmatprep.mubr.bf16.mxu0 %v7300_v23  ;;  %6630 = vmatprep.subr.bf16.mxu1 %v7306_v22  ;;  %v7307_v23 = vld [vmem:[#allocation15 + $0x18] sm:$0xff]  }
 0x277   : > { %6631 = vmatpush3.bf16.msra.mxu1 %v7306_v22 }
 0x278   : > { %6632 = vmatprep.subr.bf16.mxu1 %v7307_v23 }
 0x27b   : > { %6633 = vmatpush3.bf16.msra.mxu1 %v7307_v23 }
 0x27d   : > { %6619 = vmatmul.mubr.bf16.gmra.mrb[8].mxu0 %v7301_v24  ;;  %v7308_v24 = vld [vmem:[#allocation15 + $0x20] sm:$0xff]  }
 0x27e   : > { %6622 = vmatprep.mubr.bf16.mxu0 %v7302_v25  ;;  %6634 = vmatprep.subr.bf16.mxu1 %v7308_v24  ;;  %v7309_v25 = vld [vmem:[#allocation15 + $0x28] sm:$0xff]  }
 0x27f   : > { %6635 = vmatpush3.bf16.msra.mxu1 %v7308_v24 }
 0x280   : > { %6636 = vmatprep.subr.bf16.mxu1 %v7309_v25 }
 0x283   : > { %6637 = vmatpush3.bf16.msra.mxu1 %v7309_v25 }
 0x285   : > { %6623 = vmatmul.mubr.bf16.gmra.mrb[12].mxu0 %v7303_v26  ;;  %v7310_v26 = vld [vmem:[#allocation15 + $0x30] sm:$0xff]  }
 0x286   : > { %6674 = vmatprep.mubr.msk.bf16.mxu0 %vm1528_vm2, %v9001_v27  ;;  %6638 = vmatprep.subr.bf16.mxu1 %v7310_v26 }
 0x287   : > { %6639 = vmatpush3.bf16.msra.mxu1 %v7310_v26 }
 0x340   : > { %v6612_v28 = vpop.f32.mrb[0].mxu0 }
 0x341   : > { %v1225_v30 = vpop.f32.mrb[1].mxu0  ;;  %v1234_v32 = vadd.f32 %v6612_v28, %v6232_v29  ;;  %v7311_v28 = vld [vmem:[#allocation15 + $0x38] sm:$0xff]  }
 0x342   : > { %v6613_v31 = vpop.f32.mrb[2].mxu0  ;;  %v1226_v35 = vadd.f32 %v6232_v29, %v1225_v30  ;;  %6640 = vmatprep.subr.bf16.mxu1 %v7311_v28  ;;  %v7313_v30 = vld [vmem:[%s8584_s9 + $0x8] sm:$0xff]  }
 0x343   : > { %v1237_v33 = vadd.f32 %v6613_v31, %v6232_v29  ;;  %v1228_v34 = vpop.f32.mrb[3].mxu0  ;;  %6641 = vmatpush3.bf16.msra.mxu1 %v7311_v28  ;;  %v7314_v31 = vld [vmem:[%s8584_s9 + $0x10] sm:$0xff]  }
 0x344   : > { %v1229_v36 = vadd.f32 %v6232_v29, %v1228_v34  ;;  %v7317_v34 = vld [vmem:[%s8584_s9 + $0x28] sm:$0xff]  }
 0x345   : > { %v9008_v37 = vpack.c.bf16 %v1237_v33, %v1234_v32  ;;  %v7315_v32 = vld [vmem:[%s8584_s9 + $0x18] sm:$0xff]   ;;  %v7316_v33 = vld [vmem:[%s8584_s9 + $0x20] sm:$0xff]  }
 0x346   : > { %v9010_v38 = vpack.c.bf16 %v1229_v36, %v1226_v35  ;;  %v7318_v35 = vld [vmem:[%s8584_s9 + $0x30] sm:$0xff]   ;;  %v7319_v36 = vld [vmem:[%s8584_s9 + $0x38] sm:$0xff]  }
 0x347   : > { %v1557_v50 = vsel %vm1528_vm2, %v9008_v37, 0 }
 0x348   : > { %7058 = vmatprep.subr.msk.bf16.mxu0 %vm1528_vm2, %v9010_v38  ;;  %v1554_v39 = vsel %vm1528_vm2, %v9010_v38, 0  ;;  %v6616_v40 = vpop.f32.mrb[4].mxu0 }
 0x349   : > { %6659 = vmatpush3.bf16.xpose.msra.mxu0 %v1554_v39  ;;  %v1250_v41 = vadd.f32 %v6616_v40, %v6232_v29  ;;  %v1241_v42 = vpop.f32.mrb[5].mxu0 }
 0x34a   : > { %7059 = vmatprep.subr.msk.bf16.mxu0 %vm1528_vm2, %v9008_v37  ;;  %v1242_v43 = vadd.f32 %v6232_v29, %v1241_v42  ;;  %v6617_v44 = vpop.f32.mrb[6].mxu0 }
 0x34b   : > { %v1253_v45 = vadd.f32 %v6617_v44, %v6232_v29  ;;  %v1244_v46 = vpop.f32.mrb[7].mxu0 }
 0x34c   : > { %v1245_v47 = vadd.f32 %v6232_v29, %v1244_v46 }
 0x34d   : > { %v9018_v48 = vpack.c.bf16 %v1253_v45, %v1250_v41 }
 0x34e   : > { %v9020_v49 = vpack.c.bf16 %v1245_v47, %v1242_v43 }
 0x34f   : > { %v1563_v8 = vsel %vm1528_vm2, %v9018_v48, 0 }
 0x350   : > { %v6620_v51 = vpop.f32.mrb[8].mxu0  ;;  %v1560_v61 = vsel %vm1528_vm2, %v9020_v49, 0 }
 0x351   : > { %6661 = vmatpush3.bf16.xpose.msra.mxu0 %v1557_v50  ;;  %v1266_v52 = vadd.f32 %v6620_v51, %v6232_v29  ;;  %v1257_v53 = vpop.f32.mrb[9].mxu0  ;;  %v8079_v50 = vmov 0  }
 0x352   : > { %7060 = vmatprep.subr.msk.bf16.mxu0 %vm1528_vm2, %v9020_v49  ;;  %v1258_v54 = vadd.f32 %v6232_v29, %v1257_v53  ;;  %v6621_v55 = vpop.f32.mrb[10].mxu0  ;;  %7287 = vset.pattern.permute.xlu1 %v8079_v50 }
 0x353   : > { %v1269_v56 = vadd.f32 %v6621_v55, %v6232_v29  ;;  %v1260_v57 = vpop.f32.mrb[11].mxu0  ;;  %7286 = vset.pattern.permute.xlu0 %v8079_v50  ;;  %v9163_v50 = vld [vmem:[#allocation3 + $0x10] sm:$0xff] }
 0x354   : > { %v1261_v58 = vadd.f32 %v6232_v29, %v1260_v57 }
 0x355   : > { %v9026_v59 = vpack.c.bf16 %v1269_v56, %v1266_v52 }
 0x356   : > { %v9028_v60 = vpack.c.bf16 %v1261_v58, %v1258_v54  ;;  %v6249_v58 = vld [vmem:[%s11615_s6] ss:$0 sm:$0xff] }
 0x357   : > { %v1569_v10 = vsel %vm1528_vm2, %v9026_v59, 0 }
 0x358   : > { %v6624_v62 = vpop.f32.mrb[12].mxu0  ;;  %v1566_v9 = vsel %vm1528_vm2, %v9028_v60, 0 }
 0x359   : > { %6663 = vmatpush3.bf16.xpose.msra.mxu0 %v1560_v61  ;;  %v1282_v63 = vadd.f32 %v6624_v62, %v6232_v29  ;;  %v1273_v0 = vpop.f32.mrb[13].mxu0 }
 0x35a   : > { %7061 = vmatprep.subr.msk.bf16.mxu0 %vm1528_vm2, %v9018_v48  ;;  %v1274_v1 = vadd.f32 %v6232_v29, %v1273_v0  ;;  %v6625_v2 = vpop.f32.mrb[14].mxu0 }
 0x35b   : > { %v1285_v3 = vadd.f32 %v6625_v2, %v6232_v29  ;;  %v1276_v4 = vpop.f32.mrb[15].mxu0 }
 0x35c   : > { %v1277_v5 = vadd.f32 %v6232_v29, %v1276_v4  ;;  %v7312_v29 = vld [vmem:[%s8584_s9] sm:$0xff]  }
 0x35d   : > { %v9034_v6 = vpack.c.bf16 %v1285_v3, %v1282_v63  ;;  %6642 = vmatprep.mubr.bf16.mxu1 %v7312_v29 }
 0x35e   : > { %v9036_v7 = vpack.c.bf16 %v1277_v5, %v1274_v1  ;;  %6643 = vmatmul.mubr.bf16.vlgmr.msra.gmra.mrb[0].mxu1 %v7313_v30 }
 0x35f   : > { %v1575_v12 = vsel %vm1528_vm2, %v9034_v6, 0  ;;  %6646 = vmatprep.mubr.bf16.mxu1 %v7314_v31 }
 0x360   : > { %v1572_v11 = vsel %vm1528_vm2, %v9036_v7, 0 }
 0x361   : > { %6665 = vmatpush3.bf16.xpose.msra.mxu0 %v1563_v8 }
 0x362   : > { %7062 = vmatprep.subr.msk.bf16.mxu0 %vm1528_vm2, %v9028_v60 }
 0x366   : > { %6647 = vmatmul.mubr.bf16.gmra.mrb[4].mxu1 %v7315_v32 }
 0x367   : > { %6650 = vmatprep.mubr.bf16.mxu1 %v7316_v33 }
 0x369   : > { %6667 = vmatpush3.bf16.xpose.msra.mxu0 %v1566_v9 }
 0x36a   : > { %7063 = vmatprep.subr.msk.bf16.mxu0 %vm1528_vm2, %v9026_v59 }
 0x36e   : > { %6651 = vmatmul.mubr.bf16.gmra.mrb[8].mxu1 %v7317_v34 }
 0x36f   : > { %6654 = vmatprep.mubr.bf16.mxu1 %v7318_v35 }
 0x371   : > { %6669 = vmatpush3.bf16.xpose.msra.mxu0 %v1569_v10 }
 0x372   : > { %7064 = vmatprep.subr.msk.bf16.mxu0 %vm1528_vm2, %v9036_v7 }
 0x376   : > { %6655 = vmatmul.mubr.bf16.gmra.mrb[12].mxu1 %v7319_v36 }
 0x379   : > { %6671 = vmatpush3.bf16.xpose.msra.mxu0 %v1572_v11 }
 0x37a   : > { %7065 = vmatprep.subr.msk.bf16.mxu0 %vm1528_vm2, %v9034_v6 }
 0x381   : > { %6673 = vmatpush3.bf16.xpose.msra.mxu0 %v1575_v12 }
 0x388   : > { %6675 = vmatmul.mubr.msk.bf16.vlgmr.msra.gmra.mrb[16].mxu0 %vm1528_vm2, %v9056_v13 }
 0x389   : > { %6678 = vmatprep.mubr.msk.bf16.mxu0 %vm1528_vm2, %v9058_v14 }
 0x390   : > { %6679 = vmatmul.mubr.msk.bf16.gmra.mrb[20].mxu0 %vm1528_vm2, %v9064_v15 }
 0x391   : > { %6682 = vmatprep.mubr.msk.bf16.mxu0 %vm1528_vm2, %v9066_v16 }
 0x398   : > { %6683 = vmatmul.mubr.msk.bf16.gmra.mrb[24].mxu0 %vm1528_vm2, %v9072_v17 }
 0x399   : > { %6686 = vmatprep.mubr.msk.bf16.mxu0 %vm1528_vm2, %v9074_v18 }
 0x3a0   : > { %6687 = vmatmul.mubr.msk.bf16.gmra.mrb[28].mxu0 %vm1528_vm2, %v9080_v19 }
 0x431   : > { %v6644_v61 = vpop.f32.mrb[0].mxu1 }
 0x432   : > { %v1458_v62 = vadd.f32 %v6644_v61, %v6249_v58  ;;  %v1449_v63 = vpop.f32.mrb[1].mxu1  ;;  %v9165_v61 = vld [vmem:[#allocation3] sm:$0xff] }
 0x433   : > { %v1450_v0 = vadd.f32 %v6249_v58, %v1449_v63  ;;  %v6645_v1 = vpop.f32.mrb[2].mxu1 }
 0x434   : > { %v1461_v2 = vadd.f32 %v6645_v1, %v6249_v58  ;;  %v1452_v3 = vpop.f32.mrb[3].mxu1 }
 0x435   : > { %v1453_v4 = vadd.f32 %v6249_v58, %v1452_v3 }
 0x436   : > { %v9143_v5 = vpack.c.bf16 %v1461_v2, %v1458_v62 }
 0x437   : > { %v9145_v8 = vpack.c.bf16 %v1453_v4, %v1450_v0 }
 0x438   : > { %11616 = vst [vmem:[#allocation41_spill] sm:$0xff] %v9143_v5 }
 0x439   : > { %11617 = vst [vmem:[#allocation42_spill] sm:$0xff] %v9145_v8  ;;  %v6648_v9 = vpop.f32.mrb[4].mxu1  ;;  %6690 = vmatprep.subr.bf16.mxu1 %v9145_v8 }
 0x43a   : > { %v1474_v10 = vadd.f32 %v6648_v9, %v6249_v58  ;;  %v1465_v11 = vpop.f32.mrb[5].mxu1  ;;  %6691 = vmatpush3.bf16.msra.mxu1 %v9145_v8 }
 0x43b   : > { %v1466_v12 = vadd.f32 %v6249_v58, %v1465_v11  ;;  %v6649_v20 = vpop.f32.mrb[6].mxu1  ;;  %6692 = vmatprep.subr.bf16.mxu1 %v9143_v5  ;;  %v9176_v11 = vld [vmem:[#allocation3 + $0x18] sm:$0xff] }
 0x43c   : > { %v1477_v21 = vadd.f32 %v6649_v20, %v6249_v58  ;;  %v1468_v22 = vpop.f32.mrb[7].mxu1  ;;  %11622 = vst [vmem:[#allocation47_spill] sm:$0xff] %v9176_v11 }
 0x43d   : > { %v1469_v23 = vadd.f32 %v6249_v58, %v1468_v22  ;;  %v9183_v22 = vld [vmem:[#allocation3 + $0x8] sm:$0xff] }
 0x43e   : > { %v9150_v24 = vpack.c.bf16 %v1477_v21, %v1474_v10  ;;  %6693 = vmatpush3.bf16.msra.mxu1 %v9143_v5  ;;  %11623 = vst [vmem:[#allocation48_spill] sm:$0xff] %v9183_v22 }
 0x43f   : > { %v9153_v25 = vpack.c.bf16 %v1469_v23, %v1466_v12 }
 0x440   : > { %11618 = vst [vmem:[#allocation43_spill] sm:$0xff] %v9150_v24 }
 0x441   : > { %11619 = vst [vmem:[#allocation44_spill] sm:$0xff] %v9153_v25  ;;  %v6652_v26 = vpop.f32.mrb[8].mxu1  ;;  %6694 = vmatprep.subr.bf16.mxu1 %v9153_v25 }
 0x442   : > { %v1490_v28 = vadd.f32 %v6652_v26, %v6249_v58  ;;  %v1481_v29 = vpop.f32.mrb[9].mxu1  ;;  %6695 = vmatpush3.bf16.msra.mxu1 %v9153_v25  ;;  %v9264_v26 = vld [vmem:[#allocation3 + $0x40] sm:$0xff] }
 0x443   : > { %v1482_v30 = vadd.f32 %v6249_v58, %v1481_v29  ;;  %v6653_v31 = vpop.f32.mrb[10].mxu1  ;;  %6696 = vmatprep.subr.bf16.mxu1 %v9150_v24  ;;  %11640 = vst [vmem:[#allocation65_spill] sm:$0xff] %v9264_v26 }
 0x444   : > { %v1493_v32 = vadd.f32 %v6653_v31, %v6249_v58  ;;  %v1484_v33 = vpop.f32.mrb[11].mxu1 }
 0x445   : > { %v1485_v34 = vadd.f32 %v6249_v58, %v1484_v33 }
 0x446   : > { %v9158_v35 = vpack.c.bf16 %v1493_v32, %v1490_v28  ;;  %6697 = vmatpush3.bf16.msra.mxu1 %v9150_v24 }
 0x447   : > { %v9161_v36 = vpack.c.bf16 %v1485_v34, %v1482_v30  ;;  %v9205_v34 = vld [vmem:[#allocation3 + $0x30] sm:$0xff] }
 0x448   : > { %11620 = vst [vmem:[#allocation45_spill] sm:$0xff] %v9158_v35  ;;  %11628 = vst [vmem:[#allocation53_spill] sm:$0xff] %v9205_v34 }
 0x449   : > { %11621 = vst [vmem:[#allocation46_spill] sm:$0xff] %v9161_v36  ;;  %v6656_v62 = vpop.f32.mrb[12].mxu1  ;;  %6698 = vmatprep.subr.bf16.mxu1 %v9161_v36 }
 0x44a   : > { %v1506_v0 = vadd.f32 %v6656_v62, %v6249_v58  ;;  %v1497_v1 = vpop.f32.mrb[13].mxu1  ;;  %6699 = vmatpush3.bf16.msra.mxu1 %v9161_v36 }
 0x44b   : > { %v1498_v4 = vadd.f32 %v6249_v58, %v1497_v1  ;;  %v6657_v9 = vpop.f32.mrb[14].mxu1  ;;  %6700 = vmatprep.subr.bf16.mxu1 %v9158_v35 }
 0x44c   : > { %v1509_v12 = vadd.f32 %v6657_v9, %v6249_v58  ;;  %v1500_v20 = vpop.f32.mrb[15].mxu1  ;;  %v9223_v9 = vld [vmem:[#allocation3 + $0x20] sm:$0xff] }
 0x44d   : > { %v1501_v23 = vadd.f32 %v6249_v58, %v1500_v20  ;;  %11632 = vst [vmem:[#allocation57_spill] sm:$0xff] %v9223_v9  ;;  %v9230_v20 = vld [vmem:[#allocation3 + $0x28] sm:$0xff] }
 0x44e   : > { %v9190_v29 = vpack.c.bf16 %v1509_v12, %v1506_v0  ;;  %6701 = vmatpush3.bf16.msra.mxu1 %v9158_v35  ;;  %11633 = vst [vmem:[#allocation58_spill] sm:$0xff] %v9230_v20  ;;  %v9244_v12 = vld [vmem:[#allocation3 + $0x50] sm:$0xff] }
 0x44f   : > { %v9196_v32 = vpack.c.bf16 %v1501_v23, %v1498_v4  ;;  %11636 = vst [vmem:[#allocation61_spill] sm:$0xff] %v9244_v12  ;;  %v9252_v23 = vld [vmem:[#allocation3 + $0x58] sm:$0xff] }
 0x450   : > { %11624 = vst [vmem:[#allocation49_spill] sm:$0xff] %v9190_v29  ;;  %11637 = vst [vmem:[#allocation62_spill] sm:$0xff] %v9252_v23 }
 0x451   : > { %11626 = vst [vmem:[#allocation51_spill] sm:$0xff] %v9196_v32  ;;  %6702 = vmatprep.subr.bf16.mxu1 %v9196_v32 }
 0x452   : > { %6703 = vmatpush3.bf16.msra.mxu1 %v9196_v32 }
 0x453   : > { %6704 = vmatprep.subr.bf16.mxu1 %v9190_v29 }
 0x456   : > { %6705 = vmatpush3.bf16.msra.mxu1 %v9190_v29 }
 0x45b   : > { %v9092_v39 = vpop.f32.mrb[16].mxu0 }
 0x45c   : > { %1694 = vmax.xlane.f32.xlu1 %v9092_v39  ;;  %v9095_v40 = vpop.f32.mrb[17].mxu0 }
 0x45d   : > { %1690 = vmax.xlane.f32.xlu0 %v9095_v40  ;;  %v9098_v41 = vpop.f32.mrb[18].mxu0 }
 0x45e   : > { %v9100_v42 = vpop.f32.mrb[19].mxu0 }
 0x460   : > { %1696 = vmax.xlane.f32.xlu1 %v9098_v41 }
 0x461   : > { %1692 = vmax.xlane.f32.xlu0 %v9100_v42 }
 0x463   : > { %v9104_v43 = vpop.f32.mrb[20].mxu0 }
 0x464   : > { %v9106_v44 = vpop.f32.mrb[21].mxu0 }
 0x465   : > { %1702 = vmax.xlane.f32.xlu0 %v9104_v43  ;;  %v9109_v45 = vpop.f32.mrb[22].mxu0 }
 0x466   : > { %1704 = vmax.xlane.f32.xlu1 %v9109_v45  ;;  %v9112_v46 = vpop.f32.mrb[23].mxu0 }
 0x469   : > { %1698 = vmax.xlane.f32.xlu0 %v9106_v44 }
 0x46a   : > { %1700 = vmax.xlane.f32.xlu1 %v9112_v46 }
 0x46b   : > { %v9116_v47 = vpop.f32.mrb[24].mxu0 }
 0x46c   : > { %v9118_v51 = vpop.f32.mrb[25].mxu0 }
 0x46d   : > { %1710 = vmax.xlane.f32.xlu0 %v9116_v47  ;;  %v9121_v52 = vpop.f32.mrb[26].mxu0 }
 0x46e   : > { %1712 = vmax.xlane.f32.xlu1 %v9121_v52  ;;  %v9124_v53 = vpop.f32.mrb[27].mxu0 }
 0x471   : > { %1706 = vmax.xlane.f32.xlu0 %v9118_v51 }
 0x472   : > { %1708 = vmax.xlane.f32.xlu1 %v9124_v53 }
 0x473   : > { %v9128_v54 = vpop.f32.mrb[28].mxu0 }
 0x474   : > { %v9130_v55 = vpop.f32.mrb[29].mxu0 }
 0x475   : > { %v9132_v56 = vpop.f32.mrb[30].mxu0  ;;  %1718 = vmax.xlane.f32.xlu0 %v9128_v54 }
 0x476   : > { %1720 = vmax.xlane.f32.xlu1 %v9132_v56  ;;  %v9136_v57 = vpop.f32.mrb[31].mxu0 }
 0x479   : > { %1714 = vmax.xlane.f32.xlu0 %v9130_v55 }
 0x47a   : > { %1716 = vmax.xlane.f32.xlu1 %v9136_v57 }
 0x4e9   : > { %v1695_v63 = vpop.xlane.xlu1 %1694 }
 0x4ea   : > { %v9170_v2 = vmax.f32 %v9163_v50, %v1695_v63  ;;  %v1691_v3 = vpop.xlane.xlu0 %1690  ;;  %v9213_v63 = vld [vmem:[#allocation3 + $0x38] sm:$0xff] }
 0x4eb   : > { %v9174_v10 = vmax.f32 %v9165_v61, %v1691_v3  ;;  %11629 = vst [vmem:[#allocation54_spill] sm:$0xff] %v9213_v63 }
 0x4ec   : > { %2262 = vst.msk [vmem:[#allocation3 + $0x10] sm:$0xff] %vm1994_vm3, %v9170_v2  ;;  %1798 = vperm.xlu1 %7287, %v9170_v2  }
 0x4ed   : > { %2260 = vst.msk [vmem:[#allocation3] sm:$0xff] %vm1994_vm3, %v9174_v10  ;;  %v1697_v28 = vpop.xlane.xlu1 %1696  ;;  %1788 = vperm.xlu0 %7286, %v9174_v10  }
 0x4ee   : > { %v9194_v30 = vmax.f32 %v9176_v11, %v1697_v28  ;;  %v1693_v31 = vpop.xlane.xlu0 %1692 }
 0x4ef   : > { %v9199_v58 = vmax.f32 %v9183_v22, %v1693_v31 }
 0x4f0   : > { %11625 = vst [vmem:[#allocation50_spill] sm:$0xff] %v9194_v30  ;;  %2263 = vst.msk [vmem:[#allocation3 + $0x18] sm:$0xff] %vm1994_vm3, %v9194_v30 }
 0x4f1   : > { %11627 = vst [vmem:[#allocation52_spill] sm:$0xff] %v9199_v58  ;;  %2261 = vst.msk [vmem:[#allocation3 + $0x8] sm:$0xff] %vm1994_vm3, %v9199_v58  ;;  %1793 = vperm.xlu1 %7287, %v9199_v58  }
 0x4f2   : > { %v1703_v0 = vpop.xlane.xlu0 %1702 }
 0x4f3   : > { %v9218_v1 = vmax.f32 %v9205_v34, %v1703_v0  ;;  %v1705_v3 = vpop.xlane.xlu1 %1704 }
 0x4f4   : > { %v9221_v4 = vmax.f32 %v9213_v63, %v1705_v3 }
 0x4f5   : > { %11630 = vst [vmem:[#allocation55_spill] sm:$0xff] %v9218_v1  ;;  %2266 = vst.msk [vmem:[#allocation3 + $0x30] sm:$0xff] %vm1994_vm3, %v9218_v1  ;;  %1803 = vperm.xlu1 %7287, %v9194_v30  }
 0x4f6   : > { %11631 = vst [vmem:[#allocation56_spill] sm:$0xff] %v9221_v4  ;;  %2267 = vst.msk [vmem:[#allocation3 + $0x38] sm:$0xff] %vm1994_vm3, %v9221_v4  ;;  %v1699_v28 = vpop.xlane.xlu0 %1698  ;;  %1823 = vperm.xlu0 %7286, %v9221_v4  }
 0x4f7   : > { %v9239_v31 = vmax.f32 %v9223_v9, %v1699_v28  ;;  %v1701_v0 = vpop.xlane.xlu1 %1700  ;;  %v9273_v28 = vld [vmem:[#allocation3 + $0x48] sm:$0xff] }
 0x4f8   : > { %v9242_v3 = vmax.f32 %v9230_v20, %v1701_v0  ;;  %11641 = vst [vmem:[#allocation66_spill] sm:$0xff] %v9273_v28 }
 0x4f9   : > { %11634 = vst [vmem:[#allocation59_spill] sm:$0xff] %v9239_v31  ;;  %2264 = vst.msk [vmem:[#allocation3 + $0x20] sm:$0xff] %vm1994_vm3, %v9239_v31  ;;  %2316 = vrot.lane.b32.xlu1 %v9010_v38, %s8080_s1 }
 0x4fa   : > { %11635 = vst [vmem:[#allocation60_spill] sm:$0xff] %v9242_v3  ;;  %2265 = vst.msk [vmem:[#allocation3 + $0x28] sm:$0xff] %vm1994_vm3, %v9242_v3  ;;  %v1711_v0 = vpop.xlane.xlu0 %1710 }
 0x4fb   : > { %v9259_v33 = vmax.f32 %v9244_v12, %v1711_v0  ;;  %v1713_v62 = vpop.xlane.xlu1 %1712  ;;  %v9294_v0 = vld [vmem:[#allocation3 + $0x78] sm:$0xff] }
 0x4fc   : > { %v9262_v21 = vmax.f32 %v9252_v23, %v1713_v62  ;;  %11645 = vst [vmem:[#allocation70_spill] sm:$0xff] %v9294_v0  ;;  %v9311_v23 = vld [vmem:[#allocation3 + $0x68] sm:$0xff] }
 0x4fd   : > { %11638 = vst [vmem:[#allocation63_spill] sm:$0xff] %v9259_v33  ;;  %2270 = vst.msk [vmem:[#allocation3 + $0x50] sm:$0xff] %vm1994_vm3, %v9259_v33  ;;  %1838 = vperm.xlu0 %7286, %v9259_v33   ;;  %2318 = vrot.lane.b32.xlu1 %v9008_v37, %s8080_s1  ;;  %v9285_v33 = vld [vmem:[#allocation3 + $0x70] sm:$0xff] }
 0x4fe   : > { %11639 = vst [vmem:[#allocation64_spill] sm:$0xff] %v9262_v21  ;;  %2271 = vst.msk [vmem:[#allocation3 + $0x58] sm:$0xff] %vm1994_vm3, %v9262_v21  ;;  %v1707_v62 = vpop.xlane.xlu0 %1706 }
 0x4ff   : > { %v9280_v9 = vmax.f32 %v9264_v26, %v1707_v62  ;;  %v1709_v34 = vpop.xlane.xlu1 %1708  ;;  %11644 = vst [vmem:[#allocation69_spill] sm:$0xff] %v9285_v33  ;;  %11649 = vst [vmem:[#allocation74_spill] sm:$0xff] %v9311_v23 }
 0x500   : > { %v9283_v12 = vmax.f32 %v9273_v28, %v1709_v34 }
 0x501   : > { %11642 = vst [vmem:[#allocation67_spill] sm:$0xff] %v9280_v9  ;;  %2268 = vst.msk [vmem:[#allocation3 + $0x40] sm:$0xff] %vm1994_vm3, %v9280_v9  ;;  %1828 = vperm.xlu0 %7286, %v9280_v9   ;;  %2320 = vrot.lane.b32.xlu1 %v9020_v49, %s8080_s1  ;;  %v9306_v9 = vld [vmem:[#allocation3 + $0x60] sm:$0xff] }
 0x502   : > { %11643 = vst [vmem:[#allocation68_spill] sm:$0xff] %v9283_v12  ;;  %2269 = vst.msk [vmem:[#allocation3 + $0x48] sm:$0xff] %vm1994_vm3, %v9283_v12  ;;  %v1719_v34 = vpop.xlane.xlu0 %1718 }
 0x503   : > { %v1721_v22 = vpop.xlane.xlu1 %1720  ;;  %v9301_v58 = vmax.f32 %v9285_v33, %v1719_v34  ;;  %11648 = vst [vmem:[#allocation73_spill] sm:$0xff] %v9306_v9 }
 0x504   : > { %v9304_v26 = vmax.f32 %v9294_v0, %v1721_v22 }
 0x505   : > { %11646 = vst [vmem:[#allocation71_spill] sm:$0xff] %v9301_v58  ;;  %2322 = vrot.lane.b32.xlu0 %v9018_v48, %s8080_s1  ;;  %1818 = vperm.xlu1 %7287, %v9218_v1   ;;  %2274 = vst.msk [vmem:[#allocation3 + $0x70] sm:$0xff] %vm1994_vm3, %v9301_v58 }
 0x506   : > { %11647 = vst [vmem:[#allocation72_spill] sm:$0xff] %v9304_v26  ;;  %2275 = vst.msk [vmem:[#allocation3 + $0x78] sm:$0xff] %vm1994_vm3, %v9304_v26  ;;  %v1715_v22 = vpop.xlane.xlu0 %1714 }
 0x507   : > { %v1717_v28 = vpop.xlane.xlu1 %1716  ;;  %v9322_v4 = vmax.f32 %v9306_v9, %v1715_v22 }
 0x508   : > { %v9325_v1 = vmax.f32 %v9311_v23, %v1717_v28 }
 0x509   : > { %11650 = vst [vmem:[#allocation75_spill] sm:$0xff] %v9322_v4  ;;  %1808 = vperm.xlu1 %7287, %v9239_v31   ;;  %2272 = vst.msk [vmem:[#allocation3 + $0x60] sm:$0xff] %vm1994_vm3, %v9322_v4 }
 0x50a   : > { %11651 = vst [vmem:[#allocation76_spill] sm:$0xff] %v9325_v1  ;;  %2273 = vst.msk [vmem:[#allocation3 + $0x68] sm:$0xff] %vm1994_vm3, %v9325_v1  ;;  %1853 = vperm.xlu0 %7286, %v9325_v1  }
 0x50d   : > { %1813 = vperm.xlu1 %7287, %v9242_v3  }
 0x50e   : > { %1863 = vperm.xlu0 %7286, %v9304_v26  }
 0x511   : > { %1843 = vperm.xlu1 %7287, %v9262_v21  }
 0x512   : > { %2326 = vrot.lane.b32.xlu0 %v9026_v59, %s8080_s1 }
 0x515   : > { %1833 = vperm.xlu1 %7287, %v9283_v12   ;;  %v9564_v12 = vld [vmem:[#allocation3 + $0x88] sm:$0xff] }
 0x516   : > { %2330 = vrot.lane.b32.xlu0 %v9034_v6, %s8080_s1  ;;  %11674 = vst [vmem:[#allocation99_spill] sm:$0xff] %v9564_v12 }
 0x519   : > { %1858 = vperm.xlu1 %7287, %v9301_v58  }
 0x51a   : > { %2294 = vrot.lane.b32.xlu0 %v9056_v13, %s8080_s1 }
 0x51d   : > { %1848 = vperm.xlu1 %7287, %v9322_v4  }
 0x51e   : > { %2298 = vrot.lane.b32.xlu0 %v9064_v15, %s8080_s1 }
 0x521   : > { %2324 = vrot.lane.b32.xlu1 %v9028_v60, %s8080_s1 }
 0x522   : > { %2302 = vrot.lane.b32.xlu0 %v9072_v17, %s8080_s1 }
 0x525   : > { %2328 = vrot.lane.b32.xlu1 %v9036_v7, %s8080_s1 }
 0x526   : > { %2306 = vrot.lane.b32.xlu0 %v9080_v19, %s8080_s1 }
 0x529   : > { %2292 = vrot.lane.b32.xlu1 %v9001_v27, %s8080_s1 }
 0x52a   : > { %2831 = vrot.lane.b32.xlu0 %v9145_v8, %s8080_s1 }
 0x52d   : > { %2296 = vrot.lane.b32.xlu1 %v9058_v14, %s8080_s1 }
 0x531   : > { %2300 = vrot.lane.b32.xlu1 %v9066_v16, %s8080_s1 }
 0x535   : > { %2304 = vrot.lane.b32.xlu1 %v9074_v18, %s8080_s1 }
 0x539   : > { %2833 = vrot.lane.b32.xlu1 %v9143_v5, %s8080_s1 }
 0x56b   : > { %v1799_v13 = vpop.permute.xlu1 %1798 }
 0x56c   : > { %v1789_v15 = vpop.permute.xlu0 %1788  ;;  %v1868_v27 = vsub.f32 %v9092_v39, %v1799_v13 }
 0x56d   : > { %v1866_v17 = vsub.f32 %v9095_v40, %v1789_v15 }
 0x56e   : > { %v1886_v62 = vmul.f32 1.442695, %v1868_v27 }
 0x56f   : > { %v1882_v19 = vmul.f32 1.442695, %v1866_v17 }
 0x570   : > { %v1794_v28 = vpop.permute.xlu1 %1793 }
 0x571   : > { %v1867_v22 = vsub.f32 %v9100_v42, %v1794_v28  ;;  %7320 = vpow2.f32 %v1882_v19 }
 0x573   : > { %v1884_v14 = vmul.f32 1.442695, %v1867_v22 }
 0x574   : > { %v1804_v16 = vpop.permute.xlu1 %1803 }
 0x575   : > { %7322 = vpow2.f32 %v1884_v14  ;;  %v1869_v18 = vsub.f32 %v9098_v41, %v1804_v16  ;;  %v1824_v58 = vpop.permute.xlu0 %1823 }
 0x576   : > { %7324 = vpow2.f32 %v1886_v62 }
 0x577   : > { %v1888_v34 = vmul.f32 1.442695, %v1869_v18 }
 0x578   : > { %v2317_v33 = vpop.permute.xlu1 %2316 }
 0x579   : > { %7326 = vpow2.f32 %v1888_v34  ;;  %7066 = vmatprep.subr.msk.bf16.mxu1 %vm1528_vm2, %v2317_v33  ;;  %v2357_v22 = vsel %vm1528_vm2, %v2317_v33, 0 }
 0x57b   : > { %v9376_v13 = vpop.eup %7320 }
 0x57c   : > { %v1839_v40 = vpop.permute.xlu0 %1838  ;;  %v2319_v39 = vpop.permute.xlu1 %2318 }
 0x57f   : > { %v9378_v15 = vpop.eup %7322 }
 0x580   : > { %v1829_v42 = vpop.permute.xlu0 %1828  ;;  %v2321_v17 = vpop.permute.xlu1 %2320  ;;  %v2011_v27 = vpack.c.bf16 %v9378_v15, %v9376_v13 }
 0x581   : > { %v9382_v19 = vpop.eup %7324 }
 0x582   : > { %6706 = vmatprep.mubr.bf16.mxu1 %v2011_v27  ;;  %v1873_v27 = vsub.f32 %v9109_v45, %v1824_v58 }
 0x583   : > { %v9384_v41 = vpop.eup %7326 }
 0x584   : > { %v2323_v62 = vpop.permute.xlu0 %2322  ;;  %v1819_v34 = vpop.permute.xlu1 %1818  ;;  %v2012_v28 = vpack.c.bf16 %v9384_v41, %v9382_v19  ;;  %v1896_v33 = vmul.f32 1.442695, %v1873_v27 }
 0x585   : > { %v1872_v14 = vsub.f32 %v9104_v43, %v1819_v34  ;;  %v1874_v43 = vsub.f32 %v9118_v51, %v1829_v42 }
 0x586   : > { %6707 = vmatmul.mubr.bf16.vlgmr.msra.gmra.mrb[16].mxu1 %v2012_v28  ;;  %v2360_v28 = vsel %vm1528_vm2, %v2319_v39, 0 }
 0x587   : > { %6723 = vmatpush3.bf16.xpose.msra.mxu1 %v2357_v22  ;;  %v1894_v9 = vmul.f32 1.442695, %v1872_v14 }
 0x588   : > { %7067 = vmatprep.subr.msk.bf16.mxu1 %vm1528_vm2, %v2319_v39  ;;  %v1809_v16 = vpop.permute.xlu1 %1808 }
 0x589   : > { %v1870_v18 = vsub.f32 %v9106_v44, %v1809_v16  ;;  %v1854_v4 = vpop.permute.xlu0 %1853  ;;  %7328 = vpow2.f32 %v1894_v9 }
 0x58a   : > { %v1879_v42 = vsub.f32 %v9136_v57, %v1854_v4 }
 0x58b   : > { %v1890_v31 = vmul.f32 1.442695, %v1870_v18 }
 0x58c   : > { %v1814_v26 = vpop.permute.xlu1 %1813  ;;  %v1908_v18 = vmul.f32 1.442695, %v1879_v42 }
 0x58d   : > { %v1871_v0 = vsub.f32 %v9112_v46, %v1814_v26  ;;  %v1864_v1 = vpop.permute.xlu0 %1863  ;;  %7330 = vpow2.f32 %v1890_v31  ;;  %v1876_v46 = vsub.f32 %v9116_v47, %v1839_v40  ;;  %v1898_v26 = vmul.f32 1.442695, %v1874_v43 }
 0x58e   : > { %v2363_v31 = vsel %vm1528_vm2, %v2321_v17, 0  ;;  %v1881_v57 = vsub.f32 %v9132_v56, %v1864_v1 }
 0x58f   : > { %v1892_v34 = vmul.f32 1.442695, %v1871_v0  ;;  %6725 = vmatpush3.bf16.xpose.msra.mxu1 %v2360_v28  ;;  %v1902_v0 = vmul.f32 1.442695, %v1876_v46 }
 0x590   : > { %7068 = vmatprep.subr.msk.bf16.mxu1 %vm1528_vm2, %v2321_v17  ;;  %v1844_v44 = vpop.permute.xlu1 %1843 }
 0x591   : > { %7332 = vpow2.f32 %v1892_v34  ;;  %v1877_v45 = vsub.f32 %v9121_v52, %v1844_v44  ;;  %v9398_v58 = vpop.permute.xlu0 %2326  ;;  %v2366_v34 = vsel %vm1528_vm2, %v2323_v62, 0 }
 0x592   : > { %7334 = vpow2.f32 %v1896_v33 }
 0x593   : > { %v1904_v39 = vmul.f32 1.442695, %v1877_v45  ;;  %7336 = vpow2.f32 %v1898_v26  ;;  %v9407_v47 = vpop.eup %7328  ;;  %v1912_v45 = vmul.f32 1.442695, %v1881_v57 }
 0x594   : > { %v1834_v22 = vpop.permute.xlu1 %1833 }
 0x595   : > { %v1875_v51 = vsub.f32 %v9124_v53, %v1834_v22  ;;  %v9402_v9 = vpop.permute.xlu0 %2330  ;;  %7338 = vpow2.f32 %v1904_v39 }
 0x597   : > { %v1900_v14 = vmul.f32 1.442695, %v1875_v51  ;;  %6727 = vmatpush3.bf16.xpose.msra.mxu1 %v2363_v31  ;;  %v9412_v16 = vpop.eup %7330 }
 0x598   : > { %7069 = vmatprep.subr.msk.bf16.mxu1 %vm1528_vm2, %v2323_v62  ;;  %v1859_v52 = vpop.permute.xlu1 %1858 }
 0x599   : > { %7340 = vpow2.f32 %v1900_v14  ;;  %v1880_v40 = vsub.f32 %v9128_v54, %v1859_v52  ;;  %v9410_v53 = vpop.permute.xlu0 %2294 }
 0x59a   : > { %7342 = vpow2.f32 %v1902_v0 }
 0x59b   : > { %v9414_v17 = vpop.eup %7332  ;;  %v1910_v4 = vmul.f32 1.442695, %v1880_v40  ;;  %7344 = vpow2.f32 %v1908_v18 }
 0x59c   : > { %v1849_v27 = vpop.permute.xlu1 %1848  ;;  %v2013_v28 = vpack.c.bf16 %v9414_v17, %v9412_v16  ;;  %v9419_v33 = vpop.eup %7334 }
 0x59d   : > { %v1878_v43 = vsub.f32 %v9130_v55, %v1849_v27  ;;  %v2299_v54 = vpop.permute.xlu0 %2298  ;;  %v2014_v44 = vpack.c.bf16 %v9419_v33, %v9407_v47  ;;  %7346 = vpow2.f32 %v1910_v4  ;;  %v9425_v1 = vpop.eup %7336 }
 0x59e   : > { %6710 = vmatprep.mubr.bf16.mxu1 %v2013_v28 }
 0x59f   : > { %v1906_v46 = vmul.f32 1.442695, %v1878_v43  ;;  %6729 = vmatpush3.bf16.xpose.msra.mxu1 %v2366_v34  ;;  %v9428_v26 = vpop.eup %7338  ;;  %v2372_v43 = vsel %vm1528_vm2, %v9398_v58, 0 }
 0x5a0   : > { %6711 = vmatmul.mubr.bf16.gmra.mrb[20].mxu1 %v2014_v44  ;;  %v2325_v56 = vpop.permute.xlu1 %2324 }
 0x5a1   : > { %7348 = vpow2.f32 %v1906_v46  ;;  %7070 = vmatprep.subr.msk.bf16.mxu1 %vm1528_vm2, %v2325_v56  ;;  %v2303_v55 = vpop.permute.xlu0 %2302  ;;  %v2369_v0 = vsel %vm1528_vm2, %v2325_v56, 0 }
 0x5a2   : > { %7350 = vpow2.f32 %v1912_v45 }
 0x5a3   : > { %v9430_v39 = vpop.eup %7340 }
 0x5a4   : > { %v2329_v62 = vpop.permute.xlu1 %2328  ;;  %v2015_v22 = vpack.c.bf16 %v9430_v39, %v9425_v1  ;;  %v9434_v51 = vpop.eup %7342 }
 0x5a5   : > { %v2307_v31 = vpop.permute.xlu0 %2306  ;;  %v2016_v42 = vpack.c.bf16 %v9428_v26, %v9434_v51  ;;  %v9441_v52 = vpop.eup %7344  ;;  %v2375_v46 = vsel %vm1528_vm2, %v2329_v62, 0 }
 0x5a6   : > { %6714 = vmatprep.mubr.bf16.mxu1 %v2015_v22  ;;  %11652 = vst [vmem:[#allocation77_spill] sm:$0xff] %v9441_v52 }
 0x5a7   : > { %6731 = vmatpush3.bf16.xpose.msra.mxu1 %v2369_v0  ;;  %v9443_v18 = vpop.eup %7346 }
 0x5a8   : > { %6715 = vmatmul.mubr.bf16.gmra.mrb[24].mxu1 %v2016_v42  ;;  %7071 = vmatprep.subr.msk.bf16.mxu1 %vm1528_vm2, %v9398_v58  ;;  %v2293_v14 = vpop.permute.xlu1 %2292  ;;  %v2378_v58 = vsel %vm1528_vm2, %v9402_v9, 0 }
 0x5a9   : > { %v2832_v40 = vpop.permute.xlu0 %2831 }
 0x5aa   : > { %6754 = vmatprep.subr.bf16.mxu0 %v2832_v40 }
 0x5ab   : > { %v9445_v57 = vpop.eup %7348  ;;  %6755 = vmatpush3.bf16.msra.mxu0 %v2832_v40 }
 0x5ac   : > { %v2017_v4 = vpack.c.bf16 %v9441_v52, %v9445_v57  ;;  %v2297_v27 = vpop.permute.xlu1 %2296  ;;  %v9449_v28 = vpop.eup %7350 }
 0x5ad   : > { %11653 = vst [vmem:[#allocation78_spill] sm:$0xff] %v9449_v28  ;;  %v2018_v34 = vpack.c.bf16 %v9449_v28, %v9443_v18  ;;  %v9571_v28 = vld [vmem:[#allocation3 + $0x98] sm:$0xff] }
 0x5ae   : > { %6718 = vmatprep.mubr.bf16.mxu1 %v2017_v4  ;;  %11675 = vst [vmem:[#allocation100_spill] sm:$0xff] %v9571_v28 }
 0x5af   : > { %6733 = vmatpush3.bf16.xpose.msra.mxu1 %v2372_v43 }
 0x5b0   : > { %6719 = vmatmul.mubr.bf16.gmra.mrb[28].mxu1 %v2018_v34  ;;  %7072 = vmatprep.subr.msk.bf16.mxu1 %vm1528_vm2, %v2329_v62  ;;  %v2301_v44 = vpop.permute.xlu1 %2300 }
 0x5b1   : > { %6738 = vmatprep.mubr.msk.bf16.mxu1 %vm1528_vm2, %v2293_v14 }
 0x5b4   : > { %v2305_v45 = vpop.permute.xlu1 %2304 }
 0x5b7   : > { %6735 = vmatpush3.bf16.xpose.msra.mxu1 %v2375_v46 }
 0x5b8   : > { %7073 = vmatprep.subr.msk.bf16.mxu1 %vm1528_vm2, %v9402_v9  ;;  %v2834_v56 = vpop.permute.xlu1 %2833 }
 0x5b9   : > { %6756 = vmatprep.subr.bf16.mxu0 %v2834_v56 }
 0x5ba   : > { %6757 = vmatpush3.bf16.msra.mxu0 %v2834_v56 }
 0x5bf   : > { %6737 = vmatpush3.bf16.xpose.msra.mxu1 %v2378_v58 }
 0x5c6   : > { %6739 = vmatmul.mubr.msk.bf16.vlgmr.msra.gmra.mrb[32].mxu1 %vm1528_vm2, %v9410_v53 }
 0x5c7   : > { %6742 = vmatprep.mubr.msk.bf16.mxu1 %vm1528_vm2, %v2297_v27 }
 0x5ce   : > { %6743 = vmatmul.mubr.msk.bf16.gmra.mrb[36].mxu1 %vm1528_vm2, %v2299_v54 }
 0x5cf   : > { %6746 = vmatprep.mubr.msk.bf16.mxu1 %vm1528_vm2, %v2301_v44 }
 0x5d6   : > { %6747 = vmatmul.mubr.msk.bf16.gmra.mrb[40].mxu1 %vm1528_vm2, %v2303_v55 }
 0x5d7   : > { %6750 = vmatprep.mubr.msk.bf16.mxu1 %vm1528_vm2, %v2305_v45 }
 0x5de   : > { %6751 = vmatmul.mubr.msk.bf16.gmra.mrb[44].mxu1 %vm1528_vm2, %v2307_v31 }
 0x659   : > { %v9470_v62 = vpop.f32.mrb[16].mxu1 }
 0x65a   : > { %11654 = vst [vmem:[#allocation79_spill] sm:$0xff] %v9470_v62  ;;  %v9472_v22 = vpop.f32.mrb[17].mxu1 }
 0x65b   : > { %11655 = vst [vmem:[#allocation80_spill] sm:$0xff] %v9472_v22  ;;  %v9474_v9 = vpop.f32.mrb[18].mxu1 }
 0x65c   : > { %11656 = vst [vmem:[#allocation81_spill] sm:$0xff] %v9474_v9  ;;  %v9476_v0 = vpop.f32.mrb[19].mxu1  ;;  %v9556_v9 = vld [vmem:[#allocation3 + $0x80] sm:$0xff] }
 0x65d   : > { %11657 = vst [vmem:[#allocation82_spill] sm:$0xff] %v9476_v0  ;;  %11671 = vst [vmem:[#allocation96_spill] sm:$0xff] %v9556_v9 }
 0x673   : > { %v9478_v53 = vpop.f32.mrb[20].mxu1 }
 0x674   : > { %11658 = vst [vmem:[#allocation83_spill] sm:$0xff] %v9478_v53  ;;  %v9480_v42 = vpop.f32.mrb[21].mxu1 }
 0x675   : > { %11659 = vst [vmem:[#allocation84_spill] sm:$0xff] %v9480_v42  ;;  %v9482_v54 = vpop.f32.mrb[22].mxu1 }
 0x676   : > { %11660 = vst [vmem:[#allocation85_spill] sm:$0xff] %v9482_v54  ;;  %v9484_v14 = vpop.f32.mrb[23].mxu1 }
 0x677   : > { %11661 = vst [vmem:[#allocation86_spill] sm:$0xff] %v9484_v14  ;;  %v9554_v14 = vld [vmem:[#allocation3 + $0x90] sm:$0xff] }
 0x678   : > { %11670 = vst [vmem:[#allocation95_spill] sm:$0xff] %v9554_v14 }
 0x67b   : > { %v9486_v55 = vpop.f32.mrb[24].mxu1 }
 0x67c   : > { %11662 = vst [vmem:[#allocation87_spill] sm:$0xff] %v9486_v55  ;;  %v9488_v40 = vpop.f32.mrb[25].mxu1 }
 0x67d   : > { %11663 = vst [vmem:[#allocation88_spill] sm:$0xff] %v9488_v40  ;;  %v9490_v31 = vpop.f32.mrb[26].mxu1 }
 0x67e   : > { %11664 = vst [vmem:[#allocation89_spill] sm:$0xff] %v9490_v31  ;;  %v9492_v4 = vpop.f32.mrb[27].mxu1 }
 0x67f   : > { %11665 = vst [vmem:[#allocation90_spill] sm:$0xff] %v9492_v4 }
 0x683   : > { %v9494_v27 = vpop.f32.mrb[28].mxu1 }
 0x684   : > { %11666 = vst [vmem:[#allocation91_spill] sm:$0xff] %v9494_v27  ;;  %v9496_v43 = vpop.f32.mrb[29].mxu1 }
 0x685   : > { %11667 = vst [vmem:[#allocation92_spill] sm:$0xff] %v9496_v43  ;;  %v9498_v34 = vpop.f32.mrb[30].mxu1 }
 0x686   : > { %11668 = vst [vmem:[#allocation93_spill] sm:$0xff] %v9498_v34  ;;  %v9500_v44 = vpop.f32.mrb[31].mxu1 }
 0x687   : > { %11669 = vst [vmem:[#allocation94_spill] sm:$0xff] %v9500_v44 }
 0x699   : > { %v9502_v45 = vpop.f32.mrb[32].mxu1 }
 0x69a   : > { %2498 = vmax.xlane.f32.xlu0 %v9502_v45  ;;  %v9505_v46 = vpop.f32.mrb[33].mxu1 }
 0x69b   : > { %2494 = vmax.xlane.f32.xlu1 %v9505_v46  ;;  %v9508_v56 = vpop.f32.mrb[34].mxu1 }
 0x69c   : > { %v9510_v58 = vpop.f32.mrb[35].mxu1 }
 0x69e   : > { %2496 = vmax.xlane.f32.xlu0 %v9510_v58 }
 0x69f   : > { %2500 = vmax.xlane.f32.xlu1 %v9508_v56 }
 0x6a1   : > { %v9514_v27 = vpop.f32.mrb[36].mxu1 }
 0x6a2   : > { %v9516_v43 = vpop.f32.mrb[37].mxu1 }
 0x6a3   : > { %v9518_v55 = vpop.f32.mrb[38].mxu1 }
 0x6a4   : > { %v9520_v40 = vpop.f32.mrb[39].mxu1 }
 0x6a9   : > { %v9522_v53 = vpop.f32.mrb[40].mxu1 }
 0x6aa   : > { %v9524_v42 = vpop.f32.mrb[41].mxu1 }
 0x6ab   : > { %v9526_v0 = vpop.f32.mrb[42].mxu1 }
 0x6ac   : > { %v9528_v34 = vpop.f32.mrb[43].mxu1 }
 0x6b0   : > { %2835 = vrot.lane.b32.xlu1 %v9153_v25, %s8080_s1 }
 0x6b1   : > { %v9532_v44 = vpop.f32.mrb[44].mxu1 }
 0x6b2   : > { %v9534_v31 = vpop.f32.mrb[45].mxu1 }
 0x6b3   : > { %v9536_v4 = vpop.f32.mrb[46].mxu1 }
 0x6b4   : > { %2837 = vrot.lane.b32.xlu0 %v9150_v24, %s8080_s1  ;;  %v9540_v54 = vpop.f32.mrb[47].mxu1 }
 0x6d3   : > { %2506 = vmax.xlane.f32.xlu0 %v9514_v27 }
 0x6d4   : > { %2508 = vmax.xlane.f32.xlu1 %v9518_v55 }
 0x6d7   : > { %2502 = vmax.xlane.f32.xlu0 %v9516_v43 }
 0x6d8   : > { %2504 = vmax.xlane.f32.xlu1 %v9520_v40 }
 0x6db   : > { %2514 = vmax.xlane.f32.xlu0 %v9522_v53 }
 0x6dc   : > { %2516 = vmax.xlane.f32.xlu1 %v9526_v0 }
 0x6df   : > { %2510 = vmax.xlane.f32.xlu0 %v9524_v42 }
 0x6e0   : > { %2512 = vmax.xlane.f32.xlu1 %v9528_v34 }
 0x6e3   : > { %2522 = vmax.xlane.f32.xlu0 %v9532_v44 }
 0x6e4   : > { %2524 = vmax.xlane.f32.xlu1 %v9536_v4 }
 0x6e7   : > { %2518 = vmax.xlane.f32.xlu0 %v9534_v31 }
 0x6e8   : > { %2520 = vmax.xlane.f32.xlu1 %v9540_v54 }
 0x727   : > { %v2499_v62 = vpop.xlane.xlu0 %2498 }
 0x728   : > { %v9559_v22 = vmax.f32 %v9554_v14, %v2499_v62  ;;  %v2495_v23 = vpop.xlane.xlu1 %2494  ;;  %v9610_v14 = vld [vmem:[#allocation3 + $0xb8] sm:$0xff] }
 0x729   : > { %v9562_v21 = vmax.f32 %v9556_v9, %v2495_v23  ;;  %11679 = vst [vmem:[#allocation104_spill] sm:$0xff] %v9610_v14  ;;  %v9638_v9 = vld [vmem:[#allocation3 + $0xd0] sm:$0xff] }
 0x72a   : > { %11672 = vst [vmem:[#allocation97_spill] sm:$0xff] %v9559_v22  ;;  %3099 = vst.msk [vmem:[#allocation3 + $0x90] sm:$0xff] %vm1994_vm3, %v9559_v22  ;;  %2602 = vperm.xlu1 %7287, %v9559_v22   ;;  %v9625_v22 = vld [vmem:[#allocation3 + $0xa8] sm:$0xff] }
 0x72b   : > { %11673 = vst [vmem:[#allocation98_spill] sm:$0xff] %v9562_v21  ;;  %3097 = vst.msk [vmem:[#allocation3 + $0x80] sm:$0xff] %vm1994_vm3, %v9562_v21  ;;  %v2497_v23 = vpop.xlane.xlu0 %2496 }
 0x72c   : > { %v9578_v3 = vmax.f32 %v9564_v12, %v2497_v23  ;;  %v2501_v20 = vpop.xlane.xlu1 %2500  ;;  %11683 = vst [vmem:[#allocation108_spill] sm:$0xff] %v9625_v22  ;;  %11686 = vst [vmem:[#allocation111_spill] sm:$0xff] %v9638_v9 }
 0x72d   : > { %v9581_v63 = vmax.f32 %v9571_v28, %v2501_v20 }
 0x72e   : > { %11676 = vst [vmem:[#allocation101_spill] sm:$0xff] %v9578_v3  ;;  %3098 = vst.msk [vmem:[#allocation3 + $0x88] sm:$0xff] %vm1994_vm3, %v9578_v3  ;;  %2597 = vperm.xlu0 %7286, %v9578_v3   ;;  %2592 = vperm.xlu1 %7287, %v9562_v21  }
 0x72f   : > { %11677 = vst [vmem:[#allocation102_spill] sm:$0xff] %v9581_v63  ;;  %3100 = vst.msk [vmem:[#allocation3 + $0x98] sm:$0xff] %vm1994_vm3, %v9581_v63  ;;  %v2838_v20 = vpop.permute.xlu0 %2837 }
 0x730   : > { %v2836_v23 = vpop.permute.xlu1 %2835 }
 0x731   : > { %6758 = vmatprep.subr.bf16.mxu0 %v2836_v23 }
 0x732   : > { %2839 = vrot.lane.b32.xlu1 %v9161_v36, %s8080_s1  ;;  %2607 = vperm.xlu0 %7286, %v9581_v63   ;;  %v9618_v63 = vld [vmem:[#allocation3 + $0xa0] sm:$0xff] }
 0x733   : > { %6759 = vmatpush3.bf16.msra.mxu0 %v2836_v23  ;;  %v9608_v23 = vld [vmem:[#allocation3 + $0xb0] sm:$0xff]  ;;  %11682 = vst [vmem:[#allocation107_spill] sm:$0xff] %v9618_v63 }
 0x734   : > { %6760 = vmatprep.subr.bf16.mxu0 %v2838_v20  ;;  %11678 = vst [vmem:[#allocation103_spill] sm:$0xff] %v9608_v23 }
 0x736   : > { %2843 = vrot.lane.b32.xlu1 %v9196_v32, %s8080_s1  ;;  %2841 = vrot.lane.b32.xlu0 %v9158_v35, %s8080_s1 }
 0x737   : > { %6761 = vmatpush3.bf16.msra.mxu0 %v2838_v20 }
 0x73a   : > { %3145 = vrot.lane.b32.xlu1 %v9010_v38, %s8081_s5  ;;  %2845 = vrot.lane.b32.xlu0 %v9190_v29, %s8080_s1 }
 0x73e   : > { %3149 = vrot.lane.b32.xlu1 %v9020_v49, %s8081_s5  ;;  %3147 = vrot.lane.b32.xlu0 %v9008_v37, %s8081_s5 }
 0x760   : > { %v2507_v62 = vpop.xlane.xlu0 %2506 }
 0x761   : > { %v9613_v20 = vmax.f32 %v9608_v23, %v2507_v62  ;;  %v2509_v3 = vpop.xlane.xlu1 %2508  ;;  %v9645_v62 = vld [vmem:[#allocation3 + $0xd8] sm:$0xff] }
 0x762   : > { %v9616_v12 = vmax.f32 %v9610_v14, %v2509_v3  ;;  %11687 = vst [vmem:[#allocation112_spill] sm:$0xff] %v9645_v62 }
 0x763   : > { %11680 = vst [vmem:[#allocation105_spill] sm:$0xff] %v9613_v20  ;;  %3103 = vst.msk [vmem:[#allocation3 + $0xb0] sm:$0xff] %vm1994_vm3, %v9613_v20  ;;  %2622 = vperm.xlu1 %7287, %v9613_v20  }
 0x764   : > { %11681 = vst [vmem:[#allocation106_spill] sm:$0xff] %v9616_v12  ;;  %3104 = vst.msk [vmem:[#allocation3 + $0xb8] sm:$0xff] %vm1994_vm3, %v9616_v12  ;;  %v2503_v3 = vpop.xlane.xlu0 %2502  ;;  %2627 = vperm.xlu0 %7286, %v9616_v12  }
 0x765   : > { %v9633_v21 = vmax.f32 %v9618_v63, %v2503_v3  ;;  %v2505_v28 = vpop.xlane.xlu1 %2504  ;;  %v9658_v63 = vld [vmem:[#allocation3 + $0xc0] sm:$0xff]  ;;  %v9664_v3 = vld [vmem:[#allocation3 + $0xc8] sm:$0xff] }
 0x766   : > { %v9636_v23 = vmax.f32 %v9625_v22, %v2505_v28  ;;  %11690 = vst [vmem:[#allocation115_spill] sm:$0xff] %v9658_v63  ;;  %11691 = vst [vmem:[#allocation116_spill] sm:$0xff] %v9664_v3  ;;  %v9678_v22 = vld [vmem:[#allocation3 + $0xf0] sm:$0xff] }
 0x767   : > { %11684 = vst [vmem:[#allocation109_spill] sm:$0xff] %v9633_v21  ;;  %3101 = vst.msk [vmem:[#allocation3 + $0xa0] sm:$0xff] %vm1994_vm3, %v9633_v21  ;;  %2612 = vperm.xlu1 %7287, %v9633_v21  }
 0x768   : > { %11685 = vst [vmem:[#allocation110_spill] sm:$0xff] %v9636_v23  ;;  %3102 = vst.msk [vmem:[#allocation3 + $0xa8] sm:$0xff] %vm1994_vm3, %v9636_v23  ;;  %v2515_v28 = vpop.xlane.xlu0 %2514  ;;  %2617 = vperm.xlu0 %7286, %v9636_v23  }
 0x769   : > { %v9653_v12 = vmax.f32 %v9638_v9, %v2515_v28  ;;  %v2517_v20 = vpop.xlane.xlu1 %2516  ;;  %11694 = vst [vmem:[#allocation119_spill] sm:$0xff] %v9678_v22 }
 0x76a   : > { %v9656_v14 = vmax.f32 %v9645_v62, %v2517_v20  ;;  %v9684_v62 = vld [vmem:[#allocation3 + $0xf8] sm:$0xff] }
 0x76b   : > { %11688 = vst [vmem:[#allocation113_spill] sm:$0xff] %v9653_v12  ;;  %3107 = vst.msk [vmem:[#allocation3 + $0xd0] sm:$0xff] %vm1994_vm3, %v9653_v12 }
 0x76c   : > { %11689 = vst [vmem:[#allocation114_spill] sm:$0xff] %v9656_v14  ;;  %3108 = vst.msk [vmem:[#allocation3 + $0xd8] sm:$0xff] %vm1994_vm3, %v9656_v14  ;;  %v2511_v28 = vpop.xlane.xlu0 %2510  ;;  %2642 = vperm.xlu0 %7286, %v9653_v12   ;;  %2647 = vperm.xlu1 %7287, %v9656_v14  }
 0x76d   : > { %v9673_v20 = vmax.f32 %v9658_v63, %v2511_v28  ;;  %v2513_v21 = vpop.xlane.xlu1 %2512  ;;  %11695 = vst [vmem:[#allocation120_spill] sm:$0xff] %v9684_v62  ;;  %v9698_v63 = vld [vmem:[#allocation3 + $0xe0] sm:$0xff] }
 0x76e   : > { %v9676_v9 = vmax.f32 %v9664_v3, %v2513_v21  ;;  %11698 = vst [vmem:[#allocation123_spill] sm:$0xff] %v9698_v63  ;;  %v9704_v3 = vld [vmem:[#allocation3 + $0xe8] sm:$0xff] }
 0x76f   : > { %11692 = vst [vmem:[#allocation117_spill] sm:$0xff] %v9673_v20  ;;  %3105 = vst.msk [vmem:[#allocation3 + $0xc0] sm:$0xff] %vm1994_vm3, %v9673_v20 }
 0x770   : > { %11693 = vst [vmem:[#allocation118_spill] sm:$0xff] %v9676_v9  ;;  %3106 = vst.msk [vmem:[#allocation3 + $0xc8] sm:$0xff] %vm1994_vm3, %v9676_v9  ;;  %v2523_v28 = vpop.xlane.xlu0 %2522  ;;  %2632 = vperm.xlu0 %7286, %v9673_v20   ;;  %2637 = vperm.xlu1 %7287, %v9676_v9   ;;  %v9744_v9 = vld [vmem:[#allocation2 + $0x8] sm:$0xff]  ;;  %v9750_v20 = vld [vmem:[#allocation2 + $0x20] sm:$0xff] }
 0x771   : > { %v9693_v21 = vmax.f32 %v9678_v22, %v2523_v28  ;;  %v2525_v23 = vpop.xlane.xlu1 %2524  ;;  %11699 = vst [vmem:[#allocation124_spill] sm:$0xff] %v9704_v3 }
 0x772   : > { %v9696_v12 = vmax.f32 %v9684_v62, %v2525_v23  ;;  %v9758_v62 = vld [vmem:[#allocation2 + $0x30] sm:$0xff] }
 0x773   : > { %11696 = vst [vmem:[#allocation121_spill] sm:$0xff] %v9693_v21  ;;  %3111 = vst.msk [vmem:[#allocation3 + $0xf0] sm:$0xff] %vm1994_vm3, %v9693_v21 }
 0x774   : > { %11697 = vst [vmem:[#allocation122_spill] sm:$0xff] %v9696_v12  ;;  %3112 = vst.msk [vmem:[#allocation3 + $0xf8] sm:$0xff] %vm1994_vm3, %v9696_v12  ;;  %v2519_v28 = vpop.xlane.xlu0 %2518  ;;  %3151 = vrot.lane.b32.xlu0 %v9018_v48, %s8081_s5  ;;  %2662 = vperm.xlu1 %7287, %v9693_v21  }
 0x775   : > { %v9714_v23 = vmax.f32 %v9698_v63, %v2519_v28  ;;  %v2521_v14 = vpop.xlane.xlu1 %2520  ;;  %v9742_v28 = vld [vmem:[#allocation2 + $0x10] sm:$0xff] }
 0x776   : > { %v9717_v22 = vmax.f32 %v9704_v3, %v2521_v14  ;;  %v9736_v14 = vld [vmem:[#allocation2] sm:$0xff]  ;;  %v9766_v3 = vld [vmem:[#allocation2 + $0x38] sm:$0xff] }
 0x777   : > { %11700 = vst [vmem:[#allocation125_spill] sm:$0xff] %v9714_v23  ;;  %3109 = vst.msk [vmem:[#allocation3 + $0xe0] sm:$0xff] %vm1994_vm3, %v9714_v23 }
 0x778   : > { %11701 = vst [vmem:[#allocation126_spill] sm:$0xff] %v9717_v22  ;;  %3110 = vst.msk [vmem:[#allocation3 + $0xe8] sm:$0xff] %vm1994_vm3, %v9717_v22  ;;  %2652 = vperm.xlu1 %7287, %v9714_v23   ;;  %2657 = vperm.xlu0 %7286, %v9717_v22   ;;  %v9760_v22 = vld [vmem:[#allocation2 + $0x28] sm:$0xff] }
 0x77c   : > { %3153 = vrot.lane.b32.xlu1 %v9028_v60, %s8081_s5  ;;  %2667 = vperm.xlu0 %7286, %v9696_v12   ;;  %v9752_v12 = vld [vmem:[#allocation2 + $0x18] sm:$0xff] }
 0x780   : > { %3157 = vrot.lane.b32.xlu1 %v9036_v7, %s8081_s5  ;;  %3155 = vrot.lane.b32.xlu0 %v9026_v59, %s8081_s5 }
 0x784   : > { %3129 = vrot.lane.b32.xlu1 %v9736_v14, %s8081_s5  ;;  %3159 = vrot.lane.b32.xlu0 %v9034_v6, %s8081_s5 }
 0x788   : > { %3133 = vrot.lane.b32.xlu1 %v9742_v28, %s8081_s5  ;;  %3131 = vrot.lane.b32.xlu0 %v9744_v9, %s8081_s5 }
 0x78c   : > { %3137 = vrot.lane.b32.xlu1 %v9750_v20, %s8081_s5  ;;  %3135 = vrot.lane.b32.xlu0 %v9752_v12, %s8081_s5 }
 0x790   : > { %3141 = vrot.lane.b32.xlu1 %v9758_v62, %s8081_s5  ;;  %3139 = vrot.lane.b32.xlu0 %v9760_v22, %s8081_s5 }
 0x794   : > { %3654 = vrot.lane.b32.xlu1 %v9143_v5, %s8081_s5  ;;  %3143 = vrot.lane.b32.xlu0 %v9766_v3, %s8081_s5 }
 0x798   : > { %3656 = vrot.lane.b32.xlu1 %v9153_v25, %s8081_s5  ;;  %3652 = vrot.lane.b32.xlu0 %v9145_v8, %s8081_s5 }
 0x79c   : > { %3660 = vrot.lane.b32.xlu1 %v9161_v36, %s8081_s5  ;;  %3658 = vrot.lane.b32.xlu0 %v9150_v24, %s8081_s5 }
 0x7a0   : > { %3664 = vrot.lane.b32.xlu1 %v9196_v32, %s8081_s5  ;;  %3662 = vrot.lane.b32.xlu0 %v9158_v35, %s8081_s5 }
 0x7a9   : > { %v2603_v21 = vpop.permute.xlu1 %2602 }
 0x7aa   : > { %v2672_v23 = vsub.f32 %v9502_v45, %v2603_v21 }
 0x7ac   : > { %v2690_v30 = vmul.f32 1.442695, %v2672_v23 }
 0x7ad   : > { %v2598_v63 = vpop.permute.xlu0 %2597  ;;  %v2593_v25 = vpop.permute.xlu1 %2592 }
 0x7ae   : > { %v2671_v5 = vsub.f32 %v9510_v58, %v2598_v63  ;;  %v2670_v8 = vsub.f32 %v9505_v46, %v2593_v25 }
 0x7b0   : > { %v2688_v52 = vmul.f32 1.442695, %v2671_v5  ;;  %v2686_v36 = vmul.f32 1.442695, %v2670_v8 }
 0x7b1   : > { %v2608_v11 = vpop.permute.xlu0 %2607  ;;  %v2840_v24 = vpop.permute.xlu1 %2839 }
 0x7b2   : > { %7352 = vpow2.f32 %v2688_v52  ;;  %v2673_v32 = vsub.f32 %v9508_v56, %v2608_v11  ;;  %6762 = vmatprep.subr.bf16.mxu0 %v2840_v24 }
 0x7b3   : > { %7354 = vpow2.f32 %v2686_v36  ;;  %6763 = vmatpush3.bf16.msra.mxu0 %v2840_v24 }
 0x7b4   : > { %v2692_v35 = vmul.f32 1.442695, %v2673_v32  ;;  %7356 = vpow2.f32 %v2690_v30 }
 0x7b5   : > { %v2842_v45 = vpop.permute.xlu0 %2841  ;;  %v2844_v21 = vpop.permute.xlu1 %2843 }
 0x7b6   : > { %7358 = vpow2.f32 %v2692_v35  ;;  %6764 = vmatprep.subr.bf16.mxu0 %v2842_v45 }
 0x7b7   : > { %6765 = vmatpush3.bf16.msra.mxu0 %v2842_v45 }
 0x7b8   : > { %6766 = vmatprep.subr.bf16.mxu0 %v2844_v21 }
 0x7b9   : > { %v2846_v25 = vpop.permute.xlu0 %2845  ;;  %v3146_v24 = vpop.permute.xlu1 %3145 }
 0x7ba   : > { %v3186_v32 = vsel %vm1528_vm2, %v3146_v24, 0 }
 0x7bb   : > { %6767 = vmatpush3.bf16.msra.mxu0 %v2844_v21 }
 0x7bc   : > { %v9788_v5 = vpop.eup %7352  ;;  %6768 = vmatprep.subr.bf16.mxu0 %v2846_v25 }
 0x7bd   : > { %v9790_v8 = vpop.eup %7354  ;;  %v3148_v63 = vpop.permute.xlu0 %3147 }
 0x7be   : > { %v2815_v11 = vpack.c.bf16 %v9788_v5, %v9790_v8  ;;  %v9794_v36 = vpop.eup %7356  ;;  %v3189_v52 = vsel %vm1528_vm2, %v3148_v63, 0  ;;  %v3150_v46 = vpop.permute.xlu1 %3149 }
 0x7bf   : > { %6769 = vmatpush3.bf16.msra.mxu0 %v2846_v25  ;;  %v3192_v56 = vsel %vm1528_vm2, %v3150_v46, 0 }
 0x7c0   : > { %v9796_v30 = vpop.eup %7358  ;;  %6770 = vmatprep.mubr.bf16.mxu0 %v2815_v11  ;;  %7074 = vmatprep.subr.msk.bf16.mxu0 %vm1528_vm2, %v3146_v24 }
 0x7c1   : > { %11702 = vst [vmem:[#allocation127_spill] sm:$0xff] %v9796_v30  ;;  %v2816_v35 = vpack.c.bf16 %v9796_v30, %v9794_v36 }
 0x7c3   : > { %6771 = vmatmul.mubr.bf16.vlgmr.msra.gmra.mrb[32].mxu0 %v2816_v35 }
 0x7c8   : > { %6787 = vmatpush3.bf16.xpose.msra.mxu0 %v3186_v32 }
 0x7c9   : > { %7075 = vmatprep.subr.msk.bf16.mxu0 %vm1528_vm2, %v3148_v63 }
 0x7d0   : > { %6789 = vmatpush3.bf16.xpose.msra.mxu0 %v3189_v52 }
 0x7d1   : > { %7076 = vmatprep.subr.msk.bf16.mxu0 %vm1528_vm2, %v3150_v46 }
 0x7d8   : > { %6791 = vmatpush3.bf16.xpose.msra.mxu0 %v3192_v56 }
 0x7e2   : > { %v2623_v58 = vpop.permute.xlu1 %2622 }
 0x7e3   : > { %v2676_v23 = vsub.f32 %v9514_v27, %v2623_v58  ;;  %v2628_v45 = vpop.permute.xlu0 %2627 }
 0x7e4   : > { %v2677_v21 = vsub.f32 %v9518_v55, %v2628_v45 }
 0x7e5   : > { %v2698_v25 = vmul.f32 1.442695, %v2676_v23 }
 0x7e6   : > { %v2700_v11 = vmul.f32 1.442695, %v2677_v21  ;;  %v2613_v24 = vpop.permute.xlu1 %2612 }
 0x7e7   : > { %v2674_v35 = vsub.f32 %v9516_v43, %v2613_v24  ;;  %v2618_v32 = vpop.permute.xlu0 %2617  ;;  %7360 = vpow2.f32 %v2698_v25 }
 0x7e8   : > { %v2675_v63 = vsub.f32 %v9520_v40, %v2618_v32  ;;  %7362 = vpow2.f32 %v2700_v11 }
 0x7e9   : > { %v2694_v52 = vmul.f32 1.442695, %v2674_v35 }
 0x7ea   : > { %v2696_v30 = vmul.f32 1.442695, %v2675_v63 }
 0x7eb   : > { %7364 = vpow2.f32 %v2694_v52  ;;  %v2643_v46 = vpop.permute.xlu0 %2642  ;;  %v2648_v56 = vpop.permute.xlu1 %2647 }
 0x7ec   : > { %7366 = vpow2.f32 %v2696_v30  ;;  %v2680_v27 = vsub.f32 %v9522_v53, %v2643_v46  ;;  %v2681_v55 = vsub.f32 %v9526_v0, %v2648_v56 }
 0x7ee   : > { %v2706_v58 = vmul.f32 1.442695, %v2680_v27  ;;  %v2708_v23 = vmul.f32 1.442695, %v2681_v55 }
 0x7ef   : > { %v2633_v45 = vpop.permute.xlu0 %2632  ;;  %v2638_v21 = vpop.permute.xlu1 %2637 }
 0x7f0   : > { %v2678_v43 = vsub.f32 %v9524_v42, %v2633_v45  ;;  %v2679_v40 = vsub.f32 %v9528_v34, %v2638_v21  ;;  %7368 = vpow2.f32 %v2706_v58 }
 0x7f1   : > { %v9814_v24 = vpop.eup %7360  ;;  %7370 = vpow2.f32 %v2708_v23 }
 0x7f2   : > { %v2702_v25 = vmul.f32 1.442695, %v2678_v43  ;;  %v2704_v11 = vmul.f32 1.442695, %v2679_v40  ;;  %v9816_v32 = vpop.eup %7362 }
 0x7f3   : > { %v3152_v35 = vpop.permute.xlu0 %3151  ;;  %v2663_v30 = vpop.permute.xlu1 %2662  ;;  %v2818_v55 = vpack.c.bf16 %v9816_v32, %v9814_v24 }
 0x7f4   : > { %7372 = vpow2.f32 %v2702_v25  ;;  %7077 = vmatprep.subr.msk.bf16.mxu0 %vm1528_vm2, %v3152_v35  ;;  %v3195_v0 = vsel %vm1528_vm2, %v3152_v35, 0  ;;  %v2684_v34 = vsub.f32 %v9532_v44, %v2663_v30 }
 0x7f5   : > { %v9820_v53 = vpop.eup %7364  ;;  %7374 = vpow2.f32 %v2704_v11  ;;  %6793 = vmatpush3.bf16.xpose.msra.mxu0 %v3195_v0 }
 0x7f6   : > { %v9822_v42 = vpop.eup %7366  ;;  %v2714_v45 = vmul.f32 1.442695, %v2684_v34 }
 0x7f7   : > { %v2658_v63 = vpop.permute.xlu0 %2657  ;;  %v2653_v52 = vpop.permute.xlu1 %2652  ;;  %v2817_v46 = vpack.c.bf16 %v9822_v42, %v9820_v53 }
 0x7f8   : > { %v2683_v56 = vsub.f32 %v9540_v54, %v2658_v63  ;;  %v2682_v27 = vsub.f32 %v9534_v31, %v2653_v52 }
 0x7f9   : > { %6774 = vmatprep.mubr.bf16.mxu0 %v2817_v46 }
 0x7fa   : > { %v2712_v58 = vmul.f32 1.442695, %v2683_v56  ;;  %v2710_v23 = vmul.f32 1.442695, %v2682_v27  ;;  %6775 = vmatmul.mubr.bf16.gmra.mrb[36].mxu0 %v2818_v55  ;;  %v9831_v44 = vpop.eup %7368 }
 0x7fb   : > { %v2668_v21 = vpop.permute.xlu0 %2667  ;;  %v3154_v43 = vpop.permute.xlu1 %3153 }
 0x7fc   : > { %7376 = vpow2.f32 %v2712_v58  ;;  %v2685_v40 = vsub.f32 %v9536_v4, %v2668_v21  ;;  %7078 = vmatprep.subr.msk.bf16.mxu0 %vm1528_vm2, %v3154_v43  ;;  %v3198_v54 = vsel %vm1528_vm2, %v3154_v43, 0  ;;  %v9836_v31 = vpop.eup %7370 }
 0x7fd   : > { %11703 = vst [vmem:[#allocation128_spill] sm:$0xff] %v9836_v31  ;;  %7378 = vpow2.f32 %v2710_v23  ;;  %6795 = vmatpush3.bf16.xpose.msra.mxu0 %v3198_v54  ;;  %v2820_v34 = vpack.c.bf16 %v9836_v31, %v9831_v44 }
 0x7fe   : > { %v9838_v25 = vpop.eup %7372  ;;  %v2716_v11 = vmul.f32 1.442695, %v2685_v40  ;;  %7380 = vpow2.f32 %v2714_v45 }
 0x7ff   : > { %v9840_v35 = vpop.eup %7374  ;;  %v3156_v30 = vpop.permute.xlu0 %3155 }
 0x800   : > { %11704 = vst [vmem:[#allocation129_spill] sm:$0xff] %v9840_v35  ;;  %v3158_v0 = vpop.permute.xlu1 %3157  ;;  %7382 = vpow2.f32 %v2716_v11  ;;  %7079 = vmatprep.subr.msk.bf16.mxu0 %vm1528_vm2, %v3156_v30  ;;  %v2819_v4 = vpack.c.bf16 %v9840_v35, %v9838_v25  ;;  %v3201_v46 = vsel %vm1528_vm2, %v3156_v30, 0 }
 0x801   : > { %v3204_v11 = vsel %vm1528_vm2, %v3158_v0, 0 }
 0x802   : > { %6778 = vmatprep.mubr.bf16.mxu0 %v2819_v4 }
 0x803   : > { %6779 = vmatmul.mubr.bf16.gmra.mrb[40].mxu0 %v2820_v34  ;;  %v3160_v63 = vpop.permute.xlu0 %3159 }
 0x804   : > { %v3130_v52 = vpop.permute.xlu1 %3129 }
 0x805   : > { %6797 = vmatpush3.bf16.xpose.msra.mxu0 %v3201_v46  ;;  %v3207_v46 = vsel %vm1528_vm2, %v3160_v63, 0 }
 0x806   : > { %v9848_v56 = vpop.eup %7376  ;;  %7080 = vmatprep.subr.msk.bf16.mxu0 %vm1528_vm2, %v3158_v0 }
 0x807   : > { %11705 = vst [vmem:[#allocation130_spill] sm:$0xff] %v9848_v56  ;;  %v9851_v27 = vpop.eup %7378  ;;  %v3132_v55 = vpop.permute.xlu0 %3131 }
 0x808   : > { %v3134_v58 = vpop.permute.xlu1 %3133  ;;  %v2821_v23 = vpack.c.bf16 %v9848_v56, %v9851_v27  ;;  %v9855_v45 = vpop.eup %7380 }
 0x80a   : > { %v9857_v21 = vpop.eup %7382  ;;  %6782 = vmatprep.mubr.bf16.mxu0 %v2821_v23 }
 0x80b   : > { %11706 = vst [vmem:[#allocation131_spill] sm:$0xff] %v9857_v21  ;;  %v3136_v43 = vpop.permute.xlu0 %3135  ;;  %v2822_v54 = vpack.c.bf16 %v9857_v21, %v9855_v45 }
 0x80c   : > { %v3138_v40 = vpop.permute.xlu1 %3137 }
 0x80d   : > { %6783 = vmatmul.mubr.bf16.gmra.mrb[44].mxu0 %v2822_v54 }
 0x80e   : > { %6799 = vmatpush3.bf16.xpose.msra.mxu0 %v3204_v11  ;;  %6802 = vmatprep.mubr.msk.bf16.mxu0 %vm1528_vm2, %v3130_v52 }
 0x80f   : > { %7081 = vmatprep.subr.msk.bf16.mxu0 %vm1528_vm2, %v3160_v63  ;;  %v3140_v30 = vpop.permute.xlu0 %3139 }
 0x810   : > { %v3142_v4 = vpop.permute.xlu1 %3141 }
 0x813   : > { %v3144_v34 = vpop.permute.xlu0 %3143 }
 0x814   : > { %v3655_v23 = vpop.permute.xlu1 %3654 }
 0x816   : > { %6801 = vmatpush3.bf16.xpose.msra.mxu0 %v3207_v46 }
 0x817   : > { %v3653_v56 = vpop.permute.xlu0 %3652 }
 0x818   : > { %6818 = vmatprep.subr.bf16.mxu1 %v3653_v56  ;;  %v3657_v21 = vpop.permute.xlu1 %3656 }
 0x819   : > { %6819 = vmatpush3.bf16.msra.mxu1 %v3653_v56 }
 0x81a   : > { %6820 = vmatprep.subr.bf16.mxu1 %v3655_v23 }
 0x81b   : > { %v3659_v0 = vpop.permute.xlu0 %3658 }
 0x81c   : > { %v3661_v52 = vpop.permute.xlu1 %3660 }
 0x81d   : > { %6803 = vmatmul.mubr.msk.bf16.vlgmr.msra.gmra.mrb[48].mxu0 %vm1528_vm2, %v3132_v55  ;;  %6821 = vmatpush3.bf16.msra.mxu1 %v3655_v23 }
 0x81e   : > { %6822 = vmatprep.subr.bf16.mxu1 %v3657_v21  ;;  %6806 = vmatprep.mubr.msk.bf16.mxu0 %vm1528_vm2, %v3134_v58 }
 0x81f   : > { %v3663_v63 = vpop.permute.xlu0 %3662 }
 0x820   : > { %v3665_v56 = vpop.permute.xlu1 %3664 }
 0x821   : > { %6823 = vmatpush3.bf16.msra.mxu1 %v3657_v21 }
 0x822   : > { %6824 = vmatprep.subr.bf16.mxu1 %v3659_v0 }
 0x825   : > { %6825 = vmatpush3.bf16.msra.mxu1 %v3659_v0  ;;  %6807 = vmatmul.mubr.msk.bf16.gmra.mrb[52].mxu0 %vm1528_vm2, %v3136_v43 }
 0x826   : > { %6826 = vmatprep.subr.bf16.mxu1 %v3661_v52  ;;  %6810 = vmatprep.mubr.msk.bf16.mxu0 %vm1528_vm2, %v3138_v40 }
 0x829   : > { %6827 = vmatpush3.bf16.msra.mxu1 %v3661_v52 }
 0x82a   : > { %6828 = vmatprep.subr.bf16.mxu1 %v3663_v63 }
 0x82d   : > { %6829 = vmatpush3.bf16.msra.mxu1 %v3663_v63  ;;  %6811 = vmatmul.mubr.msk.bf16.gmra.mrb[56].mxu0 %vm1528_vm2, %v3140_v30 }
 0x82e   : > { %6830 = vmatprep.subr.bf16.mxu1 %v3665_v56  ;;  %6814 = vmatprep.mubr.msk.bf16.mxu0 %vm1528_vm2, %v3142_v4 }
 0x831   : > { %6831 = vmatpush3.bf16.msra.mxu1 %v3665_v56 }
 0x835   : > { %6815 = vmatmul.mubr.msk.bf16.gmra.mrb[60].mxu0 %vm1528_vm2, %v3144_v34 }
 0x896   : > { %v9872_v55 = vpop.f32.mrb[32].mxu0 }
 0x897   : > { %11707 = vst [vmem:[#allocation132_spill] sm:$0xff] %v9872_v55  ;;  %v9874_v58 = vpop.f32.mrb[33].mxu0 }
 0x898   : > { %11708 = vst [vmem:[#allocation133_spill] sm:$0xff] %v9874_v58  ;;  %v9876_v21 = vpop.f32.mrb[34].mxu0 }
 0x899   : > { %11709 = vst [vmem:[#allocation134_spill] sm:$0xff] %v9876_v21  ;;  %v9878_v43 = vpop.f32.mrb[35].mxu0 }
 0x89a   : > { %11710 = vst [vmem:[#allocation135_spill] sm:$0xff] %v9878_v43 }
 0x8cd   : > { %v9880_v40 = vpop.f32.mrb[36].mxu0 }
 0x8ce   : > { %11711 = vst [vmem:[#allocation136_spill] sm:$0xff] %v9880_v40  ;;  %v9882_v54 = vpop.f32.mrb[37].mxu0 }
 0x8cf   : > { %11712 = vst [vmem:[#allocation137_spill] sm:$0xff] %v9882_v54  ;;  %v9884_v11 = vpop.f32.mrb[38].mxu0 }
 0x8d0   : > { %11713 = vst [vmem:[#allocation138_spill] sm:$0xff] %v9884_v11  ;;  %v9886_v30 = vpop.f32.mrb[39].mxu0 }
 0x8d1   : > { %11714 = vst [vmem:[#allocation139_spill] sm:$0xff] %v9886_v30 }
 0x8d6   : > { %v9888_v4 = vpop.f32.mrb[40].mxu0 }
 0x8d7   : > { %11715 = vst [vmem:[#allocation140_spill] sm:$0xff] %v9888_v4  ;;  %v9890_v46 = vpop.f32.mrb[41].mxu0 }
 0x8d8   : > { %11716 = vst [vmem:[#allocation141_spill] sm:$0xff] %v9890_v46  ;;  %v9892_v34 = vpop.f32.mrb[42].mxu0 }
 0x8d9   : > { %11717 = vst [vmem:[#allocation142_spill] sm:$0xff] %v9892_v34  ;;  %v9894_v23 = vpop.f32.mrb[43].mxu0 }
 0x8da   : > { %11718 = vst [vmem:[#allocation143_spill] sm:$0xff] %v9894_v23 }
 0x8e0   : > { %v9896_v0 = vpop.f32.mrb[44].mxu0 }
 0x8e1   : > { %11719 = vst [vmem:[#allocation144_spill] sm:$0xff] %v9896_v0  ;;  %v9898_v52 = vpop.f32.mrb[45].mxu0 }
 0x8e2   : > { %11720 = vst [vmem:[#allocation145_spill] sm:$0xff] %v9898_v52  ;;  %v9900_v63 = vpop.f32.mrb[46].mxu0 }
 0x8e3   : > { %11721 = vst [vmem:[#allocation146_spill] sm:$0xff] %v9900_v63  ;;  %v9902_v56 = vpop.f32.mrb[47].mxu0 }
 0x8e4   : > { %11722 = vst [vmem:[#allocation147_spill] sm:$0xff] %v9902_v56 }
 0x8f0   : > { %v9904_v40 = vpop.f32.mrb[48].mxu0 }
 0x8f1   : > { %3327 = vmax.xlane.f32.xlu0 %v9904_v40  ;;  %v9907_v11 = vpop.f32.mrb[49].mxu0 }
 0x8f2   : > { %3323 = vmax.xlane.f32.xlu1 %v9907_v11  ;;  %v9910_v4 = vpop.f32.mrb[50].mxu0 }
 0x8f3   : > { %v9912_v34 = vpop.f32.mrb[51].mxu0 }
 0x8f5   : > { %3325 = vmax.xlane.f32.xlu0 %v9912_v34 }
 0x8f6   : > { %3329 = vmax.xlane.f32.xlu1 %v9910_v4 }
 0x8f8   : > { %v9916_v23 = vpop.f32.mrb[52].mxu0 }
 0x8f9   : > { %v9918_v63 = vpop.f32.mrb[53].mxu0 }
 0x8fa   : > { %v9920_v56 = vpop.f32.mrb[54].mxu0 }
 0x8fb   : > { %v9922_v0 = vpop.f32.mrb[55].mxu0 }
 0x900   : > { %v9924_v52 = vpop.f32.mrb[56].mxu0 }
 0x901   : > { %11723 = vst [vmem:[#allocation148_spill] sm:$0xff] %v9924_v52  ;;  %v9926_v46 = vpop.f32.mrb[57].mxu0 }
 0x902   : > { %v9928_v54 = vpop.f32.mrb[58].mxu0 }
 0x903   : > { %11724 = vst [vmem:[#allocation149_spill] sm:$0xff] %v9928_v54  ;;  %v9930_v43 = vpop.f32.mrb[59].mxu0 }
 0x904   : > { %11725 = vst [vmem:[#allocation150_spill] sm:$0xff] %v9930_v43 }
 0x907   : > { %3966 = vrot.lane.b32.xlu1 %v9010_v38, %s8082_s30  ;;  %v9956_v38 = vld [vmem:[#allocation3 + $0x110] sm:$0xff] }
 0x908   : > { %v9934_v30 = vpop.f32.mrb[60].mxu0  ;;  %11730 = vst [vmem:[#allocation155_spill] sm:$0xff] %v9956_v38 }
 0x909   : > { %11726 = vst [vmem:[#allocation151_spill] sm:$0xff] %v9934_v30  ;;  %v9936_v21 = vpop.f32.mrb[61].mxu0 }
 0x90a   : > { %11727 = vst [vmem:[#allocation152_spill] sm:$0xff] %v9936_v21  ;;  %v9938_v55 = vpop.f32.mrb[62].mxu0 }
 0x90b   : > { %11728 = vst [vmem:[#allocation153_spill] sm:$0xff] %v9938_v55  ;;  %3666 = vrot.lane.b32.xlu0 %v9190_v29, %s8081_s5  ;;  %v9942_v58 = vpop.f32.mrb[63].mxu0  ;;  %v9958_v29 = vld [vmem:[#allocation3 + $0x100] sm:$0xff] }
 0x90c   : > { %11729 = vst [vmem:[#allocation154_spill] sm:$0xff] %v9942_v58  ;;  %11731 = vst [vmem:[#allocation156_spill] sm:$0xff] %v9958_v29 }
 0x92a   : > { %3335 = vmax.xlane.f32.xlu0 %v9916_v23 }
 0x92b   : > { %3337 = vmax.xlane.f32.xlu1 %v9920_v56 }
 0x92e   : > { %3331 = vmax.xlane.f32.xlu0 %v9918_v63 }
 0x92f   : > { %3333 = vmax.xlane.f32.xlu1 %v9922_v0 }
 0x932   : > { %3343 = vmax.xlane.f32.xlu0 %v9924_v52 }
 0x933   : > { %3345 = vmax.xlane.f32.xlu1 %v9928_v54 }
 0x936   : > { %3339 = vmax.xlane.f32.xlu0 %v9926_v46 }
 0x937   : > { %3341 = vmax.xlane.f32.xlu1 %v9930_v43  ;;  %v9966_v43 = vld [vmem:[#allocation3 + $0x108] sm:$0xff] }
 0x93a   : > { %3351 = vmax.xlane.f32.xlu0 %v9934_v30 }
 0x93b   : > { %3353 = vmax.xlane.f32.xlu1 %v9938_v55 }
 0x93e   : > { %3347 = vmax.xlane.f32.xlu0 %v9936_v21 }
 0x93f   : > { %3349 = vmax.xlane.f32.xlu1 %v9942_v58  ;;  %v9973_v58 = vld [vmem:[#allocation3 + $0x118] sm:$0xff] }
 0x940   : > { %11734 = vst [vmem:[#allocation159_spill] sm:$0xff] %v9973_v58 }
 0x97e   : > { %v3328_v31 = vpop.xlane.xlu0 %3327 }
 0x97f   : > { %v9961_v52 = vmax.f32 %v9956_v38, %v3328_v31  ;;  %v3324_v54 = vpop.xlane.xlu1 %3323  ;;  %v10005_v31 = vld [vmem:[#allocation3 + $0x130] sm:$0xff]  ;;  %v10007_v38 = vld [vmem:[#allocation3 + $0x138] sm:$0xff] }
 0x980   : > { %v9964_v35 = vmax.f32 %v9958_v29, %v3324_v54  ;;  %11736 = vst [vmem:[#allocation161_spill] sm:$0xff] %v10005_v31  ;;  %11737 = vst [vmem:[#allocation162_spill] sm:$0xff] %v10007_v38 }
 0x981   : > { %11732 = vst [vmem:[#allocation157_spill] sm:$0xff] %v9961_v52  ;;  %3920 = vst.msk [vmem:[#allocation3 + $0x110] sm:$0xff] %vm1994_vm3, %v9961_v52  ;;  %3431 = vperm.xlu1 %7287, %v9961_v52  }
 0x982   : > { %11733 = vst [vmem:[#allocation158_spill] sm:$0xff] %v9964_v35  ;;  %3918 = vst.msk [vmem:[#allocation3 + $0x100] sm:$0xff] %vm1994_vm3, %v9964_v35  ;;  %v3326_v54 = vpop.xlane.xlu0 %3325 }
 0x983   : > { %v9980_v30 = vmax.f32 %v9966_v43, %v3326_v54  ;;  %v3330_v21 = vpop.xlane.xlu1 %3329 }
 0x984   : > { %v9983_v55 = vmax.f32 %v9973_v58, %v3330_v21 }
 0x985   : > { %3919 = vst.msk [vmem:[#allocation3 + $0x108] sm:$0xff] %vm1994_vm3, %v9980_v30  ;;  %3421 = vperm.xlu1 %7287, %v9964_v35   ;;  %v10015_v35 = vld [vmem:[#allocation3 + $0x120] sm:$0xff] }
 0x986   : > { %11735 = vst [vmem:[#allocation160_spill] sm:$0xff] %v9983_v55  ;;  %3921 = vst.msk [vmem:[#allocation3 + $0x118] sm:$0xff] %vm1994_vm3, %v9983_v55  ;;  %v3667_v54 = vpop.permute.xlu0 %3666  ;;  %3436 = vperm.xlu0 %7286, %v9983_v55  }
 0x987   : > { %6832 = vmatprep.subr.bf16.mxu1 %v3667_v54  ;;  %v9995_v21 = vpop.permute.xlu1 %3966  ;;  %11740 = vst [vmem:[#allocation165_spill] sm:$0xff] %v10015_v35 }
 0x988   : > { %6833 = vmatpush3.bf16.msra.mxu1 %v3667_v54 }
 0x989   : > { %7082 = vmatprep.subr.msk.bf16.mxu1 %vm1528_vm2, %v9995_v21 }
 0x98a   : > { %3426 = vperm.xlu0 %7286, %v9980_v30  }
 0x98e   : > { %3968 = vrot.lane.b32.xlu0 %v9008_v37, %s8082_s30 }
 0x992   : > { %3970 = vrot.lane.b32.xlu0 %v9020_v49, %s8082_s30  ;;  %v10024_v49 = vld [vmem:[#allocation3 + $0x128] sm:$0xff] }
 0x993   : > { %11741 = vst [vmem:[#allocation166_spill] sm:$0xff] %v10024_v49 }
 0x9a9   : > { %1946 = vadd.xlane.f32.xlu1 %v9376_v13  ;;  %v10045_v13 = vld [vmem:[#allocation3 + $0x158] sm:$0xff] }
 0x9aa   : > { %11744 = vst [vmem:[#allocation169_spill] sm:$0xff] %v10045_v13 }
 0x9b7   : > { %v3336_v55 = vpop.xlane.xlu0 %3335 }
 0x9b8   : > { %v10010_v54 = vmax.f32 %v10005_v31, %v3336_v55  ;;  %v3338_v58 = vpop.xlane.xlu1 %3337  ;;  %v10036_v31 = vld [vmem:[#allocation3 + $0x150] sm:$0xff] }
 0x9b9   : > { %v10013_v52 = vmax.f32 %v10007_v38, %v3338_v58  ;;  %11743 = vst [vmem:[#allocation168_spill] sm:$0xff] %v10036_v31 }
 0x9ba   : > { %11738 = vst [vmem:[#allocation163_spill] sm:$0xff] %v10010_v54  ;;  %3924 = vst.msk [vmem:[#allocation3 + $0x130] sm:$0xff] %vm1994_vm3, %v10010_v54  ;;  %3972 = vrot.lane.b32.xlu1 %v9018_v48, %s8082_s30  ;;  %3451 = vperm.xlu0 %7286, %v10010_v54  }
 0x9bb   : > { %11739 = vst [vmem:[#allocation164_spill] sm:$0xff] %v10013_v52  ;;  %3925 = vst.msk [vmem:[#allocation3 + $0x138] sm:$0xff] %vm1994_vm3, %v10013_v52  ;;  %v3332_v55 = vpop.xlane.xlu0 %3331 }
 0x9bc   : > { %v10031_v58 = vmax.f32 %v10015_v35, %v3332_v55  ;;  %v3334_v37 = vpop.xlane.xlu1 %3333  ;;  %v10057_v35 = vld [vmem:[#allocation3 + $0x140] sm:$0xff]  ;;  %v10066_v55 = vld [vmem:[#allocation3 + $0x148] sm:$0xff] }
 0x9bd   : > { %v10034_v29 = vmax.f32 %v10024_v49, %v3334_v37  ;;  %11747 = vst [vmem:[#allocation172_spill] sm:$0xff] %v10057_v35  ;;  %11748 = vst [vmem:[#allocation173_spill] sm:$0xff] %v10066_v55 }
 0x9be   : > { %3922 = vst.msk [vmem:[#allocation3 + $0x120] sm:$0xff] %vm1994_vm3, %v10031_v58  ;;  %3974 = vrot.lane.b32.xlu1 %v9028_v60, %s8082_s30  ;;  %3441 = vperm.xlu0 %7286, %v10031_v58   ;;  %v10078_v60 = vld [vmem:[#allocation3 + $0x170] sm:$0xff] }
 0x9bf   : > { %11742 = vst [vmem:[#allocation167_spill] sm:$0xff] %v10034_v29  ;;  %3923 = vst.msk [vmem:[#allocation3 + $0x128] sm:$0xff] %vm1994_vm3, %v10034_v29  ;;  %v3344_v37 = vpop.xlane.xlu0 %3343 }
 0x9c0   : > { %v10052_v38 = vmax.f32 %v10036_v31, %v3344_v37  ;;  %v3346_v48 = vpop.xlane.xlu1 %3345  ;;  %v10099_v37 = vld [vmem:[#allocation3 + $0x160] sm:$0xff] }
 0x9c1   : > { %v10055_v54 = vmax.f32 %v10045_v13, %v3346_v48  ;;  %v10087_v13 = vld [vmem:[#allocation3 + $0x178] sm:$0xff] }
 0x9c2   : > { %11745 = vst [vmem:[#allocation170_spill] sm:$0xff] %v10052_v38  ;;  %3978 = vrot.lane.b32.xlu1 %v9036_v7, %s8082_s30  ;;  %3456 = vperm.xlu0 %7286, %v10013_v52   ;;  %3928 = vst.msk [vmem:[#allocation3 + $0x150] sm:$0xff] %vm1994_vm3, %v10052_v38 }
 0x9c3   : > { %11746 = vst [vmem:[#allocation171_spill] sm:$0xff] %v10055_v54  ;;  %3929 = vst.msk [vmem:[#allocation3 + $0x158] sm:$0xff] %vm1994_vm3, %v10055_v54  ;;  %v3340_v48 = vpop.xlane.xlu0 %3339 }
 0x9c4   : > { %v10073_v49 = vmax.f32 %v10057_v35, %v3340_v48  ;;  %v3342_v7 = vpop.xlane.xlu1 %3341  ;;  %11749 = vst [vmem:[#allocation174_spill] sm:$0xff] %v10087_v13 }
 0x9c5   : > { %v10076_v52 = vmax.f32 %v10066_v55, %v3342_v7  ;;  %v10108_v55 = vld [vmem:[#allocation3 + $0x168] sm:$0xff] }
 0x9c6   : > { %3950 = vrot.lane.b32.xlu1 %v9736_v14, %s8082_s30  ;;  %3446 = vperm.xlu0 %7286, %v10034_v29   ;;  %3926 = vst.msk [vmem:[#allocation3 + $0x140] sm:$0xff] %vm1994_vm3, %v10073_v49  ;;  %11751 = vst [vmem:[#allocation176_spill] sm:$0xff] %v10108_v55 }
 0x9c7   : > { %3927 = vst.msk [vmem:[#allocation3 + $0x148] sm:$0xff] %vm1994_vm3, %v10076_v52  ;;  %v3352_v7 = vpop.xlane.xlu0 %3351 }
 0x9c8   : > { %v10094_v31 = vmax.f32 %v10078_v60, %v3352_v7  ;;  %v3354_v14 = vpop.xlane.xlu1 %3353 }
 0x9c9   : > { %v10097_v29 = vmax.f32 %v10087_v13, %v3354_v14 }
 0x9ca   : > { %3954 = vrot.lane.b32.xlu1 %v9742_v28, %s8082_s30  ;;  %3471 = vperm.xlu0 %7286, %v10052_v38   ;;  %3932 = vst.msk [vmem:[#allocation3 + $0x170] sm:$0xff] %vm1994_vm3, %v10094_v31 }
 0x9cb   : > { %11750 = vst [vmem:[#allocation175_spill] sm:$0xff] %v10097_v29  ;;  %3933 = vst.msk [vmem:[#allocation3 + $0x178] sm:$0xff] %vm1994_vm3, %v10097_v29  ;;  %v3348_v14 = vpop.xlane.xlu0 %3347 }
 0x9cc   : > { %v10115_v35 = vmax.f32 %v10099_v37, %v3348_v14  ;;  %v3350_v28 = vpop.xlane.xlu1 %3349 }
 0x9cd   : > { %v10118_v38 = vmax.f32 %v10108_v55, %v3350_v28 }
 0x9ce   : > { %3958 = vrot.lane.b32.xlu1 %v9750_v20, %s8082_s30  ;;  %3461 = vperm.xlu0 %7286, %v10073_v49   ;;  %3930 = vst.msk [vmem:[#allocation3 + $0x160] sm:$0xff] %vm1994_vm3, %v10115_v35 }
 0x9cf   : > { %11752 = vst [vmem:[#allocation177_spill] sm:$0xff] %v10118_v38  ;;  %3931 = vst.msk [vmem:[#allocation3 + $0x168] sm:$0xff] %vm1994_vm3, %v10118_v38 }
 0x9d2   : > { %3962 = vrot.lane.b32.xlu1 %v9758_v62, %s8082_s30  ;;  %3476 = vperm.xlu0 %7286, %v10055_v54   ;;  %v10724_v54 = vld [vmem:[#allocation3 + $0x1f0] sm:$0xff] }
 0x9d6   : > { %3466 = vperm.xlu0 %7286, %v10076_v52  }
 0x9da   : > { %3491 = vperm.xlu0 %7286, %v10094_v31  }
 0x9de   : > { %3481 = vperm.xlu0 %7286, %v10115_v35  }
 0x9e2   : > { %3486 = vperm.xlu0 %7286, %v10118_v38  }
 0x9e6   : > { %3496 = vperm.xlu0 %7286, %v10097_v29  }
 0x9ea   : > { %3976 = vrot.lane.b32.xlu0 %v9026_v59, %s8082_s30 }
 0x9ee   : > { %3980 = vrot.lane.b32.xlu0 %v9034_v6, %s8082_s30 }
 0x9f2   : > { %3952 = vrot.lane.b32.xlu0 %v9744_v9, %s8082_s30 }
 0x9f6   : > { %1948 = vadd.xlane.f32.xlu1 %v9378_v15  ;;  %3956 = vrot.lane.b32.xlu0 %v9752_v12, %s8082_s30 }
 0x9fa   : > { %1954 = vadd.xlane.f32.xlu1 %v9412_v16  ;;  %3960 = vrot.lane.b32.xlu0 %v9760_v22, %s8082_s30 }
 0x9fe   : > { %1958 = vadd.xlane.f32.xlu1 %v9407_v47  ;;  %3964 = vrot.lane.b32.xlu0 %v9766_v3, %s8082_s30 }
 0xa00   : > { %v3432_v59 = vpop.permute.xlu1 %3431 }
 0xa01   : > { %v3501_v12 = vsub.f32 %v9904_v40, %v3432_v59 }
 0xa02   : > { %1962 = vadd.xlane.f32.xlu1 %v9425_v1 }
 0xa03   : > { %v3519_v3 = vmul.f32 1.442695, %v3501_v12 }
 0xa04   : > { %v3422_v6 = vpop.permute.xlu1 %3421 }
 0xa05   : > { %v3499_v9 = vsub.f32 %v9907_v11, %v3422_v6  ;;  %v3437_v15 = vpop.permute.xlu0 %3436 }
 0xa06   : > { %v3502_v62 = vsub.f32 %v9910_v4, %v3437_v15  ;;  %1966 = vadd.xlane.f32.xlu1 %v9434_v51 }
 0xa07   : > { %v3515_v16 = vmul.f32 1.442695, %v3499_v9  ;;  %v11760_v9 = vld [vmem:[#allocation60_spill] sm:$0xff] }
 0xa08   : > { %v3521_v22 = vmul.f32 1.442695, %v3502_v62 }
 0xa09   : > { %v3427_v20 = vpop.permute.xlu0 %3426  ;;  %7384 = vpow2.f32 %v3515_v16  ;;  %v11763_v16 = vld [vmem:[#allocation54_spill] sm:$0xff] }
 0xa0a   : > { %v3500_v47 = vsub.f32 %v9912_v34, %v3427_v20  ;;  %1970 = vadd.xlane.f32.xlu1 %v9445_v57  ;;  %7386 = vpow2.f32 %v3521_v22  ;;  %v11764_v22 = vld [vmem:[#allocation56_spill] sm:$0xff] }
 0xa0b   : > { %v11765_v20 = vsub.f32 %v11763_v16, %v11764_v22  ;;  %v11780_v16 = vld [vmem:[#allocation98_spill] sm:$0xff] }
 0xa0c   : > { %v3517_v1 = vmul.f32 1.442695, %v3500_v47 }
 0xa0d   : > { %v1768_v47 = vmul.f32 1.442695, %v11765_v20 }
 0xa0e   : > { %7388 = vpow2.f32 %v3517_v1  ;;  %1974 = vadd.xlane.f32.xlu1 %v9443_v18 }
 0xa0f   : > { %7390 = vpow2.f32 %v3519_v3 }
 0xa12   : > { %2753 = vadd.xlane.f32.xlu1 %v9788_v5  ;;  %v4007_v5 = vsel %vm1528_vm2, %v9995_v21, 0  ;;  %v11758_v21 = vld [vmem:[#allocation77_spill] sm:$0xff] }
 0xa13   : > { %v10163_v51 = vpop.eup %7384 }
 0xa14   : > { %v10166_v40 = vpop.eup %7386 }
 0xa16   : > { %2759 = vadd.xlane.f32.xlu1 %v9820_v53  ;;  %v3969_v53 = vpop.permute.xlu0 %3968 }
 0xa17   : > { %v4010_v14 = vsel %vm1528_vm2, %v3969_v53, 0 }
 0xa18   : > { %v10168_v11 = vpop.eup %7388 }
 0xa19   : > { %v10170_v4 = vpop.eup %7390  ;;  %v3644_v57 = vpack.c.bf16 %v10168_v11, %v10163_v51 }
 0xa1a   : > { %2763 = vadd.xlane.f32.xlu1 %v9814_v24  ;;  %v3645_v18 = vpack.c.bf16 %v10166_v40, %v10170_v4  ;;  %v11753_v24 = vsub.f32 %v9165_v61, %v9174_v10  ;;  %v3971_v28 = vpop.permute.xlu0 %3970  ;;  %v11754_v61 = vsub.f32 %v9163_v50, %v9170_v2 }
 0xa1b   : > { %6834 = vmatprep.mubr.bf16.mxu1 %v3644_v57 }
 0xa1c   : > { %6835 = vmatmul.mubr.bf16.vlgmr.msra.gmra.mrb[48].mxu1 %v3645_v18  ;;  %v1754_v34 = vmul.f32 1.442695, %v11753_v24  ;;  %v1758_v10 = vmul.f32 1.442695, %v11754_v61  ;;  %v11766_v18 = vld [vmem:[#allocation66_spill] sm:$0xff]  ;;  %v11770_v61 = vld [vmem:[#allocation64_spill] sm:$0xff] }
 0xa1d   : > { %6851 = vmatpush3.bf16.xpose.msra.mxu1 %v4007_v5  ;;  %1950 = vadd.xlane.f32.xlu0 %v9382_v19  ;;  %v4013_v19 = vsel %vm1528_vm2, %v3971_v28, 0  ;;  %v11767_v5 = vld [vmem:[#allocation68_spill] sm:$0xff] }
 0xa1e   : > { %7083 = vmatprep.subr.msk.bf16.mxu1 %vm1528_vm2, %v3969_v53  ;;  %2767 = vadd.xlane.f32.xlu1 %v9838_v25  ;;  %7392 = vpow2.f32 %v1754_v34  ;;  %v11756_v25 = vld [vmem:[#allocation50_spill] sm:$0xff]  ;;  %v11768_v53 = vsub.f32 %v11766_v18, %v11767_v5  ;;  %v11782_v18 = vld [vmem:[#allocation129_spill] sm:$0xff] }
 0xa1f   : > { %7394 = vpow2.f32 %v1758_v10 }
 0xa20   : > { %v1772_v24 = vmul.f32 1.442695, %v11768_v53  ;;  %v11783_v53 = vld [vmem:[#allocation149_spill] sm:$0xff] }
 0xa21   : > { %1952 = vadd.xlane.f32.xlu0 %v9384_v41 }
 0xa22   : > { %2771 = vadd.xlane.f32.xlu1 %v9831_v44  ;;  %v11755_v44 = vld [vmem:[#allocation47_spill] sm:$0xff] }
 0xa25   : > { %6853 = vmatpush3.bf16.xpose.msra.mxu1 %v4010_v14  ;;  %1956 = vadd.xlane.f32.xlu0 %v9414_v17  ;;  %v1914_v17 = vld [vmem:[#allocation4] sm:$0xff] }
 0xa26   : > { %7084 = vmatprep.subr.msk.bf16.mxu1 %vm1528_vm2, %v3971_v28  ;;  %2775 = vadd.xlane.f32.xlu1 %v9851_v27  ;;  %v11757_v27 = vsub.f32 %v11755_v44, %v11756_v25 }
 0xa28   : > { %v7393_v41 = vpop.eup %7392 }
 0xa29   : > { %1960 = vadd.xlane.f32.xlu0 %v9419_v33  ;;  %v1760_v33 = vmul.f32 1.442695, %v11757_v27  ;;  %v10214_v1 = vpop.eup %7394 }
 0xa2a   : > { %2779 = vadd.xlane.f32.xlu1 %v9855_v45  ;;  %v1930_v45 = vmul.f32 %v7393_v41, %v1914_v17 }
 0xa2b   : > { %7396 = vpow2.f32 %v1760_v33 }
 0xa2d   : > { %6855 = vmatpush3.bf16.xpose.msra.mxu1 %v4013_v19  ;;  %1964 = vadd.xlane.f32.xlu0 %v9430_v39  ;;  %v11759_v39 = vld [vmem:[#allocation58_spill] sm:$0xff] }
 0xa2e   : > { %v11761_v15 = vsub.f32 %v11759_v39, %v11760_v9  ;;  %v11769_v19 = vld [vmem:[#allocation62_spill] sm:$0xff] }
 0xa2f   : > { %v11771_v10 = vsub.f32 %v11769_v19, %v11770_v61  ;;  %v11787_v61 = vld [vmem:[#allocation148_spill] sm:$0xff] }
 0xa30   : > { %v1764_v50 = vmul.f32 1.442695, %v11761_v15 }
 0xa31   : > { %1968 = vadd.xlane.f32.xlu0 %v9428_v26  ;;  %v11762_v26 = vld [vmem:[#allocation78_spill] sm:$0xff] }
 0xa32   : > { %7398 = vpow2.f32 %v1764_v50  ;;  %v11777_v50 = vld [vmem:[#allocation72_spill] sm:$0xff] }
 0xa33   : > { %7400 = vpow2.f32 %v1768_v47 }
 0xa34   : > { %7402 = vpow2.f32 %v1772_v24 }
 0xa35   : > { %1972 = vadd.xlane.f32.xlu0 %v11758_v21  ;;  %v10223_v28 = vpop.eup %7396 }
 0xa36   : > { %v1947_v59 = vpop.xlane.xlu1 %1946 }
 0xa37   : > { %v1978_v6 = vadd.f32 %v1947_v59, %v1930_v45  ;;  %v11774_v45 = vld [vmem:[#allocation76_spill] sm:$0xff] }
 0xa39   : > { %1995 = vst.msk [vmem:[#allocation4] sm:$0xff] %vm1994_vm3, %v1978_v6  ;;  %v3452_v2 = vpop.permute.xlu0 %3451  ;;  %1976 = vadd.xlane.f32.xlu0 %v11762_v26 }
 0xa3a   : > { %v3973_v62 = vpop.permute.xlu1 %3972  ;;  %v3505_v17 = vsub.f32 %v9916_v23, %v3452_v2  ;;  %v11773_v23 = vld [vmem:[#allocation74_spill] sm:$0xff] }
 0xa3b   : > { %2134 = vperm.xlu1 %7287, %v7393_v41   ;;  %7085 = vmatprep.subr.msk.bf16.mxu1 %vm1528_vm2, %v3973_v62  ;;  %v4016_v12 = vsel %vm1528_vm2, %v3973_v62, 0  ;;  %v1776_v41 = vmul.f32 1.442695, %v11771_v10  ;;  %v11775_v59 = vsub.f32 %v11773_v23, %v11774_v45 }
 0xa3c   : > { %6857 = vmatpush3.bf16.xpose.msra.mxu1 %v4016_v12  ;;  %v10233_v33 = vpop.eup %7398  ;;  %v3527_v21 = vmul.f32 1.442695, %v3505_v17 }
 0xa3d   : > { %v3442_v3 = vpop.permute.xlu0 %3441  ;;  %2751 = vadd.xlane.f32.xlu0 %v9790_v8  ;;  %7404 = vpow2.f32 %v1776_v41  ;;  %v1780_v6 = vmul.f32 1.442695, %v11775_v59  ;;  %v10241_v15 = vpop.eup %7400  ;;  %v11790_v59 = vld [vmem:[#allocation100_spill] sm:$0xff] }
 0xa3e   : > { %v3975_v57 = vpop.permute.xlu1 %3974  ;;  %v3503_v34 = vsub.f32 %v9918_v63, %v3442_v3  ;;  %v10248_v12 = vpop.eup %7402 }
 0xa3f   : > { %2144 = vperm.xlu1 %7287, %v10214_v1   ;;  %7086 = vmatprep.subr.msk.bf16.mxu1 %vm1528_vm2, %v3975_v57  ;;  %v4019_v44 = vsel %vm1528_vm2, %v3975_v57, 0 }
 0xa40   : > { %v3523_v25 = vmul.f32 1.442695, %v3503_v34  ;;  %v11784_v34 = vld [vmem:[#allocation95_spill] sm:$0xff] }
 0xa41   : > { %v3457_v14 = vpop.permute.xlu0 %3456  ;;  %2755 = vadd.xlane.f32.xlu0 %v9794_v36  ;;  %v11772_v36 = vld [vmem:[#allocation127_spill] sm:$0xff] }
 0xa42   : > { %v3506_v8 = vsub.f32 %v9920_v56, %v3457_v14  ;;  %7406 = vpow2.f32 %v3523_v25  ;;  %v11785_v14 = vld [vmem:[#allocation97_spill] sm:$0xff] }
 0xa43   : > { %2149 = vperm.xlu1 %7287, %v10223_v28  }
 0xa44   : > { %6859 = vmatpush3.bf16.xpose.msra.mxu1 %v4019_v44  ;;  %v3529_v63 = vmul.f32 1.442695, %v3506_v8  ;;  %v11786_v8 = vsub.f32 %v11784_v34, %v11785_v14  ;;  %v11799_v34 = vld [vmem:[#allocation151_spill] sm:$0xff] }
 0xa45   : > { %v3447_v27 = vpop.permute.xlu0 %3446  ;;  %2757 = vadd.xlane.f32.xlu0 %v11772_v36 }
 0xa46   : > { %v3504_v56 = vsub.f32 %v9922_v0, %v3447_v27  ;;  %7408 = vpow2.f32 %v3529_v63  ;;  %v11776_v0 = vld [vmem:[#allocation70_spill] sm:$0xff]  ;;  %v2562_v19 = vmul.f32 1.442695, %v11786_v8  ;;  %v11788_v63 = vld [vmem:[#allocation128_spill] sm:$0xff] }
 0xa47   : > { %2159 = vperm.xlu1 %7287, %v10233_v33   ;;  %v11778_v2 = vsub.f32 %v11776_v0, %v11777_v50  ;;  %v10255_v3 = vpop.eup %7404 }
 0xa48   : > { %v3525_v39 = vmul.f32 1.442695, %v3504_v56  ;;  %v11789_v56 = vld [vmem:[#allocation150_spill] sm:$0xff] }
 0xa49   : > { %v3472_v9 = vpop.permute.xlu0 %3471  ;;  %2761 = vadd.xlane.f32.xlu0 %v9822_v42  ;;  %v1784_v26 = vmul.f32 1.442695, %v11778_v2  ;;  %v11779_v42 = vld [vmem:[#allocation96_spill] sm:$0xff]  ;;  %v11793_v2 = vld [vmem:[#allocation130_spill] sm:$0xff] }
 0xa4a   : > { %7410 = vpow2.f32 %v3525_v39  ;;  %v11781_v22 = vsub.f32 %v11779_v42, %v11780_v16  ;;  %v3509_v10 = vsub.f32 %v11787_v61, %v3472_v9  ;;  %v11795_v42 = vld [vmem:[#allocation110_spill] sm:$0xff] }
 0xa4b   : > { %7412 = vpow2.f32 %v3527_v21  ;;  %2169 = vperm.xlu1 %7287, %v10241_v15  }
 0xa4c   : > { %7414 = vpow2.f32 %v1780_v6  ;;  %v2558_v20 = vmul.f32 1.442695, %v11781_v22  ;;  %v10258_v5 = vpop.eup %7406  ;;  %v3535_v45 = vmul.f32 1.442695, %v3509_v10  ;;  %v11791_v6 = vld [vmem:[#allocation102_spill] sm:$0xff] }
 0xa4d   : > { %v3462_v62 = vpop.permute.xlu0 %3461  ;;  %2765 = vadd.xlane.f32.xlu0 %v9816_v32  ;;  %7416 = vpow2.f32 %v1784_v26  ;;  %v11792_v39 = vsub.f32 %v11790_v59, %v11791_v6  ;;  %v11800_v10 = vld [vmem:[#allocation154_spill] sm:$0xff] }
 0xa4e   : > { %v3507_v47 = vsub.f32 %v9926_v46, %v3462_v62  ;;  %7418 = vpow2.f32 %v2558_v20  ;;  %v11794_v62 = vld [vmem:[#allocation108_spill] sm:$0xff] }
 0xa4f   : > { %2179 = vperm.xlu1 %7287, %v10248_v12   ;;  %7420 = vpow2.f32 %v2562_v19  ;;  %v2564_v9 = vmul.f32 1.442695, %v11792_v39  ;;  %v11796_v16 = vsub.f32 %v11794_v62, %v11795_v42  ;;  %v3979_v62 = vpop.permute.xlu1 %3978  ;;  %v11805_v42 = vld [vmem:[#allocation57_spill] sm:$0xff] }
 0xa50   : > { %v10261_v24 = vpop.eup %7408  ;;  %v3531_v41 = vmul.f32 1.442695, %v3507_v47  ;;  %v11797_v47 = vld [vmem:[#allocation131_spill] sm:$0xff] }
 0xa51   : > { %v3477_v57 = vpop.permute.xlu0 %3476  ;;  %2769 = vadd.xlane.f32.xlu0 %v11782_v18  ;;  %v2568_v22 = vmul.f32 1.442695, %v11796_v16  ;;  %v11798_v18 = vld [vmem:[#allocation152_spill] sm:$0xff]  ;;  %v11806_v16 = vld [vmem:[#allocation59_spill] sm:$0xff] }
 0xa52   : > { %v3510_v32 = vsub.f32 %v11783_v53, %v3477_v57  ;;  %7422 = vpow2.f32 %v3531_v41  ;;  %11923 = vst [vmem:[#allocation152_spill] sm:$0xff] %v10724_v54 }
 0xa53   : > { %2189 = vperm.xlu1 %7287, %v10255_v3  }
 0xa54   : > { %v10268_v46 = vpop.eup %7410  ;;  %v3537_v44 = vmul.f32 1.442695, %v3510_v32 }
 0xa55   : > { %v10270_v17 = vpop.eup %7412  ;;  %v3467_v25 = vpop.permute.xlu0 %3466  ;;  %2773 = vadd.xlane.f32.xlu0 %v11788_v63  ;;  %v3646_v27 = vpack.c.bf16 %v10268_v46, %v10258_v5  ;;  %v11801_v63 = vld [vmem:[#allocation48_spill] sm:$0xff] }
 0xa56   : > { %v10275_v36 = vpop.eup %7414  ;;  %v3508_v21 = vsub.f32 %v11789_v56, %v3467_v25  ;;  %v3647_v23 = vpack.c.bf16 %v10261_v24, %v10270_v17  ;;  %7424 = vpow2.f32 %v3537_v44 }
 0xa57   : > { %2199 = vperm.xlu1 %7287, %v10275_v36   ;;  %6838 = vmatprep.mubr.bf16.mxu1 %v3646_v27  ;;  %v10285_v26 = vpop.eup %7416  ;;  %v11802_v27 = vld [vmem:[#allocation52_spill] sm:$0xff] }
 0xa58   : > { %v3533_v0 = vmul.f32 1.442695, %v3508_v21  ;;  %6839 = vmatmul.mubr.bf16.gmra.mrb[52].mxu1 %v3647_v23  ;;  %v10292_v57 = vpop.eup %7418  ;;  %v11803_v56 = vsub.f32 %v11801_v63, %v11802_v27  ;;  %v11811_v27 = vld [vmem:[#allocation42_spill] sm:$0xff] }
 0xa59   : > { %v3492_v50 = vpop.permute.xlu0 %3491  ;;  %2777 = vadd.xlane.f32.xlu0 %v11793_v2  ;;  %v10296_v32 = vpop.eup %7420 }
 0xa5a   : > { %7426 = vpow2.f32 %v3533_v0  ;;  %v3513_v14 = vsub.f32 %v11799_v34, %v3492_v50  ;;  %v1756_v21 = vmul.f32 1.442695, %v11803_v56  ;;  %v11804_v0 = vld [vmem:[#allocation153_spill] sm:$0xff] }
 0xa5b   : > { %7428 = vpow2.f32 %v3535_v45  ;;  %2209 = vperm.xlu1 %7287, %v10285_v26  }
 0xa5c   : > { %7430 = vpow2.f32 %v2564_v9  ;;  %v10299_v61 = vpop.eup %7422  ;;  %v3543_v59 = vmul.f32 1.442695, %v3513_v14  ;;  %v3951_v14 = vpop.permute.xlu1 %3950 }
 0xa5d   : > { %v3482_v20 = vpop.permute.xlu0 %3481  ;;  %2781 = vadd.xlane.f32.xlu0 %v11797_v47  ;;  %7432 = vpow2.f32 %v2568_v22  ;;  %v11807_v22 = vsub.f32 %v11805_v42, %v11806_v16  ;;  %v11815_v42 = vld [vmem:[#allocation41_spill] sm:$0xff]  ;;  %v4025_v16 = vsel %vm1528_vm2, %v3979_v62, 0 }
 0xa5e   : > { %v3511_v53 = vsub.f32 %v11798_v18, %v3482_v20 }
 0xa5f   : > { %2971 = vperm.xlu1 %7287, %v10292_v57   ;;  %v1762_v20 = vmul.f32 1.442695, %v11807_v22 }
 0xa60   : > { %v3539_v8 = vmul.f32 1.442695, %v3511_v53  ;;  %v10302_v44 = vpop.eup %7424 }
 0xa61   : > { %v3487_v19 = vpop.permute.xlu0 %3486 }
 0xa62   : > { %v3512_v41 = vsub.f32 %v11800_v10, %v3487_v19  ;;  %7434 = vpow2.f32 %v3539_v8  ;;  %v11808_v8 = vld [vmem:[#allocation53_spill] sm:$0xff]  ;;  %v11809_v19 = vld [vmem:[#allocation55_spill] sm:$0xff] }
 0xa63   : > { %2981 = vperm.xlu1 %7287, %v10296_v32   ;;  %v11810_v10 = vsub.f32 %v11808_v8, %v11809_v19 }
 0xa64   : > { %v10305_v25 = vpop.eup %7426  ;;  %v3541_v23 = vmul.f32 1.442695, %v3512_v41 }
 0xa65   : > { %v10310_v45 = vpop.eup %7428  ;;  %v3497_v6 = vpop.permute.xlu0 %3496  ;;  %v3648_v39 = vpack.c.bf16 %v10305_v25, %v10299_v61  ;;  %v1766_v41 = vmul.f32 1.442695, %v11810_v10 }
 0xa66   : > { %v10314_v9 = vpop.eup %7430  ;;  %7436 = vpow2.f32 %v3541_v23  ;;  %v3514_v50 = vsub.f32 %v11804_v0, %v3497_v6  ;;  %v3649_v2 = vpack.c.bf16 %v10302_v44, %v10310_v45  ;;  %v11813_v23 = vld [vmem:[#allocation67_spill] sm:$0xff]  ;;  %v3955_v0 = vpop.permute.xlu1 %3954 }
 0xa67   : > { %2986 = vperm.xlu1 %7287, %v10314_v9   ;;  %6842 = vmatprep.mubr.bf16.mxu1 %v3648_v39  ;;  %7438 = vpow2.f32 %v1756_v21  ;;  %v10323_v53 = vpop.eup %7432  ;;  %v11812_v21 = vld [vmem:[#allocation65_spill] sm:$0xff] }
 0xa68   : > { %v3545_v47 = vmul.f32 1.442695, %v3514_v50  ;;  %6843 = vmatmul.mubr.bf16.gmra.mrb[56].mxu1 %v3649_v2  ;;  %7440 = vpow2.f32 %v3543_v59  ;;  %v11814_v59 = vsub.f32 %v11812_v21, %v11813_v23 }
 0xa69   : > { %v3977_v18 = vpop.permute.xlu0 %3976 }
 0xa6a   : > { %7442 = vpow2.f32 %v3545_v47  ;;  %7087 = vmatprep.subr.msk.bf16.mxu1 %vm1528_vm2, %v3977_v18  ;;  %v4022_v34 = vsel %vm1528_vm2, %v3977_v18, 0  ;;  %v1770_v6 = vmul.f32 1.442695, %v11814_v59  ;;  %v11817_v47 = vld [vmem:[#allocation63_spill] sm:$0xff] }
 0xa6b   : > { %2996 = vperm.xlu1 %7287, %v10323_v53   ;;  %6861 = vmatpush3.bf16.xpose.msra.mxu1 %v4022_v34  ;;  %7444 = vpow2.f32 %v1762_v20  ;;  %v11816_v20 = vld [vmem:[#allocation61_spill] sm:$0xff] }
 0xa6c   : > { %7088 = vmatprep.subr.msk.bf16.mxu1 %vm1528_vm2, %v3979_v62  ;;  %v10332_v63 = vpop.eup %7434  ;;  %7446 = vpow2.f32 %v1766_v41  ;;  %v11818_v18 = vsub.f32 %v11816_v20, %v11817_v47  ;;  %v3959_v41 = vpop.permute.xlu1 %3958  ;;  %v11819_v62 = vld [vmem:[#allocation73_spill] sm:$0xff] }
 0xa6d   : > { %7448 = vpow2.f32 %v1770_v6  ;;  %v3981_v8 = vpop.permute.xlu0 %3980 }
 0xa6e   : > { %v1774_v34 = vmul.f32 1.442695, %v11818_v18  ;;  %v4028_v6 = vsel %vm1528_vm2, %v3981_v8, 0 }
 0xa6f   : > { %4473 = vrot.lane.b32.xlu1 %v11811_v27, %s8082_s30  ;;  %v11820_v27 = vld [vmem:[#allocation75_spill] sm:$0xff] }
 0xa70   : > { %v10336_v56 = vpop.eup %7436  ;;  %7450 = vpow2.f32 %v1774_v34  ;;  %v11821_v21 = vsub.f32 %v11819_v62, %v11820_v27  ;;  %v3963_v47 = vpop.permute.xlu1 %3962  ;;  %v1915_v34 = vld [vmem:[#allocation4 + $0x8] sm:$0xff]  ;;  %v11826_v62 = vld [vmem:[#allocation101_spill] sm:$0xff] }
 0xa71   : > { %v3650_v39 = vpack.c.bf16 %v10336_v56, %v10332_v63  ;;  %v7439_v50 = vpop.eup %7438 }
 0xa72   : > { %v10343_v2 = vpop.eup %7440  ;;  %v1778_v23 = vmul.f32 1.442695, %v11821_v21  ;;  %v1931_v48 = vmul.f32 %v7439_v50, %v1915_v34  ;;  %v11831_v34 = vld [vmem:[#allocation103_spill] sm:$0xff] }
 0xa73   : > { %4475 = vrot.lane.b32.xlu1 %v11815_v42, %s8082_s30  ;;  %2139 = vperm.xlu0 %7286, %v7439_v50   ;;  %v11823_v42 = vld [vmem:[#allocation71_spill] sm:$0xff] }
 0xa74   : > { %v10348_v22 = vpop.eup %7442  ;;  %6846 = vmatprep.mubr.bf16.mxu1 %v3650_v39  ;;  %6863 = vmatpush3.bf16.xpose.msra.mxu1 %v4025_v16  ;;  %v11822_v39 = vld [vmem:[#allocation69_spill] sm:$0xff]  ;;  %7452 = vpow2.f32 %v1778_v23  ;;  %v11828_v23 = vld [vmem:[#allocation107_spill] sm:$0xff] }
 0xa75   : > { %7089 = vmatprep.subr.msk.bf16.mxu1 %vm1528_vm2, %v3981_v8  ;;  %v3651_v19 = vpack.c.bf16 %v10348_v22, %v10343_v2  ;;  %v7445_v10 = vpop.eup %7444  ;;  %v11824_v16 = vsub.f32 %v11822_v39, %v11823_v42  ;;  %v1918_v39 = vld [vmem:[#allocation4 + $0x20] sm:$0xff]  ;;  %v1920_v50 = vld [vmem:[#allocation4 + $0x30] sm:$0xff] }
 0xa76   : > { %v7447_v59 = vpop.eup %7446 }
 0xa77   : > { %2154 = vperm.xlu0 %7286, %v7445_v10   ;;  %6847 = vmatmul.mubr.bf16.gmra.mrb[60].mxu1 %v3651_v19  ;;  %v1782_v20 = vmul.f32 1.442695, %v11824_v16  ;;  %v7449_v18 = vpop.eup %7448  ;;  %v11825_v19 = vld [vmem:[#allocation99_spill] sm:$0xff] }
 0xa78   : > { %6866 = vmatprep.mubr.msk.bf16.mxu1 %vm1528_vm2, %v3951_v14  ;;  %v11827_v27 = vsub.f32 %v11825_v19, %v11826_v62  ;;  %v3953_v14 = vpop.permute.xlu0 %3952  ;;  %v1934_v19 = vmul.f32 %v7445_v10, %v1918_v39  ;;  %v11834_v10 = vld [vmem:[#allocation104_spill] sm:$0xff] }
 0xa79   : > { %7454 = vpow2.f32 %v1782_v20 }
 0xa7a   : > { %v2560_v21 = vmul.f32 1.442695, %v11827_v27  ;;  %v7451_v7 = vpop.eup %7450  ;;  %v11832_v27 = vld [vmem:[#allocation105_spill] sm:$0xff] }
 0xa7b   : > { %2164 = vperm.xlu0 %7286, %v7447_v59  }
 0xa7c   : > { %6865 = vmatpush3.bf16.xpose.msra.mxu1 %v4028_v6  ;;  %7456 = vpow2.f32 %v2560_v21  ;;  %v11829_v6 = vld [vmem:[#allocation109_spill] sm:$0xff]  ;;  %v3957_v38 = vpop.permute.xlu0 %3956 }
 0xa7d   : > { %v11830_v42 = vsub.f32 %v11828_v23, %v11829_v6 }
 0xa7e   : > { %v7453_v20 = vpop.eup %7452 }
 0xa7f   : > { %2174 = vperm.xlu0 %7286, %v7449_v18   ;;  %v2566_v16 = vmul.f32 1.442695, %v11830_v42 }
 0xa81   : > { %7458 = vpow2.f32 %v2566_v16 }
 0xa83   : > { %6867 = vmatmul.mubr.msk.bf16.vlgmr.msra.gmra.mrb[64].mxu1 %vm1528_vm2, %v3953_v14  ;;  %2184 = vperm.xlu0 %7286, %v7451_v7   ;;  %v1949_v8 = vpop.xlane.xlu1 %1948  ;;  %v11833_v14 = vsub.f32 %v11831_v34, %v11832_v27  ;;  %v7455_v55 = vpop.eup %7454  ;;  %v1926_v27 = vld [vmem:[#allocation4 + $0x60] sm:$0xff] }
 0xa84   : > { %v1979_v29 = vadd.f32 %v1949_v8, %v1931_v48  ;;  %6870 = vmatprep.mubr.msk.bf16.mxu1 %vm1528_vm2, %v3955_v0  ;;  %v1936_v48 = vmul.f32 %v7447_v59, %v1920_v50  ;;  %v11835_v8 = vld [vmem:[#allocation106_spill] sm:$0xff]  ;;  %v1924_v59 = vld [vmem:[#allocation4 + $0x50] sm:$0xff] }
 0xa85   : > { %v2570_v13 = vmul.f32 1.442695, %v11833_v14  ;;  %v11836_v39 = vsub.f32 %v11834_v10, %v11835_v8  ;;  %v11837_v10 = vld [vmem:[#allocation115_spill] sm:$0xff]  ;;  %v11838_v8 = vld [vmem:[#allocation117_spill] sm:$0xff] }
 0xa86   : > { %1996 = vst.msk [vmem:[#allocation4 + $0x8] sm:$0xff] %vm1994_vm3, %v1979_v29  ;;  %v1922_v29 = vld [vmem:[#allocation4 + $0x40] sm:$0xff]  ;;  %v7457_v42 = vpop.eup %7456 }
 0xa87   : > { %2194 = vperm.xlu0 %7286, %v7453_v20   ;;  %v1955_v62 = vpop.xlane.xlu1 %1954  ;;  %7460 = vpow2.f32 %v2570_v13  ;;  %v2572_v23 = vmul.f32 1.442695, %v11836_v39  ;;  %v1938_v16 = vmul.f32 %v7449_v18, %v1922_v29  ;;  %v1940_v13 = vmul.f32 %v7451_v7, %v1924_v59  ;;  %v11841_v59 = vld [vmem:[#allocation113_spill] sm:$0xff] }
 0xa88   : > { %v1982_v21 = vadd.f32 %v1955_v62, %v1934_v19  ;;  %v3961_v62 = vpop.permute.xlu0 %3960  ;;  %v1942_v18 = vmul.f32 %v7453_v20, %v1926_v27  ;;  %v11839_v7 = vsub.f32 %v11837_v10, %v11838_v8  ;;  %v2720_v20 = vld [vmem:[#allocation4 + $0x88] sm:$0xff]  ;;  %v2723_v27 = vld [vmem:[#allocation4 + $0xa0] sm:$0xff]  ;;  %v2725_v10 = vld [vmem:[#allocation4 + $0xb0] sm:$0xff] }
 0xa89   : > { %7462 = vpow2.f32 %v2572_v23 }
 0xa8a   : > { %1999 = vst.msk [vmem:[#allocation4 + $0x20] sm:$0xff] %vm1994_vm3, %v1982_v21  ;;  %v2574_v39 = vmul.f32 1.442695, %v11839_v7  ;;  %v11846_v7 = vld [vmem:[#allocation119_spill] sm:$0xff] }
 0xa8b   : > { %6871 = vmatmul.mubr.msk.bf16.gmra.mrb[68].mxu1 %vm1528_vm2, %v3957_v38  ;;  %2204 = vperm.xlu0 %7286, %v7455_v55   ;;  %v1959_v0 = vpop.xlane.xlu1 %1958  ;;  %v7459_v50 = vpop.eup %7458 }
 0xa8c   : > { %v1984_v6 = vadd.f32 %v1959_v0, %v1936_v48  ;;  %6874 = vmatprep.mubr.msk.bf16.mxu1 %vm1528_vm2, %v3959_v41  ;;  %v1928_v48 = vld [vmem:[#allocation4 + $0x70] sm:$0xff]  ;;  %v3965_v29 = vpop.permute.xlu0 %3964  ;;  %7464 = vpow2.f32 %v2574_v39 }
 0xa8e   : > { %2001 = vst.msk [vmem:[#allocation4 + $0x30] sm:$0xff] %vm1994_vm3, %v1984_v6  ;;  %v1944_v6 = vmul.f32 %v7455_v55, %v1928_v48  ;;  %v11843_v55 = vld [vmem:[#allocation123_spill] sm:$0xff] }
 0xa8f   : > { %2976 = vperm.xlu0 %7286, %v7457_v42   ;;  %v1963_v19 = vpop.xlane.xlu1 %1962 }
 0xa90   : > { %v1986_v38 = vadd.f32 %v1963_v19, %v1938_v16  ;;  %v11840_v19 = vld [vmem:[#allocation111_spill] sm:$0xff] }
 0xa91   : > { %v7461_v14 = vpop.eup %7460 }
 0xa92   : > { %2003 = vst.msk [vmem:[#allocation4 + $0x40] sm:$0xff] %vm1994_vm3, %v1986_v38  ;;  %v11842_v38 = vsub.f32 %v11840_v19, %v11841_v59  ;;  %v2727_v59 = vld [vmem:[#allocation4 + $0xc0] sm:$0xff] }
 0xa93   : > { %6875 = vmatmul.mubr.msk.bf16.gmra.mrb[72].mxu1 %vm1528_vm2, %v3961_v62  ;;  %2991 = vperm.xlu0 %7286, %v7459_v50   ;;  %v1967_v34 = vpop.xlane.xlu1 %1966  ;;  %v10390_v23 = vpop.eup %7462 }
 0xa94   : > { %v1988_v41 = vadd.f32 %v1967_v34, %v1940_v13  ;;  %6878 = vmatprep.mubr.msk.bf16.mxu1 %vm1528_vm2, %v3963_v47  ;;  %v2578_v62 = vmul.f32 1.442695, %v11842_v38  ;;  %v2736_v13 = vmul.f32 %v7457_v42, %v2720_v20  ;;  %v2741_v42 = vmul.f32 %v7461_v14, %v2725_v10  ;;  %v1916_v20 = vld [vmem:[#allocation4 + $0x10] sm:$0xff] }
 0xa96   : > { %2005 = vst.msk [vmem:[#allocation4 + $0x50] sm:$0xff] %vm1994_vm3, %v1988_v41  ;;  %7466 = vpow2.f32 %v2578_v62 }
 0xa97   : > { %3001 = vperm.xlu0 %7286, %v7461_v14   ;;  %v1971_v21 = vpop.xlane.xlu1 %1970  ;;  %v2729_v14 = vld [vmem:[#allocation4 + $0xd0] sm:$0xff] }
 0xa98   : > { %v1990_v0 = vadd.f32 %v1971_v21, %v1942_v18  ;;  %v11844_v18 = vld [vmem:[#allocation125_spill] sm:$0xff] }
 0xa99   : > { %v11845_v21 = vsub.f32 %v11843_v55, %v11844_v18 }
 0xa9a   : > { %2007 = vst.msk [vmem:[#allocation4 + $0x60] sm:$0xff] %vm1994_vm3, %v1990_v0  ;;  %v2739_v0 = vmul.f32 %v7459_v50, %v2723_v27  ;;  %v1932_v50 = vmul.f32 %v10214_v1, %v1916_v20 }
 0xa9b   : > { %6879 = vmatmul.mubr.msk.bf16.gmra.mrb[76].mxu1 %vm1528_vm2, %v3965_v29  ;;  %3006 = vperm.xlu0 %7286, %v10390_v23   ;;  %v1975_v47 = vpop.xlane.xlu1 %1974  ;;  %v2582_v48 = vmul.f32 1.442695, %v11845_v21 }
 0xa9c   : > { %v1992_v16 = vadd.f32 %v1975_v47, %v1944_v6  ;;  %v11847_v6 = vld [vmem:[#allocation121_spill] sm:$0xff] }
 0xa9d   : > { %v11848_v39 = vsub.f32 %v11846_v7, %v11847_v6  ;;  %7468 = vpow2.f32 %v2582_v48  ;;  %v2731_v7 = vld [vmem:[#allocation4 + $0xe0] sm:$0xff] }
 0xa9e   : > { %2009 = vst.msk [vmem:[#allocation4 + $0x70] sm:$0xff] %vm1994_vm3, %v1992_v16  ;;  %v10407_v16 = vpop.eup %7464 }
 0xa9f   : > { %v2754_v34 = vpop.xlane.xlu1 %2753  ;;  %v2586_v47 = vmul.f32 1.442695, %v11848_v39 }
 0xaa0   : > { %v2784_v41 = vadd.f32 %v2754_v34, %v2736_v13  ;;  %v2743_v13 = vmul.f32 %v10407_v16, %v2727_v59  ;;  %v1917_v34 = vld [vmem:[#allocation4 + $0x18] sm:$0xff]  ;;  %v10412_v27 = vpop.eup %7466 }
 0xaa1   : > { %7470 = vpow2.f32 %v2586_v47  ;;  %v1933_v21 = vmul.f32 %v10223_v28, %v1917_v34  ;;  %v2745_v1 = vmul.f32 %v10412_v27, %v2729_v14  ;;  %v1923_v34 = vld [vmem:[#allocation4 + $0x48] sm:$0xff] }
 0xaa2   : > { %2800 = vst.msk [vmem:[#allocation4 + $0x88] sm:$0xff] %vm1994_vm3, %v2784_v41 }
 0xaa3   : > { %v2760_v29 = vpop.xlane.xlu1 %2759 }
 0xaa4   : > { %v2787_v8 = vadd.f32 %v2760_v29, %v2739_v0  ;;  %v1919_v0 = vld [vmem:[#allocation4 + $0x28] sm:$0xff] }
 0xaa5   : > { %v1935_v39 = vmul.f32 %v10233_v33, %v1919_v0 }
 0xaa6   : > { %2803 = vst.msk [vmem:[#allocation4 + $0xa0] sm:$0xff] %vm1994_vm3, %v2787_v8 }
 0xaa7   : > { %v2764_v19 = vpop.xlane.xlu1 %2763  ;;  %v10418_v29 = vpop.eup %7468 }
 0xaa8   : > { %v2789_v38 = vadd.f32 %v2764_v19, %v2741_v42  ;;  %v2747_v28 = vmul.f32 %v10418_v29, %v2731_v7  ;;  %v1921_v42 = vld [vmem:[#allocation4 + $0x38] sm:$0xff]  ;;  %v2118_v7 = vld [vmem:[#allocation5 + $0x10] sm:$0xff] }
 0xaaa   : > { %2805 = vst.msk [vmem:[#allocation4 + $0xb0] sm:$0xff] %vm1994_vm3, %v2789_v38  ;;  %v1951_v62 = vpop.xlane.xlu0 %1950  ;;  %v2733_v38 = vld [vmem:[#allocation4 + $0xf0] sm:$0xff] }
 0xaab   : > { %v1980_v41 = vadd.f32 %v1951_v62, %v1932_v50  ;;  %v2768_v55 = vpop.xlane.xlu1 %2767  ;;  %v10424_v20 = vpop.eup %7470  ;;  %v1937_v62 = vmul.f32 %v10241_v15, %v1921_v42 }
 0xaac   : > { %v2791_v18 = vadd.f32 %v2768_v55, %v2743_v13  ;;  %v2749_v33 = vmul.f32 %v10424_v20, %v2733_v38  ;;  %v2119_v38 = vld [vmem:[#allocation5 + $0x18] sm:$0xff] }
 0xaad   : > { %1997 = vst.msk [vmem:[#allocation4 + $0x10] sm:$0xff] %vm1994_vm3, %v1980_v41 }
 0xaae   : > { %2807 = vst.msk [vmem:[#allocation4 + $0xc0] sm:$0xff] %vm1994_vm3, %v2791_v18  ;;  %v1953_v48 = vpop.xlane.xlu0 %1952  ;;  %v1939_v18 = vmul.f32 %v10248_v12, %v1923_v34 }
 0xaaf   : > { %v1981_v10 = vadd.f32 %v1953_v48, %v1933_v21  ;;  %v2772_v8 = vpop.xlane.xlu1 %2771  ;;  %v2116_v21 = vld [vmem:[#allocation5] sm:$0xff] }
 0xab0   : > { %v2793_v6 = vadd.f32 %v2772_v8, %v2745_v1  ;;  %v1925_v1 = vld [vmem:[#allocation4 + $0x58] sm:$0xff] }
 0xab1   : > { %1998 = vst.msk [vmem:[#allocation4 + $0x18] sm:$0xff] %vm1994_vm3, %v1981_v10  ;;  %v1941_v8 = vmul.f32 %v10255_v3, %v1925_v1  ;;  %v2719_v1 = vld [vmem:[#allocation4 + $0x80] sm:$0xff] }
 0xab2   : > { %2809 = vst.msk [vmem:[#allocation4 + $0xd0] sm:$0xff] %vm1994_vm3, %v2793_v6  ;;  %v1957_v47 = vpop.xlane.xlu0 %1956  ;;  %v11849_v6 = vld [vmem:[#allocation80_spill] sm:$0xff] }
 0xab3   : > { %v1983_v19 = vadd.f32 %v1957_v47, %v1935_v39  ;;  %v2776_v59 = vpop.xlane.xlu1 %2775 }
 0xab4   : > { %v2795_v50 = vadd.f32 %v2776_v59, %v2747_v28  ;;  %v1927_v28 = vld [vmem:[#allocation4 + $0x68] sm:$0xff] }
 0xab5   : > { %2000 = vst.msk [vmem:[#allocation4 + $0x28] sm:$0xff] %vm1994_vm3, %v1983_v19  ;;  %v1943_v59 = vmul.f32 %v10275_v36, %v1927_v28 }
 0xab6   : > { %2811 = vst.msk [vmem:[#allocation4 + $0xe0] sm:$0xff] %vm1994_vm3, %v2795_v50  ;;  %v1961_v13 = vpop.xlane.xlu0 %1960  ;;  %v11850_v50 = vld [vmem:[#allocation79_spill] sm:$0xff] }
 0xab7   : > { %v1985_v41 = vadd.f32 %v1961_v13, %v1937_v62  ;;  %v2780_v55 = vpop.xlane.xlu1 %2779 }
 0xab8   : > { %v2797_v14 = vadd.f32 %v2780_v55, %v2749_v33  ;;  %v1929_v33 = vld [vmem:[#allocation4 + $0x78] sm:$0xff] }
 0xab9   : > { %2002 = vst.msk [vmem:[#allocation4 + $0x38] sm:$0xff] %vm1994_vm3, %v1985_v41  ;;  %v1945_v55 = vmul.f32 %v10285_v26, %v1929_v33 }
 0xaba   : > { %2813 = vst.msk [vmem:[#allocation4 + $0xf0] sm:$0xff] %vm1994_vm3, %v2797_v14  ;;  %v1965_v48 = vpop.xlane.xlu0 %1964  ;;  %v2121_v14 = vld [vmem:[#allocation5 + $0x28] sm:$0xff] }
 0xabb   : > { %v1987_v0 = vadd.f32 %v1965_v48, %v1939_v18  ;;  %v2135_v15 = vpop.permute.xlu1 %2134  ;;  %v11851_v18 = vld [vmem:[#allocation81_spill] sm:$0xff] }
 0xabc   : > { %v2212_v10 = vmul.f32 %v2135_v15, %v2116_v21 }
 0xabd   : > { %2004 = vst.msk [vmem:[#allocation4 + $0x48] sm:$0xff] %vm1994_vm3, %v1987_v0 }
 0xabe   : > { %v2228_v39 = vadd.f32 %v2212_v10, %v11849_v6  ;;  %v1969_v47 = vpop.xlane.xlu0 %1968  ;;  %v2735_v10 = vmul.f32 %v10292_v57, %v2719_v1  ;;  %v11856_v57 = vld [vmem:[#allocation85_spill] sm:$0xff] }
 0xabf   : > { %v1989_v42 = vadd.f32 %v1969_v47, %v1941_v8  ;;  %v2145_v19 = vpop.permute.xlu1 %2144  ;;  %v2123_v8 = vld [vmem:[#allocation5 + $0x38] sm:$0xff]  ;;  %v2721_v47 = vld [vmem:[#allocation4 + $0x90] sm:$0xff] }
 0xac0   : > { %2244 = vst.msk [vmem:[#allocation5] sm:$0xff] %vm1528_vm2, %v2228_v39  ;;  %v2214_v12 = vmul.f32 %v2145_v19, %v2118_v7  ;;  %v11852_v7 = vld [vmem:[#allocation86_spill] sm:$0xff] }
 0xac1   : > { %2006 = vst.msk [vmem:[#allocation4 + $0x58] sm:$0xff] %vm1994_vm3, %v1989_v42  ;;  %v11853_v42 = vld [vmem:[#allocation116_spill] sm:$0xff]  ;;  %v11854_v19 = vld [vmem:[#allocation118_spill] sm:$0xff] }
 0xac2   : > { %v2230_v62 = vadd.f32 %v11850_v50, %v2214_v12  ;;  %v1973_v13 = vpop.xlane.xlu0 %1972  ;;  %v11855_v12 = vsub.f32 %v11853_v42, %v11854_v19  ;;  %v2737_v50 = vmul.f32 %v10296_v32, %v2721_v47  ;;  %v2127_v32 = vld [vmem:[#allocation5 + $0x58] sm:$0xff]  ;;  %v11864_v19 = vld [vmem:[#allocation89_spill] sm:$0xff] }
 0xac3   : > { %v1991_v3 = vadd.f32 %v1973_v13, %v1943_v59  ;;  %v2150_v34 = vpop.permute.xlu1 %2149 }
 0xac4   : > { %2246 = vst.msk [vmem:[#allocation5 + $0x10] sm:$0xff] %vm1528_vm2, %v2230_v62  ;;  %v2215_v41 = vmul.f32 %v2150_v34, %v2119_v38  ;;  %v2576_v59 = vmul.f32 1.442695, %v11855_v12  ;;  %v2125_v62 = vld [vmem:[#allocation5 + $0x48] sm:$0xff] }
 0xac5   : > { %2008 = vst.msk [vmem:[#allocation4 + $0x68] sm:$0xff] %vm1994_vm3, %v1991_v3  ;;  %v2722_v3 = vld [vmem:[#allocation4 + $0x98] sm:$0xff] }
 0xac6   : > { %v2231_v21 = vadd.f32 %v11851_v18, %v2215_v41  ;;  %v1977_v48 = vpop.xlane.xlu0 %1976  ;;  %7472 = vpow2.f32 %v2576_v59  ;;  %v2738_v1 = vmul.f32 %v10314_v9, %v2722_v3  ;;  %v2129_v9 = vld [vmem:[#allocation5 + $0x68] sm:$0xff] }
 0xac7   : > { %v1993_v36 = vadd.f32 %v1977_v48, %v1945_v55  ;;  %v2160_v0 = vpop.permute.xlu1 %2159  ;;  %v11857_v55 = vld [vmem:[#allocation112_spill] sm:$0xff] }
 0xac8   : > { %2247 = vst.msk [vmem:[#allocation5 + $0x18] sm:$0xff] %vm1528_vm2, %v2231_v21  ;;  %v2217_v15 = vmul.f32 %v2160_v0, %v2121_v14  ;;  %v11858_v14 = vld [vmem:[#allocation114_spill] sm:$0xff] }
 0xac9   : > { %2010 = vst.msk [vmem:[#allocation4 + $0x78] sm:$0xff] %vm1994_vm3, %v1993_v36  ;;  %v11859_v18 = vsub.f32 %v11857_v55, %v11858_v14  ;;  %v11860_v36 = vld [vmem:[#allocation90_spill] sm:$0xff] }
 0xaca   : > { %v2233_v6 = vadd.f32 %v2217_v15, %v11852_v7  ;;  %v2752_v39 = vpop.xlane.xlu0 %2751  ;;  %v11868_v14 = vld [vmem:[#allocation94_spill] sm:$0xff] }
 0xacb   : > { %v2783_v26 = vadd.f32 %v2752_v39, %v2735_v10  ;;  %v2170_v28 = vpop.permute.xlu1 %2169  ;;  %v2580_v21 = vmul.f32 1.442695, %v11859_v18  ;;  %v2724_v10 = vld [vmem:[#allocation4 + $0xa8] sm:$0xff] }
 0xacc   : > { %2249 = vst.msk [vmem:[#allocation5 + $0x28] sm:$0xff] %vm1528_vm2, %v2233_v6  ;;  %v2219_v38 = vmul.f32 %v2170_v28, %v2123_v8  ;;  %v11861_v6 = vld [vmem:[#allocation124_spill] sm:$0xff]  ;;  %v11862_v39 = vld [vmem:[#allocation126_spill] sm:$0xff]  ;;  %v2740_v42 = vmul.f32 %v10323_v53, %v2724_v10 }
 0xacd   : > { %2799 = vst.msk [vmem:[#allocation4 + $0x80] sm:$0xff] %vm1994_vm3, %v2783_v26  ;;  %7474 = vpow2.f32 %v2580_v21  ;;  %v11863_v47 = vsub.f32 %v11861_v6, %v11862_v39  ;;  %v2131_v53 = vld [vmem:[#allocation5 + $0x78] sm:$0xff] }
 0xace   : > { %v2235_v13 = vadd.f32 %v11856_v57, %v2219_v38  ;;  %v2756_v33 = vpop.xlane.xlu0 %2755  ;;  %v2726_v38 = vld [vmem:[#allocation4 + $0xb8] sm:$0xff] }
 0xacf   : > { %v2785_v34 = vadd.f32 %v2756_v33, %v2737_v50  ;;  %v2180_v41 = vpop.permute.xlu1 %2179  ;;  %v2584_v26 = vmul.f32 1.442695, %v11863_v47  ;;  %v11865_v57 = vld [vmem:[#allocation120_spill] sm:$0xff] }
 0xad0   : > { %2251 = vst.msk [vmem:[#allocation5 + $0x38] sm:$0xff] %vm1528_vm2, %v2235_v13  ;;  %v2221_v48 = vmul.f32 %v2180_v41, %v2125_v62  ;;  %v11866_v13 = vld [vmem:[#allocation122_spill] sm:$0xff]  ;;  %v2742_v41 = vmul.f32 %v10390_v23, %v2726_v38  ;;  %v10475_v55 = vpop.eup %7472  ;;  %v11869_v23 = vld [vmem:[#allocation93_spill] sm:$0xff]  ;;  %v2730_v6 = vld [vmem:[#allocation4 + $0xd8] sm:$0xff] }
 0xad1   : > { %2801 = vst.msk [vmem:[#allocation4 + $0x90] sm:$0xff] %vm1994_vm3, %v2785_v34  ;;  %v11867_v33 = vsub.f32 %v11865_v57, %v11866_v13  ;;  %7476 = vpow2.f32 %v2584_v26  ;;  %v2732_v38 = vld [vmem:[#allocation4 + $0xe8] sm:$0xff] }
 0xad2   : > { %v2237_v0 = vadd.f32 %v2221_v48, %v11860_v36  ;;  %v2758_v15 = vpop.xlane.xlu0 %2757  ;;  %v2728_v48 = vld [vmem:[#allocation4 + $0xc8] sm:$0xff] }
 0xad3   : > { %v2786_v8 = vadd.f32 %v2758_v15, %v2738_v1  ;;  %v2190_v7 = vpop.permute.xlu1 %2189  ;;  %v2588_v3 = vmul.f32 1.442695, %v11867_v33  ;;  %v2953_v15 = vld [vmem:[#allocation5 + $0x80] sm:$0xff]  ;;  %v2956_v33 = vld [vmem:[#allocation5 + $0x98] sm:$0xff] }
 0xad4   : > { %2253 = vst.msk [vmem:[#allocation5 + $0x48] sm:$0xff] %vm1528_vm2, %v2237_v0  ;;  %v2223_v28 = vmul.f32 %v2190_v7, %v2127_v32  ;;  %v2744_v0 = vmul.f32 %v10475_v55, %v2728_v48 }
 0xad5   : > { %2802 = vst.msk [vmem:[#allocation4 + $0x98] sm:$0xff] %vm1994_vm3, %v2786_v8  ;;  %7478 = vpow2.f32 %v2588_v3 }
 0xad6   : > { %v2239_v12 = vadd.f32 %v11864_v19, %v2223_v28  ;;  %v2762_v59 = vpop.xlane.xlu0 %2761  ;;  %v11870_v19 = vld [vmem:[#allocation133_spill] sm:$0xff] }
 0xad7   : > { %v2788_v50 = vadd.f32 %v2762_v59, %v2740_v42  ;;  %v2200_v62 = vpop.permute.xlu1 %2199  ;;  %v10481_v10 = vpop.eup %7474  ;;  %v2955_v42 = vld [vmem:[#allocation5 + $0x90] sm:$0xff] }
 0xad8   : > { %2255 = vst.msk [vmem:[#allocation5 + $0x58] sm:$0xff] %vm1528_vm2, %v2239_v12  ;;  %v2225_v34 = vmul.f32 %v2200_v62, %v2129_v9  ;;  %v2746_v28 = vmul.f32 %v10481_v10, %v2730_v6  ;;  %v11873_v6 = vld [vmem:[#allocation139_spill] sm:$0xff] }
 0xad9   : > { %2804 = vst.msk [vmem:[#allocation4 + $0xa8] sm:$0xff] %vm1994_vm3, %v2788_v50 }
 0xada   : > { %v2241_v18 = vadd.f32 %v2225_v34, %v11868_v14  ;;  %v2766_v21 = vpop.xlane.xlu0 %2765  ;;  %v11871_v34 = vld [vmem:[#allocation132_spill] sm:$0xff] }
 0xadb   : > { %v2790_v1 = vadd.f32 %v2766_v21, %v2742_v41  ;;  %v2210_v32 = vpop.permute.xlu1 %2209  ;;  %v10487_v9 = vpop.eup %7476  ;;  %v2734_v14 = vld [vmem:[#allocation4 + $0xf8] sm:$0xff] }
 0xadc   : > { %2257 = vst.msk [vmem:[#allocation5 + $0x68] sm:$0xff] %vm1528_vm2, %v2241_v18  ;;  %v2227_v36 = vmul.f32 %v2210_v32, %v2131_v53  ;;  %v2748_v13 = vmul.f32 %v10487_v9, %v2732_v38  ;;  %v2958_v32 = vld [vmem:[#allocation5 + $0xa8] sm:$0xff] }
 0xadd   : > { %2806 = vst.msk [vmem:[#allocation4 + $0xb8] sm:$0xff] %vm1994_vm3, %v2790_v1 }
 0xade   : > { %v2243_v8 = vadd.f32 %v11869_v23, %v2227_v36  ;;  %v2770_v7 = vpop.xlane.xlu0 %2769  ;;  %v11872_v36 = vld [vmem:[#allocation134_spill] sm:$0xff] }
 0xadf   : > { %v2792_v39 = vadd.f32 %v2770_v7, %v2744_v0  ;;  %v2972_v47 = vpop.permute.xlu1 %2971  ;;  %v10493_v3 = vpop.eup %7478 }
 0xae0   : > { %2259 = vst.msk [vmem:[#allocation5 + $0x78] sm:$0xff] %vm1528_vm2, %v2243_v8  ;;  %v3049_v26 = vmul.f32 %v2972_v47, %v2953_v15  ;;  %v2750_v1 = vmul.f32 %v10493_v3, %v2734_v14 }
 0xae1   : > { %2808 = vst.msk [vmem:[#allocation4 + $0xc8] sm:$0xff] %vm1994_vm3, %v2792_v39 }
 0xae2   : > { %v3065_v12 = vadd.f32 %v3049_v26, %v11870_v19  ;;  %v2774_v59 = vpop.xlane.xlu0 %2773 }
 0xae3   : > { %v2794_v50 = vadd.f32 %v2774_v59, %v2746_v28  ;;  %v2982_v62 = vpop.permute.xlu1 %2981 }
 0xae4   : > { %3081 = vst.msk [vmem:[#allocation5 + $0x80] sm:$0xff] %vm1528_vm2, %v3065_v12  ;;  %v3051_v57 = vmul.f32 %v2982_v62, %v2955_v42  ;;  %v2117_v42 = vld [vmem:[#allocation5 + $0x8] sm:$0xff]  ;;  %v2120_v62 = vld [vmem:[#allocation5 + $0x20] sm:$0xff] }
 0xae5   : > { %2810 = vst.msk [vmem:[#allocation4 + $0xd8] sm:$0xff] %vm1994_vm3, %v2794_v50 }
 0xae6   : > { %v3067_v41 = vadd.f32 %v11871_v34, %v3051_v57  ;;  %v2778_v53 = vpop.xlane.xlu0 %2777  ;;  %v11878_v57 = vld [vmem:[#allocation82_spill] sm:$0xff] }
 0xae7   : > { %v2796_v18 = vadd.f32 %v2778_v53, %v2748_v13  ;;  %v2987_v21 = vpop.permute.xlu1 %2986  ;;  %v11879_v53 = vld [vmem:[#allocation84_spill] sm:$0xff] }
 0xae8   : > { %3083 = vst.msk [vmem:[#allocation5 + $0x90] sm:$0xff] %vm1528_vm2, %v3067_v41  ;;  %v3052_v48 = vmul.f32 %v2987_v21, %v2956_v33  ;;  %v2122_v41 = vld [vmem:[#allocation5 + $0x30] sm:$0xff] }
 0xae9   : > { %2812 = vst.msk [vmem:[#allocation4 + $0xe8] sm:$0xff] %vm1994_vm3, %v2796_v18 }
 0xaea   : > { %v3068_v0 = vadd.f32 %v11872_v36, %v3052_v48  ;;  %v2782_v15 = vpop.xlane.xlu0 %2781  ;;  %v2124_v48 = vld [vmem:[#allocation5 + $0x40] sm:$0xff] }
 0xaeb   : > { %v2798_v23 = vadd.f32 %v2782_v15, %v2750_v1  ;;  %v2997_v8 = vpop.permute.xlu1 %2996  ;;  %v11880_v1 = vld [vmem:[#allocation83_spill] sm:$0xff] }
 0xaec   : > { %3084 = vst.msk [vmem:[#allocation5 + $0x98] sm:$0xff] %vm1528_vm2, %v3068_v0  ;;  %v3054_v7 = vmul.f32 %v2997_v8, %v2958_v32  ;;  %v2126_v15 = vld [vmem:[#allocation5 + $0x50] sm:$0xff] }
 0xaed   : > { %2814 = vst.msk [vmem:[#allocation4 + $0xf8] sm:$0xff] %vm1994_vm3, %v2798_v23  ;;  %v11881_v23 = vld [vmem:[#allocation88_spill] sm:$0xff] }
 0xaee   : > { %v3070_v39 = vadd.f32 %v3054_v7, %v11873_v6 }
 0xaef   : > { %v10503_v47 = vpop.f32.mrb[48].mxu1  ;;  %v4474_v26 = vpop.permute.xlu1 %4473 }
 0xaf0   : > { %11874 = vst [vmem:[#allocation47_spill] sm:$0xff] %v10503_v47  ;;  %3086 = vst.msk [vmem:[#allocation5 + $0xa8] sm:$0xff] %vm1528_vm2, %v3070_v39  ;;  %v10506_v28 = vpop.f32.mrb[49].mxu1  ;;  %6882 = vmatprep.subr.bf16.mxu0 %v4474_v26  ;;  %v2128_v39 = vld [vmem:[#allocation5 + $0x60] sm:$0xff] }
 0xaf1   : > { %11875 = vst [vmem:[#allocation50_spill] sm:$0xff] %v10506_v28  ;;  %v10508_v19 = vpop.f32.mrb[50].mxu1  ;;  %6883 = vmatpush3.bf16.msra.mxu0 %v4474_v26  ;;  %v11882_v26 = vld [vmem:[#allocation87_spill] sm:$0xff]  ;;  %v11910_v47 = vld [vmem:[#allocation49_spill] sm:$0xff] }
 0xaf2   : > { %11876 = vst [vmem:[#allocation77_spill] sm:$0xff] %v10508_v19  ;;  %v2140_v12 = vpop.permute.xlu0 %2139  ;;  %v10510_v59 = vpop.f32.mrb[51].mxu1  ;;  %v11909_v19 = vld [vmem:[#allocation45_spill] sm:$0xff] }
 0xaf3   : > { %11877 = vst [vmem:[#allocation58_spill] sm:$0xff] %v10510_v59  ;;  %v2213_v38 = vmul.f32 %v2140_v12, %v2117_v42  ;;  %v4476_v50 = vpop.permute.xlu1 %4475  ;;  %v10620_v28 = vld [vmem:[#allocation3 + $0x180] sm:$0xff] }
 0xaf4   : > { %6884 = vmatprep.subr.bf16.mxu0 %v4476_v50  ;;  %11912 = vst [vmem:[#allocation95_spill] sm:$0xff] %v10620_v28 }
 0xaf5   : > { %v2229_v13 = vadd.f32 %v2213_v38, %v11878_v57  ;;  %6885 = vmatpush3.bf16.msra.mxu0 %v4476_v50  ;;  %v2130_v50 = vld [vmem:[#allocation5 + $0x70] sm:$0xff] }
 0xaf6   : > { %v2155_v33 = vpop.permute.xlu0 %2154 }
 0xaf7   : > { %2245 = vst.msk [vmem:[#allocation5 + $0x8] sm:$0xff] %vm1528_vm2, %v2229_v13  ;;  %v2216_v34 = vmul.f32 %v2155_v33, %v2120_v62  ;;  %v11883_v62 = vld [vmem:[#allocation92_spill] sm:$0xff] }
 0xaf9   : > { %v2232_v14 = vadd.f32 %v2216_v34, %v11879_v53  ;;  %v2954_v34 = vld [vmem:[#allocation5 + $0x88] sm:$0xff] }
 0xafa   : > { %v2165_v18 = vpop.permute.xlu0 %2164 }
 0xafb   : > { %2248 = vst.msk [vmem:[#allocation5 + $0x20] sm:$0xff] %vm1528_vm2, %v2232_v14  ;;  %v2218_v21 = vmul.f32 %v2165_v18, %v2122_v41  ;;  %v11884_v41 = vld [vmem:[#allocation91_spill] sm:$0xff] }
 0xafd   : > { %v2234_v32 = vadd.f32 %v11880_v1, %v2218_v21  ;;  %v2957_v21 = vld [vmem:[#allocation5 + $0xa0] sm:$0xff] }
 0xafe   : > { %v2175_v36 = vpop.permute.xlu0 %2174 }
 0xaff   : > { %2250 = vst.msk [vmem:[#allocation5 + $0x30] sm:$0xff] %vm1528_vm2, %v2234_v32  ;;  %v2220_v0 = vmul.f32 %v2175_v36, %v2124_v48  ;;  %v11885_v48 = vld [vmem:[#allocation135_spill] sm:$0xff] }
 0xb01   : > { %v2236_v8 = vadd.f32 %v2220_v0, %v11881_v23  ;;  %v2959_v0 = vld [vmem:[#allocation5 + $0xb0] sm:$0xff] }
 0xb02   : > { %v2185_v7 = vpop.permute.xlu0 %2184 }
 0xb03   : > { %2252 = vst.msk [vmem:[#allocation5 + $0x40] sm:$0xff] %vm1528_vm2, %v2236_v8  ;;  %v2222_v6 = vmul.f32 %v2185_v7, %v2126_v15  ;;  %v11886_v15 = vld [vmem:[#allocation137_spill] sm:$0xff] }
 0xb05   : > { %v2238_v42 = vadd.f32 %v11882_v26, %v2222_v6  ;;  %v2960_v6 = vld [vmem:[#allocation5 + $0xb8] sm:$0xff] }
 0xb06   : > { %v2195_v12 = vpop.permute.xlu0 %2194 }
 0xb07   : > { %2254 = vst.msk [vmem:[#allocation5 + $0x50] sm:$0xff] %vm1528_vm2, %v2238_v42  ;;  %v2224_v38 = vmul.f32 %v2195_v12, %v2128_v39  ;;  %v11887_v39 = vld [vmem:[#allocation136_spill] sm:$0xff] }
 0xb09   : > { %v2240_v57 = vadd.f32 %v2224_v38, %v11883_v62  ;;  %v11888_v38 = vld [vmem:[#allocation138_spill] sm:$0xff] }
 0xb0a   : > { %v2205_v13 = vpop.permute.xlu0 %2204 }
 0xb0b   : > { %2256 = vst.msk [vmem:[#allocation5 + $0x60] sm:$0xff] %vm1528_vm2, %v2240_v57  ;;  %v2226_v33 = vmul.f32 %v2205_v13, %v2130_v50 }
 0xb0d   : > { %v2242_v53 = vadd.f32 %v11884_v41, %v2226_v33 }
 0xb0e   : > { %v2977_v14 = vpop.permute.xlu0 %2976 }
 0xb0f   : > { %2258 = vst.msk [vmem:[#allocation5 + $0x70] sm:$0xff] %vm1528_vm2, %v2242_v53  ;;  %v3050_v18 = vmul.f32 %v2977_v14, %v2954_v34 }
 0xb11   : > { %v3066_v1 = vadd.f32 %v3050_v18, %v11885_v48 }
 0xb12   : > { %v2992_v32 = vpop.permute.xlu0 %2991 }
 0xb13   : > { %3082 = vst.msk [vmem:[#allocation5 + $0x88] sm:$0xff] %vm1528_vm2, %v3066_v1  ;;  %v3053_v36 = vmul.f32 %v2992_v32, %v2957_v21 }
 0xb15   : > { %v3069_v23 = vadd.f32 %v3053_v36, %v11886_v15 }
 0xb16   : > { %v3002_v8 = vpop.permute.xlu0 %3001 }
 0xb17   : > { %3085 = vst.msk [vmem:[#allocation5 + $0xa0] sm:$0xff] %vm1528_vm2, %v3069_v23  ;;  %v3055_v7 = vmul.f32 %v3002_v8, %v2959_v0 }
 0xb19   : > { %v3071_v26 = vadd.f32 %v11887_v39, %v3055_v7 }
 0xb1a   : > { %v3007_v42 = vpop.permute.xlu0 %3006 }
 0xb1b   : > { %3087 = vst.msk [vmem:[#allocation5 + $0xb0] sm:$0xff] %vm1528_vm2, %v3071_v26  ;;  %v3056_v12 = vmul.f32 %v3007_v42, %v2960_v6 }
 0xb1d   : > { %v3072_v50 = vadd.f32 %v11888_v38, %v3056_v12 }
 0xb1f   : > { %3088 = vst.msk [vmem:[#allocation5 + $0xb8] sm:$0xff] %vm1528_vm2, %v3072_v50 }
 0xb2b   : > { %v10534_v62 = vpop.f32.mrb[52].mxu1 }
 0xb2c   : > { %11889 = vst [vmem:[#allocation60_spill] sm:$0xff] %v10534_v62  ;;  %v10536_v57 = vpop.f32.mrb[53].mxu1  ;;  %v10647_v62 = vld [vmem:[#allocation3 + $0x1b0] sm:$0xff] }
 0xb2d   : > { %11890 = vst [vmem:[#allocation78_spill] sm:$0xff] %v10536_v57  ;;  %v10538_v13 = vpop.f32.mrb[54].mxu1 }
 0xb2e   : > { %11891 = vst [vmem:[#allocation54_spill] sm:$0xff] %v10538_v13  ;;  %v10540_v33 = vpop.f32.mrb[55].mxu1  ;;  %v11907_v13 = vld [vmem:[#allocation46_spill] sm:$0xff] }
 0xb2f   : > { %11892 = vst [vmem:[#allocation56_spill] sm:$0xff] %v10540_v33  ;;  %v11908_v33 = vld [vmem:[#allocation51_spill] sm:$0xff] }
 0xb3b   : > { %v10542_v34 = vpop.f32.mrb[56].mxu1 }
 0xb3c   : > { %11893 = vst [vmem:[#allocation66_spill] sm:$0xff] %v10542_v34  ;;  %v10544_v41 = vpop.f32.mrb[57].mxu1 }
 0xb3d   : > { %11894 = vst [vmem:[#allocation68_spill] sm:$0xff] %v10544_v41  ;;  %v10546_v53 = vpop.f32.mrb[58].mxu1 }
 0xb3e   : > { %11895 = vst [vmem:[#allocation62_spill] sm:$0xff] %v10546_v53  ;;  %v10548_v14 = vpop.f32.mrb[59].mxu1  ;;  %v11905_v53 = vld [vmem:[#allocation43_spill] sm:$0xff] }
 0xb3f   : > { %11896 = vst [vmem:[#allocation64_spill] sm:$0xff] %v10548_v14  ;;  %v11906_v14 = vld [vmem:[#allocation44_spill] sm:$0xff] }
 0xb4a   : > { %v10550_v18 = vpop.f32.mrb[60].mxu1 }
 0xb4b   : > { %11897 = vst [vmem:[#allocation127_spill] sm:$0xff] %v10550_v18  ;;  %v10552_v21 = vpop.f32.mrb[61].mxu1 }
 0xb4c   : > { %11898 = vst [vmem:[#allocation74_spill] sm:$0xff] %v10552_v21  ;;  %v10554_v48 = vpop.f32.mrb[62].mxu1  ;;  %v10628_v21 = vld [vmem:[#allocation3 + $0x188] sm:$0xff] }
 0xb4d   : > { %11899 = vst [vmem:[#allocation76_spill] sm:$0xff] %v10554_v48  ;;  %v10556_v1 = vpop.f32.mrb[63].mxu1 }
 0xb4e   : > { %11900 = vst [vmem:[#allocation70_spill] sm:$0xff] %v10556_v1 }
 0xb56   : > { %v10558_v32 = vpop.f32.mrb[64].mxu1 }
 0xb57   : > { %4148 = vmax.xlane.f32.xlu0 %v10558_v32  ;;  %v10561_v36 = vpop.f32.mrb[65].mxu1 }
 0xb58   : > { %4144 = vmax.xlane.f32.xlu1 %v10561_v36  ;;  %v10564_v0 = vpop.f32.mrb[66].mxu1 }
 0xb59   : > { %v10566_v15 = vpop.f32.mrb[67].mxu1 }
 0xb5b   : > { %4146 = vmax.xlane.f32.xlu0 %v10566_v15 }
 0xb5c   : > { %4150 = vmax.xlane.f32.xlu1 %v10564_v0 }
 0xb5e   : > { %v10570_v23 = vpop.f32.mrb[68].mxu1 }
 0xb5f   : > { %4156 = vmax.xlane.f32.xlu0 %v10570_v23  ;;  %v10573_v8 = vpop.f32.mrb[69].mxu1 }
 0xb60   : > { %v10575_v7 = vpop.f32.mrb[70].mxu1 }
 0xb61   : > { %4158 = vmax.xlane.f32.xlu1 %v10575_v7  ;;  %v10578_v6 = vpop.f32.mrb[71].mxu1 }
 0xb63   : > { %4152 = vmax.xlane.f32.xlu0 %v10573_v8 }
 0xb65   : > { %4154 = vmax.xlane.f32.xlu1 %v10578_v6 }
 0xb66   : > { %v10582_v39 = vpop.f32.mrb[72].mxu1 }
 0xb67   : > { %4164 = vmax.xlane.f32.xlu0 %v10582_v39  ;;  %v10585_v26 = vpop.f32.mrb[73].mxu1 }
 0xb68   : > { %v10587_v42 = vpop.f32.mrb[74].mxu1 }
 0xb69   : > { %4166 = vmax.xlane.f32.xlu1 %v10587_v42  ;;  %v10590_v12 = vpop.f32.mrb[75].mxu1 }
 0xb6b   : > { %4160 = vmax.xlane.f32.xlu0 %v10585_v26 }
 0xb6d   : > { %4162 = vmax.xlane.f32.xlu1 %v10590_v12 }
 0xb6e   : > { %v10594_v38 = vpop.f32.mrb[76].mxu1 }
 0xb6f   : > { %11901 = vst [vmem:[#allocation72_spill] sm:$0xff] %v10594_v38  ;;  %4172 = vmax.xlane.f32.xlu0 %v10594_v38  ;;  %v10597_v50 = vpop.f32.mrb[77].mxu1 }
 0xb70   : > { %11902 = vst [vmem:[#allocation96_spill] sm:$0xff] %v10597_v50  ;;  %v10599_v48 = vpop.f32.mrb[78].mxu1 }
 0xb71   : > { %11903 = vst [vmem:[#allocation98_spill] sm:$0xff] %v10599_v48  ;;  %v10601_v1 = vpop.f32.mrb[79].mxu1 }
 0xb72   : > { %11904 = vst [vmem:[#allocation129_spill] sm:$0xff] %v10601_v1 }
 0xb73   : > { %4168 = vmax.xlane.f32.xlu0 %v10597_v50  ;;  %v10675_v50 = vld [vmem:[#allocation3 + $0x1a8] sm:$0xff] }
 0xb74   : > { %11919 = vst [vmem:[#allocation130_spill] sm:$0xff] %v10675_v50 }
 0xb7e   : > { %4479 = vrot.lane.b32.xlu1 %v11905_v53, %s8082_s30  ;;  %v10618_v53 = vld [vmem:[#allocation3 + $0x190] sm:$0xff] }
 0xb7f   : > { %11911 = vst [vmem:[#allocation149_spill] sm:$0xff] %v10618_v53 }
 0xb89   : > { %4477 = vrot.lane.b32.xlu0 %v11906_v14, %s8082_s30 }
 0xb8d   : > { %4481 = vrot.lane.b32.xlu0 %v11907_v13, %s8082_s30 }
 0xb91   : > { %4485 = vrot.lane.b32.xlu0 %v11908_v33, %s8082_s30 }
 0xba2   : > { %4174 = vmax.xlane.f32.xlu1 %v10599_v48 }
 0xba6   : > { %4170 = vmax.xlane.f32.xlu1 %v10601_v1  ;;  %v10664_v1 = vld [vmem:[#allocation3 + $0x1a0] sm:$0xff] }
 0xbb7   : > { %4483 = vrot.lane.b32.xlu1 %v11909_v19, %s8082_s30 }
 0xbbb   : > { %4487 = vrot.lane.b32.xlu1 %v11910_v47, %s8082_s30  ;;  %v10635_v47 = vld [vmem:[#allocation3 + $0x198] sm:$0xff] }
 0xbbc   : > { %11915 = vst [vmem:[#allocation128_spill] sm:$0xff] %v10635_v47 }
 0xbe4   : > { %v4149_v14 = vpop.xlane.xlu0 %4148 }
 0xbe5   : > { %v10623_v13 = vmax.f32 %v10618_v53, %v4149_v14  ;;  %v4145_v18 = vpop.xlane.xlu1 %4144 }
 0xbe6   : > { %v10626_v33 = vmax.f32 %v10620_v28, %v4145_v18 }
 0xbe7   : > { %11913 = vst [vmem:[#allocation97_spill] sm:$0xff] %v10623_v13  ;;  %4741 = vst.msk [vmem:[#allocation3 + $0x190] sm:$0xff] %vm1994_vm3, %v10623_v13  ;;  %4252 = vperm.xlu0 %7286, %v10623_v13  }
 0xbe8   : > { %11914 = vst [vmem:[#allocation148_spill] sm:$0xff] %v10626_v33  ;;  %4739 = vst.msk [vmem:[#allocation3 + $0x180] sm:$0xff] %vm1994_vm3, %v10626_v33  ;;  %v4147_v18 = vpop.xlane.xlu0 %4146 }
 0xbe9   : > { %v10642_v34 = vmax.f32 %v10628_v21, %v4147_v18  ;;  %v4151_v41 = vpop.xlane.xlu1 %4150 }
 0xbea   : > { %v10645_v19 = vmax.f32 %v10635_v47, %v4151_v41  ;;  %v10659_v41 = vld [vmem:[#allocation3 + $0x1b8] sm:$0xff]  ;;  %v10684_v47 = vld [vmem:[#allocation3 + $0x1d0] sm:$0xff] }
 0xbeb   : > { %4740 = vst.msk [vmem:[#allocation3 + $0x188] sm:$0xff] %vm1994_vm3, %v10642_v34  ;;  %4242 = vperm.xlu0 %7286, %v10626_v33   ;;  %11917 = vst [vmem:[#allocation100_spill] sm:$0xff] %v10659_v41  ;;  %v10704_v33 = vld [vmem:[#allocation3 + $0x1c0] sm:$0xff] }
 0xbec   : > { %11916 = vst [vmem:[#allocation150_spill] sm:$0xff] %v10645_v19  ;;  %4742 = vst.msk [vmem:[#allocation3 + $0x198] sm:$0xff] %vm1994_vm3, %v10645_v19  ;;  %v4157_v18 = vpop.xlane.xlu0 %4156  ;;  %4257 = vperm.xlu1 %7287, %v10645_v19  }
 0xbed   : > { %v10662_v59 = vmax.f32 %v10647_v62, %v4157_v18 }
 0xbee   : > { %v4159_v57 = vpop.xlane.xlu1 %4158 }
 0xbef   : > { %4745 = vst.msk [vmem:[#allocation3 + $0x1b0] sm:$0xff] %vm1994_vm3, %v10662_v59  ;;  %v10671_v14 = vmax.f32 %v10659_v41, %v4159_v57  ;;  %4272 = vperm.xlu0 %7286, %v10662_v59   ;;  %v10695_v41 = vld [vmem:[#allocation3 + $0x1d8] sm:$0xff] }
 0xbf0   : > { %v4153_v48 = vpop.xlane.xlu0 %4152  ;;  %4247 = vperm.xlu1 %7287, %v10642_v34   ;;  %11921 = vst [vmem:[#allocation110_spill] sm:$0xff] %v10695_v41 }
 0xbf1   : > { %11918 = vst [vmem:[#allocation102_spill] sm:$0xff] %v10671_v14  ;;  %4746 = vst.msk [vmem:[#allocation3 + $0x1b8] sm:$0xff] %vm1994_vm3, %v10671_v14  ;;  %v10682_v38 = vmax.f32 %v10664_v1, %v4153_v48 }
 0xbf2   : > { %v4155_v19 = vpop.xlane.xlu1 %4154 }
 0xbf3   : > { %4743 = vst.msk [vmem:[#allocation3 + $0x1a0] sm:$0xff] %vm1994_vm3, %v10682_v38  ;;  %v10691_v13 = vmax.f32 %v10675_v50, %v4155_v19  ;;  %4262 = vperm.xlu0 %7286, %v10682_v38   ;;  %v10715_v50 = vld [vmem:[#allocation3 + $0x1c8] sm:$0xff] }
 0xbf4   : > { %v4165_v18 = vpop.xlane.xlu0 %4164  ;;  %4277 = vperm.xlu1 %7287, %v10671_v14  }
 0xbf5   : > { %11920 = vst [vmem:[#allocation108_spill] sm:$0xff] %v10691_v13  ;;  %4744 = vst.msk [vmem:[#allocation3 + $0x1a8] sm:$0xff] %vm1994_vm3, %v10691_v13  ;;  %v10702_v57 = vmax.f32 %v10684_v47, %v4165_v18 }
 0xbf6   : > { %v4167_v53 = vpop.xlane.xlu1 %4166 }
 0xbf7   : > { %4749 = vst.msk [vmem:[#allocation3 + $0x1d0] sm:$0xff] %vm1994_vm3, %v10702_v57  ;;  %v10711_v14 = vmax.f32 %v10695_v41, %v4167_v53  ;;  %4292 = vperm.xlu0 %7286, %v10702_v57   ;;  %v10742_v53 = vld [vmem:[#allocation3 + $0x1e0] sm:$0xff] }
 0xbf8   : > { %v4161_v48 = vpop.xlane.xlu0 %4160  ;;  %4267 = vperm.xlu1 %7287, %v10691_v13  }
 0xbf9   : > { %11922 = vst [vmem:[#allocation131_spill] sm:$0xff] %v10711_v14  ;;  %4750 = vst.msk [vmem:[#allocation3 + $0x1d8] sm:$0xff] %vm1994_vm3, %v10711_v14  ;;  %v10722_v19 = vmax.f32 %v10704_v33, %v4161_v48 }
 0xbfa   : > { %v4163_v28 = vpop.xlane.xlu1 %4162 }
 0xbfb   : > { %4747 = vst.msk [vmem:[#allocation3 + $0x1c0] sm:$0xff] %vm1994_vm3, %v10722_v19  ;;  %v10731_v13 = vmax.f32 %v10715_v50, %v4163_v28  ;;  %4282 = vperm.xlu0 %7286, %v10722_v19  }
 0xbfc   : > { %v4173_v18 = vpop.xlane.xlu0 %4172  ;;  %4297 = vperm.xlu1 %7287, %v10711_v14  }
 0xbfd   : > { %11924 = vst [vmem:[#allocation151_spill] sm:$0xff] %v10731_v13  ;;  %4748 = vst.msk [vmem:[#allocation3 + $0x1c8] sm:$0xff] %vm1994_vm3, %v10731_v13  ;;  %v10740_v41 = vmax.f32 %v10724_v54, %v4173_v18 }
 0xbfe   : > { %v4480_v54 = vpop.permute.xlu1 %4479 }
 0xbff   : > { %11925 = vst [vmem:[#allocation154_spill] sm:$0xff] %v10740_v41  ;;  %4753 = vst.msk [vmem:[#allocation3 + $0x1f0] sm:$0xff] %vm1994_vm3, %v10740_v41  ;;  %4312 = vperm.xlu0 %7286, %v10740_v41  }
 0xc00   : > { %v4169_v14 = vpop.xlane.xlu0 %4168  ;;  %4287 = vperm.xlu1 %7287, %v10731_v13  }
 0xc01   : > { %v10751_v48 = vmax.f32 %v10742_v53, %v4169_v14  ;;  %v10761_v14 = vld [vmem:[#allocation3 + $0x1f8] sm:$0xff] }
 0xc03   : > { %4751 = vst.msk [vmem:[#allocation3 + $0x1e0] sm:$0xff] %vm1994_vm3, %v10751_v48  ;;  %4302 = vperm.xlu0 %7286, %v10751_v48  }
 0xc04   : > { %v4478_v28 = vpop.permute.xlu0 %4477 }
 0xc05   : > { %6886 = vmatprep.subr.bf16.mxu0 %v4478_v28 }
 0xc06   : > { %6887 = vmatpush3.bf16.msra.mxu0 %v4478_v28  ;;  %v10767_v28 = vld [vmem:[#allocation3 + $0x1e8] sm:$0xff] }
 0xc07   : > { %6888 = vmatprep.subr.bf16.mxu0 %v4480_v54 }
 0xc08   : > { %v4482_v41 = vpop.permute.xlu0 %4481 }
 0xc0a   : > { %6889 = vmatpush3.bf16.msra.mxu0 %v4480_v54 }
 0xc0b   : > { %6890 = vmatprep.subr.bf16.mxu0 %v4482_v41 }
 0xc0e   : > { %6891 = vmatpush3.bf16.msra.mxu0 %v4482_v41  ;;  %v4486_v41 = vpop.permute.xlu0 %4485 }
 0xc22   : > { %3580 = vadd.xlane.f32.xlu0 %v10163_v51 }
 0xc26   : > { %3584 = vadd.xlane.f32.xlu0 %v10170_v4 }
 0xc2a   : > { %3586 = vadd.xlane.f32.xlu0 %v10166_v40 }
 0xc2e   : > { %3590 = vadd.xlane.f32.xlu0 %v10268_v46 }
 0xc2f   : > { %v4175_v18 = vpop.xlane.xlu1 %4174 }
 0xc30   : > { %v10765_v13 = vmax.f32 %v10761_v14, %v4175_v18 }
 0xc32   : > { %v4207_v54 = vsub.f32 %v10761_v14, %v10765_v13  ;;  %4754 = vst.msk [vmem:[#allocation3 + $0x1f8] sm:$0xff] %vm1994_vm3, %v10765_v13  ;;  %3594 = vadd.xlane.f32.xlu0 %v10261_v24  ;;  %4317 = vperm.xlu1 %7287, %v10765_v13  }
 0xc33   : > { %v4171_v51 = vpop.xlane.xlu1 %4170 }
 0xc34   : > { %v10776_v40 = vmax.f32 %v10767_v28, %v4171_v51 }
 0xc36   : > { %v4205_v4 = vsub.f32 %v10767_v28, %v10776_v40  ;;  %4752 = vst.msk [vmem:[#allocation3 + $0x1e8] sm:$0xff] %vm1994_vm3, %v10776_v40  ;;  %3598 = vadd.xlane.f32.xlu0 %v10305_v25  ;;  %4307 = vperm.xlu1 %7287, %v10776_v40   ;;  %v11926_v25 = vsub.f32 %v9966_v43, %v9980_v30  ;;  %v11932_v43 = vld [vmem:[#allocation172_spill] sm:$0xff]  ;;  %v3561_v28 = vld [vmem:[#allocation4 + $0x168] sm:$0xff] }
 0xc37   : > { %v4484_v46 = vpop.permute.xlu1 %4483  ;;  %v11933_v30 = vsub.f32 %v11932_v43, %v10073_v49 }
 0xc38   : > { %6892 = vmatprep.subr.bf16.mxu0 %v4484_v46  ;;  %v3389_v18 = vmul.f32 1.442695, %v11926_v25 }
 0xc39   : > { %6893 = vmatpush3.bf16.msra.mxu0 %v4484_v46 }
 0xc3a   : > { %3602 = vadd.xlane.f32.xlu0 %v10302_v44  ;;  %6894 = vmatprep.subr.bf16.mxu0 %v4486_v41  ;;  %7480 = vpow2.f32 %v3389_v18  ;;  %v11927_v44 = vld [vmem:[#allocation165_spill] sm:$0xff] }
 0xc3b   : > { %v4488_v24 = vpop.permute.xlu1 %4487  ;;  %v11928_v51 = vsub.f32 %v11927_v44, %v10031_v58 }
 0xc3d   : > { %6895 = vmatpush3.bf16.msra.mxu0 %v4486_v41  ;;  %v3395_v46 = vmul.f32 1.442695, %v11928_v51 }
 0xc3e   : > { %3606 = vadd.xlane.f32.xlu0 %v10336_v56  ;;  %6896 = vmatprep.subr.bf16.mxu0 %v4488_v24  ;;  %v11929_v56 = vld [vmem:[#allocation161_spill] sm:$0xff] }
 0xc3f   : > { %7482 = vpow2.f32 %v3395_v46 }
 0xc41   : > { %6897 = vmatpush3.bf16.msra.mxu0 %v4488_v24  ;;  %v11935_v24 = vld [vmem:[#allocation170_spill] sm:$0xff] }
 0xc42   : > { %3610 = vadd.xlane.f32.xlu0 %v10348_v22  ;;  %v11930_v22 = vld [vmem:[#allocation163_spill] sm:$0xff] }
 0xc58   : > { %3011 = vperm.xlu0 %7286, %v10407_v16   ;;  %v11931_v16 = vsub.f32 %v11929_v56, %v11930_v22 }
 0xc5a   : > { %3582 = vadd.xlane.f32.xlu1 %v10168_v11  ;;  %v3399_v41 = vmul.f32 1.442695, %v11931_v16  ;;  %v3403_v11 = vmul.f32 1.442695, %v11933_v30 }
 0xc5c   : > { %3021 = vperm.xlu0 %7286, %v10412_v27   ;;  %7484 = vpow2.f32 %v3399_v41 }
 0xc5d   : > { %7486 = vpow2.f32 %v3403_v11 }
 0xc5e   : > { %3588 = vadd.xlane.f32.xlu1 %v10258_v5  ;;  %v10807_v5 = vpop.eup %7480 }
 0xc5f   : > { %v10815_v18 = vpop.eup %7482 }
 0xc60   : > { %3031 = vperm.xlu0 %7286, %v10418_v29   ;;  %v11934_v29 = vld [vmem:[#allocation168_spill] sm:$0xff] }
 0xc61   : > { %v11936_v25 = vsub.f32 %v11934_v29, %v11935_v24 }
 0xc62   : > { %3592 = vadd.xlane.f32.xlu1 %v10270_v17 }
 0xc63   : > { %v3407_v17 = vmul.f32 1.442695, %v11936_v25 }
 0xc64   : > { %3041 = vperm.xlu0 %7286, %v10424_v20  }
 0xc65   : > { %7488 = vpow2.f32 %v3407_v17 }
 0xc66   : > { %v4253_v58 = vpop.permute.xlu0 %4252  ;;  %3596 = vadd.xlane.f32.xlu1 %v10299_v61 }
 0xc67   : > { %v4322_v27 = vsub.f32 %v10558_v32, %v4253_v58  ;;  %v11937_v32 = vsub.f32 %v10099_v37, %v10115_v35 }
 0xc68   : > { %3797 = vperm.xlu0 %7286, %v10807_v5  }
 0xc69   : > { %v4340_v49 = vmul.f32 1.442695, %v4322_v27  ;;  %v3411_v46 = vmul.f32 1.442695, %v11937_v32 }
 0xc6a   : > { %v4243_v20 = vpop.permute.xlu0 %4242  ;;  %3600 = vadd.xlane.f32.xlu1 %v10310_v45  ;;  %v10824_v45 = vpop.eup %7484 }
 0xc6b   : > { %v4320_v44 = vsub.f32 %v10561_v36, %v4243_v20  ;;  %v4258_v61 = vpop.permute.xlu1 %4257  ;;  %7490 = vpow2.f32 %v4340_v49 }
 0xc6c   : > { %v4323_v51 = vsub.f32 %v10564_v0, %v4258_v61  ;;  %3812 = vperm.xlu0 %7286, %v10815_v18   ;;  %v11938_v0 = vsub.f32 %v10078_v60, %v10094_v31  ;;  %v11940_v31 = vsub.f32 %v10664_v1, %v10682_v38  ;;  %v11941_v61 = vsub.f32 %v10647_v62, %v10662_v59 }
 0xc6d   : > { %v4336_v16 = vmul.f32 1.442695, %v4320_v44 }
 0xc6e   : > { %v4342_v56 = vmul.f32 1.442695, %v4323_v51  ;;  %v4273_v22 = vpop.permute.xlu0 %4272  ;;  %3604 = vadd.xlane.f32.xlu1 %v10332_v63  ;;  %v3415_v43 = vmul.f32 1.442695, %v11938_v0  ;;  %v10832_v63 = vpop.eup %7486  ;;  %v4216_v60 = vmul.f32 1.442695, %v11940_v31 }
 0xc6f   : > { %v4248_v41 = vpop.permute.xlu1 %4247  ;;  %v4220_v51 = vmul.f32 1.442695, %v11941_v61  ;;  %v11954_v61 = vld [vmem:[#allocation166_spill] sm:$0xff] }
 0xc70   : > { %7492 = vpow2.f32 %v4342_v56  ;;  %v4321_v36 = vsub.f32 %v10566_v15, %v4248_v41  ;;  %3822 = vperm.xlu0 %7286, %v10824_v45   ;;  %v11939_v15 = vsub.f32 %v10628_v21, %v10642_v34  ;;  %v11942_v56 = vsub.f32 %v10684_v47, %v10702_v57 }
 0xc71   : > { %7494 = vpow2.f32 %v3411_v46 }
 0xc72   : > { %v4338_v35 = vmul.f32 1.442695, %v4321_v36  ;;  %v4263_v37 = vpop.permute.xlu0 %4262  ;;  %3608 = vadd.xlane.f32.xlu1 %v10343_v2  ;;  %7496 = vpow2.f32 %v4336_v16  ;;  %v4210_v58 = vmul.f32 1.442695, %v11939_v15  ;;  %v4326_v2 = vsub.f32 %v10570_v23, %v4273_v22 }
 0xc73   : > { %v4324_v30 = vsub.f32 %v10573_v8, %v4263_v37  ;;  %v4278_v11 = vpop.permute.xlu1 %4277  ;;  %v10844_v8 = vpop.eup %7488  ;;  %v4228_v22 = vmul.f32 1.442695, %v11942_v56  ;;  %v11943_v37 = vld [vmem:[#allocation156_spill] sm:$0xff] }
 0xc74   : > { %7498 = vpow2.f32 %v4338_v35  ;;  %v4327_v27 = vsub.f32 %v10575_v7, %v4278_v11  ;;  %3832 = vperm.xlu0 %7286, %v10832_v63   ;;  %v4348_v7 = vmul.f32 1.442695, %v4326_v2  ;;  %v11947_v2 = vld [vmem:[#allocation155_spill] sm:$0xff] }
 0xc75   : > { %7500 = vpow2.f32 %v3415_v43  ;;  %v4344_v29 = vmul.f32 1.442695, %v4324_v30  ;;  %v10848_v21 = vpop.eup %7490  ;;  %v11944_v30 = vld [vmem:[#allocation158_spill] sm:$0xff] }
 0xc76   : > { %v4293_v24 = vpop.permute.xlu0 %4292  ;;  %v4350_v25 = vmul.f32 1.442695, %v4327_v27  ;;  %7502 = vpow2.f32 %v4210_v58  ;;  %v11946_v58 = vsub.f32 %v10704_v33, %v10722_v19  ;;  %v11950_v19 = vsub.f32 %v10742_v53, %v10751_v48 }
 0xc77   : > { %v4268_v17 = vpop.permute.xlu1 %4267  ;;  %7504 = vpow2.f32 %v4216_v60 }
 0xc78   : > { %v4325_v34 = vsub.f32 %v10578_v6, %v4268_v17  ;;  %3842 = vperm.xlu0 %7286, %v10844_v8   ;;  %7506 = vpow2.f32 %v4344_v29  ;;  %v4224_v27 = vmul.f32 1.442695, %v11946_v58  ;;  %v11948_v29 = vld [vmem:[#allocation157_spill] sm:$0xff]  ;;  %v4232_v17 = vmul.f32 1.442695, %v11950_v19  ;;  %v11963_v58 = vld [vmem:[#allocation171_spill] sm:$0xff] }
 0xc79   : > { %7508 = vpow2.f32 %v4350_v25 }
 0xc7a   : > { %v10850_v20 = vpop.eup %7492  ;;  %v4346_v1 = vmul.f32 1.442695, %v4325_v34  ;;  %v4283_v23 = vpop.permute.xlu0 %4282 }
 0xc7b   : > { %v10852_v38 = vpop.eup %7494  ;;  %v4328_v49 = vsub.f32 %v10585_v26, %v4283_v23  ;;  %v4298_v44 = vpop.permute.xlu1 %4297  ;;  %v4466_v6 = vpack.c.bf16 %v10850_v20, %v10848_v21  ;;  %v4330_v26 = vsub.f32 %v10582_v39, %v4293_v24  ;;  %v11949_v24 = vsub.f32 %v11947_v2, %v11948_v29  ;;  %v11952_v23 = vld [vmem:[#allocation160_spill] sm:$0xff] }
 0xc7c   : > { %7510 = vpow2.f32 %v4346_v1  ;;  %v4331_v32 = vsub.f32 %v10587_v42, %v4298_v44  ;;  %3852 = vperm.xlu0 %7286, %v10852_v38   ;;  %v10862_v46 = vpop.eup %7496  ;;  %v11951_v1 = vld [vmem:[#allocation159_spill] sm:$0xff]  ;;  %v11965_v29 = vld [vmem:[#allocation176_spill] sm:$0xff] }
 0xc7d   : > { %7512 = vpow2.f32 %v4348_v7  ;;  %v4352_v41 = vmul.f32 1.442695, %v4328_v49  ;;  %v4356_v47 = vmul.f32 1.442695, %v4330_v26  ;;  %v3391_v25 = vmul.f32 1.442695, %v11949_v24 }
 0xc7e   : > { %v10868_v16 = vpop.eup %7498  ;;  %v4358_v59 = vmul.f32 1.442695, %v4331_v32  ;;  %7514 = vpow2.f32 %v4220_v51  ;;  %v11953_v49 = vsub.f32 %v11951_v1, %v11952_v23  ;;  %v11955_v51 = vld [vmem:[#allocation167_spill] sm:$0xff]  ;;  %v11966_v24 = vld [vmem:[#allocation177_spill] sm:$0xff] }
 0xc7f   : > { %v10870_v36 = vpop.eup %7500  ;;  %v4288_v62 = vpop.permute.xlu1 %4287  ;;  %v4465_v42 = vpack.c.bf16 %v10868_v16, %v10862_v46  ;;  %7516 = vpow2.f32 %v4228_v22  ;;  %v11956_v32 = vsub.f32 %v11954_v61, %v11955_v51  ;;  %v11972_v61 = vld [vmem:[#allocation148_spill] sm:$0xff] }
 0xc80   : > { %v4329_v0 = vsub.f32 %v10590_v12, %v4288_v62  ;;  %3862 = vperm.xlu0 %7286, %v10870_v36   ;;  %v10876_v57 = vpop.eup %7502  ;;  %7518 = vpow2.f32 %v4352_v41  ;;  %v11945_v12 = vsub.f32 %v11943_v37, %v11944_v30  ;;  %v3393_v44 = vmul.f32 1.442695, %v11953_v49  ;;  %v4313_v49 = vpop.permute.xlu0 %4312 }
 0xc81   : > { %6898 = vmatprep.mubr.bf16.mxu0 %v4465_v42  ;;  %v10878_v43 = vpop.eup %7504  ;;  %7520 = vpow2.f32 %v4358_v59  ;;  %v3397_v56 = vmul.f32 1.442695, %v11956_v32  ;;  %v11958_v59 = vld [vmem:[#allocation164_spill] sm:$0xff] }
 0xc82   : > { %v4354_v39 = vmul.f32 1.442695, %v4329_v0  ;;  %6899 = vmatmul.mubr.bf16.vlgmr.msra.gmra.mrb[64].mxu0 %v4466_v6  ;;  %v10881_v35 = vpop.eup %7506  ;;  %v3387_v11 = vmul.f32 1.442695, %v11945_v12 }
 0xc83   : > { %3016 = vperm.xlu1 %7287, %v10475_v55   ;;  %v10887_v15 = vpop.eup %7508 }
 0xc84   : > { %7522 = vpow2.f32 %v4354_v39  ;;  %4618 = vperm.xlu0 %7286, %v10876_v57   ;;  %v11960_v39 = vld [vmem:[#allocation173_spill] sm:$0xff] }
 0xc85   : > { %7524 = vpow2.f32 %v4356_v47  ;;  %v11961_v37 = vsub.f32 %v11960_v39, %v10076_v52  ;;  %v11968_v52 = vld [vmem:[#allocation174_spill] sm:$0xff] }
 0xc86   : > { %v10892_v31 = vpop.eup %7510  ;;  %7526 = vpow2.f32 %v3387_v11  ;;  %v11962_v11 = vld [vmem:[#allocation169_spill] sm:$0xff] }
 0xc87   : > { %v10894_v60 = vpop.eup %7512  ;;  %3026 = vperm.xlu1 %7287, %v10481_v10   ;;  %v4467_v55 = vpack.c.bf16 %v10892_v31, %v10881_v35  ;;  %7528 = vpow2.f32 %v4224_v27  ;;  %v3405_v30 = vmul.f32 1.442695, %v11961_v37  ;;  %v11964_v27 = vsub.f32 %v11962_v11, %v11963_v58  ;;  %v3550_v58 = vld [vmem:[#allocation4 + $0x110] sm:$0xff] }
 0xc88   : > { %4633 = vperm.xlu0 %7286, %v10878_v43   ;;  %v4468_v33 = vpack.c.bf16 %v10887_v15, %v10894_v60  ;;  %v10908_v10 = vpop.eup %7514  ;;  %7530 = vpow2.f32 %v3391_v25  ;;  %v11967_v25 = vsub.f32 %v11965_v29, %v11966_v24 }
 0xc89   : > { %6902 = vmatprep.mubr.bf16.mxu0 %v4467_v55  ;;  %v10910_v34 = vpop.eup %7516  ;;  %7532 = vpow2.f32 %v4232_v17  ;;  %v3409_v55 = vmul.f32 1.442695, %v11964_v27  ;;  %v11969_v17 = vld [vmem:[#allocation175_spill] sm:$0xff]  ;;  %v11977_v27 = vld [vmem:[#allocation128_spill] sm:$0xff] }
 0xc8a   : > { %6903 = vmatmul.mubr.bf16.gmra.mrb[68].mxu0 %v4468_v33  ;;  %v10913_v7 = vpop.eup %7518  ;;  %7534 = vpow2.f32 %v3393_v44  ;;  %v3413_v33 = vmul.f32 1.442695, %v11967_v25  ;;  %v11970_v1 = vsub.f32 %v11968_v52, %v11969_v17  ;;  %v11980_v25 = vld [vmem:[#allocation96_spill] sm:$0xff] }
 0xc8b   : > { %3036 = vperm.xlu1 %7287, %v10487_v9   ;;  %v10919_v6 = vpop.eup %7520  ;;  %7536 = vpow2.f32 %v3397_v56 }
 0xc8c   : > { %4643 = vperm.xlu0 %7286, %v10908_v10   ;;  %v3417_v23 = vmul.f32 1.442695, %v11970_v1 }
 0xc8e   : > { %v10921_v53 = vpop.eup %7522 }
 0xc8f   : > { %v10923_v48 = vpop.eup %7524  ;;  %3046 = vperm.xlu1 %7287, %v10493_v3   ;;  %v4469_v9 = vpack.c.bf16 %v10921_v53, %v10913_v7  ;;  %v11957_v3 = vld [vmem:[#allocation162_spill] sm:$0xff] }
 0xc90   : > { %4663 = vperm.xlu0 %7286, %v10910_v34   ;;  %v4470_v22 = vpack.c.bf16 %v10919_v6, %v10923_v48  ;;  %v7527_v26 = vpop.eup %7526  ;;  %v11959_v62 = vsub.f32 %v11957_v3, %v11958_v59  ;;  %v3548_v3 = vld [vmem:[#allocation4 + $0x100] sm:$0xff] }
 0xc91   : > { %6906 = vmatprep.mubr.bf16.mxu0 %v4469_v9  ;;  %v10934_v41 = vpop.eup %7528  ;;  %v11971_v9 = vld [vmem:[#allocation95_spill] sm:$0xff]  ;;  %v11974_v59 = vld [vmem:[#allocation149_spill] sm:$0xff] }
 0xc92   : > { %6907 = vmatmul.mubr.bf16.gmra.mrb[72].mxu0 %v4470_v22  ;;  %v3401_v42 = vmul.f32 1.442695, %v11959_v62  ;;  %v7531_v0 = vpop.eup %7530  ;;  %v11973_v51 = vsub.f32 %v11971_v9, %v11972_v61  ;;  %v4303_v22 = vpop.permute.xlu0 %4302  ;;  %v11975_v62 = vld [vmem:[#allocation97_spill] sm:$0xff]  ;;  %v11982_v61 = vld [vmem:[#allocation130_spill] sm:$0xff] }
 0xc93   : > { %3792 = vperm.xlu1 %7287, %v7527_v26   ;;  %v10940_v47 = vpop.eup %7532 }
 0xc94   : > { %4653 = vperm.xlu0 %7286, %v10934_v41   ;;  %7538 = vpow2.f32 %v3401_v42  ;;  %v7535_v12 = vpop.eup %7534  ;;  %v4208_v32 = vmul.f32 1.442695, %v11973_v51  ;;  %v11976_v42 = vsub.f32 %v11974_v59, %v11975_v62  ;;  %v11983_v51 = vld [vmem:[#allocation108_spill] sm:$0xff] }
 0xc95   : > { %7540 = vpow2.f32 %v3405_v30  ;;  %v7537_v2 = vpop.eup %7536  ;;  %v3564_v30 = vmul.f32 %v7527_v26, %v3548_v3  ;;  %v3566_v26 = vmul.f32 %v7531_v0, %v3550_v58  ;;  %v3551_v62 = vld [vmem:[#allocation4 + $0x118] sm:$0xff] }
 0xc96   : > { %7542 = vpow2.f32 %v3409_v55  ;;  %v4212_v39 = vmul.f32 1.442695, %v11976_v42  ;;  %v11978_v55 = vld [vmem:[#allocation150_spill] sm:$0xff]  ;;  %v11985_v42 = vld [vmem:[#allocation72_spill] sm:$0xff] }
 0xc97   : > { %3802 = vperm.xlu1 %7287, %v7531_v0   ;;  %7544 = vpow2.f32 %v3413_v33  ;;  %v11979_v29 = vsub.f32 %v11977_v27, %v11978_v55  ;;  %v4332_v33 = vsub.f32 %v11980_v25, %v4303_v22  ;;  %v4334_v22 = vsub.f32 %v11985_v42, %v4313_v49  ;;  %v11986_v0 = vld [vmem:[#allocation129_spill] sm:$0xff]  ;;  %v11987_v25 = vld [vmem:[#allocation100_spill] sm:$0xff]  ;;  %v3553_v49 = vld [vmem:[#allocation4 + $0x128] sm:$0xff] }
 0xc98   : > { %4673 = vperm.xlu0 %7286, %v10940_v47   ;;  %7546 = vpow2.f32 %v3417_v23  ;;  %v11981_v23 = vld [vmem:[#allocation98_spill] sm:$0xff] }
 0xc99   : > { %7548 = vpow2.f32 %v4208_v32  ;;  %v4214_v24 = vmul.f32 1.442695, %v11979_v29  ;;  %v11984_v32 = vsub.f32 %v11982_v61, %v11983_v51  ;;  %v3567_v29 = vmul.f32 %v7535_v12, %v3551_v62 }
 0xc9a   : > { %7550 = vpow2.f32 %v4212_v39  ;;  %v4360_v39 = vmul.f32 1.442695, %v4332_v33  ;;  %v4364_v33 = vmul.f32 1.442695, %v4334_v22 }
 0xc9b   : > { %3807 = vperm.xlu1 %7287, %v7535_v12   ;;  %v4218_v3 = vmul.f32 1.442695, %v11984_v32  ;;  %7552 = vpow2.f32 %v4214_v24  ;;  %v3569_v12 = vmul.f32 %v7537_v2, %v3553_v49  ;;  %v11990_v32 = vld [vmem:[#allocation110_spill] sm:$0xff] }
 0xc9d   : > { %7554 = vpow2.f32 %v4218_v3  ;;  %v11991_v3 = vld [vmem:[#allocation131_spill] sm:$0xff] }
 0xc9e   : > { %v10952_v19 = vpop.eup %7538  ;;  %7556 = vpow2.f32 %v4360_v39 }
 0xc9f   : > { %3817 = vperm.xlu1 %7287, %v7537_v2   ;;  %v10958_v44 = vpop.eup %7540 }
 0xca0   : > { %v10964_v56 = vpop.eup %7542 }
 0xca1   : > { %v10970_v37 = vpop.eup %7544 }
 0xca2   : > { %v10977_v1 = vpop.eup %7546 }
 0xca3   : > { %3827 = vperm.xlu1 %7287, %v10952_v19   ;;  %v10986_v55 = vpop.eup %7548 }
 0xca4   : > { %v10995_v61 = vpop.eup %7550 }
 0xca5   : > { %v11003_v22 = vpop.eup %7552 }
 0xca7   : > { %3837 = vperm.xlu1 %7287, %v10958_v44  }
 0xcab   : > { %3847 = vperm.xlu1 %7287, %v10964_v56  }
 0xcaf   : > { %v3581_v11 = vpop.xlane.xlu0 %3580  ;;  %3857 = vperm.xlu1 %7287, %v10970_v37  }
 0xcb0   : > { %v3612_v52 = vadd.f32 %v3581_v11, %v3564_v30 }
 0xcb1   : > { %v4318_v17 = vpop.permute.xlu1 %4317 }
 0xcb2   : > { %3628 = vst.msk [vmem:[#allocation4 + $0x100] sm:$0xff] %vm1994_vm3, %v3612_v52  ;;  %v4335_v9 = vsub.f32 %v11981_v23, %v4318_v17  ;;  %v11988_v52 = vld [vmem:[#allocation102_spill] sm:$0xff] }
 0xcb3   : > { %v3585_v59 = vpop.xlane.xlu0 %3584  ;;  %3867 = vperm.xlu1 %7287, %v10977_v1   ;;  %v11989_v17 = vsub.f32 %v11987_v25, %v11988_v52 }
 0xcb4   : > { %v3614_v30 = vadd.f32 %v3585_v59, %v3566_v26  ;;  %v4366_v11 = vmul.f32 1.442695, %v4335_v9  ;;  %v11992_v59 = vsub.f32 %v11990_v32, %v11991_v3 }
 0xcb5   : > { %v4308_v27 = vpop.permute.xlu1 %4307  ;;  %v4222_v23 = vmul.f32 1.442695, %v11989_v17 }
 0xcb6   : > { %3630 = vst.msk [vmem:[#allocation4 + $0x110] sm:$0xff] %vm1994_vm3, %v3614_v30  ;;  %v4333_v58 = vsub.f32 %v11986_v0, %v4308_v27  ;;  %7558 = vpow2.f32 %v4366_v11  ;;  %v4230_v62 = vmul.f32 1.442695, %v11992_v59  ;;  %v11993_v30 = vld [vmem:[#allocation151_spill] sm:$0xff] }
 0xcb7   : > { %4405 = vadd.xlane.f32.xlu0 %v10848_v21  ;;  %v3587_v24 = vpop.xlane.xlu0 %3586  ;;  %4613 = vperm.xlu1 %7287, %v10986_v55   ;;  %v3555_v21 = vld [vmem:[#allocation4 + $0x138] sm:$0xff]  ;;  %v11994_v11 = vsub.f32 %v10715_v50, %v11993_v30  ;;  %v4234_v50 = vmul.f32 1.442695, %v4205_v4 }
 0xcb8   : > { %v4362_v9 = vmul.f32 1.442695, %v4333_v58  ;;  %v3615_v26 = vadd.f32 %v3587_v24, %v3567_v29  ;;  %v3571_v39 = vmul.f32 %v10952_v19, %v3555_v21  ;;  %v11012_v58 = vpop.eup %7554  ;;  %v11996_v30 = vld [vmem:[#allocation152_spill] sm:$0xff] }
 0xcb9   : > { %v4226_v27 = vmul.f32 1.442695, %v11994_v11  ;;  %v11014_v29 = vpop.eup %7556  ;;  %v11997_v11 = vld [vmem:[#allocation154_spill] sm:$0xff] }
 0xcba   : > { %7560 = vpow2.f32 %v4362_v9  ;;  %3631 = vst.msk [vmem:[#allocation4 + $0x118] sm:$0xff] %vm1994_vm3, %v3615_v26  ;;  %v3577_v26 = vmul.f32 %v10970_v37, %v3561_v28  ;;  %v12001_v28 = vld [vmem:[#allocation144_spill] sm:$0xff] }
 0xcbb   : > { %7562 = vpow2.f32 %v4222_v23  ;;  %4401 = vadd.xlane.f32.xlu0 %v10862_v46  ;;  %v3591_v51 = vpop.xlane.xlu0 %3590  ;;  %4623 = vperm.xlu1 %7287, %v10995_v61   ;;  %v3557_v46 = vld [vmem:[#allocation4 + $0x148] sm:$0xff] }
 0xcbc   : > { %7564 = vpow2.f32 %v4364_v33  ;;  %v3617_v42 = vadd.f32 %v3591_v51, %v3569_v12  ;;  %v3573_v19 = vmul.f32 %v10958_v44, %v3557_v46 }
 0xcbd   : > { %7566 = vpow2.f32 %v4230_v62 }
 0xcbe   : > { %3633 = vst.msk [vmem:[#allocation4 + $0x128] sm:$0xff] %vm1994_vm3, %v3617_v42  ;;  %7568 = vpow2.f32 %v4226_v27  ;;  %v2963_v42 = vld [vmem:[#allocation5 + $0xd0] sm:$0xff]  ;;  %v11998_v27 = vsub.f32 %v11996_v30, %v11997_v11  ;;  %v12003_v30 = vld [vmem:[#allocation78_spill] sm:$0xff] }
 0xcbf   : > { %v3595_v2 = vpop.xlane.xlu0 %3594  ;;  %4628 = vperm.xlu1 %7287, %v11003_v22   ;;  %4407 = vadd.xlane.f32.xlu0 %v10850_v20  ;;  %v3559_v20 = vld [vmem:[#allocation4 + $0x158] sm:$0xff]  ;;  %7570 = vpow2.f32 %v4234_v50  ;;  %v12000_v50 = vld [vmem:[#allocation145_spill] sm:$0xff] }
 0xcc0   : > { %v3619_v0 = vadd.f32 %v3595_v2, %v3571_v39  ;;  %v7559_v25 = vpop.eup %7558  ;;  %v3575_v44 = vmul.f32 %v10964_v56, %v3559_v20  ;;  %v3563_v56 = vld [vmem:[#allocation4 + $0x178] sm:$0xff]  ;;  %v11995_v39 = vld [vmem:[#allocation141_spill] sm:$0xff] }
 0xcc1   : > { %v3579_v21 = vmul.f32 %v10977_v1, %v3563_v56 }
 0xcc2   : > { %3635 = vst.msk [vmem:[#allocation4 + $0x138] sm:$0xff] %vm1994_vm3, %v3619_v0  ;;  %v4236_v0 = vmul.f32 1.442695, %v11998_v27 }
 0xcc3   : > { %v3599_v52 = vpop.xlane.xlu0 %3598  ;;  %4638 = vperm.xlu1 %7287, %v11012_v58   ;;  %4415 = vadd.xlane.f32.xlu0 %v10887_v15 }
 0xcc4   : > { %v7561_v17 = vpop.eup %7560  ;;  %v3621_v23 = vadd.f32 %v3599_v52, %v3573_v19  ;;  %v11999_v19 = vld [vmem:[#allocation140_spill] sm:$0xff]  ;;  %7572 = vpow2.f32 %v4236_v0 }
 0xcc5   : > { %v11023_v24 = vpop.eup %7562  ;;  %v4471_v49 = vpack.c.bf16 %v7561_v17, %v11014_v29 }
 0xcc6   : > { %v11026_v33 = vpop.eup %7564  ;;  %3637 = vst.msk [vmem:[#allocation4 + $0x148] sm:$0xff] %vm1994_vm3, %v3621_v23 }
 0xcc7   : > { %v3603_v9 = vpop.xlane.xlu0 %3602  ;;  %4648 = vperm.xlu1 %7287, %v11023_v24   ;;  %4411 = vadd.xlane.f32.xlu0 %v10892_v31  ;;  %v4472_v15 = vpack.c.bf16 %v7559_v25, %v11026_v33  ;;  %v11033_v4 = vpop.eup %7566 }
 0xcc8   : > { %v3623_v40 = vadd.f32 %v3603_v9, %v3575_v44  ;;  %6910 = vmatprep.mubr.bf16.mxu0 %v4471_v49  ;;  %v11039_v51 = vpop.eup %7568  ;;  %v3549_v44 = vld [vmem:[#allocation4 + $0x108] sm:$0xff] }
 0xcc9   : > { %6911 = vmatmul.mubr.bf16.gmra.mrb[76].mxu0 %v4472_v15  ;;  %v11045_v37 = vpop.eup %7570  ;;  %v3775_v15 = vld [vmem:[#allocation5 + $0x108] sm:$0xff] }
 0xcca   : > { %3639 = vst.msk [vmem:[#allocation4 + $0x158] sm:$0xff] %vm1994_vm3, %v3623_v40 }
 0xccb   : > { %v3607_v12 = vpop.xlane.xlu0 %3606  ;;  %4668 = vperm.xlu1 %7287, %v11033_v4   ;;  %4423 = vadd.xlane.f32.xlu0 %v10919_v6  ;;  %v2961_v6 = vld [vmem:[#allocation5 + $0xc0] sm:$0xff] }
 0xccc   : > { %v3625_v31 = vadd.f32 %v3607_v12, %v3577_v26  ;;  %v3565_v26 = vmul.f32 %v10807_v5, %v3549_v44 }
 0xcce   : > { %3641 = vst.msk [vmem:[#allocation4 + $0x168] sm:$0xff] %vm1994_vm3, %v3625_v31  ;;  %v3552_v31 = vld [vmem:[#allocation4 + $0x120] sm:$0xff] }
 0xccf   : > { %v3611_v32 = vpop.xlane.xlu0 %3610  ;;  %4658 = vperm.xlu1 %7287, %v11039_v51   ;;  %4419 = vadd.xlane.f32.xlu0 %v10921_v53  ;;  %v2965_v53 = vld [vmem:[#allocation5 + $0xe0] sm:$0xff] }
 0xcd0   : > { %v3627_v3 = vadd.f32 %v3611_v32, %v3579_v21 }
 0xcd2   : > { %3643 = vst.msk [vmem:[#allocation4 + $0x178] sm:$0xff] %vm1994_vm3, %v3627_v3  ;;  %v3778_v3 = vld [vmem:[#allocation5 + $0x120] sm:$0xff] }
 0xcd3   : > { %4678 = vperm.xlu1 %7287, %v11045_v37   ;;  %4431 = vadd.xlane.f32.xlu0 %v7559_v25 }
 0xcd7   : > { %v3012_v59 = vpop.permute.xlu0 %3011  ;;  %4427 = vadd.xlane.f32.xlu0 %v7561_v17  ;;  %v2967_v17 = vld [vmem:[#allocation5 + $0xf0] sm:$0xff] }
 0xcd8   : > { %v3057_v62 = vmul.f32 %v3012_v59, %v2961_v6  ;;  %v12002_v6 = vld [vmem:[#allocation58_spill] sm:$0xff] }
 0xcda   : > { %v3073_v1 = vadd.f32 %v3057_v62, %v11995_v39  ;;  %v3568_v62 = vmul.f32 %v10815_v18, %v3552_v31 }
 0xcdb   : > { %v3022_v2 = vpop.permute.xlu0 %3021 }
 0xcdc   : > { %3089 = vst.msk [vmem:[#allocation5 + $0xc0] sm:$0xff] %vm1528_vm2, %v3073_v1  ;;  %v3059_v46 = vmul.f32 %v3022_v2, %v2963_v42  ;;  %v3554_v1 = vld [vmem:[#allocation4 + $0x130] sm:$0xff]  ;;  %v11064_v2 = vpop.eup %7572 }
 0xcdd   : > { %v3570_v27 = vmul.f32 %v10824_v45, %v3554_v1 }
 0xcde   : > { %v3075_v52 = vadd.f32 %v11999_v19, %v3059_v46  ;;  %v3556_v19 = vld [vmem:[#allocation4 + $0x140] sm:$0xff] }
 0xcdf   : > { %v3032_v20 = vpop.permute.xlu0 %3031 }
 0xce0   : > { %3091 = vst.msk [vmem:[#allocation5 + $0xd0] sm:$0xff] %vm1528_vm2, %v3075_v52  ;;  %v3061_v25 = vmul.f32 %v3032_v20, %v2965_v53  ;;  %v3780_v53 = vld [vmem:[#allocation5 + $0x130] sm:$0xff] }
 0xce2   : > { %v3077_v23 = vadd.f32 %v3061_v25, %v12000_v50  ;;  %v3782_v25 = vld [vmem:[#allocation5 + $0x140] sm:$0xff] }
 0xce3   : > { %v3042_v49 = vpop.permute.xlu0 %3041 }
 0xce4   : > { %3093 = vst.msk [vmem:[#allocation5 + $0xe0] sm:$0xff] %vm1528_vm2, %v3077_v23  ;;  %v3063_v9 = vmul.f32 %v3042_v49, %v2967_v17  ;;  %v12004_v17 = vld [vmem:[#allocation60_spill] sm:$0xff]  ;;  %v3572_v23 = vmul.f32 %v10832_v63, %v3556_v19 }
 0xce6   : > { %v3079_v40 = vadd.f32 %v12001_v28, %v3063_v9  ;;  %v3558_v9 = vld [vmem:[#allocation4 + $0x150] sm:$0xff] }
 0xce7   : > { %v3798_v12 = vpop.permute.xlu0 %3797  ;;  %v3583_v56 = vpop.xlane.xlu1 %3582  ;;  %v3784_v28 = vld [vmem:[#allocation5 + $0x150] sm:$0xff] }
 0xce8   : > { %3095 = vst.msk [vmem:[#allocation5 + $0xf0] sm:$0xff] %vm1528_vm2, %v3079_v40  ;;  %v3871_v21 = vmul.f32 %v3798_v12, %v3775_v15  ;;  %v3613_v32 = vadd.f32 %v3583_v56, %v3565_v26  ;;  %v12005_v40 = vld [vmem:[#allocation68_spill] sm:$0xff]  ;;  %v3574_v12 = vmul.f32 %v10844_v8, %v3558_v9 }
 0xcea   : > { %v3887_v59 = vadd.f32 %v3871_v21, %v12002_v6  ;;  %3629 = vst.msk [vmem:[#allocation4 + $0x108] sm:$0xff] %vm1994_vm3, %v3613_v32  ;;  %v3560_v21 = vld [vmem:[#allocation4 + $0x160] sm:$0xff]  ;;  %v12006_v6 = vld [vmem:[#allocation66_spill] sm:$0xff] }
 0xceb   : > { %v3813_v42 = vpop.permute.xlu0 %3812  ;;  %v3589_v39 = vpop.xlane.xlu1 %3588 }
 0xcec   : > { %3903 = vst.msk [vmem:[#allocation5 + $0x108] sm:$0xff] %vm1528_vm2, %v3887_v59  ;;  %v3874_v5 = vmul.f32 %v3813_v42, %v3778_v3  ;;  %v3616_v46 = vadd.f32 %v3589_v39, %v3568_v62  ;;  %v3786_v3 = vld [vmem:[#allocation5 + $0x160] sm:$0xff]  ;;  %v3576_v62 = vmul.f32 %v10852_v38, %v3560_v21  ;;  %v3562_v39 = vld [vmem:[#allocation4 + $0x170] sm:$0xff] }
 0xced   : > { %4683 = vperm.xlu0 %7286, %v11064_v2  }
 0xcee   : > { %v3890_v11 = vadd.f32 %v3874_v5, %v12003_v30  ;;  %3632 = vst.msk [vmem:[#allocation4 + $0x120] sm:$0xff] %vm1994_vm3, %v3616_v46  ;;  %v3788_v5 = vld [vmem:[#allocation5 + $0x170] sm:$0xff]  ;;  %v12007_v46 = vld [vmem:[#allocation74_spill] sm:$0xff]  ;;  %v3578_v30 = vmul.f32 %v10870_v36, %v3562_v39  ;;  %v2964_v36 = vld [vmem:[#allocation5 + $0xd8] sm:$0xff] }
 0xcef   : > { %v3823_v0 = vpop.permute.xlu0 %3822  ;;  %v3593_v18 = vpop.xlane.xlu1 %3592 }
 0xcf0   : > { %3906 = vst.msk [vmem:[#allocation5 + $0x120] sm:$0xff] %vm1528_vm2, %v3890_v11  ;;  %v3876_v52 = vmul.f32 %v3823_v0, %v3780_v53  ;;  %v3618_v20 = vadd.f32 %v3593_v18, %v3570_v27  ;;  %v2962_v0 = vld [vmem:[#allocation5 + $0xc8] sm:$0xff]  ;;  %v12008_v18 = vld [vmem:[#allocation127_spill] sm:$0xff] }
 0xcf2   : > { %v3892_v50 = vadd.f32 %v12004_v17, %v3876_v52  ;;  %3634 = vst.msk [vmem:[#allocation4 + $0x130] sm:$0xff] %vm1994_vm3, %v3618_v20 }
 0xcf3   : > { %v3833_v49 = vpop.permute.xlu0 %3832  ;;  %v3597_v44 = vpop.xlane.xlu1 %3596 }
 0xcf4   : > { %3908 = vst.msk [vmem:[#allocation5 + $0x130] sm:$0xff] %vm1528_vm2, %v3892_v50  ;;  %v3878_v45 = vmul.f32 %v3833_v49, %v3782_v25  ;;  %v3620_v15 = vadd.f32 %v3597_v44, %v3572_v23  ;;  %v12009_v25 = vld [vmem:[#allocation143_spill] sm:$0xff]  ;;  %v2966_v23 = vld [vmem:[#allocation5 + $0xe8] sm:$0xff] }
 0xcf5   : > { %v12010_v49 = vld [vmem:[#allocation142_spill] sm:$0xff] }
 0xcf6   : > { %v3894_v26 = vadd.f32 %v3878_v45, %v12005_v40  ;;  %3636 = vst.msk [vmem:[#allocation4 + $0x140] sm:$0xff] %vm1994_vm3, %v3620_v15  ;;  %v2968_v45 = vld [vmem:[#allocation5 + $0xf8] sm:$0xff]  ;;  %v12011_v15 = vld [vmem:[#allocation147_spill] sm:$0xff] }
 0xcf7   : > { %v3843_v56 = vpop.permute.xlu0 %3842  ;;  %4403 = vadd.xlane.f32.xlu1 %v10868_v16  ;;  %v3601_v31 = vpop.xlane.xlu1 %3600 }
 0xcf8   : > { %3910 = vst.msk [vmem:[#allocation5 + $0x140] sm:$0xff] %vm1528_vm2, %v3894_v26  ;;  %v3880_v63 = vmul.f32 %v3843_v56, %v3784_v28  ;;  %v3622_v32 = vadd.f32 %v3601_v31, %v3574_v12  ;;  %v4238_v26 = vmul.f32 1.442695, %v4207_v54  ;;  %v3774_v12 = vld [vmem:[#allocation5 + $0x100] sm:$0xff]  ;;  %v12012_v56 = vld [vmem:[#allocation146_spill] sm:$0xff] }
 0xcf9   : > { %v3779_v54 = vld [vmem:[#allocation5 + $0x128] sm:$0xff] }
 0xcfa   : > { %v3896_v59 = vadd.f32 %v12006_v6, %v3880_v63  ;;  %3638 = vst.msk [vmem:[#allocation4 + $0x150] sm:$0xff] %vm1994_vm3, %v3622_v32  ;;  %7574 = vpow2.f32 %v4238_v26  ;;  %v3776_v63 = vld [vmem:[#allocation5 + $0x110] sm:$0xff]  ;;  %v12013_v32 = vld [vmem:[#allocation50_spill] sm:$0xff] }
 0xcfb   : > { %v3853_v42 = vpop.permute.xlu0 %3852  ;;  %4413 = vadd.xlane.f32.xlu1 %v10894_v60  ;;  %v3605_v8 = vpop.xlane.xlu1 %3604 }
 0xcfc   : > { %3912 = vst.msk [vmem:[#allocation5 + $0x150] sm:$0xff] %vm1528_vm2, %v3896_v59  ;;  %v3882_v16 = vmul.f32 %v3853_v42, %v3786_v3  ;;  %v3624_v1 = vadd.f32 %v3605_v8, %v3576_v62  ;;  %v3777_v59 = vld [vmem:[#allocation5 + $0x118] sm:$0xff]  ;;  %v12014_v62 = vld [vmem:[#allocation47_spill] sm:$0xff]  ;;  %v12015_v8 = vld [vmem:[#allocation77_spill] sm:$0xff] }
 0xcfe   : > { %v3898_v53 = vadd.f32 %v3882_v16, %v12007_v46  ;;  %3640 = vst.msk [vmem:[#allocation4 + $0x160] sm:$0xff] %vm1994_vm3, %v3624_v1  ;;  %v3781_v46 = vld [vmem:[#allocation5 + $0x138] sm:$0xff] }
 0xcff   : > { %v3863_v11 = vpop.permute.xlu0 %3862  ;;  %4409 = vadd.xlane.f32.xlu1 %v10881_v35  ;;  %v3609_v38 = vpop.xlane.xlu1 %3608 }
 0xd00   : > { %3914 = vst.msk [vmem:[#allocation5 + $0x160] sm:$0xff] %vm1528_vm2, %v3898_v53  ;;  %v3884_v60 = vmul.f32 %v3863_v11, %v3788_v5  ;;  %v3626_v27 = vadd.f32 %v3609_v38, %v3578_v30  ;;  %v12016_v30 = vld [vmem:[#allocation56_spill] sm:$0xff] }
 0xd02   : > { %v3900_v19 = vadd.f32 %v12008_v18, %v3884_v60  ;;  %3642 = vst.msk [vmem:[#allocation4 + $0x170] sm:$0xff] %vm1994_vm3, %v3626_v27  ;;  %v3783_v27 = vld [vmem:[#allocation5 + $0x148] sm:$0xff] }
 0xd03   : > { %4421 = vadd.xlane.f32.xlu1 %v10923_v48  ;;  %v3017_v52 = vpop.permute.xlu1 %3016  ;;  %v11118_v53 = vpop.permute.xlu0 %4618 }
 0xd04   : > { %3916 = vst.msk [vmem:[#allocation5 + $0x170] sm:$0xff] %vm1528_vm2, %v3900_v19  ;;  %v3058_v20 = vmul.f32 %v3017_v52, %v2962_v0  ;;  %v11114_v16 = vpop.eup %7574  ;;  %v12017_v0 = vld [vmem:[#allocation54_spill] sm:$0xff] }
 0xd06   : > { %v3074_v17 = vadd.f32 %v3058_v20, %v12009_v25  ;;  %v12018_v25 = vld [vmem:[#allocation64_spill] sm:$0xff] }
 0xd07   : > { %4417 = vadd.xlane.f32.xlu1 %v10913_v7  ;;  %v3027_v35 = vpop.permute.xlu1 %3026  ;;  %v11123_v52 = vpop.permute.xlu0 %4633 }
 0xd08   : > { %3090 = vst.msk [vmem:[#allocation5 + $0xc8] sm:$0xff] %vm1528_vm2, %v3074_v17  ;;  %v3060_v50 = vmul.f32 %v3027_v35, %v2964_v36  ;;  %v3785_v36 = vld [vmem:[#allocation5 + $0x158] sm:$0xff] }
 0xd0a   : > { %v3076_v44 = vadd.f32 %v12010_v49, %v3060_v50 }
 0xd0b   : > { %4429 = vadd.xlane.f32.xlu1 %v11026_v33  ;;  %v3037_v9 = vpop.permute.xlu1 %3036  ;;  %v11128_v49 = vpop.permute.xlu0 %4643 }
 0xd0c   : > { %3092 = vst.msk [vmem:[#allocation5 + $0xd8] sm:$0xff] %vm1528_vm2, %v3076_v44  ;;  %v3062_v48 = vmul.f32 %v3037_v9, %v2966_v23  ;;  %v3787_v23 = vld [vmem:[#allocation5 + $0x168] sm:$0xff] }
 0xd0d   : > { %v12019_v44 = vld [vmem:[#allocation62_spill] sm:$0xff] }
 0xd0e   : > { %v3078_v28 = vadd.f32 %v3062_v48, %v12011_v15  ;;  %v3789_v15 = vld [vmem:[#allocation5 + $0x178] sm:$0xff] }
 0xd0f   : > { %4425 = vadd.xlane.f32.xlu1 %v11014_v29  ;;  %v3047_v40 = vpop.permute.xlu1 %3046  ;;  %v11133_v26 = vpop.permute.xlu0 %4663 }
 0xd10   : > { %3094 = vst.msk [vmem:[#allocation5 + $0xe8] sm:$0xff] %vm1528_vm2, %v3078_v28  ;;  %v3064_v7 = vmul.f32 %v3047_v40, %v2968_v45  ;;  %v12020_v28 = vld [vmem:[#allocation70_spill] sm:$0xff] }
 0xd12   : > { %v3080_v33 = vadd.f32 %v12012_v56, %v3064_v7  ;;  %v12021_v56 = vld [vmem:[#allocation76_spill] sm:$0xff] }
 0xd13   : > { %v3793_v31 = vpop.permute.xlu1 %3792 }
 0xd14   : > { %3096 = vst.msk [vmem:[#allocation5 + $0xf8] sm:$0xff] %vm1528_vm2, %v3080_v33  ;;  %v3870_v21 = vmul.f32 %v3793_v31, %v3774_v12  ;;  %v11138_v31 = vpop.permute.xlu0 %4653 }
 0xd16   : > { %v3886_v3 = vadd.f32 %v3870_v21, %v12013_v32  ;;  %v4371_v32 = vld [vmem:[#allocation4 + $0x190] sm:$0xff] }
 0xd17   : > { %v3803_v29 = vpop.permute.xlu1 %3802 }
 0xd18   : > { %3902 = vst.msk [vmem:[#allocation5 + $0x100] sm:$0xff] %vm1528_vm2, %v3886_v3  ;;  %v3872_v6 = vmul.f32 %v3803_v29, %v3776_v63  ;;  %v11140_v63 = vpop.permute.xlu0 %4673  ;;  %v4387_v3 = vmul.f32 %v10995_v61, %v4371_v32 }
 0xd1a   : > { %v3888_v42 = vadd.f32 %v12014_v62, %v3872_v6  ;;  %v4369_v6 = vld [vmem:[#allocation4 + $0x180] sm:$0xff] }
 0xd1b   : > { %v3808_v13 = vpop.permute.xlu1 %3807 }
 0xd1c   : > { %3904 = vst.msk [vmem:[#allocation5 + $0x110] sm:$0xff] %vm1528_vm2, %v3888_v42  ;;  %v3873_v14 = vmul.f32 %v3808_v13, %v3777_v59  ;;  %v4385_v42 = vmul.f32 %v10986_v55, %v4369_v6  ;;  %v4384_v6 = vld [vmem:[#allocation4 + $0x1f8] sm:$0xff] }
 0xd1e   : > { %v3889_v39 = vadd.f32 %v12015_v8, %v3873_v14  ;;  %v4372_v14 = vld [vmem:[#allocation4 + $0x198] sm:$0xff] }
 0xd1f   : > { %v3818_v1 = vpop.permute.xlu1 %3817 }
 0xd20   : > { %3905 = vst.msk [vmem:[#allocation5 + $0x118] sm:$0xff] %vm1528_vm2, %v3889_v39  ;;  %v3875_v5 = vmul.f32 %v3818_v1, %v3779_v54  ;;  %4688 = vperm.xlu1 %7287, %v11114_v16   ;;  %v4388_v39 = vmul.f32 %v11003_v22, %v4372_v14 }
 0xd22   : > { %v3891_v11 = vadd.f32 %v3875_v5, %v12016_v30  ;;  %v4376_v5 = vld [vmem:[#allocation4 + $0x1b8] sm:$0xff] }
 0xd23   : > { %v3828_v38 = vpop.permute.xlu1 %3827  ;;  %v4392_v61 = vmul.f32 %v11023_v24, %v4376_v5 }
 0xd24   : > { %3907 = vst.msk [vmem:[#allocation5 + $0x128] sm:$0xff] %vm1528_vm2, %v3891_v11  ;;  %v3877_v60 = vmul.f32 %v3828_v38, %v3781_v46  ;;  %v4374_v11 = vld [vmem:[#allocation4 + $0x1a8] sm:$0xff]  ;;  %v4597_v38 = vld [vmem:[#allocation5 + $0x190] sm:$0xff] }
 0xd26   : > { %v3893_v18 = vadd.f32 %v12017_v0, %v3877_v60  ;;  %v4598_v0 = vld [vmem:[#allocation5 + $0x198] sm:$0xff] }
 0xd27   : > { %v3838_v19 = vpop.permute.xlu1 %3837 }
 0xd28   : > { %3909 = vst.msk [vmem:[#allocation5 + $0x138] sm:$0xff] %vm1528_vm2, %v3893_v18  ;;  %v3879_v20 = vmul.f32 %v3838_v19, %v3783_v27  ;;  %v4595_v27 = vld [vmem:[#allocation5 + $0x180] sm:$0xff]  ;;  %v4390_v18 = vmul.f32 %v11012_v58, %v4374_v11  ;;  %v4596_v19 = vld [vmem:[#allocation5 + $0x188] sm:$0xff] }
 0xd2a   : > { %v3895_v17 = vadd.f32 %v3879_v20, %v12018_v25 }
 0xd2b   : > { %v3848_v35 = vpop.permute.xlu1 %3847 }
 0xd2c   : > { %3911 = vst.msk [vmem:[#allocation5 + $0x148] sm:$0xff] %vm1528_vm2, %v3895_v17  ;;  %v3881_v50 = vmul.f32 %v3848_v35, %v3785_v36  ;;  %v4380_v36 = vld [vmem:[#allocation4 + $0x1d8] sm:$0xff] }
 0xd2e   : > { %v3897_v9 = vadd.f32 %v12019_v44, %v3881_v50  ;;  %v4692_v44 = vmul.f32 %v11118_v53, %v4596_v19  ;;  %v4602_v53 = vld [vmem:[#allocation5 + $0x1b8] sm:$0xff] }
 0xd2f   : > { %v3858_v48 = vpop.permute.xlu1 %3857 }
 0xd30   : > { %3913 = vst.msk [vmem:[#allocation5 + $0x158] sm:$0xff] %vm1528_vm2, %v3897_v9  ;;  %v3883_v45 = vmul.f32 %v3858_v48, %v3787_v23 }
 0xd32   : > { %v3899_v40 = vadd.f32 %v3883_v45, %v12020_v28 }
 0xd33   : > { %v3868_v7 = vpop.permute.xlu1 %3867 }
 0xd34   : > { %3915 = vst.msk [vmem:[#allocation5 + $0x168] sm:$0xff] %vm1528_vm2, %v3899_v40  ;;  %v3885_v12 = vmul.f32 %v3868_v7, %v3789_v15  ;;  %v4396_v15 = vmul.f32 %v11033_v4, %v4380_v36  ;;  %v4378_v7 = vld [vmem:[#allocation4 + $0x1c8] sm:$0xff] }
 0xd35   : > { %v4394_v4 = vmul.f32 %v11039_v51, %v4378_v7  ;;  %v4400_v51 = vmul.f32 %v11114_v16, %v4384_v6  ;;  %v4373_v7 = vld [vmem:[#allocation4 + $0x1a0] sm:$0xff]  ;;  %v4383_v6 = vld [vmem:[#allocation4 + $0x1f0] sm:$0xff] }
 0xd36   : > { %v3901_v33 = vadd.f32 %v12021_v56, %v3885_v12  ;;  %v4601_v12 = vld [vmem:[#allocation5 + $0x1b0] sm:$0xff] }
 0xd37   : > { %v4614_v21 = vpop.permute.xlu1 %4613  ;;  %v4697_v32 = vmul.f32 %v11128_v49, %v4601_v12 }
 0xd38   : > { %3917 = vst.msk [vmem:[#allocation5 + $0x178] sm:$0xff] %vm1528_vm2, %v3901_v33  ;;  %v4691_v25 = vmul.f32 %v4614_v21, %v4595_v27  ;;  %v4599_v21 = vld [vmem:[#allocation5 + $0x1a0] sm:$0xff] }
 0xd3b   : > { %v4624_v59 = vpop.permute.xlu1 %4623 }
 0xd3c   : > { %v4693_v22 = vmul.f32 %v4624_v59, %v4597_v38  ;;  %v4695_v59 = vmul.f32 %v11123_v52, %v4599_v21  ;;  %v4605_v52 = vld [vmem:[#allocation5 + $0x1d0] sm:$0xff] }
 0xd3d   : > { %v4701_v27 = vmul.f32 %v11133_v26, %v4605_v52  ;;  %v4379_v21 = vld [vmem:[#allocation4 + $0x1d0] sm:$0xff] }
 0xd3f   : > { %v4629_v8 = vpop.permute.xlu1 %4628 }
 0xd40   : > { %v4694_v50 = vmul.f32 %v4629_v8, %v4598_v0  ;;  %v4604_v0 = vld [vmem:[#allocation5 + $0x1c8] sm:$0xff] }
 0xd43   : > { %v4639_v60 = vpop.permute.xlu1 %4638 }
 0xd44   : > { %v4406_v29 = vpop.xlane.xlu0 %4405 }
 0xd45   : > { %v4435_v62 = vadd.f32 %v4406_v29, %v4387_v3  ;;  %v4600_v3 = vld [vmem:[#allocation5 + $0x1a8] sm:$0xff] }
 0xd47   : > { %4451 = vst.msk [vmem:[#allocation4 + $0x190] sm:$0xff] %vm1994_vm3, %v4435_v62  ;;  %v4649_v9 = vpop.permute.xlu1 %4648 }
 0xd48   : > { %v4402_v13 = vpop.xlane.xlu0 %4401 }
 0xd49   : > { %v4433_v54 = vadd.f32 %v4402_v13, %v4385_v42  ;;  %v4698_v13 = vmul.f32 %v4649_v9, %v4602_v53  ;;  %v4370_v9 = vld [vmem:[#allocation4 + $0x188] sm:$0xff] }
 0xd4b   : > { %4449 = vst.msk [vmem:[#allocation4 + $0x180] sm:$0xff] %vm1994_vm3, %v4433_v54  ;;  %v4669_v14 = vpop.permute.xlu1 %4668 }
 0xd4c   : > { %v4408_v1 = vpop.xlane.xlu0 %4407 }
 0xd4d   : > { %v4436_v46 = vadd.f32 %v4408_v1, %v4388_v39  ;;  %v4696_v39 = vmul.f32 %v4639_v60, %v4600_v3  ;;  %v4606_v60 = vld [vmem:[#allocation5 + $0x1d8] sm:$0xff] }
 0xd4f   : > { %4452 = vst.msk [vmem:[#allocation4 + $0x198] sm:$0xff] %vm1994_vm3, %v4436_v46 }
 0xd50   : > { %v4416_v30 = vpop.xlane.xlu0 %4415 }
 0xd51   : > { %v4440_v55 = vadd.f32 %v4416_v30, %v4392_v61  ;;  %v4382_v30 = vld [vmem:[#allocation4 + $0x1e8] sm:$0xff] }
 0xd52   : > { %v4398_v16 = vmul.f32 %v11045_v37, %v4382_v30 }
 0xd53   : > { %4456 = vst.msk [vmem:[#allocation4 + $0x1b8] sm:$0xff] %vm1994_vm3, %v4440_v55  ;;  %v4603_v55 = vld [vmem:[#allocation5 + $0x1c0] sm:$0xff] }
 0xd54   : > { %v4412_v20 = vpop.xlane.xlu0 %4411 }
 0xd55   : > { %v4438_v17 = vadd.f32 %v4412_v20, %v4390_v18  ;;  %v6900_v35 = vpop.f32.mrb[64].mxu0  ;;  %v4659_v18 = vpop.permute.xlu1 %4658 }
 0xd56   : > { %v4709_v24 = vadd.f32 %v6900_v35, %v4693_v22  ;;  %v4531_v23 = vpop.f32.mrb[65].mxu0  ;;  %v4699_v22 = vmul.f32 %v11138_v31, %v4603_v55 }
 0xd57   : > { %4454 = vst.msk [vmem:[#allocation4 + $0x1a8] sm:$0xff] %vm1994_vm3, %v4438_v17  ;;  %v4707_v48 = vadd.f32 %v4691_v25, %v4531_v23  ;;  %v6901_v45 = vpop.f32.mrb[66].mxu0  ;;  %v4702_v25 = vmul.f32 %v4669_v14, %v4606_v60  ;;  %v4381_v14 = vld [vmem:[#allocation4 + $0x1e0] sm:$0xff] }
 0xd58   : > { %4725 = vst.msk [vmem:[#allocation5 + $0x190] sm:$0xff] %vm1528_vm2, %v4709_v24  ;;  %v4710_v58 = vadd.f32 %v6901_v45, %v4694_v50  ;;  %v4534_v28 = vpop.f32.mrb[67].mxu0  ;;  %v4424_v40 = vpop.xlane.xlu0 %4423  ;;  %v4700_v50 = vmul.f32 %v4659_v18, %v4604_v0  ;;  %v5338_v0 = vld [vmem:[#allocation4 + $0x108] sm:$0xff] (!%p6298_p8)  ;;  %v8083_v18 = vmov (!%p6298_p8), 0  }
 0xd59   : > { %4723 = vst.msk [vmem:[#allocation5 + $0x180] sm:$0xff] %vm1528_vm2, %v4707_v48  ;;  %v4708_v56 = vadd.f32 %v4692_v44, %v4534_v28  ;;  %v4444_v33 = vadd.f32 %v4424_v40, %v4396_v15  ;;  %v4679_v31 = vpop.permute.xlu1 %4678  ;;  %v4386_v48 = vmul.f32 %v10876_v57, %v4370_v9  ;;  %v4375_v15 = vld [vmem:[#allocation4 + $0x1b0] sm:$0xff]  ;;  %v4395_v57 = vmul.f32 %v10910_v34, %v4379_v21  ;;  %v7580_v21 = vld [vmem:[#allocation17 + $0x20] sm:$0xff] (!%p6298_p8)  }
 0xd5a   : > { %4726 = vst.msk [vmem:[#allocation5 + $0x198] sm:$0xff] %vm1528_vm2, %v4710_v58  ;;  %v4391_v28 = vmul.f32 %v10908_v10, %v4375_v15  ;;  %7577 = vset.pattern.permute.xlu1 (!%p6298_p8), %v8083_v18  ;;  %7576 = vset.pattern.permute.xlu0 (!%p6298_p8), %v8083_v18  ;;  %v4921_v15 = vld [vmem:[#allocation4 + $0xb0] sm:$0xff] (!%p6298_p8) }
 0xd5b   : > { %4724 = vst.msk [vmem:[#allocation5 + $0x188] sm:$0xff] %vm1528_vm2, %v4708_v56  ;;  %v4389_v56 = vmul.f32 %v10878_v43, %v4373_v7  ;;  %v4399_v43 = vmul.f32 %v11064_v2, %v4383_v6  ;;  %v5343_v7 = vld [vmem:[#allocation4 + $0x130] sm:$0xff] (!%p6298_p8)  ;;  %6954 = vmatprep.subr.bf16.mxu0 (!%p6298_p8), %v7580_v21  ;;  %v5345_v6 = vld [vmem:[#allocation4 + $0x140] sm:$0xff] (!%p6298_p8) }
 0xd5c   : > { %4460 = vst.msk [vmem:[#allocation4 + $0x1d8] sm:$0xff] %vm1994_vm3, %v4444_v33  ;;  %v4420_v29 = vpop.xlane.xlu0 %4419  ;;  %6955 = vmatpush3.bf16.msra.mxu0 (!%p6298_p8), %v7580_v21  ;;  %v5649_v21 = vld [vmem:[#allocation4 + $0x1b8] sm:$0xff] (!%p6298_p8) }
 0xd5d   : > { %v4442_v62 = vadd.f32 %v4420_v29, %v4394_v4  ;;  %v6904_v42 = vpop.f32.mrb[68].mxu0 }
 0xd5e   : > { %v4713_v54 = vadd.f32 %v6904_v42, %v4697_v32  ;;  %v4547_v8 = vpop.f32.mrb[69].mxu0  ;;  %v4377_v32 = vld [vmem:[#allocation4 + $0x1c0] sm:$0xff] }
 0xd5f   : > { %4458 = vst.msk [vmem:[#allocation4 + $0x1c8] sm:$0xff] %vm1994_vm3, %v4442_v62  ;;  %v4711_v1 = vadd.f32 %v4695_v59, %v4547_v8  ;;  %v6905_v5 = vpop.f32.mrb[70].mxu0  ;;  %v4393_v10 = vmul.f32 %v10934_v41, %v4377_v32  ;;  %v4609_v62 = vld [vmem:[#allocation5 + $0x1f0] sm:$0xff]  ;;  %v4608_v8 = vld [vmem:[#allocation5 + $0x1e8] sm:$0xff] }
 0xd60   : > { %4729 = vst.msk [vmem:[#allocation5 + $0x1b0] sm:$0xff] %vm1528_vm2, %v4713_v54  ;;  %v4714_v49 = vadd.f32 %v6905_v5, %v4698_v13  ;;  %v4550_v46 = vpop.f32.mrb[71].mxu0  ;;  %v4432_v61 = vpop.xlane.xlu0 %4431  ;;  %v4607_v54 = vld [vmem:[#allocation5 + $0x1e0] sm:$0xff]  ;;  %v4704_v2 = vmul.f32 %v4679_v31, %v4608_v8 }
 0xd61   : > { %4727 = vst.msk [vmem:[#allocation5 + $0x1a0] sm:$0xff] %vm1528_vm2, %v4711_v1  ;;  %v4712_v11 = vadd.f32 %v4696_v39, %v4550_v46  ;;  %v4448_v38 = vadd.f32 %v4432_v61, %v4400_v51  ;;  %v4397_v1 = vmul.f32 %v10940_v47, %v4381_v14  ;;  %v4703_v41 = vmul.f32 %v11140_v63, %v4607_v54  ;;  %v5341_v31 = vld [vmem:[#allocation4 + $0x120] sm:$0xff] (!%p6298_p8)  ;;  %v5348_v14 = vld [vmem:[#allocation4 + $0x158] sm:$0xff] (!%p6298_p8) }
 0xd62   : > { %4730 = vst.msk [vmem:[#allocation5 + $0x1b8] sm:$0xff] %vm1528_vm2, %v4714_v49 }
 0xd63   : > { %4728 = vst.msk [vmem:[#allocation5 + $0x1a8] sm:$0xff] %vm1528_vm2, %v4712_v11  ;;  %v4610_v11 = vld [vmem:[#allocation5 + $0x1f8] sm:$0xff] }
 0xd64   : > { %4464 = vst.msk [vmem:[#allocation4 + $0x1f8] sm:$0xff] %vm1994_vm3, %v4448_v38  ;;  %v4428_v19 = vpop.xlane.xlu0 %4427 }
 0xd65   : > { %v4446_v20 = vadd.f32 %v4428_v19, %v4398_v16  ;;  %v6908_v36 = vpop.f32.mrb[72].mxu0  ;;  %v5337_v16 = vld [vmem:[#allocation4 + $0x100] sm:$0xff] (!%p6298_p8)  ;;  %v4916_v19 = vld [vmem:[#allocation4 + $0x88] sm:$0xff] (!%p6298_p8) }
 0xd66   : > { %v4717_v17 = vadd.f32 %v6908_v36, %v4701_v27  ;;  %v4563_v35 = vpop.f32.mrb[73].mxu0  ;;  %v4915_v27 = vld [vmem:[#allocation4 + $0x80] sm:$0xff] (!%p6298_p8)  ;;  %7586 = vrcp.f32 (!%p6298_p8), %v5337_v16  ;;  %v5340_v36 = vld [vmem:[#allocation4 + $0x118] sm:$0xff] (!%p6298_p8) }
 0xd67   : > { %4462 = vst.msk [vmem:[#allocation4 + $0x1e8] sm:$0xff] %vm1994_vm3, %v4446_v20  ;;  %v4715_v24 = vadd.f32 %v4699_v22, %v4563_v35  ;;  %v6909_v23 = vpop.f32.mrb[74].mxu0  ;;  %7588 = vrcp.f32 (!%p6298_p8), %v4915_v27  ;;  %v4918_v22 = vld [vmem:[#allocation4 + $0x98] sm:$0xff] (!%p6298_p8)  ;;  %v4917_v20 = vld [vmem:[#allocation4 + $0x90] sm:$0xff] (!%p6298_p8)  ;;  %v4759_v27 = vld [vmem:[#allocation4] sm:$0xff] (!%p6298_p8) }
 0xd68   : > { %4733 = vst.msk [vmem:[#allocation5 + $0x1d0] sm:$0xff] %vm1528_vm2, %v4717_v17  ;;  %v4718_v37 = vadd.f32 %v6909_v23, %v4702_v25  ;;  %v4566_v44 = vpop.f32.mrb[75].mxu0  ;;  %7590 = vrcp.f32 (!%p6298_p8), %v5338_v0  ;;  %v5339_v25 = vld [vmem:[#allocation4 + $0x110] sm:$0xff] (!%p6298_p8)  ;;  %v4919_v23 = vld [vmem:[#allocation4 + $0xa0] sm:$0xff] (!%p6298_p8) }
 0xd69   : > { %4731 = vst.msk [vmem:[#allocation5 + $0x1c0] sm:$0xff] %vm1528_vm2, %v4715_v24  ;;  %v4716_v26 = vadd.f32 %v4700_v50, %v4566_v44  ;;  %7592 = vrcp.f32 (!%p6298_p8), %v4916_v19  ;;  %v4920_v50 = vld [vmem:[#allocation4 + $0xa8] sm:$0xff] (!%p6298_p8) }
 0xd6a   : > { %4734 = vst.msk [vmem:[#allocation5 + $0x1d8] sm:$0xff] %vm1528_vm2, %v4718_v37  ;;  %7594 = vrcp.f32 (!%p6298_p8), %v4918_v22  ;;  %v5342_v44 = vld [vmem:[#allocation4 + $0x128] sm:$0xff] (!%p6298_p8)  ;;  %v5642_v22 = vld [vmem:[#allocation4 + $0x180] sm:$0xff] (!%p6298_p8) }
 0xd6b   : > { %4732 = vst.msk [vmem:[#allocation5 + $0x1c8] sm:$0xff] %vm1528_vm2, %v4716_v26  ;;  %7596 = vrcp.f32 (!%p6298_p8), %v4917_v20 }
 0xd6c   : > { %v4684_v42 = vpop.permute.xlu0 %4683  ;;  %7598 = vrcp.f32 (!%p6298_p8), %v5340_v36  ;;  %v4762_v36 = vld [vmem:[#allocation4 + $0x18] sm:$0xff] (!%p6298_p8) }
 0xd6d   : > { %v4705_v39 = vmul.f32 %v4684_v42, %v4609_v62  ;;  %7600 = vrcp.f32 (!%p6298_p8), %v5339_v25  ;;  %v4925_v42 = vld [vmem:[#allocation4 + $0xd0] sm:$0xff] (!%p6298_p8) }
 0xd6e   : > { %7602 = vrcp.f32 (!%p6298_p8), %v4920_v50  ;;  %v5645_v50 = vld [vmem:[#allocation4 + $0x198] sm:$0xff] (!%p6298_p8) }
 0xd6f   : > { %7604 = vrcp.f32 (!%p6298_p8), %v4919_v23  ;;  %v5644_v23 = vld [vmem:[#allocation4 + $0x190] sm:$0xff] (!%p6298_p8) }
 0xd70   : > { %v7587_v17 = vpop.eup (!%p6298_p8), %7586  ;;  %7606 = vrcp.f32 (!%p6298_p8), %v5342_v44  ;;  %v4764_v44 = vld [vmem:[#allocation4 + $0x28] sm:$0xff] (!%p6298_p8) }
 0xd71   : > { %v7589_v35 = vpop.eup (!%p6298_p8), %7588  ;;  %5387 = vperm.xlu1 (!%p6298_p8), %7577, %v7587_v17   ;;  %7608 = vrcp.f32 (!%p6298_p8), %v5341_v31  ;;  %v4761_v17 = vld [vmem:[#allocation4 + $0x10] sm:$0xff] (!%p6298_p8)  ;;  %v4763_v31 = vld [vmem:[#allocation4 + $0x20] sm:$0xff] (!%p6298_p8) }
 0xd72   : > { %v7591_v24 = vpop.eup (!%p6298_p8), %7590  ;;  %4965 = vperm.xlu0 (!%p6298_p8), %7576, %v7589_v35  }
 0xd73   : > { %v7593_v37 = vpop.eup (!%p6298_p8), %7592 }
 0xd74   : > { %v7595_v26 = vpop.eup (!%p6298_p8), %7594 }
 0xd75   : > { %5392 = vperm.xlu1 (!%p6298_p8), %7577, %v7591_v24   ;;  %v7597_v9 = vpop.eup (!%p6298_p8), %7596 }
 0xd76   : > { %4970 = vperm.xlu0 (!%p6298_p8), %7576, %v7593_v37  }
 0xd79   : > { %4980 = vperm.xlu1 (!%p6298_p8), %7577, %v7595_v26  }
 0xd7a   : > { %4975 = vperm.xlu0 (!%p6298_p8), %7576, %v7597_v9  }
 0xd84   : > { %v4404_v45 = vpop.xlane.xlu1 %4403 }
 0xd85   : > { %v4434_v58 = vadd.f32 %v4404_v45, %v4386_v48  ;;  %v4922_v48 = vld [vmem:[#allocation4 + $0xb8] sm:$0xff] (!%p6298_p8)  ;;  %v7599_v45 = vpop.eup (!%p6298_p8), %7598 }
 0xd86   : > { %7610 = vrcp.f32 (!%p6298_p8), %v4922_v48  ;;  %5402 = vperm.xlu1 (!%p6298_p8), %7577, %v7599_v45   ;;  %v11197_v48 = vld [vmem:[#allocation17] sm:$0xff] (!%p6298_p8)   ;;  %v5647_v45 = vld [vmem:[#allocation4 + $0x1a8] sm:$0xff] (!%p6298_p8) }
 0xd87   : > { %4450 = vst.msk [vmem:[#allocation4 + $0x188] sm:$0xff] %vm1994_vm3, %v4434_v58  ;;  %v7601_v58 = vpop.eup (!%p6298_p8), %7600  ;;  %7612 = vrcp.f32 (!%p6298_p8), %v4921_v15 }
 0xd88   : > { %v4414_v40 = vpop.xlane.xlu1 %4413  ;;  %5397 = vperm.xlu0 (!%p6298_p8), %7576, %v7601_v58  }
 0xd89   : > { %v4439_v12 = vadd.f32 %v4414_v40, %v4391_v28  ;;  %v5344_v28 = vld [vmem:[#allocation4 + $0x138] sm:$0xff] (!%p6298_p8)  ;;  %v7578_v40 = vld [vmem:[#allocation17 + $0x10] sm:$0xff] (!%p6298_p8)  }
 0xd8a   : > { %6914 = vmatprep.subr.bf16.mxu1 (!%p6298_p8), %v7578_v40  ;;  %7614 = vrcp.f32 (!%p6298_p8), %v5344_v28 }
 0xd8b   : > { %4455 = vst.msk [vmem:[#allocation4 + $0x1b0] sm:$0xff] %vm1994_vm3, %v4439_v12  ;;  %v7603_v12 = vpop.eup (!%p6298_p8), %7602  ;;  %6915 = vmatpush3.bf16.msra.mxu1 (!%p6298_p8), %v7578_v40  ;;  %7616 = vrcp.f32 (!%p6298_p8), %v5343_v7  ;;  %v11200_v40 = vld [vmem:[#allocation17 + $0x30] sm:$0xff] (!%p6298_p8)   ;;  %v4766_v7 = vld [vmem:[#allocation4 + $0x38] sm:$0xff] (!%p6298_p8) }
 0xd8c   : > { %v4410_v33 = vpop.xlane.xlu1 %4409  ;;  %4990 = vperm.xlu1 (!%p6298_p8), %7577, %v7603_v12  }
 0xd8d   : > { %v4437_v53 = vadd.f32 %v4410_v33, %v4389_v56  ;;  %v7579_v56 = vld [vmem:[#allocation17 + $0x18] sm:$0xff] (!%p6298_p8)   ;;  %v7605_v33 = vpop.eup (!%p6298_p8), %7604 }
 0xd8e   : > { %6916 = vmatprep.subr.bf16.mxu1 (!%p6298_p8), %v7579_v56  ;;  %v7607_v32 = vpop.eup (!%p6298_p8), %7606  ;;  %4985 = vperm.xlu0 (!%p6298_p8), %7576, %v7605_v33   ;;  %v5643_v18 = vld [vmem:[#allocation4 + $0x188] sm:$0xff] (!%p6298_p8) }
 0xd8f   : > { %4453 = vst.msk [vmem:[#allocation4 + $0x1a0] sm:$0xff] %vm1994_vm3, %v4437_v53  ;;  %v7581_v53 = vld [vmem:[#allocation17 + $0x28] sm:$0xff] (!%p6298_p8)   ;;  %6917 = vmatpush3.bf16.msra.mxu1 (!%p6298_p8), %v7579_v56  ;;  %v4765_v56 = vld [vmem:[#allocation4 + $0x30] sm:$0xff] (!%p6298_p8) }
 0xd90   : > { %v4422_v4 = vpop.xlane.xlu1 %4421  ;;  %6956 = vmatprep.subr.bf16.mxu0 (!%p6298_p8), %v7581_v53  ;;  %5412 = vperm.xlu1 (!%p6298_p8), %7577, %v7607_v32   ;;  %v4768_v32 = vld [vmem:[#allocation4 + $0x48] sm:$0xff] (!%p6298_p8) }
 0xd91   : > { %v4443_v3 = vadd.f32 %v4422_v4, %v4395_v57  ;;  %v4924_v57 = vld [vmem:[#allocation4 + $0xc8] sm:$0xff] (!%p6298_p8)  ;;  %v4923_v4 = vld [vmem:[#allocation4 + $0xc0] sm:$0xff] (!%p6298_p8)  ;;  %6957 = vmatpush3.bf16.msra.mxu0 (!%p6298_p8), %v7581_v53  ;;  %6934 = vmatprep.subr.bf16.mxu1 (!%p6298_p8), %v11197_v48 }
 0xd92   : > { %7618 = vrcp.f32 (!%p6298_p8), %v4924_v57  ;;  %6974 = vmatprep.subr.bf16.mxu0 (!%p6298_p8), %v11200_v40  ;;  %v5648_v57 = vld [vmem:[#allocation4 + $0x1b0] sm:$0xff] (!%p6298_p8) }
 0xd93   : > { %4459 = vst.msk [vmem:[#allocation4 + $0x1d0] sm:$0xff] %vm1994_vm3, %v4443_v3  ;;  %v7609_v3 = vpop.eup (!%p6298_p8), %7608  ;;  %7620 = vrcp.f32 (!%p6298_p8), %v4923_v4 }
 0xd94   : > { %v4418_v29 = vpop.xlane.xlu1 %4417  ;;  %5407 = vperm.xlu0 (!%p6298_p8), %7576, %v7609_v3  }
 0xd95   : > { %v4441_v59 = vadd.f32 %v4418_v29, %v4393_v10  ;;  %v5346_v10 = vld [vmem:[#allocation4 + $0x148] sm:$0xff] (!%p6298_p8)  ;;  %v7611_v29 = vpop.eup (!%p6298_p8), %7610 }
 0xd96   : > { %7622 = vrcp.f32 (!%p6298_p8), %v5346_v10  ;;  %5000 = vperm.xlu1 (!%p6298_p8), %7577, %v7611_v29   ;;  %v5646_v58 = vld [vmem:[#allocation4 + $0x1a0] sm:$0xff] (!%p6298_p8) }
 0xd97   : > { %4457 = vst.msk [vmem:[#allocation4 + $0x1c0] sm:$0xff] %vm1994_vm3, %v4441_v59  ;;  %v7613_v59 = vpop.eup (!%p6298_p8), %7612  ;;  %7624 = vrcp.f32 (!%p6298_p8), %v5345_v6  ;;  %v4767_v10 = vld [vmem:[#allocation4 + $0x40] sm:$0xff] (!%p6298_p8)  ;;  %v5651_v6 = vld [vmem:[#allocation4 + $0x1c8] sm:$0xff] (!%p6298_p8) }
 0xd98   : > { %v4430_v13 = vpop.xlane.xlu1 %4429  ;;  %v7615_v62 = vpop.eup (!%p6298_p8), %7614  ;;  %4995 = vperm.xlu0 (!%p6298_p8), %7576, %v7613_v59  }
 0xd99   : > { %v4447_v34 = vadd.f32 %v4430_v13, %v4399_v43  ;;  %v4926_v43 = vld [vmem:[#allocation4 + $0xd8] sm:$0xff] (!%p6298_p8)  ;;  %v7617_v13 = vpop.eup (!%p6298_p8), %7616 }
 0xd9a   : > { %7626 = vrcp.f32 (!%p6298_p8), %v4926_v43  ;;  %5422 = vperm.xlu1 (!%p6298_p8), %7577, %v7615_v62  }
 0xd9b   : > { %4463 = vst.msk [vmem:[#allocation4 + $0x1f0] sm:$0xff] %vm1994_vm3, %v4447_v34  ;;  %7628 = vrcp.f32 (!%p6298_p8), %v4925_v42  ;;  %v5347_v34 = vld [vmem:[#allocation4 + $0x150] sm:$0xff] (!%p6298_p8)  ;;  %v4770_v42 = vld [vmem:[#allocation4 + $0x58] sm:$0xff] (!%p6298_p8) }
 0xd9c   : > { %v6912_v5 = vpop.f32.mrb[76].mxu0  ;;  %v4426_v51 = vpop.xlane.xlu1 %4425  ;;  %5417 = vperm.xlu0 (!%p6298_p8), %7576, %v7617_v13   ;;  %7630 = vrcp.f32 (!%p6298_p8), %v5348_v14  ;;  %v4769_v14 = vld [vmem:[#allocation4 + $0x50] sm:$0xff] (!%p6298_p8) }
 0xd9d   : > { %v4721_v49 = vadd.f32 %v6912_v5, %v4705_v39  ;;  %v4579_v46 = vpop.f32.mrb[77].mxu0  ;;  %v4445_v61 = vadd.f32 %v4426_v51, %v4397_v1  ;;  %v7619_v54 = vpop.eup (!%p6298_p8), %7618  ;;  %7632 = vrcp.f32 (!%p6298_p8), %v5347_v34  ;;  %v4928_v39 = vld [vmem:[#allocation4 + $0xe8] sm:$0xff] (!%p6298_p8)  ;;  %v5653_v34 = vld [vmem:[#allocation4 + $0x1d8] sm:$0xff] (!%p6298_p8) }
 0xd9e   : > { %v4719_v30 = vadd.f32 %v4703_v41, %v4579_v46  ;;  %v6913_v52 = vpop.f32.mrb[78].mxu0  ;;  %v7621_v8 = vpop.eup (!%p6298_p8), %7620  ;;  %5010 = vperm.xlu1 (!%p6298_p8), %7577, %v7619_v54   ;;  %v4927_v41 = vld [vmem:[#allocation4 + $0xe0] sm:$0xff] (!%p6298_p8)  ;;  %7634 = vrcp.f32 (!%p6298_p8), %v4928_v39  ;;  %v5350_v51 = vld [vmem:[#allocation4 + $0x168] sm:$0xff] (!%p6298_p8)  ;;  %v5652_v39 = vld [vmem:[#allocation4 + $0x1d0] sm:$0xff] (!%p6298_p8) }
 0xd9f   : > { %4737 = vst.msk [vmem:[#allocation5 + $0x1f0] sm:$0xff] %vm1528_vm2, %v4721_v49  ;;  %v4582_v38 = vpop.f32.mrb[79].mxu0  ;;  %4758 = sbr.rel (%p6298_p8) target bundleno = 3932 (0xf5c), region = 100  ;;  %7636 = vrcp.f32 (!%p6298_p8), %v4927_v41  ;;  %v5349_v46 = vld [vmem:[#allocation4 + $0x160] sm:$0xff] (!%p6298_p8)  ;;  %v4772_v41 = vld [vmem:[#allocation4 + $0x68] sm:$0xff] (!%p6298_p8) }
 0xda0   : > { %4461 = vst.msk [vmem:[#allocation4 + $0x1e0] sm:$0xff] %vm1994_vm3, %v4445_v61  ;;  %v4720_v55 = vadd.f32 %v4704_v2, %v4582_v38  ;;  %v4689_v47 = vpop.permute.xlu1 %4688  ;;  %v7623_v1 = vpop.eup (!%p6298_p8), %7622  ;;  %5005 = vperm.xlu0 (!%p6298_p8), %7576, %v7621_v8   ;;  %7638 = vrcp.f32 (!%p6298_p8), %v5350_v51  ;;  %v4930_v2 = vld [vmem:[#allocation4 + $0xf8] sm:$0xff] (!%p6298_p8)  ;;  %v5650_v43 = vld [vmem:[#allocation4 + $0x1c0] sm:$0xff] (!%p6298_p8) }
 0xda1   : > { %4735 = vst.msk [vmem:[#allocation5 + $0x1e0] sm:$0xff] %vm1528_vm2, %v4719_v30  ;;  %v4706_v60 = vmul.f32 %v4689_v47, %v4610_v11  ;;  %v7625_v5 = vpop.eup (!%p6298_p8), %7624  ;;  %7640 = vrcp.f32 (!%p6298_p8), %v5349_v46  ;;  %v5352_v38 = vld [vmem:[#allocation4 + $0x178] sm:$0xff] (!%p6298_p8)  ;;  %v5351_v47 = vld [vmem:[#allocation4 + $0x170] sm:$0xff] (!%p6298_p8)  ;;  %v4771_v51 = vld [vmem:[#allocation4 + $0x60] sm:$0xff] (!%p6298_p8) }
 0xda2   : > { %4736 = vst.msk [vmem:[#allocation5 + $0x1e8] sm:$0xff] %vm1528_vm2, %v4720_v55  ;;  %5432 = vperm.xlu1 (!%p6298_p8), %7577, %v7623_v1   ;;  %7642 = vrcp.f32 (!%p6298_p8), %v4930_v2  ;;  %v5655_v46 = vld [vmem:[#allocation4 + $0x1e8] sm:$0xff] (!%p6298_p8) }
 0xda3   : > { %v4722_v63 = vadd.f32 %v6913_v52, %v4706_v60  ;;  %v4929_v52 = vld [vmem:[#allocation4 + $0xf0] sm:$0xff] (!%p6298_p8) }
 0xda4   : > { %v7627_v49 = vpop.eup (!%p6298_p8), %7626  ;;  %5427 = vperm.xlu0 (!%p6298_p8), %7576, %v7625_v5   ;;  %7644 = vrcp.f32 (!%p6298_p8), %v4929_v52  ;;  %v4774_v52 = vld [vmem:[#allocation4 + $0x78] sm:$0xff] (!%p6298_p8) }
 0xda5   : > { %4738 = vst.msk [vmem:[#allocation5 + $0x1f8] sm:$0xff] %vm1528_vm2, %v4722_v63  ;;  %v7629_v61 = vpop.eup (!%p6298_p8), %7628  ;;  %7646 = vrcp.f32 (!%p6298_p8), %v5352_v38  ;;  %v4760_v63 = vld [vmem:[#allocation4 + $0x8] sm:$0xff] (!%p6298_p8)  ;;  %v4773_v38 = vld [vmem:[#allocation4 + $0x70] sm:$0xff] (!%p6298_p8) }
 0xda6   : > { %5020 = vperm.xlu1 %7577, %v7627_v49   ;;  %v7631_v30 = vpop.eup %7630  ;;  %7648 = vrcp.f32 %v5351_v47  ;;  %v5657_v47 = vld [vmem:[#allocation4 + $0x1f8] sm:$0xff] }
 0xda7   : > { %v7633_v11 = vpop.eup %7632  ;;  %7650 = vrcp.f32 %v4760_v63  ;;  %v5654_v2 = vld [vmem:[#allocation4 + $0x1e0] sm:$0xff]  ;;  %v5656_v63 = vld [vmem:[#allocation4 + $0x1f0] sm:$0xff] }
 0xda8   : > { %5015 = vperm.xlu0 %7576, %v7629_v61   ;;  %v7635_v55 = vpop.eup %7634  ;;  %7652 = vrcp.f32 %v4759_v27 }
 0xda9   : > { %v7637_v60 = vpop.eup %7636  ;;  %7654 = vrcp.f32 %v5643_v18 }
 0xdaa   : > { %5442 = vperm.xlu1 %7577, %v7631_v30   ;;  %v7639_v16 = vpop.eup %7638  ;;  %7656 = vrcp.f32 %v5642_v22 }
 0xdab   : > { %v7641_v0 = vpop.eup %7640  ;;  %7658 = vrcp.f32 %v4762_v36 }
 0xdac   : > { %5437 = vperm.xlu0 %7576, %v7633_v11   ;;  %v7643_v19 = vpop.eup %7642  ;;  %7660 = vrcp.f32 %v4761_v17  ;;  %v5369_v17 = vld [vmem:[#allocation5 + $0x100] sm:$0xff] }
 0xdad   : > { %7662 = vrcp.f32 %v5645_v50  ;;  %v4947_v50 = vld [vmem:[#allocation5 + $0x80] sm:$0xff] }
 0xdae   : > { %5030 = vperm.xlu1 %7577, %v7635_v55   ;;  %v7645_v20 = vpop.eup %7644  ;;  %7664 = vrcp.f32 %v5644_v23 }
 0xdaf   : > { %v7647_v25 = vpop.eup %7646  ;;  %7666 = vrcp.f32 %v4764_v44 }
 0xdb0   : > { %5025 = vperm.xlu0 %7576, %v7637_v60   ;;  %v7649_v35 = vpop.eup %7648  ;;  %7668 = vrcp.f32 %v4763_v31 }
 0xdb1   : > { %v7651_v24 = vpop.eup %7650  ;;  %7670 = vrcp.f32 %v5647_v45  ;;  %v4950_v45 = vld [vmem:[#allocation5 + $0x98] sm:$0xff] }
 0xdb2   : > { %5452 = vperm.xlu1 %7577, %v7639_v16   ;;  %v7653_v37 = vpop.eup %7652  ;;  %7672 = vrcp.f32 %v5646_v58 }
 0xdb3   : > { %v7655_v26 = vpop.eup %7654  ;;  %7674 = vrcp.f32 %v4766_v7 }
 0xdb4   : > { %5447 = vperm.xlu0 %7576, %v7641_v0   ;;  %v7657_v9 = vpop.eup %7656  ;;  %7676 = vrcp.f32 %v4765_v56 }
 0xdb5   : > { %v7659_v15 = vpop.eup %7658  ;;  %7678 = vrcp.f32 %v5649_v21  ;;  %v5372_v21 = vld [vmem:[#allocation5 + $0x118] sm:$0xff] }
 0xdb6   : > { %5040 = vperm.xlu1 %7577, %v7643_v19   ;;  %v7661_v28 = vpop.eup %7660  ;;  %7680 = vrcp.f32 %v5648_v57 }
 0xdb7   : > { %v7663_v12 = vpop.eup %7662  ;;  %7682 = vrcp.f32 %v4768_v32  ;;  %v7584_v32 = vld [vmem:[#allocation17 + $0x8] sm:$0xff]  }
 0xdb8   : > { %5035 = vperm.xlu0 %7576, %v7645_v20   ;;  %v7665_v33 = vpop.eup %7664  ;;  %7684 = vrcp.f32 %v4767_v10 }
 0xdb9   : > { %v7667_v53 = vpop.eup %7666  ;;  %7686 = vrcp.f32 %v5651_v6  ;;  %v4952_v6 = vld [vmem:[#allocation5 + $0xa8] sm:$0xff] }
 0xdba   : > { %5462 = vperm.xlu1 %7577, %v7647_v25   ;;  %v7669_v4 = vpop.eup %7668  ;;  %7688 = vrcp.f32 %v5650_v43 }
 0xdbb   : > { %v7671_v3 = vpop.eup %7670  ;;  %7690 = vrcp.f32 %v4770_v42  ;;  %v7585_v42 = vld [vmem:[#allocation17 + $0x38] sm:$0xff]  }
 0xdbc   : > { %5457 = vperm.xlu0 %7576, %v7649_v35   ;;  %v7673_v29 = vpop.eup %7672  ;;  %7692 = vrcp.f32 %v4769_v14  ;;  %v5370_v35 = vld [vmem:[#allocation5 + $0x108] sm:$0xff] }
 0xdbd   : > { %v7675_v59 = vpop.eup %7674  ;;  %7694 = vrcp.f32 %v5653_v34  ;;  %v5374_v34 = vld [vmem:[#allocation5 + $0x128] sm:$0xff] }
 0xdbe   : > { %4814 = vperm.xlu1 %7577, %v7651_v24   ;;  %v7677_v62 = vpop.eup %7676  ;;  %7696 = vrcp.f32 %v5652_v39  ;;  %v4948_v24 = vld [vmem:[#allocation5 + $0x88] sm:$0xff] }
 0xdbf   : > { %v7679_v13 = vpop.eup %7678  ;;  %7698 = vrcp.f32 %v4772_v41 }
 0xdc0   : > { %4809 = vperm.xlu0 %7576, %v7653_v37   ;;  %v7681_v54 = vpop.eup %7680  ;;  %7700 = vrcp.f32 %v4771_v51  ;;  %v4954_v51 = vld [vmem:[#allocation5 + $0xb8] sm:$0xff] }
 0xdc1   : > { %v7683_v8 = vpop.eup %7682  ;;  %7702 = vrcp.f32 %v5655_v46 }
 0xdc2   : > { %5697 = vperm.xlu1 %7577, %v7655_v26   ;;  %v7685_v1 = vpop.eup %7684  ;;  %7704 = vrcp.f32 %v5654_v2 }
 0xdc3   : > { %v7687_v5 = vpop.eup %7686  ;;  %7706 = vrcp.f32 %v4774_v52 }
 0xdc4   : > { %5692 = vperm.xlu0 %7576, %v7657_v9   ;;  %v7689_v49 = vpop.eup %7688  ;;  %7708 = vrcp.f32 %v4773_v38 }
 0xdc5   : > { %v7691_v61 = vpop.eup %7690  ;;  %7710 = vrcp.f32 %v5657_v47 }
 0xdc6   : > { %4824 = vperm.xlu1 %7577, %v7659_v15   ;;  %v7693_v30 = vpop.eup %7692  ;;  %7712 = vrcp.f32 %v5656_v63  ;;  %v4949_v15 = vld [vmem:[#allocation5 + $0x90] sm:$0xff] }
 0xdc7   : > { %v7695_v11 = vpop.eup %7694 }
 0xdc8   : > { %4819 = vperm.xlu0 %7576, %v7661_v28   ;;  %v7697_v55 = vpop.eup %7696 }
 0xdc9   : > { %v7699_v60 = vpop.eup %7698 }
 0xdca   : > { %5707 = vperm.xlu1 %7577, %v7663_v12   ;;  %v7701_v16 = vpop.eup %7700 }
 0xdcb   : > { %v7703_v27 = vpop.eup %7702 }
 0xdcc   : > { %5702 = vperm.xlu0 %7576, %v7665_v33   ;;  %v7705_v0 = vpop.eup %7704 }
 0xdcd   : > { %v7707_v18 = vpop.eup %7706 }
 0xdce   : > { %4834 = vperm.xlu1 %7577, %v7667_v53   ;;  %v7709_v19 = vpop.eup %7708  ;;  %v5371_v53 = vld [vmem:[#allocation5 + $0x110] sm:$0xff] }
 0xdcf   : > { %v7711_v22 = vpop.eup %7710 }
 0xdd0   : > { %4829 = vperm.xlu0 %7576, %v7669_v4   ;;  %v7713_v20 = vpop.eup %7712 }
 0xdd2   : > { %5717 = vperm.xlu1 %7577, %v7671_v3  }
 0xdd4   : > { %5712 = vperm.xlu0 %7576, %v7673_v29  }
 0xdd6   : > { %4844 = vperm.xlu1 %7577, %v7675_v59   ;;  %v4951_v59 = vld [vmem:[#allocation5 + $0xa0] sm:$0xff] }
 0xdd8   : > { %4839 = vperm.xlu0 %7576, %v7677_v62  }
 0xdda   : > { %5727 = vperm.xlu1 %7577, %v7679_v13  }
 0xddc   : > { %5722 = vperm.xlu0 %7576, %v7681_v54  }
 0xdde   : > { %4854 = vperm.xlu1 %7577, %v7683_v8   ;;  %v5373_v8 = vld [vmem:[#allocation5 + $0x120] sm:$0xff] }
 0xde0   : > { %4849 = vperm.xlu0 %7576, %v7685_v1  }
 0xde2   : > { %5737 = vperm.xlu1 %7577, %v7687_v5  }
 0xde4   : > { %5732 = vperm.xlu0 %7576, %v7689_v49   ;;  %v4953_v49 = vld [vmem:[#allocation5 + $0xb0] sm:$0xff] }
 0xde6   : > { %4864 = vperm.xlu1 %7577, %v7691_v61  }
 0xde8   : > { %4859 = vperm.xlu0 %7576, %v7693_v30  }
 0xdea   : > { %5747 = vperm.xlu1 %7577, %v7695_v11   ;;  %v5375_v11 = vld [vmem:[#allocation5 + $0x130] sm:$0xff] }
 0xdec   : > { %5742 = vperm.xlu0 %7576, %v7697_v55  }
 0xdee   : > { %4874 = vperm.xlu1 %7577, %v7699_v60  }
 0xdf0   : > { %4869 = vperm.xlu0 %7576, %v7701_v16   ;;  %v5388_v36 = vpop.permute.xlu1 %5387  ;;  %v4956_v16 = vld [vmem:[#allocation5 + $0xc8] sm:$0xff] }
 0xdf1   : > { %v4966_v25 = vpop.permute.xlu0 %4965  ;;  %v5465_v37 = vmul.f32 %v5388_v36, %v5369_v17  ;;  %v5378_v36 = vld [vmem:[#allocation5 + $0x148] sm:$0xff] }
 0xdf2   : > { %5757 = vperm.xlu1 %7577, %v7703_v27   ;;  %v5043_v31 = vmul.f32 %v4966_v25, %v4947_v50  ;;  %v4955_v27 = vld [vmem:[#allocation5 + $0xc0] sm:$0xff] }
 0xdf3   : > { %v5377_v25 = vld [vmem:[#allocation5 + $0x140] sm:$0xff] }
 0xdf4   : > { %5752 = vperm.xlu0 %7576, %v7705_v0   ;;  %v5393_v23 = vpop.permute.xlu1 %5392 }
 0xdf5   : > { %v5466_v44 = vmul.f32 %v5393_v23, %v5370_v35  ;;  %v4971_v26 = vpop.permute.xlu0 %4970 }
 0xdf6   : > { %4884 = vperm.xlu1 %7577, %v7707_v18   ;;  %v5044_v9 = vmul.f32 %v4971_v26, %v4948_v24 }
 0xdf7   : > { %v5481_v58 = vpack.c.bf16 %v5466_v44, %v5465_v37  ;;  %v4958_v37 = vld [vmem:[#allocation5 + $0xd8] sm:$0xff]  ;;  %v4957_v44 = vld [vmem:[#allocation5 + $0xd0] sm:$0xff] }
 0xdf8   : > { %4879 = vperm.xlu0 %7576, %v7709_v19   ;;  %v4981_v28 = vpop.permute.xlu1 %4980  ;;  %v5059_v7 = vpack.c.bf16 %v5044_v9, %v5043_v31 }
 0xdf9   : > { %v5046_v12 = vmul.f32 %v4981_v28, %v4950_v45  ;;  %v4976_v56 = vpop.permute.xlu0 %4975  ;;  %6958 = vmatprep.mubr.msk.bf16.mxu0 %vm1528_vm2, %v5481_v58  ;;  %v5380_v58 = vld [vmem:[#allocation5 + $0x158] sm:$0xff]  ;;  %v5379_v28 = vld [vmem:[#allocation5 + $0x150] sm:$0xff] }
 0xdfa   : > { %5767 = vperm.xlu1 %7577, %v7711_v22   ;;  %v5045_v33 = vmul.f32 %v4976_v56, %v4949_v15  ;;  %6918 = vmatprep.mubr.msk.bf16.mxu1 %vm1528_vm2, %v5059_v7 }
 0xdfc   : > { %5762 = vperm.xlu0 %7576, %v7713_v20   ;;  %v5060_v57 = vpack.c.bf16 %v5046_v12, %v5045_v33 }
 0xdfe   : > { %6919 = vmatmul.mubr.msk.bf16.vlgmr.msra.gmra.mrb[0].mxu1 %vm1528_vm2, %v5060_v57  ;;  %v4959_v57 = vld [vmem:[#allocation5 + $0xe0] sm:$0xff] }
 0xdff   : > { %6935 = vmatpush3.bf16.msra.mxu1 %v11197_v48 }
 0xe00   : > { %6936 = vmatprep.subr.bf16.mxu1 %v7584_v32 }
 0xe03   : > { %6937 = vmatpush3.bf16.msra.mxu1 %v7584_v32 }
 0xe05   : > { %v5403_v4 = vpop.permute.xlu1 %5402 }
 0xe06   : > { %v5468_v3 = vmul.f32 %v5403_v4, %v5372_v21 }
 0xe07   : > { %v5398_v10 = vpop.permute.xlu0 %5397 }
 0xe08   : > { %v5467_v29 = vmul.f32 %v5398_v10, %v5371_v53  ;;  %v4960_v53 = vld [vmem:[#allocation5 + $0xe8] sm:$0xff] }
 0xe0a   : > { %v5482_v43 = vpack.c.bf16 %v5468_v3, %v5467_v29 }
 0xe0b   : > { %v4991_v62 = vpop.permute.xlu1 %4990 }
 0xe0c   : > { %v5048_v13 = vmul.f32 %v4991_v62, %v4952_v6  ;;  %6959 = vmatmul.mubr.msk.bf16.vlgmr.msra.gmra.mrb[0].mxu0 %vm1528_vm2, %v5482_v43  ;;  %v5382_v6 = vld [vmem:[#allocation5 + $0x168] sm:$0xff] }
 0xe0d   : > { %v4986_v14 = vpop.permute.xlu0 %4985  ;;  %6975 = vmatpush3.bf16.msra.mxu0 %v11200_v40  ;;  %v5376_v40 = vld [vmem:[#allocation5 + $0x138] sm:$0xff] }
 0xe0e   : > { %v5047_v54 = vmul.f32 %v4986_v14, %v4951_v59  ;;  %6976 = vmatprep.subr.bf16.mxu0 %v7585_v42  ;;  %v5381_v59 = vld [vmem:[#allocation5 + $0x160] sm:$0xff] }
 0xe0f   : > { %v5413_v1 = vpop.permute.xlu1 %5412 }
 0xe10   : > { %v5061_v39 = vpack.c.bf16 %v5048_v13, %v5047_v54  ;;  %v5470_v41 = vmul.f32 %v5413_v1, %v5374_v34  ;;  %v4962_v54 = vld [vmem:[#allocation5 + $0xf8] sm:$0xff]  ;;  %v4961_v34 = vld [vmem:[#allocation5 + $0xf0] sm:$0xff] }
 0xe11   : > { %6977 = vmatpush3.bf16.msra.mxu0 %v7585_v42 }
 0xe12   : > { %6922 = vmatprep.mubr.msk.bf16.mxu1 %vm1528_vm2, %v5061_v39 }
 0xe13   : > { %v5408_v5 = vpop.permute.xlu0 %5407 }
 0xe14   : > { %v5469_v48 = vmul.f32 %v5408_v5, %v5373_v8 }
 0xe15   : > { %v5001_v61 = vpop.permute.xlu1 %5000 }
 0xe16   : > { %v5483_v46 = vpack.c.bf16 %v5470_v41, %v5469_v48  ;;  %v5050_v2 = vmul.f32 %v5001_v61, %v4954_v51  ;;  %v5384_v48 = vld [vmem:[#allocation5 + $0x178] sm:$0xff]  ;;  %v5383_v51 = vld [vmem:[#allocation5 + $0x170] sm:$0xff] }
 0xe17   : > { %v4996_v30 = vpop.permute.xlu0 %4995 }
 0xe18   : > { %v5049_v52 = vmul.f32 %v4996_v30, %v4953_v49  ;;  %6962 = vmatprep.mubr.msk.bf16.mxu0 %vm1528_vm2, %v5483_v46 }
 0xe19   : > { %v5423_v55 = vpop.permute.xlu1 %5422 }
 0xe1a   : > { %v5062_v38 = vpack.c.bf16 %v5050_v2, %v5049_v52  ;;  %v5472_v47 = vmul.f32 %v5423_v55, %v5376_v40  ;;  %v4792_v52 = vld [vmem:[#allocation5 + $0x8] sm:$0xff]  ;;  %v4791_v40 = vld [vmem:[#allocation5] sm:$0xff] }
 0xe1b   : > { %v5418_v60 = vpop.permute.xlu0 %5417 }
 0xe1c   : > { %v5471_v63 = vmul.f32 %v5418_v60, %v5375_v11  ;;  %6923 = vmatmul.mubr.msk.bf16.gmra.mrb[4].mxu1 %vm1528_vm2, %v5062_v38 }
 0xe1d   : > { %v5011_v18 = vpop.permute.xlu1 %5010 }
 0xe1e   : > { %v5484_v0 = vpack.c.bf16 %v5472_v47, %v5471_v63  ;;  %v5052_v19 = vmul.f32 %v5011_v18, %v4956_v16  ;;  %v5675_v63 = vld [vmem:[#allocation5 + $0x188] sm:$0xff]  ;;  %v5674_v16 = vld [vmem:[#allocation5 + $0x180] sm:$0xff] }
 0xe1f   : > { %v5006_v22 = vpop.permute.xlu0 %5005 }
 0xe20   : > { %v5051_v20 = vmul.f32 %v5006_v22, %v4955_v27  ;;  %6963 = vmatmul.mubr.msk.bf16.gmra.mrb[4].mxu0 %vm1528_vm2, %v5484_v0 }
 0xe21   : > { %v5433_v35 = vpop.permute.xlu1 %5432 }
 0xe22   : > { %v5063_v17 = vpack.c.bf16 %v5052_v19, %v5051_v20  ;;  %v5474_v50 = vmul.f32 %v5433_v35, %v5378_v36  ;;  %v4794_v20 = vld [vmem:[#allocation5 + $0x18] sm:$0xff]  ;;  %v4793_v36 = vld [vmem:[#allocation5 + $0x10] sm:$0xff] }
 0xe23   : > { %v5428_v24 = vpop.permute.xlu0 %5427 }
 0xe24   : > { %v5473_v23 = vmul.f32 %v5428_v24, %v5377_v25  ;;  %6926 = vmatprep.mubr.msk.bf16.mxu1 %vm1528_vm2, %v5063_v17 }
 0xe25   : > { %v5021_v31 = vpop.permute.xlu1 %5020 }
 0xe26   : > { %v5485_v26 = vpack.c.bf16 %v5474_v50, %v5473_v23  ;;  %v5054_v9 = vmul.f32 %v5021_v31, %v4958_v37  ;;  %v5677_v23 = vld [vmem:[#allocation5 + $0x198] sm:$0xff]  ;;  %v5676_v37 = vld [vmem:[#allocation5 + $0x190] sm:$0xff] }
 0xe27   : > { %v5016_v45 = vpop.permute.xlu0 %5015 }
 0xe28   : > { %v5053_v15 = vmul.f32 %v5016_v45, %v4957_v44  ;;  %6966 = vmatprep.mubr.msk.bf16.mxu0 %vm1528_vm2, %v5485_v26 }
 0xe29   : > { %v5443_v12 = vpop.permute.xlu1 %5442 }
 0xe2a   : > { %v5064_v7 = vpack.c.bf16 %v5054_v9, %v5053_v15  ;;  %v5476_v56 = vmul.f32 %v5443_v12, %v5380_v58  ;;  %v4796_v15 = vld [vmem:[#allocation5 + $0x28] sm:$0xff]  ;;  %v4795_v58 = vld [vmem:[#allocation5 + $0x20] sm:$0xff] }
 0xe2b   : > { %v5438_v33 = vpop.permute.xlu0 %5437 }
 0xe2c   : > { %v5475_v21 = vmul.f32 %v5438_v33, %v5379_v28  ;;  %6927 = vmatmul.mubr.msk.bf16.gmra.mrb[8].mxu1 %vm1528_vm2, %v5064_v7 }
 0xe2d   : > { %v5031_v32 = vpop.permute.xlu1 %5030 }
 0xe2e   : > { %v5486_v4 = vpack.c.bf16 %v5476_v56, %v5475_v21  ;;  %v5056_v3 = vmul.f32 %v5031_v32, %v4960_v53  ;;  %v5679_v21 = vld [vmem:[#allocation5 + $0x1a8] sm:$0xff]  ;;  %v5678_v53 = vld [vmem:[#allocation5 + $0x1a0] sm:$0xff] }
 0xe2f   : > { %v5026_v10 = vpop.permute.xlu0 %5025 }
 0xe30   : > { %v5055_v29 = vmul.f32 %v5026_v10, %v4959_v57  ;;  %6967 = vmatmul.mubr.msk.bf16.gmra.mrb[8].mxu0 %vm1528_vm2, %v5486_v4 }
 0xe31   : > { %v5453_v62 = vpop.permute.xlu1 %5452 }
 0xe32   : > { %v5065_v43 = vpack.c.bf16 %v5056_v3, %v5055_v29  ;;  %v5478_v42 = vmul.f32 %v5453_v62, %v5382_v6  ;;  %v4798_v29 = vld [vmem:[#allocation5 + $0x38] sm:$0xff]  ;;  %v4797_v6 = vld [vmem:[#allocation5 + $0x30] sm:$0xff] }
 0xe33   : > { %v5448_v13 = vpop.permute.xlu0 %5447 }
 0xe34   : > { %v5477_v14 = vmul.f32 %v5448_v13, %v5381_v59  ;;  %6930 = vmatprep.mubr.msk.bf16.mxu1 %vm1528_vm2, %v5065_v43 }
 0xe35   : > { %v5041_v39 = vpop.permute.xlu1 %5040 }
 0xe36   : > { %v5487_v8 = vpack.c.bf16 %v5478_v42, %v5477_v14  ;;  %v5058_v1 = vmul.f32 %v5041_v39, %v4962_v54  ;;  %v5681_v14 = vld [vmem:[#allocation5 + $0x1b8] sm:$0xff]  ;;  %v5680_v54 = vld [vmem:[#allocation5 + $0x1b0] sm:$0xff] }
 0xe37   : > { %v5036_v41 = vpop.permute.xlu0 %5035 }
 0xe38   : > { %v5057_v5 = vmul.f32 %v5036_v41, %v4961_v34  ;;  %6970 = vmatprep.mubr.msk.bf16.mxu0 %vm1528_vm2, %v5487_v8 }
 0xe39   : > { %v5463_v46 = vpop.permute.xlu1 %5462 }
 0xe3a   : > { %v5066_v49 = vpack.c.bf16 %v5058_v1, %v5057_v5  ;;  %v5480_v61 = vmul.f32 %v5463_v46, %v5384_v48  ;;  %v4800_v5 = vld [vmem:[#allocation5 + $0x48] sm:$0xff]  ;;  %v4799_v48 = vld [vmem:[#allocation5 + $0x40] sm:$0xff] }
 0xe3b   : > { %v5458_v2 = vpop.permute.xlu0 %5457 }
 0xe3c   : > { %v5479_v30 = vmul.f32 %v5458_v2, %v5383_v51  ;;  %6931 = vmatmul.mubr.msk.bf16.gmra.mrb[12].mxu1 %vm1528_vm2, %v5066_v49 }
 0xe3d   : > { %v4815_v38 = vpop.permute.xlu1 %4814 }
 0xe3e   : > { %v5488_v11 = vpack.c.bf16 %v5480_v61, %v5479_v30  ;;  %v4888_v55 = vmul.f32 %v4815_v38, %v4792_v52  ;;  %v5683_v30 = vld [vmem:[#allocation5 + $0x1c8] sm:$0xff]  ;;  %v5682_v52 = vld [vmem:[#allocation5 + $0x1c0] sm:$0xff] }
 0xe3f   : > { %v4810_v47 = vpop.permute.xlu0 %4809 }
 0xe40   : > { %v4887_v60 = vmul.f32 %v4810_v47, %v4791_v40  ;;  %6971 = vmatmul.mubr.msk.bf16.gmra.mrb[12].mxu0 %vm1528_vm2, %v5488_v11 }
 0xe41   : > { %v5698_v0 = vpop.permute.xlu1 %5697 }
 0xe42   : > { %v4903_v27 = vpack.c.bf16 %v4888_v55, %v4887_v60  ;;  %v5771_v18 = vmul.f32 %v5698_v0, %v5675_v63  ;;  %v4802_v60 = vld [vmem:[#allocation5 + $0x58] sm:$0xff]  ;;  %v4801_v63 = vld [vmem:[#allocation5 + $0x50] sm:$0xff] }
 0xe43   : > { %v5693_v19 = vpop.permute.xlu0 %5692 }
 0xe44   : > { %v5770_v22 = vmul.f32 %v5693_v19, %v5674_v16  ;;  %6938 = vmatprep.mubr.msk.bf16.mxu1 %vm1528_vm2, %v4903_v27 }
 0xe45   : > { %v4825_v17 = vpop.permute.xlu1 %4824 }
 0xe46   : > { %v5786_v25 = vpack.c.bf16 %v5771_v18, %v5770_v22  ;;  %v4890_v35 = vmul.f32 %v4825_v17, %v4794_v20  ;;  %v5685_v22 = vld [vmem:[#allocation5 + $0x1d8] sm:$0xff]  ;;  %v5684_v20 = vld [vmem:[#allocation5 + $0x1d0] sm:$0xff] }
 0xe47   : > { %v4820_v50 = vpop.permute.xlu0 %4819 }
 0xe48   : > { %v4889_v24 = vmul.f32 %v4820_v50, %v4793_v36  ;;  %6978 = vmatprep.mubr.msk.bf16.mxu0 %vm1528_vm2, %v5786_v25 }
 0xe49   : > { %v5708_v26 = vpop.permute.xlu1 %5707 }
 0xe4a   : > { %v4904_v44 = vpack.c.bf16 %v4890_v35, %v4889_v24  ;;  %v5773_v31 = vmul.f32 %v5708_v26, %v5677_v23  ;;  %v4804_v24 = vld [vmem:[#allocation5 + $0x68] sm:$0xff]  ;;  %v4803_v23 = vld [vmem:[#allocation5 + $0x60] sm:$0xff] }
 0xe4b   : > { %v5703_v9 = vpop.permute.xlu0 %5702 }
 0xe4c   : > { %v5772_v45 = vmul.f32 %v5703_v9, %v5676_v37  ;;  %6939 = vmatmul.mubr.msk.bf16.vlgmr.msra.gmra.mrb[0].mxu1 %vm1528_vm2, %v4904_v44 }
 0xe4d   : > { %v4835_v7 = vpop.permute.xlu1 %4834 }
 0xe4e   : > { %v5787_v28 = vpack.c.bf16 %v5773_v31, %v5772_v45  ;;  %v4892_v12 = vmul.f32 %v4835_v7, %v4796_v15  ;;  %v5687_v45 = vld [vmem:[#allocation5 + $0x1e8] sm:$0xff]  ;;  %v5686_v15 = vld [vmem:[#allocation5 + $0x1e0] sm:$0xff] }
 0xe4f   : > { %v4830_v56 = vpop.permute.xlu0 %4829 }
 0xe50   : > { %v4891_v33 = vmul.f32 %v4830_v56, %v4795_v58  ;;  %6979 = vmatmul.mubr.msk.bf16.vlgmr.msra.gmra.mrb[0].mxu0 %vm1528_vm2, %v5787_v28 }
 0xe51   : > { %v5718_v4 = vpop.permute.xlu1 %5717 }
 0xe52   : > { %v4905_v57 = vpack.c.bf16 %v4892_v12, %v4891_v33  ;;  %v5775_v32 = vmul.f32 %v5718_v4, %v5679_v21  ;;  %v4806_v33 = vld [vmem:[#allocation5 + $0x78] sm:$0xff]  ;;  %v4805_v21 = vld [vmem:[#allocation5 + $0x70] sm:$0xff] }
 0xe53   : > { %v5713_v3 = vpop.permute.xlu0 %5712 }
 0xe54   : > { %v5774_v10 = vmul.f32 %v5713_v3, %v5678_v53  ;;  %6942 = vmatprep.mubr.msk.bf16.mxu1 %vm1528_vm2, %v4905_v57 }
 0xe55   : > { %v4845_v43 = vpop.permute.xlu1 %4844 }
 0xe56   : > { %v5788_v59 = vpack.c.bf16 %v5775_v32, %v5774_v10  ;;  %v4894_v62 = vmul.f32 %v4845_v43, %v4798_v29  ;;  %v5689_v10 = vld [vmem:[#allocation5 + $0x1f8] sm:$0xff]  ;;  %v5688_v29 = vld [vmem:[#allocation5 + $0x1f0] sm:$0xff] }
 0xe57   : > { %v4840_v42 = vpop.permute.xlu0 %4839 }
 0xe58   : > { %v4893_v13 = vmul.f32 %v4840_v42, %v4797_v6  ;;  %6982 = vmatprep.mubr.msk.bf16.mxu0 %vm1528_vm2, %v5788_v59 }
 0xe59   : > { %v5728_v8 = vpop.permute.xlu1 %5727 }
 0xe5a   : > { %v4906_v34 = vpack.c.bf16 %v4894_v62, %v4893_v13  ;;  %v5777_v39 = vmul.f32 %v5728_v8, %v5681_v14 }
 0xe5b   : > { %v5723_v1 = vpop.permute.xlu0 %5722 }
 0xe5c   : > { %v5776_v41 = vmul.f32 %v5723_v1, %v5680_v54  ;;  %6943 = vmatmul.mubr.msk.bf16.gmra.mrb[4].mxu1 %vm1528_vm2, %v4906_v34  ;;  %v11240_v1 = vld [vmem:[%s12023_s13] ss:$0 sm:$0xff] }
 0xe5d   : > { %v4855_v49 = vpop.permute.xlu1 %4854 }
 0xe5e   : > { %v5789_v51 = vpack.c.bf16 %v5777_v39, %v5776_v41  ;;  %v4896_v46 = vmul.f32 %v4855_v49, %v4800_v5 }
 0xe5f   : > { %v4850_v61 = vpop.permute.xlu0 %4849 }
 0xe60   : > { %v4895_v2 = vmul.f32 %v4850_v61, %v4799_v48  ;;  %6983 = vmatmul.mubr.msk.bf16.gmra.mrb[4].mxu0 %vm1528_vm2, %v5789_v51 }
 0xe61   : > { %v5738_v11 = vpop.permute.xlu1 %5737 }
 0xe62   : > { %v4907_v40 = vpack.c.bf16 %v4896_v46, %v4895_v2  ;;  %v5779_v38 = vmul.f32 %v5738_v11, %v5683_v30 }
 0xe63   : > { %v5733_v55 = vpop.permute.xlu0 %5732 }
 0xe64   : > { %v5778_v47 = vmul.f32 %v5733_v55, %v5682_v52  ;;  %6946 = vmatprep.mubr.msk.bf16.mxu1 %vm1528_vm2, %v4907_v40 }
 0xe65   : > { %v4865_v27 = vpop.permute.xlu1 %4864 }
 0xe66   : > { %v5790_v16 = vpack.c.bf16 %v5779_v38, %v5778_v47  ;;  %v4898_v0 = vmul.f32 %v4865_v27, %v4802_v60 }
 0xe67   : > { %v4860_v18 = vpop.permute.xlu0 %4859 }
 0xe68   : > { %v4897_v19 = vmul.f32 %v4860_v18, %v4801_v63  ;;  %6986 = vmatprep.mubr.msk.bf16.mxu0 %vm1528_vm2, %v5790_v16 }
 0xe69   : > { %v5748_v25 = vpop.permute.xlu1 %5747 }
 0xe6a   : > { %v4908_v36 = vpack.c.bf16 %v4898_v0, %v4897_v19  ;;  %v5781_v17 = vmul.f32 %v5748_v25, %v5685_v22 }
 0xe6b   : > { %v5743_v35 = vpop.permute.xlu0 %5742 }
 0xe6c   : > { %v5780_v50 = vmul.f32 %v5743_v35, %v5684_v20  ;;  %6947 = vmatmul.mubr.msk.bf16.gmra.mrb[8].mxu1 %vm1528_vm2, %v4908_v36 }
 0xe6d   : > { %v4875_v44 = vpop.permute.xlu1 %4874 }
 0xe6e   : > { %v5791_v37 = vpack.c.bf16 %v5781_v17, %v5780_v50  ;;  %v4900_v26 = vmul.f32 %v4875_v44, %v4804_v24 }
 0xe6f   : > { %v4870_v31 = vpop.permute.xlu0 %4869 }
 0xe70   : > { %v4899_v9 = vmul.f32 %v4870_v31, %v4803_v23  ;;  %6987 = vmatmul.mubr.msk.bf16.gmra.mrb[8].mxu0 %vm1528_vm2, %v5791_v37 }
 0xe71   : > { %v5758_v28 = vpop.permute.xlu1 %5757 }
 0xe72   : > { %v4909_v58 = vpack.c.bf16 %v4900_v26, %v4899_v9  ;;  %v5783_v7 = vmul.f32 %v5758_v28, %v5687_v45 }
 0xe73   : > { %v5753_v12 = vpop.permute.xlu0 %5752 }
 0xe74   : > { %v5782_v56 = vmul.f32 %v5753_v12, %v5686_v15  ;;  %6950 = vmatprep.mubr.msk.bf16.mxu1 %vm1528_vm2, %v4909_v58 }
 0xe75   : > { %v4885_v57 = vpop.permute.xlu1 %4884 }
 0xe76   : > { %v5792_v53 = vpack.c.bf16 %v5783_v7, %v5782_v56  ;;  %v4902_v4 = vmul.f32 %v4885_v57, %v4806_v33 }
 0xe77   : > { %v4880_v32 = vpop.permute.xlu0 %4879 }
 0xe78   : > { %v4901_v3 = vmul.f32 %v4880_v32, %v4805_v21  ;;  %6990 = vmatprep.mubr.msk.bf16.mxu0 %vm1528_vm2, %v5792_v53 }
 0xe79   : > { %v5768_v59 = vpop.permute.xlu1 %5767 }
 0xe7a   : > { %v4910_v6 = vpack.c.bf16 %v4902_v4, %v4901_v3  ;;  %v5785_v43 = vmul.f32 %v5768_v59, %v5689_v10 }
 0xe7b   : > { %v5763_v62 = vpop.permute.xlu0 %5762 }
 0xe7c   : > { %v5784_v42 = vmul.f32 %v5763_v62, %v5688_v29  ;;  %6951 = vmatmul.mubr.msk.bf16.gmra.mrb[12].mxu1 %vm1528_vm2, %v4910_v6 }
 0xe7e   : > { %v5793_v13 = vpack.c.bf16 %v5785_v43, %v5784_v42 }
 0xe80   : > { %6991 = vmatmul.mubr.msk.bf16.gmra.mrb[12].mxu0 %vm1528_vm2, %v5793_v13 }
 0xf1f   : > { %v6940_v14 = vpop.f32.mrb[0].mxu1 }
 0xf20   : > { %v5274_v54 = vpop.f32.mrb[1].mxu1 }
 0xf21   : > { %v6941_v34 = vpop.f32.mrb[2].mxu1 }
 0xf22   : > { %v5277_v8 = vpop.f32.mrb[3].mxu1 }
 0xf23   : > { %v6980_v39 = vpop.f32.mrb[0].mxu0 }
 0xf24   : > { %v7010_v41 = vadd.f32 %v6980_v39, %v6940_v14  ;;  %v5868_v5 = vpop.f32.mrb[1].mxu0 }
 0xf25   : > { %v7011_v48 = vadd.f32 %v5868_v5, %v5274_v54  ;;  %v6981_v51 = vpop.f32.mrb[2].mxu0 }
 0xf26   : > { %v5956_v49 = vadd.f32 %v7010_v41, %v11240_v1  ;;  %v7012_v46 = vadd.f32 %v6981_v51, %v6941_v34  ;;  %v5871_v61 = vpop.f32.mrb[3].mxu0 }
 0xf27   : > { %v5954_v2 = vadd.f32 %v7011_v48, %v11240_v1  ;;  %v7013_v30 = vadd.f32 %v5871_v61, %v5277_v8 }
 0xf28   : > { %5972 = vst [vmem:[%s8595_s8 + $0x10] sm:$0xff] %v5956_v49  ;;  %v5957_v52 = vadd.f32 %v7012_v46, %v11240_v1 }
 0xf29   : > { %5970 = vst [vmem:[%s8595_s8] sm:$0xff] %v5954_v2  ;;  %v5955_v40 = vadd.f32 %v7013_v30, %v11240_v1 }
 0xf2a   : > { %5973 = vst [vmem:[%s8595_s8 + $0x18] sm:$0xff] %v5957_v52 }
 0xf2b   : > { %5971 = vst [vmem:[%s8595_s8 + $0x8] sm:$0xff] %v5955_v40 }
 0xf2f   : > { %v6944_v11 = vpop.f32.mrb[4].mxu1 }
 0xf30   : > { %v5290_v38 = vpop.f32.mrb[5].mxu1 }
 0xf31   : > { %v6945_v55 = vpop.f32.mrb[6].mxu1 }
 0xf32   : > { %v5293_v47 = vpop.f32.mrb[7].mxu1 }
 0xf33   : > { %v6984_v60 = vpop.f32.mrb[4].mxu0 }
 0xf34   : > { %v7014_v63 = vadd.f32 %v6984_v60, %v6944_v11  ;;  %v5884_v16 = vpop.f32.mrb[5].mxu0 }
 0xf35   : > { %v7015_v27 = vadd.f32 %v5884_v16, %v5290_v38  ;;  %v6985_v0 = vpop.f32.mrb[6].mxu0 }
 0xf36   : > { %v5960_v18 = vadd.f32 %v7014_v63, %v11240_v1  ;;  %v7016_v19 = vadd.f32 %v6985_v0, %v6945_v55  ;;  %v5887_v22 = vpop.f32.mrb[7].mxu0 }
 0xf37   : > { %v5958_v20 = vadd.f32 %v7015_v27, %v11240_v1  ;;  %v7017_v36 = vadd.f32 %v5887_v22, %v5293_v47 }
 0xf38   : > { %5976 = vst [vmem:[%s8595_s8 + $0x30] sm:$0xff] %v5960_v18  ;;  %v5961_v25 = vadd.f32 %v7016_v19, %v11240_v1 }
 0xf39   : > { %5974 = vst [vmem:[%s8595_s8 + $0x20] sm:$0xff] %v5958_v20  ;;  %v5959_v17 = vadd.f32 %v7017_v36, %v11240_v1 }
 0xf3a   : > { %5977 = vst [vmem:[%s8595_s8 + $0x38] sm:$0xff] %v5961_v25 }
 0xf3b   : > { %5975 = vst [vmem:[%s8595_s8 + $0x28] sm:$0xff] %v5959_v17 }
 0xf3f   : > { %v6948_v35 = vpop.f32.mrb[8].mxu1 }
 0xf40   : > { %v5306_v50 = vpop.f32.mrb[9].mxu1 }
 0xf41   : > { %v6949_v24 = vpop.f32.mrb[10].mxu1 }
 0xf42   : > { %v5309_v23 = vpop.f32.mrb[11].mxu1 }
 0xf43   : > { %v6988_v37 = vpop.f32.mrb[8].mxu0 }
 0xf44   : > { %v7018_v44 = vadd.f32 %v6988_v37, %v6948_v35  ;;  %v5900_v26 = vpop.f32.mrb[9].mxu0 }
 0xf45   : > { %v7019_v31 = vadd.f32 %v5900_v26, %v5306_v50  ;;  %v6989_v9 = vpop.f32.mrb[10].mxu0 }
 0xf46   : > { %v5964_v45 = vadd.f32 %v7018_v44, %v11240_v1  ;;  %v7020_v15 = vadd.f32 %v6989_v9, %v6949_v24  ;;  %v5903_v58 = vpop.f32.mrb[11].mxu0 }
 0xf47   : > { %v5962_v28 = vadd.f32 %v7019_v31, %v11240_v1  ;;  %v7021_v7 = vadd.f32 %v5903_v58, %v5309_v23 }
 0xf48   : > { %5980 = vst [vmem:[%s8595_s8 + $0x50] sm:$0xff] %v5964_v45  ;;  %v5965_v12 = vadd.f32 %v7020_v15, %v11240_v1 }
 0xf49   : > { %5978 = vst [vmem:[%s8595_s8 + $0x40] sm:$0xff] %v5962_v28  ;;  %v5963_v56 = vadd.f32 %v7021_v7, %v11240_v1 }
 0xf4a   : > { %5981 = vst [vmem:[%s8595_s8 + $0x58] sm:$0xff] %v5965_v12 }
 0xf4b   : > { %5979 = vst [vmem:[%s8595_s8 + $0x48] sm:$0xff] %v5963_v56 }
 0xf4f   : > { %v6952_v33 = vpop.f32.mrb[12].mxu1 }
 0xf50   : > { %v5322_v21 = vpop.f32.mrb[13].mxu1 }
 0xf51   : > { %v6953_v53 = vpop.f32.mrb[14].mxu1 }
 0xf52   : > { %v5325_v57 = vpop.f32.mrb[15].mxu1 }
 0xf53   : > { %v6992_v4 = vpop.f32.mrb[12].mxu0 }
 0xf54   : > { %v7022_v32 = vadd.f32 %v6992_v4, %v6952_v33  ;;  %v5916_v3 = vpop.f32.mrb[13].mxu0 }
 0xf55   : > { %v7023_v10 = vadd.f32 %v5916_v3, %v5322_v21  ;;  %v6993_v29 = vpop.f32.mrb[14].mxu0 }
 0xf56   : > { %v5968_v6 = vadd.f32 %v7022_v32, %v11240_v1  ;;  %v7024_v59 = vadd.f32 %v6993_v29, %v6953_v53  ;;  %v5919_v43 = vpop.f32.mrb[15].mxu0 }
 0xf57   : > { %v5966_v62 = vadd.f32 %v7023_v10, %v11240_v1  ;;  %v7025_v42 = vadd.f32 %v5919_v43, %v5325_v57 }
 0xf58   : > { %5984 = vst [vmem:[%s8595_s8 + $0x70] sm:$0xff] %v5968_v6  ;;  %v5969_v13 = vadd.f32 %v7024_v59, %v11240_v1 }
 0xf59   : > { %5982 = vst [vmem:[%s8595_s8 + $0x60] sm:$0xff] %v5966_v62  ;;  %v5967_v14 = vadd.f32 %v7025_v42, %v11240_v1 }
 0xf5a   : > { %5985 = vst [vmem:[%s8595_s8 + $0x78] sm:$0xff] %v5969_v13 }
 0xf5b   : > { %5983 = vst [vmem:[%s8595_s8 + $0x68] sm:$0xff] %v5967_v14 }
 0xf5c PF: > { %s12024_s2 = sld [smem:[#allocation29_spill]]  ;;  %s12025_s14 = sld [smem:[#allocation30_spill]] }
 0xf5d   : > { %s12026_s9 = sld [smem:[#allocation36_spill]]  ;;  %s6002_s25 = sshll.u32 %s8595_s8, 4  ;;  %s11277_s25 = int_to_ptr.vmem [resolvable:$true] %s6002_s25 }
 0xf5e   : > { %s12027_s12 = sld [smem:[#allocation189_spill]]  ;;  %s5987_s11 = scalar_lea.sflag [#allocation8], %s8566_s7 }
 0xf5f   : > { %s7916_s6 = scalar_lea.vmem %s11277_s25, 2048  ;;  %s8084_s1 = smov [#allocation18]  }
 0xf60   : > { %p7917_p2 = scmp.ne.s32.totalorder %s11277_s25, %s7916_s6  ;;  %s7920_s8 = sshll.u32 %s8084_s1, 4  ;;  %s7921_s8 = int_to_ptr.vmem [resolvable:$false] %s7920_s8 }
 0xf61   : > { %s7922_s5 = scalar_lea.vmem %s7921_s8, 4096  ;;  %p7923_p13 = scmp.lt.s32.totalorder %s11277_s25, %s7921_s8 }
 0xf62   : > { %s6341_s15 = sshll.u32 %s12024_s2, 4  ;;  %s6342_s0 = sshll.u32 %s12025_s14, 5 }
 0xf63   : > { %s5999_s3 = sadd.s32 %s6342_s0, %s6341_s15  ;;  %p12028_p11 = scmp.ne.s32.totalorder %s12026_s9, 0 }
 0xf64   : > { %s6343_s24 = sshll.u32 %s5999_s3, 7  ;;  %p7924_p7 = scmp.lt.s32.totalorder %s7922_s5, %s7916_s6 }
 0xf65   : > { %s11282_s4 = scalar_lea.hbm %s12027_s12, %s6343_s24  ;;  %p7918_p1 = pnand %p7917_p2, %p12028_p11 }
 0xf66   : > { %p7925_p10 = por %p7924_p7, %p7923_p13 }
 0xf67   : > { %p7919_p0 = pneg %p7918_p1 }
 0xf69   : > { %p7926_p12 = pnand %p7925_p10, %p7919_p0 }
 0xf6b   : > { %7929 = shalt.err (!%p7926_p12)
}
 0xf6c   : > { %s7930_s30 = scalar_lea.hbm %s11282_s4, 2048  ;;  %s7934_s17 = scalar_lea.hbm %s12027_s12, 8192 }
 0xf6d   : > { %p7931_p3 = scmp.ne.s32.totalorder %s11282_s4, %s7930_s30  ;;  %p7935_p5 = scmp.lt.u32.totalorder %s11282_s4, %s12027_s12 }
 0xf6e   : > { %p7936_p9 = scmp.lt.u32.totalorder %s7934_s17, %s7930_s30  ;;  %p7938_p2 = scmp.lt.u32.totalorder %s7930_s30, %s11282_s4 }
 0xf6f   : > { %p7932_p4 = pnand %p7931_p3, %p12028_p11 }
 0xf70   : > { %p7937_p8 = por %p7936_p9, %p7935_p5 }
 0xf71   : > { %p7933_p6 = pneg %p7932_p4 }
 0xf72   : > { %p7939_p1 = por %p7938_p2, %p7937_p8 }
 0xf74   : > { %p7940_p0 = pnand %p7939_p1, %p7933_p6 }
 0xf76   : > { %7943 = shalt.err (!%p7940_p0)
}
 0xf77   : > { %s8085_s14 = smov 128   ;;  %s8086_s15 = smov 8  }
 0xf78   : > { %7112 = dma.vmem_to_hbm [thread:$0]  (%p12028_p11), %s11277_s25, 2048, %s11282_s4, %s5987_s11, %s8085_s14, %s8085_s14, %s8086_s15  }
 0xf79 PF: > { %s12029_s0 = sld [smem:[#allocation26_spill]]  ;;  %s12030_s3 = sld [smem:[#allocation40_spill]] }
 0xf7a   : > { %p7150_p13 = scmp.ge.s32.totalorder %s8066_s29, 2 }
 0xf7f   : > { %s6017_s24 = sand.u32 1, %s12029_s0   ;;  %p12031_p7 = scmp.ne.s32.totalorder %s12030_s3, 0 }
 0xf80   : > { %s6018_s21 = scalar_lea.sflag [#allocation8], %s6017_s24 }
 0xf81   : > { %p7138_p10 = pnand %p7150_p13, %p12031_p7 }
 0xf83   : > { %8013 = dma.done.wait (!%p7138_p10), %s6018_s21, 2048  }
 0xf84   : > { %8015 = vsyncadd (!%p7138_p10), %s6018_s21, 4294965248  ;;  %s32_s29 = sadd.s32 1, %s8066_s29   ;;  %s12033_s17 = sld [smem:[#allocation24_spill]] }
 0xf85   : > { %p11313_p12 = scmp.ge.s32.totalorder %s32_s29, 10   ;;  %s12034_s7 = sld [smem:[#allocation25_spill]] }
 0xf86   : > { %s12035_s9 = smov %s12062_s18  ;;  %s12036_s20 = sld [smem:[#allocation27_spill]] }
 0xf87   : > { %s12037_s24 = sld [smem:[#allocation31_spill]]  ;;  %s12038_s4 = smov %s12052_s23 }
 0xf88   : > { %s12039_s11 = sld [smem:[#allocation37_spill]]  ;;  %s12040_s6 = sld [smem:[#allocation39_spill]] }
 0xf89   : > { %s12043_s19 = smov %s12035_s9  ;;  %s12044_s21 = smov %s8038_s22 }
 0xf8a   : > { %s12045_s22 = smov %s8481_s10  ;;  %s12046_s23 = smov %s8054_s26 }
 0xf8b   : > { %s12042_s18 = smov %s12034_s7  ;;  %s12047_s25 = smov %s8062_s28 }
 0xf8c   : > { %s12048_s26 = smov %s12038_s4  ;;  %31 = sbr.rel (!%p11313_p12) target bundleno = 27 (0x1b), region = 166 }
 0xf8e   : > { %s12049_s27 = smov %s12039_s11  ;;  %s12050_s28 = smov %s12040_s6 }
 0xf93   :  { %6023 = vsyncpa [#allocation7], 1 }
 0xf94   :  { %6025 = vsyncpa [#allocation7 + $0x1], 1 }
 0xf95   :  { %6026 = vsyncpa [#allocation10], 1 }
 0xf96   :  { %6028 = vsyncpa [#allocation10 + $0x1], 1 }
 0xf97   :  { %6029 = vsyncpa [#allocation13], 1 }
 0xf98   :  { %6030 = vsyncpa [#allocation16], 1 }
 0xf99   :  { %6031 = vsyncpa [#allocation8], 1 }
 0xf9a   :  { %6033 = vsyncpa [#allocation8 + $0x1], 1 }

</bundles_post_ra>
